<compile_context>
chip_gen: v6e
topology: v6e:2x2x1
jax: 0.10.0
libtpu: 0.0.40
codegen_flags: <defaults>
</compile_context>

<pallas_src>
import functools

import jax
import jax.numpy as jnp
from jax import lax
from jax.experimental import pallas as pl
from jax.experimental.pallas import tpu as pltpu

_LN_EPS = 1e-5                 # PyTorch nn.LayerNorm default
_NEG_LARGE = -1e30             # mask value for padded key columns
_VMEM_LIMIT = 48 * 1024 * 1024


def _layernorm_f32(x_f32, gamma, beta):
    mu = jnp.mean(x_f32, axis=-1, keepdims=True)
    var = jnp.mean(jnp.square(x_f32 - mu), axis=-1, keepdims=True)
    return (x_f32 - mu) * lax.rsqrt(var + _LN_EPS) * gamma + beta


def _erf_poly(x, use_fast):
    # Abramowitz & Stegun 7.1.26 polynomial erf, |abs err| <= 1.5e-7 (f32 path).
    # TODO(synk): replace with lax.erf if/when Mosaic exposes an erf lowering.
    a1, a2, a3, a4, a5 = (0.254829592, -0.284496736, 1.421413741,
                          -1.453152027, 1.061405429)
    p = 0.3275911
    ax = jnp.abs(x)
    # EUP vrcp on the fast path instead of a VPU divide sequence.
    t = pl.reciprocal(1.0 + p * ax, approx=use_fast)
    poly = ((((a5 * t + a4) * t + a3) * t + a2) * t + a1) * t
    if use_fast:
        # bf16 EUP exp (v6e/v7x); argument <= 0 so bf16 is well conditioned.
        e = jnp.exp((-(ax * ax)).astype(jnp.bfloat16)).astype(jnp.float32)
    else:
        e = jnp.exp(-(ax * ax))
    y = 1.0 - poly * e
    return jnp.where(x >= 0.0, y, -y)


def _gelu_exact(x, use_fast):
    # Matches torch.nn.GELU() (erf-based, not the tanh approximation).
    return 0.5 * x * (1.0 + _erf_poly(x * 0.7071067811865476, use_fast))


# --------------------------------------------------------------------------
# Kernel 1: LN1 + QKV + multi-head attention + output projection + residual
# --------------------------------------------------------------------------
def _attn_block_kernel(x_ref, g1_ref, b1_ref, wqkv_ref, wp_ref, bp_ref, o_ref,
                       qkv_scr, oh_scr, *, num_heads, head_dim, scale,
                       n_valid, q_tile, use_fast):
    # x_ref   : (1, Np, C)  full (padded) token block for this batch element
    # g1/b1   : (1, C)      LayerNorm1 gamma / beta (f32)
    # wqkv_ref: (C, 3C)     fused QKV weight, input-major
    # wp_ref  : (C, C)      output-projection weight, input-major
    # bp_ref  : (1, C)      output-projection bias (f32)
    # o_ref   : (1, tq, C)  lane-dense output tile
    # qkv_scr : (Np, 3C)    cached LN1(x) @ Wqkv for this batch element
    # oh_scr  : (tq, C)     per-head outputs, head-major columns
    qi = pl.program_id(1)
    C = num_heads * head_dim
    n_pad = x_ref.shape[1]
    cdt = x_ref.dtype                        # MXU compute dtype (bf16 stays bf16)

    # Q/K/V for the whole (padded) sequence are computed once per batch
    # element and cached in VMEM; subsequent query tiles reuse the cache.
    @pl.when(qi == 0)
    def _():
        xf = x_ref[0].astype(jnp.float32)
        y = _layernorm_f32(xf, g1_ref[...], b1_ref[...]).astype(cdt)
        # TODO(synk): qkv_bias=False (module default); bias add would go here.
        qkv_scr[...] = jnp.dot(
            y, wqkv_ref[...], preferred_element_type=jnp.float32).astype(cdt)

    row0 = pl.multiple_of(qi * q_tile, q_tile)
    rows = pl.ds(row0, q_tile)

    mask = None
    if n_valid < n_pad:                      # static: mask padded key columns
        col = lax.broadcasted_iota(jnp.int32, (q_tile, n_pad), 1)
        mask = col < n_valid

    contract = (((1,), (1,)), ((), ()))      # q @ k^T without transposing k
    # TODO(synk): for very large head counts switch to lax.fori_loop over heads.
    for h in range(num_heads):
        lo = h * head_dim
        # scale folded into q: tq*hd mults instead of tq*Np on the scores.
        q_h = qkv_scr[rows, lo:lo + head_dim] * scale
        k_h = qkv_scr[:, C + lo:C + lo + head_dim]
        v_h = qkv_scr[:, 2 * C + lo:2 * C + lo + head_dim]

        s = lax.dot_general(q_h.astype(cdt), k_h, contract,
                            preferred_element_type=jnp.float32)  # (tq, Np)
        if mask is not None:
            s = jnp.where(mask, s, _NEG_LARGE)
        s = s - jnp.max(s, axis=-1, keepdims=True)
        if use_fast:
            p = jnp.exp(s.astype(jnp.bfloat16))          # bf16 EUP (v6e/v7x)
            l = jnp.sum(p, axis=-1, keepdims=True, dtype=jnp.float32)
        else:
            p = jnp.exp(s)
            l = jnp.sum(p, axis=-1, keepdims=True)
        # TODO(synk): attn_drop is identity (attn_drop_ratio=0.0); the
        # `attention_maps` side capture of the PyTorch module is not emitted.

        # Deferred softmax normalization on the (tq, hd) head output.
        o_h = jnp.dot(p.astype(cdt), v_h, preferred_element_type=jnp.float32)
        o_h = o_h * pl.reciprocal(l, approx=use_fast)
        # Write into the VMEM scratch (no f32 vreg accumulator carried).
        oh_scr[:, lo:lo + head_dim] = o_h.astype(cdt)

    # ONE (tq, C) x (C, C) projection instead of H small K=hd matmuls.
    acc = jnp.dot(oh_scr[...], wp_ref[...], preferred_element_type=jnp.float32)
    # proj bias + residual (x tile re-read here so it is not live earlier).
    # TODO(synk): proj_drop / drop_path are identity at ratio 0.0.
    out = acc + bp_ref[...].astype(jnp.float32) \
        + x_ref[0, rows, :].astype(jnp.float32)
    o_ref[0] = out.astype(o_ref.dtype)


# --------------------------------------------------------------------------
# Kernel 2: LN2 + MLP (fc1 -> GELU -> fc2) + residual, hidden-dim tiled
# --------------------------------------------------------------------------
def _mlp_block_kernel(x_ref, g2_ref, b2_ref, w1_ref, bb1_ref, w2_ref, bb2_ref,
                      o_ref, y_scr, acc_scr, *, use_fast):
    # x_ref: (1, tn, C); w1: (C, tCh); w2: (tCh, C); bb1: (1, tCh); bb2: (1, C)
    kk = pl.program_id(2)
    cdt = x_ref.dtype

    @pl.when(kk == 0)
    def _():
        xf = x_ref[0].astype(jnp.float32)
        y_scr[...] = _layernorm_f32(xf, g2_ref[...], b2_ref[...]).astype(cdt)
        acc_scr[...] = jnp.zeros_like(acc_scr)

    h = jnp.dot(y_scr[...], w1_ref[...],
                preferred_element_type=jnp.float32) + bb1_ref[...]
    h = _gelu_exact(h, use_fast).astype(cdt)
    acc_scr[...] += jnp.dot(h, w2_ref[...], preferred_element_type=jnp.float32)

    @pl.when(kk == pl.num_programs(2) - 1)
    def _():
        # TODO(synk): Mlp dropout / drop_path are identity at ratio 0.0.
        out = acc_scr[...] + bb2_ref[...].astype(jnp.float32) \
            + x_ref[0].astype(jnp.float32)
        o_ref[0] = out.astype(o_ref.dtype)


# --------------------------------------------------------------------------
# Wrapper
# --------------------------------------------------------------------------
def _single_buffered(shape, index_map):
    # Constant-index weights are fetched once; single-buffering halves their
    # VMEM footprint.  Falls back to default buffering on older jax versions.
    try:
        return pl.BlockSpec(shape, index_map, pipeline_mode=pl.Buffered(1))
    except TypeError:
        return pl.BlockSpec(shape, index_map)


def _round_up(n, m):
    return ((n + m - 1) // m) * m


def _pick_hidden_tile(ch, c, itemsize):
    """Tile the MLP hidden dim only when fc1+fc2 would crowd VMEM (v7x)."""
    try:
        vmem = pltpu.get_tpu_info().vmem_capacity_bytes
    except Exception:
        vmem = 64 * 1024 * 1024
    if 2 * c * ch * itemsize <= vmem // 4:
        return ch
    for cand in (1024, 512, 256, 128):
        if ch % cand == 0:
            return cand
    return ch


def prepare_params(params, compute_dtype):
    """One-time weight re-layout (input-major) and MXU-operand dtype cast.

    Call once and reuse: keeps per-forward HBM transposes out of the hot path.
    """
    C = params["norm1_w"].shape[0]
    Ch = params["fc1_w"].shape[0]
    f32 = jnp.float32
    return dict(
        g1=params["norm1_w"].reshape(1, C).astype(f32),
        b1=params["norm1_b"].reshape(1, C).astype(f32),
        wqkv=params["qkv_w"].T.astype(compute_dtype),      # (C, 3C)
        wp=params["proj_w"].T.astype(compute_dtype),       # (C, C)
        bp=params["proj_b"].reshape(1, C).astype(f32),
        g2=params["norm2_w"].reshape(1, C).astype(f32),
        b2=params["norm2_b"].reshape(1, C).astype(f32),
        w1=params["fc1_w"].T.astype(compute_dtype),        # (C, Ch)
        bb1=params["fc1_b"].reshape(1, Ch).astype(f32),
        w2=params["fc2_w"].T.astype(compute_dtype),        # (Ch, C)
        bb2=params["fc2_b"].reshape(1, C).astype(f32),
    )


def block_forward(x, prep, num_heads):
    """Forward of ViT `Block` (qkv_bias=False, all drop ratios 0.0)."""
    B, N, C = x.shape
    assert C % num_heads == 0
    hd = C // num_heads
    scale = hd ** (-0.5)
    Ch = prep["w1"].shape[1]
    cdt = x.dtype
    use_fast = cdt == jnp.bfloat16          # bf16 EUP exp / vrcp (v6e, v7x)

    # Pad tokens to a lane/sublane-friendly multiple of 128.
    Np = _round_up(N, 128)
    xp = jnp.pad(x, ((0, 0), (0, Np - N), (0, 0))) if Np != N else x

    # ---- Kernel 1: LN1 + QKV + attention + out-proj + bias + residual ----
    tq = 256 if Np % 256 == 0 else 128
    x1 = pl.pallas_call(
        functools.partial(_attn_block_kernel, num_heads=num_heads, head_dim=hd,
                          scale=scale, n_valid=N, q_tile=tq, use_fast=use_fast),
        out_shape=jax.ShapeDtypeStruct((B, Np, C), cdt),
        grid=(B, Np // tq),
        in_specs=[
            pl.BlockSpec((1, Np, C), lambda b, qi: (b, 0, 0)),
            _single_buffered((1, C), lambda b, qi: (0, 0)),
            _single_buffered((1, C), lambda b, qi: (0, 0)),
            _single_buffered((C, 3 * C), lambda b, qi: (0, 0)),
            _single_buffered((C, C), lambda b, qi: (0, 0)),
            _single_buffered((1, C), lambda b, qi: (0, 0)),
        ],
        out_specs=pl.BlockSpec((1, tq, C), lambda b, qi: (b, qi, 0)),
        scratch_shapes=[
            pltpu.VMEM((Np, 3 * C), cdt),   # cached QKV for this batch element
            pltpu.VMEM((tq, C), cdt),       # per-head outputs (head-major cols)
        ],
        compiler_params=pltpu.CompilerParams(
            dimension_semantics=("parallel", "arbitrary"),
            vmem_limit_bytes=_VMEM_LIMIT),
    )(xp, prep["g1"], prep["b1"], prep["wqkv"], prep["wp"], prep["bp"])

    # ---- Kernel 2: LN2 + fc1 + GELU + fc2 + bias + residual ----
    tn = 512 if Np % 512 == 0 else (256 if Np % 256 == 0 else 128)
    tch = _pick_hidden_tile(Ch, C, x.dtype.itemsize)
    n_kc = Ch // tch
    if n_kc == 1:
        w1_spec = _single_buffered((C, tch), lambda b, i, kk: (0, 0))
        bb1_spec = _single_buffered((1, tch), lambda b, i, kk: (0, 0))
        w2_spec = _single_buffered((tch, C), lambda b, i, kk: (0, 0))
    else:
        w1_spec = pl.BlockSpec((C, tch), lambda b, i, kk: (0, kk))
        bb1_spec = pl.BlockSpec((1, tch), lambda b, i, kk: (0, kk))
        w2_spec = pl.BlockSpec((tch, C), lambda b, i, kk: (kk, 0))

    x2 = pl.pallas_call(
        functools.partial(_mlp_block_kernel, use_fast=use_fast),
        out_shape=jax.ShapeDtypeStruct((B, Np, C), cdt),
        grid=(B, Np // tn, n_kc),
        in_specs=[
            pl.BlockSpec((1, tn, C), lambda b, i, kk: (b, i, 0)),
            _single_buffered((1, C), lambda b, i, kk: (0, 0)),
            _single_buffered((1, C), lambda b, i, kk: (0, 0)),
            w1_spec, bb1_spec, w2_spec,
            _single_buffered((1, C), lambda b, i, kk: (0, 0)),
        ],
        out_specs=pl.BlockSpec((1, tn, C), lambda b, i, kk: (b, i, 0)),
        scratch_shapes=[
            pltpu.VMEM((tn, C), cdt),          # cached LN2(x) tile
            pltpu.VMEM((tn, C), jnp.float32),  # fc2 partial-sum accumulator
        ],
        compiler_params=pltpu.CompilerParams(
            dimension_semantics=("parallel", "parallel", "arbitrary"),
            vmem_limit_bytes=_VMEM_LIMIT),
    )(x1, prep["g2"], prep["b2"], prep["w1"], prep["bb1"], prep["w2"],
      prep["bb2"])

    return x2[:, :N, :] if Np != N else x2


# --------------------------------------------------------------------------
# Pure-JAX reference mirroring the PyTorch Block.forward exactly
# --------------------------------------------------------------------------
def _reference_block(x, p, num_heads, eps=_LN_EPS):
    B, N, C = x.shape
    hd = C // num_heads
    scale = hd ** (-0.5)

    def ln(v, g, b):
        mu = v.mean(-1, keepdims=True)
        var = jnp.mean((v - mu) ** 2, -1, keepdims=True)
        return (v - mu) / jnp.sqrt(var + eps) * g + b

    y = ln(x, p["norm1_w"], p["norm1_b"])
    qkv = (y @ p["qkv_w"].T).reshape(B, N, 3, num_heads, hd)
    qkv = qkv.transpose(2, 0, 3, 1, 4)
    q, k, v = qkv[0], qkv[1], qkv[2]
    attn = jax.nn.softmax((q @ k.transpose(0, 1, 3, 2)) * scale, axis=-1)
    a = (attn @ v).transpose(0, 2, 1, 3).reshape(B, N, C)
    x = x + (a @ p["proj_w"].T + p["proj_b"])

    y = ln(x, p["norm2_w"], p["norm2_b"])
    h = jax.nn.gelu(y @ p["fc1_w"].T + p["fc1_b"], approximate=False)
    x = x + (h @ p["fc2_w"].T + p["fc2_b"])
    return x


if __name__ == "__main__":
    B, N, C, H = 2, 8, 32, 8          # head_dim = 4, mlp hidden = 128
    Ch = 4 * C

    key = jax.random.PRNGKey(0)
    ks = jax.random.split(key, 12)
    x = jax.random.normal(ks[0], (B, N, C), dtype=jnp.float32)
    params = dict(
        norm1_w=1.0 + 0.1 * jax.random.normal(ks[1], (C,), jnp.float32),
        norm1_b=0.1 * jax.random.normal(ks[2], (C,), jnp.float32),
        qkv_w=0.02 * jax.random.normal(ks[3], (3 * C, C), jnp.float32),
        proj_w=0.02 * jax.random.normal(ks[4], (C, C), jnp.float32),
        proj_b=0.02 * jax.random.normal(ks[5], (C,), jnp.float32),
        norm2_w=1.0 + 0.1 * jax.random.normal(ks[6], (C,), jnp.float32),
        norm2_b=0.1 * jax.random.normal(ks[7], (C,), jnp.float32),
        fc1_w=0.02 * jax.random.normal(ks[8], (Ch, C), jnp.float32),
        fc1_b=0.02 * jax.random.normal(ks[9], (Ch,), jnp.float32),
        fc2_w=0.02 * jax.random.normal(ks[10], (C, Ch), jnp.float32),
        fc2_b=0.02 * jax.random.normal(ks[11], (C,), jnp.float32),
    )
    ref = _reference_block(x, params, num_heads=H)

    # ---- f32 path: exact (tight tolerance) ----
    prep32 = prepare_params(params, jnp.float32)
    out = jax.block_until_ready(block_forward(x, prep32, num_heads=H))
    assert out.shape == (B, N, C)
    err = float(jnp.max(jnp.abs(out - ref)))
    assert jnp.allclose(out, ref, atol=2e-4, rtol=2e-4), f"f32 mismatch: {err}"

    # ---- bf16 fast path: bf16 MXU operands, bf16 EUP exp, approx reciprocal
    prep16 = prepare_params(params, jnp.bfloat16)
    out16 = jax.block_until_ready(
        block_forward(x.astype(jnp.bfloat16), prep16, num_heads=H))
    err16 = float(jnp.max(jnp.abs(out16.astype(jnp.float32) - ref)))
    assert err16 < 1e-1, f"bf16 mismatch: {err16}"

    print("KERNEL_OK")
</pallas_src>

<mosaic_0001>
module attributes {stable_mosaic.version = 11 : i64} {
  func.func @_attn_block_kernel(%arg0: i32, %arg1: i32, %arg2: memref<1x128x32xf32, #tpu.memory_space<vmem>>, %arg3: memref<1x32xf32, #tpu.memory_space<vmem>>, %arg4: memref<1x32xf32, #tpu.memory_space<vmem>>, %arg5: memref<32x96xf32, #tpu.memory_space<vmem>>, %arg6: memref<32x32xf32, #tpu.memory_space<vmem>>, %arg7: memref<1x32xf32, #tpu.memory_space<vmem>>, %arg8: memref<1x128x32xf32, #tpu.memory_space<vmem>>, %arg9: memref<128x96xf32, #tpu.memory_space<vmem>>, %arg10: memref<128x32xf32, #tpu.memory_space<vmem>>) attributes {dimension_semantics = [#tpu.dimension_semantics<parallel>, #tpu.dimension_semantics<arbitrary>], iteration_bounds = array<i64: 2, 1>, scalar_prefetch = 0 : i64, scratch_operands = 2 : i64, tpu.core_type = #tpu.core_type<tc>, window_params = [{transform_indices = @transform_0, window_bounds = array<i64: 1, 128, 32>}, {pipeline_mode = #tpu.pipeline_mode<synchronous>, transform_indices = @transform_1, window_bounds = array<i64: 1, 32>}, {pipeline_mode = #tpu.pipeline_mode<synchronous>, transform_indices = @transform_2, window_bounds = array<i64: 1, 32>}, {pipeline_mode = #tpu.pipeline_mode<synchronous>, transform_indices = @transform_3, window_bounds = array<i64: 32, 96>}, {pipeline_mode = #tpu.pipeline_mode<synchronous>, transform_indices = @transform_4, window_bounds = array<i64: 32, 32>}, {pipeline_mode = #tpu.pipeline_mode<synchronous>, transform_indices = @transform_5, window_bounds = array<i64: 1, 32>}, {transform_indices = @transform_6, window_bounds = array<i64: 1, 128, 32>}]} {
    %c0_i32 = arith.constant 0 : i32
    %0 = arith.cmpi eq, %arg1, %c0_i32 : i32
    %1 = arith.extui %0 : i1 to i32
    %c0_i32_0 = arith.constant 0 : i32
    %2 = arith.cmpi ne, %1, %c0_i32_0 : i32
    scf.if %2 {
      %c0_92 = arith.constant 0 : index
      %c0_93 = arith.constant 0 : index
      %c0_94 = arith.constant 0 : index
      %189 = vector.load %arg2[%c0_92, %c0_93, %c0_94] : memref<1x128x32xf32, #tpu.memory_space<vmem>>, vector<1x128x32xf32>
      %190 = vector.shape_cast %189 : vector<1x128x32xf32> to vector<128x32xf32>
      %c0_95 = arith.constant 0 : index
      %c0_96 = arith.constant 0 : index
      %191 = vector.load %arg3[%c0_95, %c0_96] : memref<1x32xf32, #tpu.memory_space<vmem>>, vector<1x32xf32>
      %c0_97 = arith.constant 0 : index
      %c0_98 = arith.constant 0 : index
      %192 = vector.load %arg4[%c0_97, %c0_98] : memref<1x32xf32, #tpu.memory_space<vmem>>, vector<1x32xf32>
      %cst_99 = arith.constant dense<0.000000e+00> : vector<128xf32>
      %193 = vector.multi_reduction <add>, %190, %cst_99 [1] : vector<128x32xf32> to vector<128xf32>
      %194 = vector.shape_cast %193 : vector<128xf32> to vector<128x1xf32>
      %cst_100 = arith.constant 3.200000e+01 : f32
      %195 = vector.broadcast %cst_100 : f32 to vector<128x1xf32>
      %196 = arith.divf %194, %195 : vector<128x1xf32>
      %197 = vector.broadcast %196 : vector<128x1xf32> to vector<128x32xf32>
      %198 = arith.subf %190, %197 : vector<128x32xf32>
      %199 = arith.mulf %198, %198 : vector<128x32xf32>
      %cst_101 = arith.constant dense<0.000000e+00> : vector<128xf32>
      %200 = vector.multi_reduction <add>, %199, %cst_101 [1] : vector<128x32xf32> to vector<128xf32>
      %201 = vector.shape_cast %200 : vector<128xf32> to vector<128x1xf32>
      %cst_102 = arith.constant 3.200000e+01 : f32
      %202 = vector.broadcast %cst_102 : f32 to vector<128x1xf32>
      %203 = arith.divf %201, %202 : vector<128x1xf32>
      %204 = vector.broadcast %196 : vector<128x1xf32> to vector<128x32xf32>
      %205 = arith.subf %190, %204 : vector<128x32xf32>
      %cst_103 = arith.constant 9.99999974E-6 : f32
      %206 = vector.broadcast %cst_103 : f32 to vector<128x1xf32>
      %207 = arith.addf %203, %206 : vector<128x1xf32>
      %208 = math.rsqrt %207 : vector<128x1xf32>
      %209 = vector.broadcast %208 : vector<128x1xf32> to vector<128x32xf32>
      %210 = arith.mulf %205, %209 : vector<128x32xf32>
      %211 = vector.broadcast %191 : vector<1x32xf32> to vector<128x32xf32>
      %212 = arith.mulf %210, %211 : vector<128x32xf32>
      %213 = vector.broadcast %192 : vector<1x32xf32> to vector<128x32xf32>
      %214 = arith.addf %212, %213 : vector<128x32xf32>
      %c0_104 = arith.constant 0 : index
      %c0_105 = arith.constant 0 : index
      %215 = vector.load %arg5[%c0_104, %c0_105] : memref<32x96xf32, #tpu.memory_space<vmem>>, vector<32x96xf32>
      %cst_106 = arith.constant dense<0.000000e+00> : vector<128x96xf32>
      %216 = tpu.matmul %214, %215, %cst_106 {dimension_numbers = #tpu.dot_dimension_numbers<[1], [0], [0], [1], [0, 0, 1, 1], [], []>} : vector<128x32xf32>, vector<32x96xf32>, vector<128x96xf32> -> vector<128x96xf32>
      %c0_107 = arith.constant 0 : index
      %c0_108 = arith.constant 0 : index
      %217 = vector.load %arg9[%c0_107, %c0_108] : memref<128x96xf32, #tpu.memory_space<vmem>>, vector<128x96xf32>
      tpu.vector_store %arg9[%c0_107, %c0_108], %216 {strides = array<i32>} : memref<128x96xf32, #tpu.memory_space<vmem>>, vector<128x96xf32>,
    } else {
    }
    %c128_i32 = arith.constant 128 : i32
    %3 = arith.muli %arg1, %c128_i32 : i32
    %4 = tpu.assume_multiple %3, 128 : i32
    %5 = tpu.iota {dimensions = array<i32: 1>} : vector<128x128xi32>
    %c8_i32 = arith.constant 8 : i32
    %6 = vector.broadcast %c8_i32 : i32 to vector<128x128xi32>
    %7 = arith.cmpi slt, %5, %6 : vector<128x128xi32>
    %8 = arith.index_cast %4 : i32 to index
    %c0 = arith.constant 0 : index
    %9 = vector.load %arg9[%8, %c0] : memref<128x96xf32, #tpu.memory_space<vmem>>, vector<128x4xf32>
    %cst = arith.constant 5.000000e-01 : f32
    %10 = vector.broadcast %cst : f32 to vector<128x4xf32>
    %11 = arith.mulf %9, %10 : vector<128x4xf32>
    %c0_1 = arith.constant 0 : index
    %c32 = arith.constant 32 : index
    %12 = vector.load %arg9[%c0_1, %c32] : memref<128x96xf32, #tpu.memory_space<vmem>>, vector<128x4xf32>
    %c0_2 = arith.constant 0 : index
    %c64 = arith.constant 64 : index
    %13 = vector.load %arg9[%c0_2, %c64] : memref<128x96xf32, #tpu.memory_space<vmem>>, vector<128x4xf32>
    %cst_3 = arith.constant dense<0.000000e+00> : vector<128x128xf32>
    %14 = tpu.matmul %11, %12, %cst_3 {dimension_numbers = #tpu.dot_dimension_numbers<[1], [1], [0], [0], [0, 0, 1, 0], [], []>} : vector<128x4xf32>, vector<128x4xf32>, vector<128x128xf32> -> vector<128x128xf32>
    %cst_4 = arith.constant -1.000000e+30 : f32
    %15 = vector.broadcast %cst_4 : f32 to vector<128x128xf32>
    %16 = arith.select %7, %14, %15 : vector<128x128xi1>, vector<128x128xf32>
    %cst_5 = arith.constant dense<0xFF800000> : vector<128xf32>
    %17 = vector.multi_reduction <maximumf>, %16, %cst_5 [1] : vector<128x128xf32> to vector<128xf32>
    %18 = vector.shape_cast %17 : vector<128xf32> to vector<128x1xf32>
    %19 = vector.broadcast %18 : vector<128x1xf32> to vector<128x128xf32>
    %20 = arith.subf %16, %19 : vector<128x128xf32>
    %21 = math.exp %20 : vector<128x128xf32>
    %cst_6 = arith.constant dense<0.000000e+00> : vector<128xf32>
    %22 = vector.multi_reduction <add>, %21, %cst_6 [1] : vector<128x128xf32> to vector<128xf32>
    %23 = vector.shape_cast %22 : vector<128xf32> to vector<128x1xf32>
    %cst_7 = arith.constant dense<0.000000e+00> : vector<128x4xf32>
    %24 = tpu.matmul %21, %13, %cst_7 {dimension_numbers = #tpu.dot_dimension_numbers<[1], [0], [0], [1], [0, 0, 1, 1], [], []>} : vector<128x128xf32>, vector<128x4xf32>, vector<128x4xf32> -> vector<128x4xf32>
    %25 = tpu.reciprocal %23 : vector<128x1xf32> -> vector<128x1xf32>
    %26 = vector.broadcast %25 : vector<128x1xf32> to vector<128x4xf32>
    %27 = arith.mulf %24, %26 : vector<128x4xf32>
    %c0_8 = arith.constant 0 : index
    %c0_9 = arith.constant 0 : index
    %28 = vector.load %arg10[%c0_8, %c0_9] : memref<128x32xf32, #tpu.memory_space<vmem>>, vector<128x4xf32>
    tpu.vector_store %arg10[%c0_8, %c0_9], %27 {strides = array<i32>} : memref<128x32xf32, #tpu.memory_space<vmem>>, vector<128x4xf32>,
    %29 = arith.index_cast %4 : i32 to index
    %c4 = arith.constant 4 : index
    %30 = vector.load %arg9[%29, %c4] : memref<128x96xf32, #tpu.memory_space<vmem>>, vector<128x4xf32>
    %cst_10 = arith.constant 5.000000e-01 : f32
    %31 = vector.broadcast %cst_10 : f32 to vector<128x4xf32>
    %32 = arith.mulf %30, %31 : vector<128x4xf32>
    %c0_11 = arith.constant 0 : index
    %c36 = arith.constant 36 : index
    %33 = vector.load %arg9[%c0_11, %c36] : memref<128x96xf32, #tpu.memory_space<vmem>>, vector<128x4xf32>
    %c0_12 = arith.constant 0 : index
    %c68 = arith.constant 68 : index
    %34 = vector.load %arg9[%c0_12, %c68] : memref<128x96xf32, #tpu.memory_space<vmem>>, vector<128x4xf32>
    %cst_13 = arith.constant dense<0.000000e+00> : vector<128x128xf32>
    %35 = tpu.matmul %32, %33, %cst_13 {dimension_numbers = #tpu.dot_dimension_numbers<[1], [1], [0], [0], [0, 0, 1, 0], [], []>} : vector<128x4xf32>, vector<128x4xf32>, vector<128x128xf32> -> vector<128x128xf32>
    %cst_14 = arith.constant -1.000000e+30 : f32
    %36 = vector.broadcast %cst_14 : f32 to vector<128x128xf32>
    %37 = arith.select %7, %35, %36 : vector<128x128xi1>, vector<128x128xf32>
    %cst_15 = arith.constant dense<0xFF800000> : vector<128xf32>
    %38 = vector.multi_reduction <maximumf>, %37, %cst_15 [1] : vector<128x128xf32> to vector<128xf32>
    %39 = vector.shape_cast %38 : vector<128xf32> to vector<128x1xf32>
    %40 = vector.broadcast %39 : vector<128x1xf32> to vector<128x128xf32>
    %41 = arith.subf %37, %40 : vector<128x128xf32>
    %42 = math.exp %41 : vector<128x128xf32>
    %cst_16 = arith.constant dense<0.000000e+00> : vector<128xf32>
    %43 = vector.multi_reduction <add>, %42, %cst_16 [1] : vector<128x128xf32> to vector<128xf32>
    %44 = vector.shape_cast %43 : vector<128xf32> to vector<128x1xf32>
    %cst_17 = arith.constant dense<0.000000e+00> : vector<128x4xf32>
    %45 = tpu.matmul %42, %34, %cst_17 {dimension_numbers = #tpu.dot_dimension_numbers<[1], [0], [0], [1], [0, 0, 1, 1], [], []>} : vector<128x128xf32>, vector<128x4xf32>, vector<128x4xf32> -> vector<128x4xf32>
    %46 = tpu.reciprocal %44 : vector<128x1xf32> -> vector<128x1xf32>
    %47 = vector.broadcast %46 : vector<128x1xf32> to vector<128x4xf32>
    %48 = arith.mulf %45, %47 : vector<128x4xf32>
    %c0_18 = arith.constant 0 : index
    %c4_19 = arith.constant 4 : index
    %49 = vector.load %arg10[%c0_18, %c4_19] : memref<128x32xf32, #tpu.memory_space<vmem>>, vector<128x4xf32>
    tpu.vector_store %arg10[%c0_18, %c4_19], %48 {strides = array<i32>} : memref<128x32xf32, #tpu.memory_space<vmem>>, vector<128x4xf32>,
    %50 = arith.index_cast %4 : i32 to index
    %c8 = arith.constant 8 : index
    %51 = vector.load %arg9[%50, %c8] : memref<128x96xf32, #tpu.memory_space<vmem>>, vector<128x4xf32>
    %cst_20 = arith.constant 5.000000e-01 : f32
    %52 = vector.broadcast %cst_20 : f32 to vector<128x4xf32>
    %53 = arith.mulf %51, %52 : vector<128x4xf32>
    %c0_21 = arith.constant 0 : index
    %c40 = arith.constant 40 : index
    %54 = vector.load %arg9[%c0_21, %c40] : memref<128x96xf32, #tpu.memory_space<vmem>>, vector<128x4xf32>
    %c0_22 = arith.constant 0 : index
    %c72 = arith.constant 72 : index
    %55 = vector.load %arg9[%c0_22, %c72] : memref<128x96xf32, #tpu.memory_space<vmem>>, vector<128x4xf32>
    %cst_23 = arith.constant dense<0.000000e+00> : vector<128x128xf32>
    %56 = tpu.matmul %53, %54, %cst_23 {dimension_numbers = #tpu.dot_dimension_numbers<[1], [1], [0], [0], [0, 0, 1, 0], [], []>} : vector<128x4xf32>, vector<128x4xf32>, vector<128x128xf32> -> vector<128x128xf32>
    %cst_24 = arith.constant -1.000000e+30 : f32
    %57 = vector.broadcast %cst_24 : f32 to vector<128x128xf32>
    %58 = arith.select %7, %56, %57 : vector<128x128xi1>, vector<128x128xf32>
    %cst_25 = arith.constant dense<0xFF800000> : vector<128xf32>
    %59 = vector.multi_reduction <maximumf>, %58, %cst_25 [1] : vector<128x128xf32> to vector<128xf32>
    %60 = vector.shape_cast %59 : vector<128xf32> to vector<128x1xf32>
    %61 = vector.broadcast %60 : vector<128x1xf32> to vector<128x128xf32>
    %62 = arith.subf %58, %61 : vector<128x128xf32>
    %63 = math.exp %62 : vector<128x128xf32>
    %cst_26 = arith.constant dense<0.000000e+00> : vector<128xf32>
    %64 = vector.multi_reduction <add>, %63, %cst_26 [1] : vector<128x128xf32> to vector<128xf32>
    %65 = vector.shape_cast %64 : vector<128xf32> to vector<128x1xf32>
    %cst_27 = arith.constant dense<0.000000e+00> : vector<128x4xf32>
    %66 = tpu.matmul %63, %55, %cst_27 {dimension_numbers = #tpu.dot_dimension_numbers<[1], [0], [0], [1], [0, 0, 1, 1], [], []>} : vector<128x128xf32>, vector<128x4xf32>, vector<128x4xf32> -> vector<128x4xf32>
    %67 = tpu.reciprocal %65 : vector<128x1xf32> -> vector<128x1xf32>
    %68 = vector.broadcast %67 : vector<128x1xf32> to vector<128x4xf32>
    %69 = arith.mulf %66, %68 : vector<128x4xf32>
    %c0_28 = arith.constant 0 : index
    %c8_29 = arith.constant 8 : index
    %70 = vector.load %arg10[%c0_28, %c8_29] : memref<128x32xf32, #tpu.memory_space<vmem>>, vector<128x4xf32>
    tpu.vector_store %arg10[%c0_28, %c8_29], %69 {strides = array<i32>} : memref<128x32xf32, #tpu.memory_space<vmem>>, vector<128x4xf32>,
    %71 = arith.index_cast %4 : i32 to index
    %c12 = arith.constant 12 : index
    %72 = vector.load %arg9[%71, %c12] : memref<128x96xf32, #tpu.memory_space<vmem>>, vector<128x4xf32>
    %cst_30 = arith.constant 5.000000e-01 : f32
    %73 = vector.broadcast %cst_30 : f32 to vector<128x4xf32>
    %74 = arith.mulf %72, %73 : vector<128x4xf32>
    %c0_31 = arith.constant 0 : index
    %c44 = arith.constant 44 : index
    %75 = vector.load %arg9[%c0_31, %c44] : memref<128x96xf32, #tpu.memory_space<vmem>>, vector<128x4xf32>
    %c0_32 = arith.constant 0 : index
    %c76 = arith.constant 76 : index
    %76 = vector.load %arg9[%c0_32, %c76] : memref<128x96xf32, #tpu.memory_space<vmem>>, vector<128x4xf32>
    %cst_33 = arith.constant dense<0.000000e+00> : vector<128x128xf32>
    %77 = tpu.matmul %74, %75, %cst_33 {dimension_numbers = #tpu.dot_dimension_numbers<[1], [1], [0], [0], [0, 0, 1, 0], [], []>} : vector<128x4xf32>, vector<128x4xf32>, vector<128x128xf32> -> vector<128x128xf32>
    %cst_34 = arith.constant -1.000000e+30 : f32
    %78 = vector.broadcast %cst_34 : f32 to vector<128x128xf32>
    %79 = arith.select %7, %77, %78 : vector<128x128xi1>, vector<128x128xf32>
    %cst_35 = arith.constant dense<0xFF800000> : vector<128xf32>
    %80 = vector.multi_reduction <maximumf>, %79, %cst_35 [1] : vector<128x128xf32> to vector<128xf32>
    %81 = vector.shape_cast %80 : vector<128xf32> to vector<128x1xf32>
    %82 = vector.broadcast %81 : vector<128x1xf32> to vector<128x128xf32>
    %83 = arith.subf %79, %82 : vector<128x128xf32>
    %84 = math.exp %83 : vector<128x128xf32>
    %cst_36 = arith.constant dense<0.000000e+00> : vector<128xf32>
    %85 = vector.multi_reduction <add>, %84, %cst_36 [1] : vector<128x128xf32> to vector<128xf32>
    %86 = vector.shape_cast %85 : vector<128xf32> to vector<128x1xf32>
    %cst_37 = arith.constant dense<0.000000e+00> : vector<128x4xf32>
    %87 = tpu.matmul %84, %76, %cst_37 {dimension_numbers = #tpu.dot_dimension_numbers<[1], [0], [0], [1], [0, 0, 1, 1], [], []>} : vector<128x128xf32>, vector<128x4xf32>, vector<128x4xf32> -> vector<128x4xf32>
    %88 = tpu.reciprocal %86 : vector<128x1xf32> -> vector<128x1xf32>
    %89 = vector.broadcast %88 : vector<128x1xf32> to vector<128x4xf32>
    %90 = arith.mulf %87, %89 : vector<128x4xf32>
    %c0_38 = arith.constant 0 : index
    %c12_39 = arith.constant 12 : index
    %91 = vector.load %arg10[%c0_38, %c12_39] : memref<128x32xf32, #tpu.memory_space<vmem>>, vector<128x4xf32>
    tpu.vector_store %arg10[%c0_38, %c12_39], %90 {strides = array<i32>} : memref<128x32xf32, #tpu.memory_space<vmem>>, vector<128x4xf32>,
    %92 = arith.index_cast %4 : i32 to index
    %c16 = arith.constant 16 : index
    %93 = vector.load %arg9[%92, %c16] : memref<128x96xf32, #tpu.memory_space<vmem>>, vector<128x4xf32>
    %cst_40 = arith.constant 5.000000e-01 : f32
    %94 = vector.broadcast %cst_40 : f32 to vector<128x4xf32>
    %95 = arith.mulf %93, %94 : vector<128x4xf32>
    %c0_41 = arith.constant 0 : index
    %c48 = arith.constant 48 : index
    %96 = vector.load %arg9[%c0_41, %c48] : memref<128x96xf32, #tpu.memory_space<vmem>>, vector<128x4xf32>
    %c0_42 = arith.constant 0 : index
    %c80 = arith.constant 80 : index
    %97 = vector.load %arg9[%c0_42, %c80] : memref<128x96xf32, #tpu.memory_space<vmem>>, vector<128x4xf32>
    %cst_43 = arith.constant dense<0.000000e+00> : vector<128x128xf32>
    %98 = tpu.matmul %95, %96, %cst_43 {dimension_numbers = #tpu.dot_dimension_numbers<[1], [1], [0], [0], [0, 0, 1, 0], [], []>} : vector<128x4xf32>, vector<128x4xf32>, vector<128x128xf32> -> vector<128x128xf32>
    %cst_44 = arith.constant -1.000000e+30 : f32
    %99 = vector.broadcast %cst_44 : f32 to vector<128x128xf32>
    %100 = arith.select %7, %98, %99 : vector<128x128xi1>, vector<128x128xf32>
    %cst_45 = arith.constant dense<0xFF800000> : vector<128xf32>
    %101 = vector.multi_reduction <maximumf>, %100, %cst_45 [1] : vector<128x128xf32> to vector<128xf32>
    %102 = vector.shape_cast %101 : vector<128xf32> to vector<128x1xf32>
    %103 = vector.broadcast %102 : vector<128x1xf32> to vector<128x128xf32>
    %104 = arith.subf %100, %103 : vector<128x128xf32>
    %105 = math.exp %104 : vector<128x128xf32>
    %cst_46 = arith.constant dense<0.000000e+00> : vector<128xf32>
    %106 = vector.multi_reduction <add>, %105, %cst_46 [1] : vector<128x128xf32> to vector<128xf32>
    %107 = vector.shape_cast %106 : vector<128xf32> to vector<128x1xf32>
    %cst_47 = arith.constant dense<0.000000e+00> : vector<128x4xf32>
    %108 = tpu.matmul %105, %97, %cst_47 {dimension_numbers = #tpu.dot_dimension_numbers<[1], [0], [0], [1], [0, 0, 1, 1], [], []>} : vector<128x128xf32>, vector<128x4xf32>, vector<128x4xf32> -> vector<128x4xf32>
    %109 = tpu.reciprocal %107 : vector<128x1xf32> -> vector<128x1xf32>
    %110 = vector.broadcast %109 : vector<128x1xf32> to vector<128x4xf32>
    %111 = arith.mulf %108, %110 : vector<128x4xf32>
    %c0_48 = arith.constant 0 : index
    %c16_49 = arith.constant 16 : index
    %112 = vector.load %arg10[%c0_48, %c16_49] : memref<128x32xf32, #tpu.memory_space<vmem>>, vector<128x4xf32>
    tpu.vector_store %arg10[%c0_48, %c16_49], %111 {strides = array<i32>} : memref<128x32xf32, #tpu.memory_space<vmem>>, vector<128x4xf32>,
    %113 = arith.index_cast %4 : i32 to index
    %c20 = arith.constant 20 : index
    %114 = vector.load %arg9[%113, %c20] : memref<128x96xf32, #tpu.memory_space<vmem>>, vector<128x4xf32>
    %cst_50 = arith.constant 5.000000e-01 : f32
    %115 = vector.broadcast %cst_50 : f32 to vector<128x4xf32>
    %116 = arith.mulf %114, %115 : vector<128x4xf32>
    %c0_51 = arith.constant 0 : index
    %c52 = arith.constant 52 : index
    %117 = vector.load %arg9[%c0_51, %c52] : memref<128x96xf32, #tpu.memory_space<vmem>>, vector<128x4xf32>
    %c0_52 = arith.constant 0 : index
    %c84 = arith.constant 84 : index
    %118 = vector.load %arg9[%c0_52, %c84] : memref<128x96xf32, #tpu.memory_space<vmem>>, vector<128x4xf32>
    %cst_53 = arith.constant dense<0.000000e+00> : vector<128x128xf32>
    %119 = tpu.matmul %116, %117, %cst_53 {dimension_numbers = #tpu.dot_dimension_numbers<[1], [1], [0], [0], [0, 0, 1, 0], [], []>} : vector<128x4xf32>, vector<128x4xf32>, vector<128x128xf32> -> vector<128x128xf32>
    %cst_54 = arith.constant -1.000000e+30 : f32
    %120 = vector.broadcast %cst_54 : f32 to vector<128x128xf32>
    %121 = arith.select %7, %119, %120 : vector<128x128xi1>, vector<128x128xf32>
    %cst_55 = arith.constant dense<0xFF800000> : vector<128xf32>
    %122 = vector.multi_reduction <maximumf>, %121, %cst_55 [1] : vector<128x128xf32> to vector<128xf32>
    %123 = vector.shape_cast %122 : vector<128xf32> to vector<128x1xf32>
    %124 = vector.broadcast %123 : vector<128x1xf32> to vector<128x128xf32>
    %125 = arith.subf %121, %124 : vector<128x128xf32>
    %126 = math.exp %125 : vector<128x128xf32>
    %cst_56 = arith.constant dense<0.000000e+00> : vector<128xf32>
    %127 = vector.multi_reduction <add>, %126, %cst_56 [1] : vector<128x128xf32> to vector<128xf32>
    %128 = vector.shape_cast %127 : vector<128xf32> to vector<128x1xf32>
    %cst_57 = arith.constant dense<0.000000e+00> : vector<128x4xf32>
    %129 = tpu.matmul %126, %118, %cst_57 {dimension_numbers = #tpu.dot_dimension_numbers<[1], [0], [0], [1], [0, 0, 1, 1], [], []>} : vector<128x128xf32>, vector<128x4xf32>, vector<128x4xf32> -> vector<128x4xf32>
    %130 = tpu.reciprocal %128 : vector<128x1xf32> -> vector<128x1xf32>
    %131 = vector.broadcast %130 : vector<128x1xf32> to vector<128x4xf32>
    %132 = arith.mulf %129, %131 : vector<128x4xf32>
    %c0_58 = arith.constant 0 : index
    %c20_59 = arith.constant 20 : index
    %133 = vector.load %arg10[%c0_58, %c20_59] : memref<128x32xf32, #tpu.memory_space<vmem>>, vector<128x4xf32>
    tpu.vector_store %arg10[%c0_58, %c20_59], %132 {strides = array<i32>} : memref<128x32xf32, #tpu.memory_space<vmem>>, vector<128x4xf32>,
    %134 = arith.index_cast %4 : i32 to index
    %c24 = arith.constant 24 : index
    %135 = vector.load %arg9[%134, %c24] : memref<128x96xf32, #tpu.memory_space<vmem>>, vector<128x4xf32>
    %cst_60 = arith.constant 5.000000e-01 : f32
    %136 = vector.broadcast %cst_60 : f32 to vector<128x4xf32>
    %137 = arith.mulf %135, %136 : vector<128x4xf32>
    %c0_61 = arith.constant 0 : index
    %c56 = arith.constant 56 : index
    %138 = vector.load %arg9[%c0_61, %c56] : memref<128x96xf32, #tpu.memory_space<vmem>>, vector<128x4xf32>
    %c0_62 = arith.constant 0 : index
    %c88 = arith.constant 88 : index
    %139 = vector.load %arg9[%c0_62, %c88] : memref<128x96xf32, #tpu.memory_space<vmem>>, vector<128x4xf32>
    %cst_63 = arith.constant dense<0.000000e+00> : vector<128x128xf32>
    %140 = tpu.matmul %137, %138, %cst_63 {dimension_numbers = #tpu.dot_dimension_numbers<[1], [1], [0], [0], [0, 0, 1, 0], [], []>} : vector<128x4xf32>, vector<128x4xf32>, vector<128x128xf32> -> vector<128x128xf32>
    %cst_64 = arith.constant -1.000000e+30 : f32
    %141 = vector.broadcast %cst_64 : f32 to vector<128x128xf32>
    %142 = arith.select %7, %140, %141 : vector<128x128xi1>, vector<128x128xf32>
    %cst_65 = arith.constant dense<0xFF800000> : vector<128xf32>
    %143 = vector.multi_reduction <maximumf>, %142, %cst_65 [1] : vector<128x128xf32> to vector<128xf32>
    %144 = vector.shape_cast %143 : vector<128xf32> to vector<128x1xf32>
    %145 = vector.broadcast %144 : vector<128x1xf32> to vector<128x128xf32>
    %146 = arith.subf %142, %145 : vector<128x128xf32>
    %147 = math.exp %146 : vector<128x128xf32>
    %cst_66 = arith.constant dense<0.000000e+00> : vector<128xf32>
    %148 = vector.multi_reduction <add>, %147, %cst_66 [1] : vector<128x128xf32> to vector<128xf32>
    %149 = vector.shape_cast %148 : vector<128xf32> to vector<128x1xf32>
    %cst_67 = arith.constant dense<0.000000e+00> : vector<128x4xf32>
    %150 = tpu.matmul %147, %139, %cst_67 {dimension_numbers = #tpu.dot_dimension_numbers<[1], [0], [0], [1], [0, 0, 1, 1], [], []>} : vector<128x128xf32>, vector<128x4xf32>, vector<128x4xf32> -> vector<128x4xf32>
    %151 = tpu.reciprocal %149 : vector<128x1xf32> -> vector<128x1xf32>
    %152 = vector.broadcast %151 : vector<128x1xf32> to vector<128x4xf32>
    %153 = arith.mulf %150, %152 : vector<128x4xf32>
    %c0_68 = arith.constant 0 : index
    %c24_69 = arith.constant 24 : index
    %154 = vector.load %arg10[%c0_68, %c24_69] : memref<128x32xf32, #tpu.memory_space<vmem>>, vector<128x4xf32>
    tpu.vector_store %arg10[%c0_68, %c24_69], %153 {strides = array<i32>} : memref<128x32xf32, #tpu.memory_space<vmem>>, vector<128x4xf32>,
    %155 = arith.index_cast %4 : i32 to index
    %c28 = arith.constant 28 : index
    %156 = vector.load %arg9[%155, %c28] : memref<128x96xf32, #tpu.memory_space<vmem>>, vector<128x4xf32>
    %cst_70 = arith.constant 5.000000e-01 : f32
    %157 = vector.broadcast %cst_70 : f32 to vector<128x4xf32>
    %158 = arith.mulf %156, %157 : vector<128x4xf32>
    %c0_71 = arith.constant 0 : index
    %c60 = arith.constant 60 : index
    %159 = vector.load %arg9[%c0_71, %c60] : memref<128x96xf32, #tpu.memory_space<vmem>>, vector<128x4xf32>
    %c0_72 = arith.constant 0 : index
    %c92 = arith.constant 92 : index
    %160 = vector.load %arg9[%c0_72, %c92] : memref<128x96xf32, #tpu.memory_space<vmem>>, vector<128x4xf32>
    %cst_73 = arith.constant dense<0.000000e+00> : vector<128x128xf32>
    %161 = tpu.matmul %158, %159, %cst_73 {dimension_numbers = #tpu.dot_dimension_numbers<[1], [1], [0], [0], [0, 0, 1, 0], [], []>} : vector<128x4xf32>, vector<128x4xf32>, vector<128x128xf32> -> vector<128x128xf32>
    %cst_74 = arith.constant -1.000000e+30 : f32
    %162 = vector.broadcast %cst_74 : f32 to vector<128x128xf32>
    %163 = arith.select %7, %161, %162 : vector<128x128xi1>, vector<128x128xf32>
    %cst_75 = arith.constant dense<0xFF800000> : vector<128xf32>
    %164 = vector.multi_reduction <maximumf>, %163, %cst_75 [1] : vector<128x128xf32> to vector<128xf32>
    %165 = vector.shape_cast %164 : vector<128xf32> to vector<128x1xf32>
    %166 = vector.broadcast %165 : vector<128x1xf32> to vector<128x128xf32>
    %167 = arith.subf %163, %166 : vector<128x128xf32>
    %168 = math.exp %167 : vector<128x128xf32>
    %cst_76 = arith.constant dense<0.000000e+00> : vector<128xf32>
    %169 = vector.multi_reduction <add>, %168, %cst_76 [1] : vector<128x128xf32> to vector<128xf32>
    %170 = vector.shape_cast %169 : vector<128xf32> to vector<128x1xf32>
    %cst_77 = arith.constant dense<0.000000e+00> : vector<128x4xf32>
    %171 = tpu.matmul %168, %160, %cst_77 {dimension_numbers = #tpu.dot_dimension_numbers<[1], [0], [0], [1], [0, 0, 1, 1], [], []>} : vector<128x128xf32>, vector<128x4xf32>, vector<128x4xf32> -> vector<128x4xf32>
    %172 = tpu.reciprocal %170 : vector<128x1xf32> -> vector<128x1xf32>
    %173 = vector.broadcast %172 : vector<128x1xf32> to vector<128x4xf32>
    %174 = arith.mulf %171, %173 : vector<128x4xf32>
    %c0_78 = arith.constant 0 : index
    %c28_79 = arith.constant 28 : index
    %175 = vector.load %arg10[%c0_78, %c28_79] : memref<128x32xf32, #tpu.memory_space<vmem>>, vector<128x4xf32>
    tpu.vector_store %arg10[%c0_78, %c28_79], %174 {strides = array<i32>} : memref<128x32xf32, #tpu.memory_space<vmem>>, vector<128x4xf32>,
    %c0_80 = arith.constant 0 : index
    %c0_81 = arith.constant 0 : index
    %176 = vector.load %arg10[%c0_80, %c0_81] : memref<128x32xf32, #tpu.memory_space<vmem>>, vector<128x32xf32>
    %c0_82 = arith.constant 0 : index
    %c0_83 = arith.constant 0 : index
    %177 = vector.load %arg6[%c0_82, %c0_83] : memref<32x32xf32, #tpu.memory_space<vmem>>, vector<32x32xf32>
    %cst_84 = arith.constant dense<0.000000e+00> : vector<128x32xf32>
    %178 = tpu.matmul %176, %177, %cst_84 {dimension_numbers = #tpu.dot_dimension_numbers<[1], [0], [0], [1], [0, 0, 1, 1], [], []>} : vector<128x32xf32>, vector<32x32xf32>, vector<128x32xf32> -> vector<128x32xf32>
    %c0_85 = arith.constant 0 : index
    %c0_86 = arith.constant 0 : index
    %179 = vector.load %arg7[%c0_85, %c0_86] : memref<1x32xf32, #tpu.memory_space<vmem>>, vector<1x32xf32>
    %180 = vector.broadcast %179 : vector<1x32xf32> to vector<128x32xf32>
    %181 = arith.addf %178, %180 : vector<128x32xf32>
    %c0_87 = arith.constant 0 : index
    %182 = arith.index_cast %4 : i32 to index
    %c0_88 = arith.constant 0 : index
    %183 = vector.load %arg2[%c0_87, %182, %c0_88] : memref<1x128x32xf32, #tpu.memory_space<vmem>>, vector<1x128x32xf32>
    %184 = vector.shape_cast %183 : vector<1x128x32xf32> to vector<128x32xf32>
    %185 = arith.addf %181, %184 : vector<128x32xf32>
    %c0_89 = arith.constant 0 : index
    %c0_90 = arith.constant 0 : index
    %c0_91 = arith.constant 0 : index
    %186 = vector.load %arg8[%c0_89, %c0_90, %c0_91] : memref<1x128x32xf32, #tpu.memory_space<vmem>>, vector<1x128x32xf32>
    %187 = vector.shape_cast %186 : vector<1x128x32xf32> to vector<128x32xf32>
    %188 = vector.shape_cast %185 : vector<128x32xf32> to vector<1x128x32xf32>
    tpu.vector_store %arg8[%c0_89, %c0_90, %c0_91], %188 {strides = array<i32>} : memref<1x128x32xf32, #tpu.memory_space<vmem>>, vector<1x128x32xf32>,
    return
  }
  func.func @transform_0(%arg0: i32, %arg1: i32) -> (i32, i32, i32) {
    %c0_i32 = arith.constant 0 : i32
    %c0_i32_0 = arith.constant 0 : i32
    %c0_i32_1 = arith.constant 0 : i32
    return %arg0, %c0_i32, %c0_i32_0 : i32, i32, i32
  }
  func.func @transform_1(%arg0: i32, %arg1: i32) -> (i32, i32) {
    %c0_i32 = arith.constant 0 : i32
    %c0_i32_0 = arith.constant 0 : i32
    %c0_i32_1 = arith.constant 0 : i32
    return %c0_i32, %c0_i32_0 : i32, i32
  }
  func.func @transform_2(%arg0: i32, %arg1: i32) -> (i32, i32) {
    %c0_i32 = arith.constant 0 : i32
    %c0_i32_0 = arith.constant 0 : i32
    %c0_i32_1 = arith.constant 0 : i32
    return %c0_i32, %c0_i32_0 : i32, i32
  }
  func.func @transform_3(%arg0: i32, %arg1: i32) -> (i32, i32) {
    %c0_i32 = arith.constant 0 : i32
    %c0_i32_0 = arith.constant 0 : i32
    %c0_i32_1 = arith.constant 0 : i32
    return %c0_i32, %c0_i32_0 : i32, i32
  }
  func.func @transform_4(%arg0: i32, %arg1: i32) -> (i32, i32) {
    %c0_i32 = arith.constant 0 : i32
    %c0_i32_0 = arith.constant 0 : i32
    %c0_i32_1 = arith.constant 0 : i32
    return %c0_i32, %c0_i32_0 : i32, i32
  }
  func.func @transform_5(%arg0: i32, %arg1: i32) -> (i32, i32) {
    %c0_i32 = arith.constant 0 : i32
    %c0_i32_0 = arith.constant 0 : i32
    %c0_i32_1 = arith.constant 0 : i32
    return %c0_i32, %c0_i32_0 : i32, i32
  }
  func.func @transform_6(%arg0: i32, %arg1: i32) -> (i32, i32, i32) {
    %c0_i32 = arith.constant 0 : i32
    %c0_i32_0 = arith.constant 0 : i32
    return %arg0, %arg1, %c0_i32 : i32, i32, i32
  }
}

</mosaic_0001>

<bundles_post_ra>
// kernel: tpu_custom_call.1
= control target key start
LH: loop header
LB: loop body
LE: loop exit
PB: predicated region body
PF: predicated region fallthrough
CT: control target
= control target key end

     0   :  { %s9899_s21 = smov 0   ;;  %s9901_s22 = smov 0   ;;  %s14379_s0 = inlined_call_operand.vmem [shape: f32[2,128,32], index: 0, kind: input, shape index: {}]   ;;  %s14380_s1 = inlined_call_operand.vmem [shape: f32[1,32], index: 1, kind: input, shape index: {}]   ;;  %s14381_s2 = inlined_call_operand.vmem [shape: f32[1,32], index: 2, kind: input, shape index: {}]   ;;  %s14382_s3 = inlined_call_operand.vmem [shape: f32[32,96], index: 3, kind: input, shape index: {}]   ;;  %s14383_s4 = inlined_call_operand.vmem [shape: f32[32,32], index: 4, kind: input, shape index: {}]   ;;  %s14384_s5 = inlined_call_operand.vmem [shape: f32[1,32], index: 5, kind: input, shape index: {}]   ;;  %s14385_s6 = inlined_call_operand.vmem [shape: f32[2,128,32], index: 6, kind: output, shape index: {}]  }
   0x1   :  { %s9903_s23 = smov 0  }
   0x2 LB: > { %s28_s24 = sadd.s32 1, %s9828_s22  ;;  %p7329_p0 = scmp.ge.s32.totalorder %s9832_s23, 1  ;;  %s9832_s23 = sphi %s9903_s23, %s16_s23   ;;  %s9828_s22 = sphi %s9901_s22, %s15106_s22   ;;  %s9824_s21 = sphi %s9899_s21, %s15105_s21  }
   0x3   : > { %p30_p1 = scmp.ge.s32.totalorder %s28_s24, 2  ;;  %p226_p2 = scmp.lt.s32.totalorder %s9832_s23, 3 }
   0x5   : > { %s15108_s24 = smov (%p30_p1, %s28_s24), 0  ;;  %p227_p3 = pnand %p7329_p0, %p226_p2 }
   0x7   : > { %230 = sbr.rel (%p227_p3) target bundleno = 4908 (0x132c), region = 44 }
   0xc   : > { %p260_p4 = scmp.lt.s32.totalorder %s9824_s21, 1  ;;  %vm297_vm0 = vcmask 261120   ;;  %vm748_vm1 = vcmask 785408   ;;  %vm866_vm2 = vcmask 31744   ;;  %s9834_s17 = smov 96   ;;  %vm2231_vm4 = vcmask 64544  }
   0xd   : > { %s9835_s18 = smov 64   ;;  %s9836_s19 = smov 92   ;;  %vm3018_vm5 = vcmask 97344   ;;  %vm3805_vm6 = vcmask 130144   ;;  %vm4592_vm7 = vcmask 162944   ;;  %vm5379_vm8 = vcmask 195744  }
   0xe   : > { %s15110_s21 = smov (!%p260_p4, %s9824_s21), 1  ;;  %s9837_s20 = smov 124   ;;  %vm6166_vm9 = vcmask 228544   ;;  %vm6953_vm10 = vcmask 261344  }
   0xf   : > { %s7627_s25 = sshll.u32 %s15110_s21, 7  ;;  %s9838_s26 = smov 60  }
  0x10   : > { %s9925_s28 = scalar_lea.vmem %s14379_s0, %s7627_s25  ;;  %s9839_s27 = smov 88  }
  0x11   : > { %v279_v0 = vld [vmem:[%s9925_s28] sm:$0xff]  ;;  %v281_v1 = vld [vmem:[%s9925_s28 + $0x10] sm:$0xff]  ;;  %v280_v2 = vld [vmem:[%s9925_s28 + $0x8] sm:$0xff]  ;;  %s9840_s29 = smov 120   ;;  %s9841_s30 = smov 56  }
  0x12   : > { %v298_v3 = vsel %vm297_vm0, %v279_v0, 0.0  ;;  %v304_v4 = vsel %vm297_vm0, %v281_v1, 0.0  ;;  %v282_v5 = vld [vmem:[%s9925_s28 + $0x18] sm:$0xff]  ;;  %v301_v6 = vsel %vm297_vm0, %v280_v2, 0.0  ;;  %v283_v8 = vld [vmem:[%s9925_s28 + $0x20] sm:$0xff]  ;;  %v284_v9 = vld [vmem:[%s9925_s28 + $0x28] sm:$0xff] }
  0x13   : > { %299 = vadd.xlane.f32.xlu0 %v298_v3  ;;  %305 = vadd.xlane.f32.xlu1 %v304_v4  ;;  %v307_v7 = vsel %vm297_vm0, %v282_v5, 0.0  ;;  %v310_v10 = vsel %vm297_vm0, %v283_v8, 0.0  ;;  %v313_v11 = vsel %vm297_vm0, %v284_v9, 0.0  ;;  %v9940_v12 = vld [vmem:[%s9925_s28 + $0x30] sm:$0xff]  ;;  %v9943_v13 = vld [vmem:[%s9925_s28 + $0x38] sm:$0xff]  ;;  %v9950_v16 = vld [vmem:[%s9925_s28 + $0x40] sm:$0xff] }
  0x14   : > { %v316_v14 = vsel %vm297_vm0, %v9940_v12, 0.0  ;;  %v319_v15 = vsel %vm297_vm0, %v9943_v13, 0.0  ;;  %v9953_v17 = vld [vmem:[%s9925_s28 + $0x48] sm:$0xff]  ;;  %v322_v18 = vsel %vm297_vm0, %v9950_v16, 0.0  ;;  %v9960_v20 = vld [vmem:[%s9925_s28 + $0x50] sm:$0xff]  ;;  %v9963_v21 = vld [vmem:[%s9925_s28 + $0x58] sm:$0xff] }
  0x15   : > { %v325_v19 = vsel %vm297_vm0, %v9953_v17, 0.0  ;;  %v328_v22 = vsel %vm297_vm0, %v9960_v20, 0.0  ;;  %v331_v23 = vsel %vm297_vm0, %v9963_v21, 0.0  ;;  %v9970_v24 = vld [vmem:[%s9925_s28 + $0x60] sm:$0xff]  ;;  %v9973_v25 = vld [vmem:[%s9925_s28 + $0x68] sm:$0xff]  ;;  %v9980_v28 = vld [vmem:[%s9925_s28 + $0x70] sm:$0xff] }
  0x16   : > { %v334_v26 = vsel %vm297_vm0, %v9970_v24, 0.0  ;;  %v337_v27 = vsel %vm297_vm0, %v9973_v25, 0.0  ;;  %v9983_v29 = vld [vmem:[%s9925_s28 + $0x78] sm:$0xff]  ;;  %v340_v30 = vsel %vm297_vm0, %v9980_v28, 0.0  ;;  %s9842_s7 = smov 84   ;;  %s9843_s8 = smov 116  }
  0x17   : > { %302 = vadd.xlane.f32.xlu0 %v301_v6  ;;  %308 = vadd.xlane.f32.xlu1 %v307_v7  ;;  %v343_v31 = vsel %vm297_vm0, %v9983_v29, 0.0  ;;  %s9844_s9 = smov 52   ;;  %s9845_s10 = smov 80  }
  0x18   : > { %s9846_s11 = smov 112   ;;  %s9847_s12 = smov 48  }
  0x19   : > { %s9848_s13 = smov 76   ;;  %s9849_s14 = smov 108  }
  0x1a   : > { %s9850_s15 = smov 44   ;;  %s9851_s16 = smov 72  }
  0x1b   : > { %311 = vadd.xlane.f32.xlu0 %v310_v10  ;;  %314 = vadd.xlane.f32.xlu1 %v313_v11 }
  0x1f   : > { %317 = vadd.xlane.f32.xlu0 %v316_v14  ;;  %320 = vadd.xlane.f32.xlu1 %v319_v15 }
  0x23   : > { %323 = vadd.xlane.f32.xlu0 %v322_v18  ;;  %326 = vadd.xlane.f32.xlu1 %v325_v19 }
  0x27   : > { %329 = vadd.xlane.f32.xlu0 %v328_v22  ;;  %332 = vadd.xlane.f32.xlu1 %v331_v23 }
  0x2b   : > { %335 = vadd.xlane.f32.xlu0 %v334_v26  ;;  %338 = vadd.xlane.f32.xlu1 %v337_v27 }
  0x2f   : > { %341 = vadd.xlane.f32.xlu0 %v340_v30  ;;  %344 = vadd.xlane.f32.xlu1 %v343_v31 }
  0x9c   : > { %v300_v32 = vpop.xlane.xlu0 %299  ;;  %v306_v33 = vpop.xlane.xlu1 %305 }
  0x9d   : > { %v347_v34 = vmul.f32 0.03125, %v300_v32  ;;  %v349_v35 = vmul.f32 0.03125, %v306_v33 }
  0x9f   : > { %v9989_v36 = vsub.f32 %v279_v0, %v347_v34  ;;  %v9991_v37 = vsub.f32 %v281_v1, %v349_v35 }
  0xa0   : > { %v303_v38 = vpop.xlane.xlu0 %302  ;;  %v309_v39 = vpop.xlane.xlu1 %308 }
  0xa1   : > { %v348_v40 = vmul.f32 0.03125, %v303_v38  ;;  %v350_v41 = vmul.f32 0.03125, %v309_v39  ;;  %v379_v42 = vmul.f32 %v9989_v36, %v9989_v36  ;;  %v381_v43 = vmul.f32 %v9991_v37, %v9991_v37 }
  0xa3   : > { %v9997_v44 = vsub.f32 %v280_v2, %v348_v40  ;;  %v9999_v45 = vsub.f32 %v282_v5, %v350_v41  ;;  %v395_v46 = vsel %vm297_vm0, %v379_v42, 0.0  ;;  %v401_v49 = vsel %vm297_vm0, %v381_v43, 0.0 }
  0xa4   : > { %396 = vadd.xlane.f32.xlu0 %v395_v46  ;;  %v312_v47 = vpop.xlane.xlu0 %311  ;;  %v315_v48 = vpop.xlane.xlu1 %314 }
  0xa5   : > { %v351_v50 = vmul.f32 0.03125, %v312_v47  ;;  %v352_v51 = vmul.f32 0.03125, %v315_v48  ;;  %v380_v52 = vmul.f32 %v9997_v44, %v9997_v44  ;;  %v382_v53 = vmul.f32 %v9999_v45, %v9999_v45 }
  0xa7   : > { %v10007_v54 = vsub.f32 %v283_v8, %v351_v50  ;;  %v10009_v55 = vsub.f32 %v284_v9, %v352_v51  ;;  %v398_v56 = vsel %vm297_vm0, %v380_v52, 0.0  ;;  %v404_v59 = vsel %vm297_vm0, %v382_v53, 0.0  ;;  %v553_v53 = vld [vmem:[%s14382_s3 + $0x10] sm:$0xff] }
  0xa8   : > { %402 = vadd.xlane.f32.xlu0 %v401_v49  ;;  %399 = vadd.xlane.f32.xlu1 %v398_v56  ;;  %v318_v57 = vpop.xlane.xlu0 %317  ;;  %v321_v58 = vpop.xlane.xlu1 %320  ;;  %v552_v56 = vld [vmem:[%s14382_s3 + $0x8] sm:$0xff] }
  0xa9   : > { %v353_v60 = vmul.f32 0.03125, %v318_v57  ;;  %v354_v61 = vmul.f32 0.03125, %v321_v58  ;;  %v383_v62 = vmul.f32 %v10007_v54, %v10007_v54  ;;  %v384_v63 = vmul.f32 %v10009_v55, %v10009_v55  ;;  %v551_v57 = vld [vmem:[%s14382_s3] sm:$0xff] }
  0xab   : > { %v10018_v0 = vsub.f32 %v9940_v12, %v353_v60  ;;  %v10021_v1 = vsub.f32 %v9943_v13, %v354_v61  ;;  %v407_v2 = vsel %vm297_vm0, %v383_v62, 0.0  ;;  %v410_v5 = vsel %vm297_vm0, %v384_v63, 0.0 }
  0xac   : > { %405 = vadd.xlane.f32.xlu1 %v404_v59  ;;  %408 = vadd.xlane.f32.xlu0 %v407_v2  ;;  %v324_v3 = vpop.xlane.xlu0 %323  ;;  %v327_v4 = vpop.xlane.xlu1 %326 }
  0xad   : > { %v355_v6 = vmul.f32 0.03125, %v324_v3  ;;  %v356_v7 = vmul.f32 0.03125, %v327_v4  ;;  %v385_v8 = vmul.f32 %v10018_v0, %v10018_v0  ;;  %v386_v9 = vmul.f32 %v10021_v1, %v10021_v1 }
  0xaf   : > { %v10030_v10 = vsub.f32 %v9950_v16, %v355_v6  ;;  %v10033_v11 = vsub.f32 %v9953_v17, %v356_v7  ;;  %v413_v12 = vsel %vm297_vm0, %v385_v8, 0.0  ;;  %v416_v15 = vsel %vm297_vm0, %v386_v9, 0.0 }
  0xb0   : > { %411 = vadd.xlane.f32.xlu1 %v410_v5  ;;  %414 = vadd.xlane.f32.xlu0 %v413_v12  ;;  %v330_v13 = vpop.xlane.xlu0 %329  ;;  %v333_v14 = vpop.xlane.xlu1 %332 }
  0xb1   : > { %v357_v18 = vmul.f32 0.03125, %v330_v13  ;;  %v358_v19 = vmul.f32 0.03125, %v333_v14  ;;  %v387_v22 = vmul.f32 %v10030_v10, %v10030_v10  ;;  %v388_v16 = vmul.f32 %v10033_v11, %v10033_v11 }
  0xb3   : > { %v10042_v23 = vsub.f32 %v9960_v20, %v357_v18  ;;  %v10045_v17 = vsub.f32 %v9963_v21, %v358_v19  ;;  %v419_v26 = vsel %vm297_vm0, %v387_v22, 0.0  ;;  %v422_v31 = vsel %vm297_vm0, %v388_v16, 0.0 }
  0xb4   : > { %417 = vadd.xlane.f32.xlu1 %v416_v15  ;;  %420 = vadd.xlane.f32.xlu0 %v419_v26  ;;  %v336_v27 = vpop.xlane.xlu0 %335  ;;  %v339_v30 = vpop.xlane.xlu1 %338 }
  0xb5   : > { %v359_v32 = vmul.f32 0.03125, %v336_v27  ;;  %v360_v33 = vmul.f32 0.03125, %v339_v30  ;;  %v389_v34 = vmul.f32 %v10042_v23, %v10042_v23  ;;  %v390_v20 = vmul.f32 %v10045_v17, %v10045_v17 }
  0xb7   : > { %v10054_v35 = vsub.f32 %v9970_v24, %v359_v32  ;;  %v10057_v21 = vsub.f32 %v9973_v25, %v360_v33  ;;  %v425_v38 = vsel %vm297_vm0, %v389_v34, 0.0  ;;  %v428_v41 = vsel %vm297_vm0, %v390_v20, 0.0  ;;  %v10094_v32 = vld [vmem:[%s14380_s1] ss:$0 sm:$0xff] }
  0xb8   : > { %423 = vadd.xlane.f32.xlu1 %v422_v31  ;;  %426 = vadd.xlane.f32.xlu0 %v425_v38  ;;  %v342_v39 = vpop.xlane.xlu0 %341  ;;  %v345_v40 = vpop.xlane.xlu1 %344 }
  0xb9   : > { %v361_v42 = vmul.f32 0.03125, %v342_v39  ;;  %v362_v43 = vmul.f32 0.03125, %v345_v40  ;;  %v391_v46 = vmul.f32 %v10054_v35, %v10054_v35  ;;  %v392_v24 = vmul.f32 %v10057_v21, %v10057_v21  ;;  %v10100_v40 = vld [vmem:[%s14381_s2] ss:$0 sm:$0xff] }
  0xbb   : > { %v10066_v47 = vsub.f32 %v9980_v28, %v361_v42  ;;  %v10069_v25 = vsub.f32 %v9983_v29, %v362_v43  ;;  %v431_v48 = vsel %vm297_vm0, %v391_v46, 0.0  ;;  %v434_v49 = vsel %vm297_vm0, %v392_v24, 0.0  ;;  %v554_v29 = vld [vmem:[%s14382_s3 + $0x18] sm:$0xff] }
  0xbc   : > { %429 = vadd.xlane.f32.xlu1 %v428_v41  ;;  %432 = vadd.xlane.f32.xlu0 %v431_v48 }
  0xbd   : > { %v393_v50 = vmul.f32 %v10066_v47, %v10066_v47  ;;  %v394_v51 = vmul.f32 %v10069_v25, %v10069_v25  ;;  %8181 = vmatprep.subr.mxu0 %v554_v29 }
  0xbe   : > { %8182 = vmatpush3.msra.mxu0 %v554_v29 }
  0xbf   : > { %v437_v52 = vsel %vm297_vm0, %v393_v50, 0.0  ;;  %v440_v28 = vsel %vm297_vm0, %v394_v51, 0.0  ;;  %8183 = vmatprep.subr.mxu0 %v553_v53 }
  0xc0   : > { %435 = vadd.xlane.f32.xlu1 %v434_v49  ;;  %438 = vadd.xlane.f32.xlu0 %v437_v52 }
  0xc1   : > { %8184 = vmatpush3.msra.mxu0 %v553_v53 }
  0xc2   : > { %8185 = vmatprep.subr.mxu0 %v552_v56 }
  0xc3   : > { %8186 = vmatpush3.msra.mxu0 %v552_v56 }
  0xc4   : > { %441 = vadd.xlane.f32.xlu1 %v440_v28  ;;  %8187 = vmatprep.subr.mxu0 %v551_v57 }
  0xc5   : > { %8188 = vmatpush3.msra.mxu0 %v551_v57 }
 0x12d   : > { %v397_v58 = vpop.xlane.xlu0 %396 }
 0x12e   : > { %v443_v59 = vmul.f32 0.03125, %v397_v58 }
 0x130   : > { %v459_v60 = vadd.f32 1e-05, %v443_v59 }
 0x131   : > { %v400_v61 = vpop.xlane.xlu1 %399  ;;  %v403_v62 = vpop.xlane.xlu0 %402 }
 0x132   : > { %9227 = vrsqrt.f32 %v459_v60  ;;  %v444_v63 = vmul.f32 0.03125, %v400_v61  ;;  %v445_v2 = vmul.f32 0.03125, %v403_v62 }
 0x134   : > { %v460_v3 = vadd.f32 1e-05, %v444_v63  ;;  %v461_v4 = vadd.f32 1e-05, %v445_v2 }
 0x135   : > { %v406_v5 = vpop.xlane.xlu1 %405  ;;  %v409_v6 = vpop.xlane.xlu0 %408 }
 0x136   : > { %9229 = vrsqrt.f32 %v460_v3  ;;  %v446_v7 = vmul.f32 0.03125, %v406_v5  ;;  %v447_v8 = vmul.f32 0.03125, %v409_v6 }
 0x137   : > { %9231 = vrsqrt.f32 %v461_v4 }
 0x138   : > { %v462_v9 = vadd.f32 1e-05, %v446_v7  ;;  %v463_v12 = vadd.f32 1e-05, %v447_v8 }
 0x139   : > { %v412_v13 = vpop.xlane.xlu1 %411  ;;  %v415_v14 = vpop.xlane.xlu0 %414 }
 0x13a   : > { %9233 = vrsqrt.f32 %v462_v9  ;;  %v448_v15 = vmul.f32 0.03125, %v412_v13  ;;  %v449_v18 = vmul.f32 0.03125, %v415_v14 }
 0x13b   : > { %9235 = vrsqrt.f32 %v463_v12 }
 0x13c   : > { %v464_v19 = vadd.f32 1e-05, %v448_v15  ;;  %v465_v22 = vadd.f32 1e-05, %v449_v18 }
 0x13d   : > { %v418_v16 = vpop.xlane.xlu1 %417  ;;  %v421_v26 = vpop.xlane.xlu0 %420 }
 0x13e   : > { %9237 = vrsqrt.f32 %v464_v19  ;;  %v450_v27 = vmul.f32 0.03125, %v418_v16  ;;  %v451_v30 = vmul.f32 0.03125, %v421_v26 }
 0x13f   : > { %v9228_v31 = vpop.eup %9227  ;;  %9239 = vrsqrt.f32 %v465_v22 }
 0x140   : > { %v466_v33 = vadd.f32 1e-05, %v450_v27  ;;  %v467_v34 = vadd.f32 1e-05, %v451_v30  ;;  %v491_v20 = vmul.f32 %v9228_v31, %v9989_v36 }
 0x141   : > { %v424_v38 = vpop.xlane.xlu1 %423  ;;  %v427_v39 = vpop.xlane.xlu0 %426 }
 0x142   : > { %9241 = vrsqrt.f32 %v466_v33  ;;  %v452_v41 = vmul.f32 0.03125, %v424_v38  ;;  %v453_v42 = vmul.f32 0.03125, %v427_v39  ;;  %v513_v43 = vmul.f32 %v10094_v32, %v491_v20 }
 0x143   : > { %v9230_v46 = vpop.eup %9229  ;;  %9243 = vrsqrt.f32 %v467_v34 }
 0x144   : > { %v9232_v24 = vpop.eup %9231  ;;  %v468_v48 = vadd.f32 1e-05, %v452_v41  ;;  %v469_v49 = vadd.f32 1e-05, %v453_v42  ;;  %v535_v50 = vadd.f32 %v10100_v40, %v513_v43  ;;  %v492_v36 = vmul.f32 %v9230_v46, %v9997_v44 }
 0x145   : > { %v430_v51 = vpop.xlane.xlu1 %429  ;;  %v433_v52 = vpop.xlane.xlu0 %432  ;;  %v493_v28 = vmul.f32 %v9232_v24, %v9991_v37 }
 0x146   : > { %9245 = vrsqrt.f32 %v468_v48  ;;  %v454_v29 = vmul.f32 0.03125, %v430_v51  ;;  %v455_v53 = vmul.f32 0.03125, %v433_v52  ;;  %8189 = vmatprep.mubr.msk.f32.mxu0 %vm297_vm0, %v535_v50  ;;  %v514_v56 = vmul.f32 %v10094_v32, %v492_v36 }
 0x147   : > { %v9234_v57 = vpop.eup %9233  ;;  %9247 = vrsqrt.f32 %v469_v49  ;;  %v515_v58 = vmul.f32 %v10094_v32, %v493_v28 }
 0x148   : > { %v9236_v59 = vpop.eup %9235  ;;  %v470_v60 = vadd.f32 1e-05, %v454_v29  ;;  %v471_v61 = vadd.f32 1e-05, %v455_v53  ;;  %v536_v44 = vadd.f32 %v10100_v40, %v514_v56  ;;  %v494_v62 = vmul.f32 %v9234_v57, %v9999_v45 }
 0x149   : > { %v436_v63 = vpop.xlane.xlu1 %435  ;;  %v439_v37 = vpop.xlane.xlu0 %438  ;;  %v537_v2 = vadd.f32 %v10100_v40, %v515_v58  ;;  %v495_v3 = vmul.f32 %v9236_v59, %v10007_v54 }
 0x14a   : > { %9249 = vrsqrt.f32 %v470_v60  ;;  %v456_v4 = vmul.f32 0.03125, %v436_v63  ;;  %v457_v5 = vmul.f32 0.03125, %v439_v37  ;;  %8190 = vmatmul.mubr.msk.f32.vlgmr.msra.gmra.mxu0 %vm297_vm0, %v536_v44  ;;  %v516_v6 = vmul.f32 %v10094_v32, %v494_v62 }
 0x14b   : > { %v9238_v7 = vpop.eup %9237  ;;  %9251 = vrsqrt.f32 %v471_v61  ;;  %8192 = vmatprep.mubr.msk.f32.mxu0 %vm297_vm0, %v537_v2  ;;  %v517_v8 = vmul.f32 %v10094_v32, %v495_v3 }
 0x14c   : > { %v9240_v45 = vpop.eup %9239  ;;  %v472_v9 = vadd.f32 1e-05, %v456_v4  ;;  %v473_v12 = vadd.f32 1e-05, %v457_v5  ;;  %v538_v13 = vadd.f32 %v10100_v40, %v516_v6  ;;  %v496_v54 = vmul.f32 %v9238_v7, %v10009_v55 }
 0x14d   : > { %v442_v14 = vpop.xlane.xlu1 %441  ;;  %v539_v15 = vadd.f32 %v10100_v40, %v517_v8  ;;  %v497_v18 = vmul.f32 %v9240_v45, %v10018_v0 }
 0x14e   : > { %9253 = vrsqrt.f32 %v472_v9  ;;  %v458_v19 = vmul.f32 0.03125, %v442_v14  ;;  %8193 = vmatmul.mubr.msk.f32.gmra.mxu0 %vm297_vm0, %v538_v13  ;;  %v518_v22 = vmul.f32 %v10094_v32, %v496_v54 }
 0x14f   : > { %v9242_v16 = vpop.eup %9241  ;;  %9255 = vrsqrt.f32 %v473_v12  ;;  %8195 = vmatprep.mubr.msk.f32.mxu0 %vm297_vm0, %v539_v15  ;;  %v519_v26 = vmul.f32 %v10094_v32, %v497_v18 }
 0x150   : > { %v9244_v27 = vpop.eup %9243  ;;  %v474_v30 = vadd.f32 1e-05, %v458_v19  ;;  %v540_v55 = vadd.f32 %v10100_v40, %v518_v22  ;;  %v498_v31 = vmul.f32 %v9242_v16, %v10021_v1 }
 0x151   : > { %v541_v0 = vadd.f32 %v10100_v40, %v519_v26  ;;  %v499_v33 = vmul.f32 %v9244_v27, %v10030_v10 }
 0x152   : > { %9257 = vrsqrt.f32 %v474_v30  ;;  %8196 = vmatmul.mubr.msk.f32.gmra.mxu0 %vm297_vm0, %v540_v55  ;;  %v520_v34 = vmul.f32 %v10094_v32, %v498_v31 }
 0x153   : > { %v9246_v20 = vpop.eup %9245  ;;  %8198 = vmatprep.mubr.msk.f32.mxu0 %vm297_vm0, %v541_v0  ;;  %v521_v38 = vmul.f32 %v10094_v32, %v499_v33 }
 0x154   : > { %v9248_v39 = vpop.eup %9247  ;;  %v542_v41 = vadd.f32 %v10100_v40, %v520_v34  ;;  %v500_v42 = vmul.f32 %v9246_v20, %v10033_v11 }
 0x155   : > { %v543_v1 = vadd.f32 %v10100_v40, %v521_v38  ;;  %v501_v43 = vmul.f32 %v9248_v39, %v10042_v23 }
 0x156   : > { %8199 = vmatmul.mubr.msk.f32.gmra.mxu0 %vm297_vm0, %v542_v41  ;;  %v522_v10 = vmul.f32 %v10094_v32, %v500_v42 }
 0x157   : > { %v9250_v46 = vpop.eup %9249  ;;  %8201 = vmatprep.mubr.msk.f32.mxu0 %vm297_vm0, %v543_v1  ;;  %v523_v24 = vmul.f32 %v10094_v32, %v501_v43 }
 0x158   : > { %v9252_v48 = vpop.eup %9251  ;;  %v544_v49 = vadd.f32 %v10100_v40, %v522_v10  ;;  %v502_v50 = vmul.f32 %v9250_v46, %v10045_v17 }
 0x159   : > { %v545_v11 = vadd.f32 %v10100_v40, %v523_v24  ;;  %v503_v36 = vmul.f32 %v9252_v48, %v10054_v35 }
 0x15a   : > { %8202 = vmatmul.mubr.msk.f32.gmra.mxu0 %vm297_vm0, %v544_v49  ;;  %v524_v23 = vmul.f32 %v10094_v32, %v502_v50 }
 0x15b   : > { %v9254_v51 = vpop.eup %9253  ;;  %8204 = vmatprep.mubr.msk.f32.mxu0 %vm297_vm0, %v545_v11  ;;  %v525_v52 = vmul.f32 %v10094_v32, %v503_v36 }
 0x15c   : > { %v9256_v28 = vpop.eup %9255  ;;  %v546_v29 = vadd.f32 %v10100_v40, %v524_v23  ;;  %v504_v53 = vmul.f32 %v9254_v51, %v10057_v21 }
 0x15d   : > { %v547_v17 = vadd.f32 %v10100_v40, %v525_v52  ;;  %v505_v56 = vmul.f32 %v9256_v28, %v10066_v47 }
 0x15e   : > { %8205 = vmatmul.mubr.msk.f32.gmra.mxu0 %vm297_vm0, %v546_v29  ;;  %v526_v35 = vmul.f32 %v10094_v32, %v504_v53 }
 0x15f   : > { %v9258_v57 = vpop.eup %9257  ;;  %8207 = vmatprep.mubr.msk.f32.mxu0 %vm297_vm0, %v547_v17  ;;  %v527_v58 = vmul.f32 %v10094_v32, %v505_v56 }
 0x160   : > { %v548_v59 = vadd.f32 %v10100_v40, %v526_v35  ;;  %v506_v60 = vmul.f32 %v9258_v57, %v10069_v25 }
 0x161   : > { %v549_v61 = vadd.f32 %v10100_v40, %v527_v58 }
 0x162   : > { %8208 = vmatmul.mubr.msk.f32.gmra.mxu0 %vm297_vm0, %v548_v59  ;;  %v528_v21 = vmul.f32 %v10094_v32, %v506_v60 }
 0x163   : > { %8210 = vmatprep.mubr.msk.f32.mxu0 %vm297_vm0, %v549_v61 }
 0x164   : > { %v550_v47 = vadd.f32 %v10100_v40, %v528_v21 }
 0x166   : > { %8211 = vmatmul.mubr.msk.f32.gmra.mxu0 %vm297_vm0, %v550_v47 }
 0x20a   : > { %v8191_v44 = vpop.f32.mrf.mxu0 }
 0x20b   : > { %750 = vst.msk [vmem:[#allocation2 + $0x8] sm:$0xff] %vm748_vm1, %v8191_v44 }
 0x20c   : > { %v669_v62 = vpop.f32.mrf.mxu0 }
 0x20d   : > { %749 = vst.msk [vmem:[#allocation2] sm:$0xff] %vm748_vm1, %v669_v62 }
 0x20e   : > { %v8194_v25 = vpop.f32.mrf.mxu0 }
 0x20f   : > { %752 = vst.msk [vmem:[#allocation2 + $0x18] sm:$0xff] %vm748_vm1, %v8194_v25 }
 0x210   : > { %v679_v63 = vpop.f32.mrf.mxu0 }
 0x211   : > { %751 = vst.msk [vmem:[#allocation2 + $0x10] sm:$0xff] %vm748_vm1, %v679_v63 }
 0x212   : > { %v8197_v32 = vpop.f32.mrf.mxu0  ;;  %v10236_v0 = vld [vmem:[#allocation2 + $0x8] sm:$0xff] }
 0x213   : > { %754 = vst.msk [vmem:[#allocation2 + $0x28] sm:$0xff] %vm748_vm1, %v8197_v32  ;;  %v10333_v59 = vmul.f32 0.5, %v10236_v0 }
 0x214   : > { %v689_v37 = vpop.f32.mrf.mxu0  ;;  %v10170_v40 = vld [vmem:[#allocation2] sm:$0xff] }
 0x215   : > { %753 = vst.msk [vmem:[#allocation2 + $0x20] sm:$0xff] %vm748_vm1, %v689_v37  ;;  %v10174_v2 = vmul.f32 0.5, %v10170_v40 }
 0x216   : > { %v8200_v3 = vpop.f32.mrf.mxu0  ;;  %v10228_v55 = vld [vmem:[#allocation2 + $0x18] sm:$0xff] }
 0x217   : > { %756 = vst.msk [vmem:[#allocation2 + $0x38] sm:$0xff] %vm748_vm1, %v8200_v3  ;;  %8245 = vmatprep.mubr.msk.f32.mxu1 %vm866_vm2, %v10174_v2  ;;  %v10345_v47 = vmul.f32 0.5, %v10228_v55 }
 0x218   : > { %v699_v4 = vpop.f32.mrf.mxu0  ;;  %v10245_v34 = vld [vmem:[#allocation2 + $0x10] sm:$0xff] }
 0x219   : > { %755 = vst.msk [vmem:[#allocation2 + $0x30] sm:$0xff] %vm748_vm1, %v699_v4  ;;  %v10338_v21 = vmul.f32 0.5, %v10245_v34 }
 0x21a   : > { %v8203_v5 = vpop.f32.mrf.mxu0  ;;  %v10220_v27 = vld [vmem:[#allocation2 + $0x28] sm:$0xff] }
 0x21b   : > { %758 = vst.msk [vmem:[#allocation2 + $0x48] sm:$0xff] %vm748_vm1, %v8203_v5  ;;  %v10357_v63 = vmul.f32 0.5, %v10220_v27 }
 0x21c   : > { %v709_v6 = vpop.f32.mrf.mxu0  ;;  %v10240_v33 = vld [vmem:[#allocation2 + $0x20] sm:$0xff] }
 0x21d   : > { %757 = vst.msk [vmem:[#allocation2 + $0x40] sm:$0xff] %vm748_vm1, %v709_v6  ;;  %v10350_v62 = vmul.f32 0.5, %v10240_v33 }
 0x21e   : > { %v8206_v7 = vpop.f32.mrf.mxu0  ;;  %v10212_v16 = vld [vmem:[#allocation2 + $0x38] sm:$0xff] }
 0x21f   : > { %760 = vst.msk [vmem:[#allocation2 + $0x58] sm:$0xff] %vm748_vm1, %v8206_v7  ;;  %v10367_v3 = vmul.f32 0.5, %v10212_v16 }
 0x220   : > { %v719_v8 = vpop.f32.mrf.mxu0  ;;  %v10232_v31 = vld [vmem:[#allocation2 + $0x30] sm:$0xff] }
 0x221   : > { %759 = vst.msk [vmem:[#allocation2 + $0x50] sm:$0xff] %vm748_vm1, %v719_v8  ;;  %v10360_v37 = vmul.f32 0.5, %v10232_v31 }
 0x222   : > { %v8209_v45 = vpop.f32.mrf.mxu0  ;;  %v10204_v19 = vld [vmem:[#allocation2 + $0x48] sm:$0xff] }
 0x223   : > { %762 = vst.msk [vmem:[#allocation2 + $0x68] sm:$0xff] %vm748_vm1, %v8209_v45  ;;  %v10377_v6 = vmul.f32 0.5, %v10204_v19 }
 0x224   : > { %v729_v9 = vpop.f32.mrf.mxu0  ;;  %v10224_v30 = vld [vmem:[#allocation2 + $0x40] sm:$0xff] }
 0x225   : > { %761 = vst.msk [vmem:[#allocation2 + $0x60] sm:$0xff] %vm748_vm1, %v729_v9  ;;  %v10370_v5 = vmul.f32 0.5, %v10224_v30 }
 0x226   : > { %v8212_v12 = vpop.f32.mrf.mxu0  ;;  %v10196_v15 = vld [vmem:[#allocation2 + $0x58] sm:$0xff] }
 0x227   : > { %764 = vst.msk [vmem:[#allocation2 + $0x78] sm:$0xff] %vm748_vm1, %v8212_v12  ;;  %v10387_v45 = vmul.f32 0.5, %v10196_v15 }
 0x228   : > { %v739_v13 = vpop.f32.mrf.mxu0  ;;  %v10216_v26 = vld [vmem:[#allocation2 + $0x50] sm:$0xff] }
 0x229   : > { %763 = vst.msk [vmem:[#allocation2 + $0x70] sm:$0xff] %vm748_vm1, %v739_v13  ;;  %v10380_v7 = vmul.f32 0.5, %v10216_v26 }
 0x22a   : > { %v10200_v18 = vld [vmem:[#allocation2 + $0x68] sm:$0xff] }
 0x22b   : > { %v10398_v12 = vmul.f32 0.5, %v10200_v18 }
 0x22c   : > { %v10208_v22 = vld [vmem:[#allocation2 + $0x60] sm:$0xff] }
 0x22d   : > { %v10390_v9 = vmul.f32 0.5, %v10208_v22 }
 0x22e   : > { %v10188_v54 = vld [vmem:[#allocation2 + $0x78] sm:$0xff] }
 0x22f   : > { %864 = vrot.lane.b32.xlu0 %v10188_v54, %s9834_s17 }
 0x230   : > { %v10192_v14 = vld [vmem:[#allocation2 + $0x70] sm:$0xff] }
 0x231   : > { %862 = vrot.lane.b32.xlu1 %v10192_v14, %s9834_s17 }
 0x233   : > { %856 = vrot.lane.b32.xlu0 %v10196_v15, %s9834_s17 }
 0x235   : > { %860 = vrot.lane.b32.xlu1 %v10200_v18, %s9834_s17 }
 0x237   : > { %852 = vrot.lane.b32.xlu0 %v10204_v19, %s9834_s17 }
 0x239   : > { %858 = vrot.lane.b32.xlu1 %v10208_v22, %s9834_s17 }
 0x23b   : > { %848 = vrot.lane.b32.xlu0 %v10212_v16, %s9834_s17 }
 0x23d   : > { %854 = vrot.lane.b32.xlu1 %v10216_v26, %s9834_s17 }
 0x23f   : > { %844 = vrot.lane.b32.xlu0 %v10220_v27, %s9834_s17 }
 0x241   : > { %850 = vrot.lane.b32.xlu1 %v10224_v30, %s9834_s17 }
 0x243   : > { %840 = vrot.lane.b32.xlu0 %v10228_v55, %s9834_s17 }
 0x245   : > { %846 = vrot.lane.b32.xlu1 %v10232_v31, %s9834_s17 }
 0x247   : > { %836 = vrot.lane.b32.xlu0 %v10236_v0, %s9834_s17 }
 0x249   : > { %842 = vrot.lane.b32.xlu1 %v10240_v33, %s9834_s17 }
 0x24b   : > { %1250 = vrot.lane.b32.xlu0 %v10188_v54, %s9835_s18 }
 0x24d   : > { %838 = vrot.lane.b32.xlu1 %v10245_v34, %s9834_s17 }
 0x24f   : > { %1246 = vrot.lane.b32.xlu0 %v10200_v18, %s9835_s18 }
 0x251   : > { %834 = vrot.lane.b32.xlu1 %v10170_v40, %s9834_s17  ;;  %s9852_s17 = smov 104  }
 0x253   : > { %1238 = vrot.lane.b32.xlu0 %v10204_v19, %s9835_s18 }
 0x255   : > { %1244 = vrot.lane.b32.xlu1 %v10208_v22, %s9835_s18 }
 0x257   : > { %1234 = vrot.lane.b32.xlu0 %v10212_v16, %s9835_s18 }
 0x259   : > { %1242 = vrot.lane.b32.xlu1 %v10196_v15, %s9835_s18 }
 0x25b   : > { %1230 = vrot.lane.b32.xlu0 %v10220_v27, %s9835_s18 }
 0x25d   : > { %1240 = vrot.lane.b32.xlu1 %v10216_v26, %s9835_s18 }
 0x25f   : > { %1226 = vrot.lane.b32.xlu0 %v10228_v55, %s9835_s18 }
 0x261   : > { %1236 = vrot.lane.b32.xlu1 %v10224_v30, %s9835_s18 }
 0x263   : > { %1222 = vrot.lane.b32.xlu0 %v10236_v0, %s9835_s18 }
 0x265   : > { %1232 = vrot.lane.b32.xlu1 %v10232_v31, %s9835_s18 }
 0x267   : > { %1603 = vrot.lane.b32.xlu0 %v10188_v54, %s9836_s19 }
 0x269   : > { %1228 = vrot.lane.b32.xlu1 %v10240_v33, %s9835_s18 }
 0x26b   : > { %1599 = vrot.lane.b32.xlu0 %v10200_v18, %s9836_s19 }
 0x26d   : > { %1224 = vrot.lane.b32.xlu1 %v10245_v34, %s9835_s18 }
 0x26f   : > { %1595 = vrot.lane.b32.xlu0 %v10196_v15, %s9836_s19 }
 0x271   : > { %1220 = vrot.lane.b32.xlu1 %v10170_v40, %s9835_s18 }
 0x273   : > { %1593 = vrot.lane.b32.xlu0 %v10216_v26, %s9836_s19 }
 0x275   : > { %1597 = vrot.lane.b32.xlu1 %v10208_v22, %s9836_s19 }
 0x277   : > { %1248 = vrot.lane.b32.xlu0 %v10192_v14, %s9835_s18  ;;  %s9853_s18 = smov 40  }
 0x279   : > { %1591 = vrot.lane.b32.xlu1 %v10204_v19, %s9836_s19 }
 0x27d   : > { %1601 = vrot.lane.b32.xlu1 %v10192_v14, %s9836_s19 }
 0x281   : > { %1587 = vrot.lane.b32.xlu1 %v10212_v16, %s9836_s19 }
 0x285   : > { %1585 = vrot.lane.b32.xlu1 %v10232_v31, %s9836_s19 }
 0x289   : > { %1583 = vrot.lane.b32.xlu1 %v10220_v27, %s9836_s19 }
 0x28d   : > { %1581 = vrot.lane.b32.xlu1 %v10240_v33, %s9836_s19 }
 0x2a1   : > { %v865_v20 = vpop.permute.xlu0 %864 }
 0x2a2   : > { %8213 = vmatprep.subr.msk.mxu1 %vm866_vm2, %v865_v20 }
 0x2a3   : > { %8214 = vmatpush3.xpose.msk.msra.mxu1 %vm866_vm2, %v865_v20  ;;  %v863_v38 = vpop.permute.xlu1 %862  ;;  %v10402_v20 = vmul.f32 0.5, %v10192_v14 }
 0x2a4   : > { %8215 = vmatprep.subr.msk.mxu1 %vm866_vm2, %v863_v38 }
 0x2a5   : > { %v857_v39 = vpop.permute.xlu0 %856 }
 0x2a7   : > { %8216 = vmatpush3.xpose.msk.msra.mxu1 %vm866_vm2, %v863_v38  ;;  %v861_v41 = vpop.permute.xlu1 %860  ;;  %v10410_v38 = vmul.f32 0.5, %v10188_v54 }
 0x2a8   : > { %8217 = vmatprep.subr.msk.mxu1 %vm866_vm2, %v861_v41 }
 0x2a9   : > { %v853_v42 = vpop.permute.xlu0 %852 }
 0x2ab   : > { %8218 = vmatpush3.xpose.msk.msra.mxu1 %vm866_vm2, %v861_v41  ;;  %v859_v1 = vpop.permute.xlu1 %858 }
 0x2ac   : > { %8219 = vmatprep.subr.msk.mxu1 %vm866_vm2, %v859_v1 }
 0x2ad   : > { %v849_v43 = vpop.permute.xlu0 %848 }
 0x2af   : > { %8220 = vmatpush3.xpose.msk.msra.mxu1 %vm866_vm2, %v859_v1  ;;  %v855_v46 = vpop.permute.xlu1 %854 }
 0x2b0   : > { %8221 = vmatprep.subr.msk.mxu1 %vm866_vm2, %v857_v39 }
 0x2b1   : > { %v845_v10 = vpop.permute.xlu0 %844 }
 0x2b3   : > { %8222 = vmatpush3.xpose.msk.msra.mxu1 %vm866_vm2, %v857_v39  ;;  %v851_v49 = vpop.permute.xlu1 %850 }
 0x2b4   : > { %8223 = vmatprep.subr.msk.mxu1 %vm866_vm2, %v855_v46 }
 0x2b5   : > { %v841_v24 = vpop.permute.xlu0 %840 }
 0x2b7   : > { %8224 = vmatpush3.xpose.msk.msra.mxu1 %vm866_vm2, %v855_v46  ;;  %v847_v36 = vpop.permute.xlu1 %846 }
 0x2b8   : > { %8225 = vmatprep.subr.msk.mxu1 %vm866_vm2, %v853_v42 }
 0x2b9   : > { %v837_v48 = vpop.permute.xlu0 %836 }
 0x2bb   : > { %8226 = vmatpush3.xpose.msk.msra.mxu1 %vm866_vm2, %v853_v42  ;;  %v843_v51 = vpop.permute.xlu1 %842  ;;  %v766_v42 = vlaneseq }
 0x2bc   : > { %8227 = vmatprep.subr.msk.mxu1 %vm866_vm2, %v851_v49 }
 0x2bd   : > { %v1251_v50 = vpop.permute.xlu0 %1250  ;;  %v10421_v1 = vand.u32 127, %v766_v42 }
 0x2be   : > { %8269 = vmatprep.subr.mxu0 %v1251_v50 }
 0x2bf   : > { %8228 = vmatpush3.xpose.msk.msra.mxu1 %vm866_vm2, %v851_v49  ;;  %8270 = vmatpush3.msra.mxu0 %v1251_v50  ;;  %v839_v29 = vpop.permute.xlu1 %838  ;;  %14543 = vst [vmem:[#allocation4_spill] sm:$0xff] %v10421_v1  ;;  %vm768_vm3 = vcmp.lt.s32.totalorder %v10421_v1, 8 }
 0x2c0   : > { %8229 = vmatprep.subr.msk.mxu1 %vm866_vm2, %v849_v43 }
 0x2c1   : > { %v1247_v11 = vpop.permute.xlu0 %1246 }
 0x2c3   : > { %8230 = vmatpush3.xpose.msk.msra.mxu1 %vm866_vm2, %v849_v43  ;;  %v835_v17 = vpop.permute.xlu1 %834 }
 0x2c4   : > { %8231 = vmatprep.subr.msk.mxu1 %vm866_vm2, %v847_v36 }
 0x2c5   : > { %v1239_v23 = vpop.permute.xlu0 %1238 }
 0x2c7   : > { %8232 = vmatpush3.xpose.msk.msra.mxu1 %vm866_vm2, %v847_v36  ;;  %v1245_v57 = vpop.permute.xlu1 %1244 }
 0x2c8   : > { %8233 = vmatprep.subr.msk.mxu1 %vm866_vm2, %v845_v10 }
 0x2c9   : > { %v10309_v52 = vpop.permute.xlu0 %1234 }
 0x2cb   : > { %8234 = vmatpush3.xpose.msk.msra.mxu1 %vm866_vm2, %v845_v10  ;;  %v1243_v60 = vpop.permute.xlu1 %1242 }
 0x2cc   : > { %8235 = vmatprep.subr.msk.mxu1 %vm866_vm2, %v843_v51 }
 0x2cd   : > { %v10313_v28 = vpop.permute.xlu0 %1230 }
 0x2cf   : > { %8236 = vmatpush3.xpose.msk.msra.mxu1 %vm866_vm2, %v843_v51  ;;  %v1241_v25 = vpop.permute.xlu1 %1240 }
 0x2d0   : > { %8237 = vmatprep.subr.msk.mxu1 %vm866_vm2, %v841_v24 }
 0x2d1   : > { %v10317_v53 = vpop.permute.xlu0 %1226 }
 0x2d3   : > { %8238 = vmatpush3.xpose.msk.msra.mxu1 %vm866_vm2, %v841_v24  ;;  %v1237_v4 = vpop.permute.xlu1 %1236 }
 0x2d4   : > { %8239 = vmatprep.subr.msk.mxu1 %vm866_vm2, %v839_v29 }
 0x2d5   : > { %v10321_v56 = vpop.permute.xlu0 %1222 }
 0x2d7   : > { %8240 = vmatpush3.xpose.msk.msra.mxu1 %vm866_vm2, %v839_v29  ;;  %v1233_v8 = vpop.permute.xlu1 %1232 }
 0x2d8   : > { %8241 = vmatprep.subr.msk.mxu1 %vm866_vm2, %v837_v48 }
 0x2d9   : > { %v10325_v35 = vpop.permute.xlu0 %1603 }
 0x2db   : > { %8242 = vmatpush3.xpose.msk.msra.mxu1 %vm866_vm2, %v837_v48  ;;  %v1229_v13 = vpop.permute.xlu1 %1228 }
 0x2dc   : > { %8243 = vmatprep.subr.msk.mxu1 %vm866_vm2, %v835_v17 }
 0x2dd   : > { %v10329_v58 = vpop.permute.xlu0 %1599 }
 0x2df   : > { %8244 = vmatpush3.xpose.msk.msra.mxu1 %vm866_vm2, %v835_v17  ;;  %v1225_v39 = vpop.permute.xlu1 %1224 }
 0x2e1   : > { %v10335_v61 = vpop.permute.xlu0 %1595 }
 0x2e2   : > { %8246 = vmatmul.mubr.msk.f32.vlgmr.msra.gmra.mxu1 %vm866_vm2, %v10333_v59 }
 0x2e3   : > { %8248 = vmatprep.mubr.msk.f32.mxu1 %vm866_vm2, %v10338_v21  ;;  %v1221_v41 = vpop.permute.xlu1 %1220 }
 0x2e5   : > { %v10347_v44 = vpop.permute.xlu0 %1593 }
 0x2e6   : > { %8249 = vmatmul.mubr.msk.f32.gmra.mxu1 %vm866_vm2, %v10345_v47 }
 0x2e7   : > { %8251 = vmatprep.mubr.msk.f32.mxu1 %vm866_vm2, %v10350_v62 }
 0x2e9   : > { %v1249_v32 = vpop.permute.xlu0 %1248 }
 0x2ea   : > { %8252 = vmatmul.mubr.msk.f32.gmra.mxu1 %vm866_vm2, %v10357_v63  ;;  %8271 = vmatprep.subr.mxu0 %v1249_v32 }
 0x2eb   : > { %8254 = vmatprep.mubr.msk.f32.mxu1 %vm866_vm2, %v10360_v37  ;;  %8272 = vmatpush3.msra.mxu0 %v1249_v32 }
 0x2ec   : > { %8273 = vmatprep.subr.mxu0 %v1247_v11 }
 0x2ed   : > { %8274 = vmatpush3.msra.mxu0 %v1247_v11 }
 0x2ee   : > { %8255 = vmatmul.mubr.msk.f32.gmra.mxu1 %vm866_vm2, %v10367_v3  ;;  %8275 = vmatprep.subr.mxu0 %v1245_v57 }
 0x2ef   : > { %8257 = vmatprep.mubr.msk.f32.mxu1 %vm866_vm2, %v10370_v5  ;;  %8276 = vmatpush3.msra.mxu0 %v1245_v57 }
 0x2f0   : > { %8277 = vmatprep.subr.mxu0 %v1243_v60 }
 0x2f1   : > { %8278 = vmatpush3.msra.mxu0 %v1243_v60 }
 0x2f2   : > { %8258 = vmatmul.mubr.msk.f32.gmra.mxu1 %vm866_vm2, %v10377_v6  ;;  %8279 = vmatprep.subr.mxu0 %v1241_v25 }
 0x2f3   : > { %8260 = vmatprep.mubr.msk.f32.mxu1 %vm866_vm2, %v10380_v7  ;;  %8280 = vmatpush3.msra.mxu0 %v1241_v25 }
 0x2f4   : > { %8281 = vmatprep.subr.mxu0 %v1239_v23 }
 0x2f5   : > { %8282 = vmatpush3.msra.mxu0 %v1239_v23 }
 0x2f6   : > { %8261 = vmatmul.mubr.msk.f32.gmra.mxu1 %vm866_vm2, %v10387_v45  ;;  %8283 = vmatprep.subr.mxu0 %v1237_v4 }
 0x2f7   : > { %8263 = vmatprep.mubr.msk.f32.mxu1 %vm866_vm2, %v10390_v9  ;;  %8284 = vmatpush3.msra.mxu0 %v1237_v4 }
 0x2f8   : > { %8285 = vmatprep.subr.mxu0 %v10309_v52 }
 0x2f9   : > { %8286 = vmatpush3.msra.mxu0 %v10309_v52 }
 0x2fa   : > { %8264 = vmatmul.mubr.msk.f32.gmra.mxu1 %vm866_vm2, %v10398_v12  ;;  %8287 = vmatprep.subr.mxu0 %v1233_v8 }
 0x2fb   : > { %8288 = vmatpush3.msra.mxu0 %v1233_v8  ;;  %8266 = vmatprep.mubr.msk.f32.mxu1 %vm866_vm2, %v10402_v20 }
 0x2fc   : > { %8289 = vmatprep.subr.mxu0 %v10313_v28 }
 0x2fd   : > { %8290 = vmatpush3.msra.mxu0 %v10313_v28 }
 0x2fe   : > { %8267 = vmatmul.mubr.msk.f32.gmra.mxu1 %vm866_vm2, %v10410_v38  ;;  %8291 = vmatprep.subr.mxu0 %v1229_v13 }
 0x2ff   : > { %8292 = vmatpush3.msra.mxu0 %v1229_v13 }
 0x300   : > { %8293 = vmatprep.subr.mxu0 %v10317_v53 }
 0x301   : > { %8294 = vmatpush3.msra.mxu0 %v10317_v53 }
 0x302   : > { %8295 = vmatprep.subr.mxu0 %v1225_v39 }
 0x303   : > { %8296 = vmatpush3.msra.mxu0 %v1225_v39 }
 0x304   : > { %8297 = vmatprep.subr.mxu0 %v10321_v56 }
 0x305   : > { %8298 = vmatpush3.msra.mxu0 %v10321_v56 }
 0x306   : > { %8299 = vmatprep.subr.mxu0 %v1221_v41 }
 0x307   : > { %8300 = vmatpush3.msra.mxu0 %v1221_v41 }
 0x308   : > { %8325 = vmatprep.subr.msk.mxu0 %vm866_vm2, %v10325_v35 }
 0x3a2   : > { %v8247_v43 = vpop.f32.mrf.mxu1 }
 0x3a3   : > { %v10426_v10 = vsel %vm768_vm3, %v8247_v43, -1e+30 }
 0x3a4   : > { %1110 = vmax.xlane.f32.xlu0 %v10426_v10  ;;  %v1013_v46 = vpop.f32.mrf.mxu1 }
 0x3a5   : > { %v10431_v24 = vsel %vm768_vm3, %v1013_v46, -1e+30 }
 0x3a6   : > { %1108 = vmax.xlane.f32.xlu1 %v10431_v24  ;;  %v8250_v48 = vpop.f32.mrf.mxu1 }
 0x3a7   : > { %v10436_v50 = vsel %vm768_vm3, %v8250_v48, -1e+30 }
 0x3a8   : > { %v1023_v49 = vpop.f32.mrf.mxu1 }
 0x3a9   : > { %v10480_v39 = vsel %vm768_vm3, %v1023_v49, -1e+30 }
 0x3aa   : > { %1114 = vmax.xlane.f32.xlu1 %v10436_v50  ;;  %v8253_v11 = vpop.f32.mrf.mxu1 }
 0x3ab   : > { %v10441_v23 = vsel %vm768_vm3, %v8253_v11, -1e+30  ;;  %v10517_v11 = vpop.permute.xlu1 %1597 }
 0x3ac   : > { %v1033_v36 = vpop.f32.mrf.mxu1 }
 0x3ad   : > { %v10446_v28 = vsel %vm768_vm3, %v1033_v36, -1e+30 }
 0x3ae   : > { %1118 = vmax.xlane.f32.xlu1 %v10441_v23  ;;  %v8256_v51 = vpop.f32.mrf.mxu1 }
 0x3af   : > { %v10451_v17 = vsel %vm768_vm3, %v8256_v51, -1e+30  ;;  %v10524_v36 = vpop.permute.xlu1 %1591 }
 0x3b0   : > { %v1043_v52 = vpop.f32.mrf.mxu1 }
 0x3b1   : > { %v10487_v41 = vsel %vm768_vm3, %v1043_v52, -1e+30 }
 0x3b2   : > { %1116 = vmax.xlane.f32.xlu1 %v10446_v28  ;;  %v8259_v29 = vpop.f32.mrf.mxu1 }
 0x3b3   : > { %v10456_v57 = vsel %vm768_vm3, %v8259_v29, -1e+30 }
 0x3b4   : > { %v1053_v53 = vpop.f32.mrf.mxu1 }
 0x3b5   : > { %v10463_v25 = vsel %vm768_vm3, %v1053_v53, -1e+30 }
 0x3b6   : > { %1122 = vmax.xlane.f32.xlu1 %v10451_v17  ;;  %v8262_v56 = vpop.f32.mrf.mxu1 }
 0x3b7   : > { %v10494_v42 = vsel %vm768_vm3, %v8262_v56, -1e+30 }
 0x3b8   : > { %v1063_v60 = vpop.f32.mrf.mxu1 }
 0x3b9   : > { %v10468_v4 = vsel %vm768_vm3, %v1063_v60, -1e+30 }
 0x3ba   : > { %1589 = vrot.lane.b32.xlu0 %v10224_v30, %s9836_s19  ;;  %1126 = vmax.xlane.f32.xlu1 %v10456_v57  ;;  %v8265_v32 = vpop.f32.mrf.mxu1 }
 0x3bb   : > { %v10501_v43 = vsel %vm768_vm3, %v8265_v32, -1e+30 }
 0x3bc   : > { %v1073_v8 = vpop.f32.mrf.mxu1 }
 0x3bd   : > { %v10473_v13 = vsel %vm768_vm3, %v1073_v8, -1e+30 }
 0x3be   : > { %1124 = vmax.xlane.f32.xlu1 %v10463_v25  ;;  %v8268_v46 = vpop.f32.mrf.mxu1 }
 0x3bf   : > { %v10506_v48 = vsel %vm768_vm3, %v8268_v46, -1e+30 }
 0x3c0   : > { %v1083_v49 = vpop.f32.mrf.mxu1 }
 0x3c2   : > { %1128 = vmax.xlane.f32.xlu1 %v10468_v4 }
 0x3c6   : > { %1132 = vmax.xlane.f32.xlu1 %v10473_v13 }
 0x3d7   : > { %1577 = vrot.lane.b32.xlu1 %v10245_v34, %s9836_s19 }
 0x3d9   : > { %1112 = vmax.xlane.f32.xlu0 %v10480_v39 }
 0x3db   : > { %1575 = vrot.lane.b32.xlu1 %v10236_v0, %s9836_s19 }
 0x3dd   : > { %1120 = vmax.xlane.f32.xlu0 %v10487_v41 }
 0x3df   : > { %1573 = vrot.lane.b32.xlu1 %v10170_v40, %s9836_s19 }
 0x3e1   : > { %1130 = vmax.xlane.f32.xlu0 %v10494_v42 }
 0x3e3   : > { %1525 = vrot.lane.b32.xlu1 %v10174_v2, %s9837_s20  ;;  %v10515_v2 = vsel %vm768_vm3, %v1083_v49, -1e+30 }
 0x3e5   : > { %1134 = vmax.xlane.f32.xlu0 %v10501_v43 }
 0x3e9   : > { %1138 = vmax.xlane.f32.xlu0 %v10506_v48 }
 0x3ff   : > { %1579 = vrot.lane.b32.xlu0 %v10228_v55, %s9836_s19  ;;  %s9854_s19 = smov 68  }
 0x403   : > { %1531 = vrot.lane.b32.xlu0 %v10345_v47, %s9837_s20  ;;  %v1602_v47 = vpop.permute.xlu1 %1601 }
 0x407   : > { %1535 = vrot.lane.b32.xlu0 %v10357_v63, %s9837_s20  ;;  %1136 = vmax.xlane.f32.xlu1 %v10515_v2  ;;  %v10534_v63 = vpop.permute.xlu1 %1587 }
 0x40b   : > { %1539 = vrot.lane.b32.xlu0 %v10367_v3, %s9837_s20  ;;  %v10540_v3 = vpop.permute.xlu1 %1585 }
 0x40f   : > { %1543 = vrot.lane.b32.xlu0 %v10377_v6, %s9837_s20 }
 0x413   : > { %1547 = vrot.lane.b32.xlu0 %v10387_v45, %s9837_s20 }
 0x417   : > { %1551 = vrot.lane.b32.xlu0 %v10398_v12, %s9837_s20 }
 0x418   : > { %1527 = vrot.lane.b32.xlu1 %v10333_v59, %s9837_s20  ;;  %v10550_v59 = vpop.permute.xlu1 %1583 }
 0x41b   : > { %1555 = vrot.lane.b32.xlu0 %v10410_v38, %s9837_s20 }
 0x41c   : > { %1529 = vrot.lane.b32.xlu1 %v10338_v21, %s9837_s20  ;;  %v10556_v21 = vpop.permute.xlu1 %1581 }
 0x41f   : > { %1968 = vrot.lane.b32.xlu0 %v10200_v18, %s9838_s26 }
 0x420   : > { %1533 = vrot.lane.b32.xlu1 %v10350_v62, %s9837_s20 }
 0x423   : > { %1964 = vrot.lane.b32.xlu0 %v10196_v15, %s9838_s26 }
 0x424   : > { %1537 = vrot.lane.b32.xlu1 %v10360_v37, %s9837_s20 }
 0x427   : > { %1962 = vrot.lane.b32.xlu0 %v10216_v26, %s9838_s26 }
 0x428   : > { %1541 = vrot.lane.b32.xlu1 %v10370_v5, %s9837_s20 }
 0x42b   : > { %1958 = vrot.lane.b32.xlu0 %v10224_v30, %s9838_s26 }
 0x42c   : > { %1545 = vrot.lane.b32.xlu1 %v10380_v7, %s9837_s20 }
 0x42d   : > { %v1111_v62 = vpop.xlane.xlu0 %1110 }
 0x42e   : > { %v1141_v6 = vsub.f32 %v10426_v10, %v1111_v62 }
 0x42f   : > { %v1109_v37 = vpop.xlane.xlu1 %1108  ;;  %1954 = vrot.lane.b32.xlu0 %v10232_v31, %s9838_s26 }
 0x430   : > { %v1140_v45 = vsub.f32 %v10431_v24, %v1109_v37  ;;  %1549 = vrot.lane.b32.xlu1 %v10390_v9, %s9837_s20  ;;  %v1158_v5 = vmul.f32 1.442695, %v1141_v6 }
 0x432   : > { %v1156_v12 = vmul.f32 1.442695, %v1140_v45 }
 0x433   : > { %1950 = vrot.lane.b32.xlu0 %v10240_v33, %s9838_s26 }
 0x434   : > { %9259 = vpow2.f32 %v1156_v12  ;;  %1553 = vrot.lane.b32.xlu1 %v10402_v20, %s9837_s20  ;;  %s9855_s20 = smov 100  }
 0x435   : > { %9261 = vpow2.f32 %v1158_v5 }
 0x437   : > { %1946 = vrot.lane.b32.xlu0 %v10245_v34, %s9838_s26 }
 0x438   : > { %1972 = vrot.lane.b32.xlu1 %v10188_v54, %s9838_s26 }
 0x43b   : > { %1942 = vrot.lane.b32.xlu0 %v10170_v40, %s9838_s26  ;;  %v1115_v40 = vpop.xlane.xlu1 %1114 }
 0x43c   : > { %1970 = vrot.lane.b32.xlu1 %v10192_v14, %s9838_s26 }
 0x43f   : > { %2388 = vrot.lane.b32.xlu0 %v10192_v14, %s9839_s27  ;;  %v1119_v14 = vpop.xlane.xlu1 %1118 }
 0x440   : > { %1966 = vrot.lane.b32.xlu1 %v10208_v22, %s9838_s26 }
 0x441   : > { %v10584_v7 = vpop.eup %9259 }
 0x442   : > { %14544 = vst [vmem:[#allocation5_spill] sm:$0xff] %v10584_v7  ;;  %v10586_v9 = vpop.eup %9261  ;;  %8301 = vmatprep.mubr.f32.mxu0 %v10584_v7  ;;  %v9771_v7 = vld [vmem:[#allocation2 + $0x68] sm:$0xff] }
 0x443   : > { %14545 = vst [vmem:[#allocation6_spill] sm:$0xff] %v10586_v9  ;;  %8302 = vmatmul.mubr.f32.vlgmr.msra.gmra.mxu0 %v10586_v9  ;;  %2386 = vrot.lane.b32.xlu0 %v10200_v18, %s9839_s27  ;;  %v9772_v9 = vld [vmem:[#allocation2 + $0x78] sm:$0xff] }
 0x444   : > { %8326 = vmatpush3.xpose.msk.msra.mxu0 %vm866_vm2, %v10325_v35  ;;  %1960 = vrot.lane.b32.xlu1 %v10204_v19, %s9838_s26 }
 0x445   : > { %8327 = vmatprep.subr.msk.mxu0 %vm866_vm2, %v1602_v47 }
 0x447   : > { %2382 = vrot.lane.b32.xlu0 %v10196_v15, %s9839_s27  ;;  %v1117_v15 = vpop.xlane.xlu1 %1116 }
 0x448   : > { %8328 = vmatpush3.xpose.msk.msra.mxu0 %vm866_vm2, %v1602_v47  ;;  %1956 = vrot.lane.b32.xlu1 %v10212_v16, %s9838_s26 }
 0x449   : > { %8329 = vmatprep.subr.msk.mxu0 %vm866_vm2, %v10329_v58 }
 0x44b   : > { %2378 = vrot.lane.b32.xlu0 %v10204_v19, %s9839_s27  ;;  %v1123_v18 = vpop.xlane.xlu1 %1122  ;;  %v1590_v19 = vpop.permute.xlu0 %1589 }
 0x44c   : > { %8330 = vmatpush3.xpose.msk.msra.mxu0 %vm866_vm2, %v10329_v58  ;;  %1952 = vrot.lane.b32.xlu1 %v10220_v27, %s9838_s26  ;;  %v1147_v20 = vsub.f32 %v10451_v17, %v1123_v18 }
 0x44d   : > { %8331 = vmatprep.subr.msk.mxu0 %vm866_vm2, %v10517_v11 }
 0x44f   : > { %2374 = vrot.lane.b32.xlu0 %v10212_v16, %s9839_s27  ;;  %v1127_v16 = vpop.xlane.xlu1 %1126 }
 0x450   : > { %8332 = vmatpush3.xpose.msk.msra.mxu0 %vm866_vm2, %v10517_v11  ;;  %1948 = vrot.lane.b32.xlu1 %v10228_v55, %s9838_s26 }
 0x451   : > { %8333 = vmatprep.subr.msk.mxu0 %vm866_vm2, %v10335_v61 }
 0x453   : > { %2370 = vrot.lane.b32.xlu0 %v10220_v27, %s9839_s27  ;;  %v1143_v27 = vsub.f32 %v10436_v50, %v1115_v40  ;;  %v1170_v50 = vmul.f32 1.442695, %v1147_v20 }
 0x454   : > { %8334 = vmatpush3.xpose.msk.msra.mxu0 %vm866_vm2, %v10335_v61  ;;  %1944 = vrot.lane.b32.xlu1 %v10236_v0, %s9838_s26  ;;  %s9856_s26 = smov 36  }
 0x455   : > { %8335 = vmatprep.subr.msk.mxu0 %vm866_vm2, %v10347_v44  ;;  %v1162_v34 = vmul.f32 1.442695, %v1143_v27 }
 0x457   : > { %2368 = vrot.lane.b32.xlu0 %v10240_v33, %s9839_s27 }
 0x458   : > { %8336 = vmatpush3.xpose.msk.msra.mxu0 %vm866_vm2, %v10347_v44  ;;  %2390 = vrot.lane.b32.xlu1 %v10188_v54, %s9839_s27  ;;  %v1144_v54 = vsub.f32 %v10446_v28, %v1117_v15 }
 0x459   : > { %8337 = vmatprep.subr.msk.mxu0 %vm866_vm2, %v10524_v36 }
 0x45a   : > { %v1164_v35 = vmul.f32 1.442695, %v1144_v54 }
 0x45b   : > { %2366 = vrot.lane.b32.xlu0 %v10228_v55, %s9839_s27  ;;  %v1125_v55 = vpop.xlane.xlu1 %1124 }
 0x45c   : > { %8338 = vmatpush3.xpose.msk.msra.mxu0 %vm866_vm2, %v10524_v36  ;;  %2384 = vrot.lane.b32.xlu1 %v10208_v22, %s9839_s27  ;;  %v1145_v22 = vsub.f32 %v10441_v23, %v1119_v14  ;;  %v1149_v23 = vsub.f32 %v10456_v57, %v1127_v16 }
 0x45d   : > { %8339 = vmatprep.subr.msk.mxu0 %vm866_vm2, %v1590_v19 }
 0x45e   : > { %v1166_v44 = vmul.f32 1.442695, %v1145_v22  ;;  %v1174_v29 = vmul.f32 1.442695, %v1149_v23 }
 0x45f   : > { %v1129_v38 = vpop.xlane.xlu1 %1128 }
 0x460   : > { %8340 = vmatpush3.xpose.msk.msra.mxu0 %vm866_vm2, %v1590_v19  ;;  %2380 = vrot.lane.b32.xlu1 %v10216_v26, %s9839_s27  ;;  %v1150_v52 = vsub.f32 %v10468_v4, %v1129_v38 }
 0x461   : > { %8341 = vmatprep.subr.msk.mxu0 %vm866_vm2, %v10534_v63 }
 0x462   : > { %v1113_v0 = vpop.xlane.xlu0 %1112  ;;  %v1176_v17 = vmul.f32 1.442695, %v1150_v52 }
 0x463   : > { %v1142_v33 = vsub.f32 %v10480_v39, %v1113_v0 }
 0x464   : > { %8342 = vmatpush3.xpose.msk.msra.mxu0 %vm866_vm2, %v10534_v63  ;;  %2376 = vrot.lane.b32.xlu1 %v10224_v30, %s9839_s27  ;;  %v1148_v30 = vsub.f32 %v10463_v25, %v1125_v55 }
 0x465   : > { %v1160_v26 = vmul.f32 1.442695, %v1142_v33  ;;  %8343 = vmatprep.subr.msk.mxu0 %vm866_vm2, %v10540_v3 }
 0x466   : > { %v1121_v58 = vpop.xlane.xlu0 %1120  ;;  %v1172_v51 = vmul.f32 1.442695, %v1148_v30 }
 0x467   : > { %9263 = vpow2.f32 %v1160_v26  ;;  %v1146_v61 = vsub.f32 %v10487_v41, %v1121_v58 }
 0x468   : > { %9265 = vpow2.f32 %v1162_v34  ;;  %8344 = vmatpush3.xpose.msk.msra.mxu0 %vm866_vm2, %v10540_v3  ;;  %2372 = vrot.lane.b32.xlu1 %v10232_v31, %s9839_s27  ;;  %v1133_v31 = vpop.xlane.xlu1 %1132 }
 0x469   : > { %9267 = vpow2.f32 %v1164_v35  ;;  %v1168_v10 = vmul.f32 1.442695, %v1146_v61  ;;  %8345 = vmatprep.subr.msk.mxu0 %vm866_vm2, %v10550_v59  ;;  %v1152_v56 = vsub.f32 %v10473_v13, %v1133_v31 }
 0x46a   : > { %v1131_v24 = vpop.xlane.xlu0 %1130  ;;  %9269 = vpow2.f32 %v1166_v44 }
 0x46b   : > { %9271 = vpow2.f32 %v1168_v10  ;;  %v1151_v53 = vsub.f32 %v10494_v42, %v1131_v24  ;;  %v1180_v39 = vmul.f32 1.442695, %v1152_v56 }
 0x46c   : > { %8346 = vmatpush3.xpose.msk.msra.mxu0 %vm866_vm2, %v10550_v59  ;;  %9273 = vpow2.f32 %v1170_v50  ;;  %v1578_v25 = vpop.permute.xlu1 %1577 }
 0x46d   : > { %8347 = vmatprep.subr.msk.mxu0 %vm866_vm2, %v10556_v21  ;;  %9275 = vpow2.f32 %v1172_v51  ;;  %v1178_v32 = vmul.f32 1.442695, %v1151_v53 }
 0x46e   : > { %v1135_v28 = vpop.xlane.xlu0 %1134  ;;  %9277 = vpow2.f32 %v1174_v29 }
 0x46f   : > { %v1153_v4 = vsub.f32 %v10501_v43, %v1135_v28  ;;  %9279 = vpow2.f32 %v1176_v17 }
 0x470   : > { %8348 = vmatpush3.xpose.msk.msra.mxu0 %vm866_vm2, %v10556_v21  ;;  %9281 = vpow2.f32 %v1178_v32  ;;  %v1576_v49 = vpop.permute.xlu1 %1575 }
 0x471   : > { %v1182_v13 = vmul.f32 1.442695, %v1153_v4  ;;  %9283 = vpow2.f32 %v1180_v39 }
 0x472   : > { %v1139_v57 = vpop.xlane.xlu0 %1138 }
 0x473   : > { %9285 = vpow2.f32 %v1182_v13  ;;  %v1155_v12 = vsub.f32 %v10506_v48, %v1139_v57 }
 0x474   : > { %v10677_v60 = vpop.eup %9263  ;;  %v1574_v47 = vpop.permute.xlu1 %1573 }
 0x475   : > { %14546 = vst [vmem:[#allocation7_spill] sm:$0xff] %v10677_v60  ;;  %v10680_v8 = vpop.eup %9265  ;;  %8304 = vmatprep.mubr.f32.mxu0 %v10677_v60  ;;  %v1186_v15 = vmul.f32 1.442695, %v1155_v12 }
 0x476   : > { %14547 = vst [vmem:[#allocation8_spill] sm:$0xff] %v10680_v8  ;;  %v10683_v41 = vpop.eup %9267  ;;  %8305 = vmatmul.mubr.f32.gmra.mxu0 %v10680_v8  ;;  %v1580_v42 = vpop.permute.xlu0 %1579 }
 0x477   : > { %14548 = vst [vmem:[#allocation9_spill] sm:$0xff] %v10683_v41  ;;  %8307 = vmatprep.mubr.f32.mxu0 %v10683_v41  ;;  %8349 = vmatprep.subr.msk.mxu0 %vm866_vm2, %v1580_v42  ;;  %v10689_v43 = vpop.eup %9269  ;;  %v10987_v41 = vld [vmem:[#allocation2 + $0x70] sm:$0xff] }
 0x478   : > { %8350 = vmatpush3.xpose.msk.msra.mxu0 %vm866_vm2, %v1580_v42  ;;  %14549 = vst [vmem:[#allocation10_spill] sm:$0xff] %v10689_v43  ;;  %v10692_v46 = vpop.eup %9271  ;;  %v1526_v45 = vpop.permute.xlu1 %1525  ;;  %v10996_v60 = vmul.f32 0.5, %v10987_v41 }
 0x479   : > { %8351 = vmatprep.subr.msk.mxu0 %vm866_vm2, %v1578_v25  ;;  %14550 = vst [vmem:[#allocation11_spill] sm:$0xff] %v10692_v46  ;;  %v10697_v11 = vpop.eup %9273 }
 0x47a   : > { %8308 = vmatmul.mubr.f32.gmra.mxu0 %v10689_v43  ;;  %14551 = vst [vmem:[#allocation12_spill] sm:$0xff] %v10697_v11  ;;  %v10700_v36 = vpop.eup %9275  ;;  %v1532_v63 = vpop.permute.xlu0 %1531  ;;  %14586 = vst [vmem:[#allocation47_spill] sm:$0xff] %v10996_v60 }
 0x47b   : > { %8310 = vmatprep.mubr.f32.mxu0 %v10692_v46  ;;  %14552 = vst [vmem:[#allocation13_spill] sm:$0xff] %v10700_v36  ;;  %v10705_v3 = vpop.eup %9277 }
 0x47c   : > { %8352 = vmatpush3.xpose.msk.msra.mxu0 %vm866_vm2, %v1578_v25  ;;  %14553 = vst [vmem:[#allocation14_spill] sm:$0xff] %v10705_v3  ;;  %v10708_v59 = vpop.eup %9279 }
 0x47d   : > { %8353 = vmatprep.subr.msk.mxu0 %vm866_vm2, %v1576_v49  ;;  %14554 = vst [vmem:[#allocation15_spill] sm:$0xff] %v10708_v59  ;;  %v10713_v21 = vpop.eup %9281 }
 0x47e   : > { %8311 = vmatmul.mubr.f32.gmra.mxu0 %v10697_v11  ;;  %14555 = vst [vmem:[#allocation16_spill] sm:$0xff] %v10713_v21  ;;  %v10715_v62 = vpop.eup %9283  ;;  %v1536_v6 = vpop.permute.xlu0 %1535 }
 0x47f   : > { %8313 = vmatprep.mubr.f32.mxu0 %v10700_v36  ;;  %14556 = vst [vmem:[#allocation17_spill] sm:$0xff] %v10715_v62  ;;  %v10975_v36 = vld [vmem:[#allocation2 + $0x78] sm:$0xff] }
 0x480   : > { %8354 = vmatpush3.xpose.msk.msra.mxu0 %vm866_vm2, %v1576_v49  ;;  %v10719_v37 = vpop.eup %9285 }
 0x481   : > { %8355 = vmatprep.subr.msk.mxu0 %vm866_vm2, %v1574_v47  ;;  %14557 = vst [vmem:[#allocation18_spill] sm:$0xff] %v10719_v37 }
 0x482   : > { %8314 = vmatmul.mubr.f32.gmra.mxu0 %v10705_v3  ;;  %v1540_v5 = vpop.permute.xlu0 %1539  ;;  %v10985_v3 = vmul.f32 0.5, %v10975_v36 }
 0x483   : > { %8316 = vmatprep.mubr.f32.mxu0 %v10708_v59 }
 0x484   : > { %8356 = vmatpush3.xpose.msk.msra.mxu0 %vm866_vm2, %v1574_v47  ;;  %14585 = vst [vmem:[#allocation46_spill] sm:$0xff] %v10985_v3 }
 0x486   : > { %8317 = vmatmul.mubr.f32.gmra.mxu0 %v10713_v21  ;;  %v1544_v18 = vpop.permute.xlu0 %1543 }
 0x487   : > { %8319 = vmatprep.mubr.f32.mxu0 %v10715_v62 }
 0x48a   : > { %8320 = vmatmul.mubr.f32.gmra.mxu0 %v10719_v37  ;;  %v1548_v27 = vpop.permute.xlu0 %1547  ;;  %v10971_v37 = vld [vmem:[#allocation2 + $0x60] sm:$0xff] }
 0x48b   : > { %v10980_v21 = vmul.f32 0.5, %v10971_v37 }
 0x48d   : > { %14584 = vst [vmem:[#allocation45_spill] sm:$0xff] %v10980_v21 }
 0x48e   : > { %v1552_v0 = vpop.permute.xlu0 %1551 }
 0x490   : > { %v1137_v40 = vpop.xlane.xlu1 %1136 }
 0x491   : > { %v1154_v14 = vsub.f32 %v10515_v2, %v1137_v40 }
 0x492   : > { %v1556_v48 = vpop.permute.xlu0 %1555 }
 0x493   : > { %v1184_v19 = vmul.f32 1.442695, %v1154_v14 }
 0x494   : > { %v1528_v16 = vpop.permute.xlu1 %1527 }
 0x495   : > { %9287 = vpow2.f32 %v1184_v19 }
 0x496   : > { %9289 = vpow2.f32 %v1186_v15  ;;  %v1969_v26 = vpop.permute.xlu0 %1968 }
 0x498   : > { %v1530_v54 = vpop.permute.xlu1 %1529 }
 0x49a   : > { %v1965_v61 = vpop.permute.xlu0 %1964 }
 0x49c   : > { %v1534_v55 = vpop.permute.xlu1 %1533 }
 0x49e   : > { %v1963_v38 = vpop.permute.xlu0 %1962 }
 0x4a0   : > { %v1538_v33 = vpop.permute.xlu1 %1537 }
 0x4a2   : > { %v10724_v34 = vpop.eup %9287  ;;  %v1959_v10 = vpop.permute.xlu0 %1958 }
 0x4a3   : > { %14558 = vst [vmem:[#allocation19_spill] sm:$0xff] %v10724_v34  ;;  %v10726_v22 = vpop.eup %9289  ;;  %8322 = vmatprep.mubr.f32.mxu0 %v10724_v34 }
 0x4a4   : > { %14559 = vst [vmem:[#allocation20_spill] sm:$0xff] %v10726_v22  ;;  %8323 = vmatmul.mubr.f32.gmra.mxu0 %v10726_v22  ;;  %v1542_v2 = vpop.permute.xlu1 %1541 }
 0x4a5   : > { %8357 = vmatprep.mubr.msk.f32.mxu0 %vm866_vm2, %v1526_v45 }
 0x4a6   : > { %v1955_v23 = vpop.permute.xlu0 %1954 }
 0x4a8   : > { %8358 = vmatmul.mubr.msk.f32.vlgmr.msra.gmra.mxu0 %vm866_vm2, %v1528_v16  ;;  %v1546_v35 = vpop.permute.xlu1 %1545 }
 0x4a9   : > { %8360 = vmatprep.mubr.msk.f32.mxu0 %vm866_vm2, %v1530_v54 }
 0x4aa   : > { %v1951_v52 = vpop.permute.xlu0 %1950 }
 0x4ac   : > { %8361 = vmatmul.mubr.msk.f32.gmra.mxu0 %vm866_vm2, %v1532_v63  ;;  %v1550_v58 = vpop.permute.xlu1 %1549 }
 0x4ad   : > { %8363 = vmatprep.mubr.msk.f32.mxu0 %vm866_vm2, %v1534_v55 }
 0x4ae   : > { %v1947_v29 = vpop.permute.xlu0 %1946 }
 0x4b0   : > { %8364 = vmatmul.mubr.msk.f32.gmra.mxu0 %vm866_vm2, %v1536_v6  ;;  %v1554_v44 = vpop.permute.xlu1 %1553 }
 0x4b1   : > { %8366 = vmatprep.mubr.msk.f32.mxu0 %vm866_vm2, %v1538_v33 }
 0x4b2   : > { %v1943_v17 = vpop.permute.xlu0 %1942 }
 0x4b4   : > { %8367 = vmatmul.mubr.msk.f32.gmra.mxu0 %vm866_vm2, %v1540_v5  ;;  %v1973_v20 = vpop.permute.xlu1 %1972 }
 0x4b5   : > { %8369 = vmatprep.mubr.msk.f32.mxu0 %vm866_vm2, %v1542_v2  ;;  %8381 = vmatprep.subr.mxu1 %v1973_v20 }
 0x4b6   : > { %8382 = vmatpush3.msra.mxu1 %v1973_v20  ;;  %v10822_v20 = vld [vmem:[#allocation2 + $0x8] sm:$0xff] }
 0x4b8   : > { %8370 = vmatmul.mubr.msk.f32.gmra.mxu0 %vm866_vm2, %v1544_v18  ;;  %v1971_v30 = vpop.permute.xlu1 %1970 }
 0x4b9   : > { %8372 = vmatprep.mubr.msk.f32.mxu0 %vm866_vm2, %v1546_v35  ;;  %8383 = vmatprep.subr.mxu1 %v1971_v30 }
 0x4ba   : > { %8384 = vmatpush3.msra.mxu1 %v1971_v30 }
 0x4bb   : > { %8385 = vmatprep.subr.mxu1 %v1969_v26 }
 0x4bc   : > { %8373 = vmatmul.mubr.msk.f32.gmra.mxu0 %vm866_vm2, %v1548_v27  ;;  %8386 = vmatpush3.msra.mxu1 %v1969_v26  ;;  %v1967_v24 = vpop.permute.xlu1 %1966 }
 0x4bd   : > { %8375 = vmatprep.mubr.msk.f32.mxu0 %vm866_vm2, %v1550_v58  ;;  %8387 = vmatprep.subr.mxu1 %v1967_v24 }
 0x4be   : > { %8388 = vmatpush3.msra.mxu1 %v1967_v24 }
 0x4bf   : > { %8389 = vmatprep.subr.mxu1 %v1965_v61 }
 0x4c0   : > { %8376 = vmatmul.mubr.msk.f32.gmra.mxu0 %vm866_vm2, %v1552_v0  ;;  %8390 = vmatpush3.msra.mxu1 %v1965_v61  ;;  %v1961_v50 = vpop.permute.xlu1 %1960 }
 0x4c1   : > { %8378 = vmatprep.mubr.msk.f32.mxu0 %vm866_vm2, %v1554_v44  ;;  %8391 = vmatprep.subr.mxu1 %v1963_v38 }
 0x4c2   : > { %8392 = vmatpush3.msra.mxu1 %v1963_v38  ;;  %v10826_v38 = vld [vmem:[#allocation2 + $0x10] sm:$0xff] }
 0x4c3   : > { %8393 = vmatprep.subr.mxu1 %v1961_v50 }
 0x4c4   : > { %8379 = vmatmul.mubr.msk.f32.gmra.mxu0 %vm866_vm2, %v1556_v48  ;;  %8394 = vmatpush3.msra.mxu1 %v1961_v50  ;;  %v1957_v51 = vpop.permute.xlu1 %1956 }
 0x4c5   : > { %8395 = vmatprep.subr.mxu1 %v1959_v10 }
 0x4c6   : > { %8396 = vmatpush3.msra.mxu1 %v1959_v10 }
 0x4c7   : > { %8397 = vmatprep.subr.mxu1 %v1957_v51 }
 0x4c8   : > { %8398 = vmatpush3.msra.mxu1 %v1957_v51  ;;  %v1953_v31 = vpop.permute.xlu1 %1952 }
 0x4c9   : > { %8399 = vmatprep.subr.mxu1 %v1955_v23 }
 0x4ca   : > { %8400 = vmatpush3.msra.mxu1 %v1955_v23 }
 0x4cb   : > { %8401 = vmatprep.subr.mxu1 %v1953_v31 }
 0x4cc   : > { %8402 = vmatpush3.msra.mxu1 %v1953_v31  ;;  %v1949_v28 = vpop.permute.xlu1 %1948 }
 0x4cd   : > { %8403 = vmatprep.subr.mxu1 %v1951_v52 }
 0x4ce   : > { %8404 = vmatpush3.msra.mxu1 %v1951_v52 }
 0x4cf   : > { %8405 = vmatprep.subr.mxu1 %v1949_v28 }
 0x4d0   : > { %8406 = vmatpush3.msra.mxu1 %v1949_v28  ;;  %v1945_v53 = vpop.permute.xlu1 %1944 }
 0x4d1   : > { %8407 = vmatprep.subr.mxu1 %v1947_v29 }
 0x4d2   : > { %8408 = vmatpush3.msra.mxu1 %v1947_v29 }
 0x4d3   : > { %8409 = vmatprep.subr.mxu1 %v1945_v53 }
 0x4d4   : > { %8410 = vmatpush3.msra.mxu1 %v1945_v53  ;;  %v10746_v56 = vpop.permute.xlu1 %2390 }
 0x4d5   : > { %8411 = vmatprep.subr.mxu1 %v1943_v17 }
 0x4d6   : > { %8412 = vmatpush3.msra.mxu1 %v1943_v17 }
 0x4d7   : > { %8437 = vmatprep.subr.msk.mxu1 %vm866_vm2, %v10746_v56 }
 0x503   : > { %v10750_v57 = vpop.f32.mrf.mxu0 }
 0x504   : > { %14560 = vst [vmem:[#allocation21_spill] sm:$0xff] %v10750_v57  ;;  %v10957_v57 = vld [vmem:[#allocation2 + $0x68] sm:$0xff] }
 0x505   : > { %v10752_v25 = vpop.f32.mrf.mxu0  ;;  %v10969_v59 = vmul.f32 0.5, %v10957_v57 }
 0x506   : > { %14561 = vst [vmem:[#allocation22_spill] sm:$0xff] %v10752_v25 }
 0x507   : > { %14583 = vst [vmem:[#allocation44_spill] sm:$0xff] %v10969_v59 }
 0x536   : > { %v10754_v32 = vpop.f32.mrf.mxu0 }
 0x537   : > { %14562 = vst [vmem:[#allocation23_spill] sm:$0xff] %v10754_v32  ;;  %v10953_v32 = vld [vmem:[#allocation2 + $0x50] sm:$0xff] }
 0x538   : > { %v10756_v4 = vpop.f32.mrf.mxu0  ;;  %v10964_v62 = vmul.f32 0.5, %v10953_v32 }
 0x539   : > { %14563 = vst [vmem:[#allocation24_spill] sm:$0xff] %v10756_v4 }
 0x53a   : > { %v10758_v39 = vpop.f32.mrf.mxu0  ;;  %14582 = vst [vmem:[#allocation43_spill] sm:$0xff] %v10964_v62 }
 0x53b   : > { %14564 = vst [vmem:[#allocation25_spill] sm:$0xff] %v10758_v39 }
 0x53c   : > { %v10760_v42 = vpop.f32.mrf.mxu0 }
 0x53d   : > { %14565 = vst [vmem:[#allocation26_spill] sm:$0xff] %v10760_v42  ;;  %v10937_v42 = vld [vmem:[#allocation2 + $0x40] sm:$0xff] }
 0x53e   : > { %v10762_v13 = vpop.f32.mrf.mxu0  ;;  %v10948_v39 = vmul.f32 0.5, %v10937_v42 }
 0x53f   : > { %14566 = vst [vmem:[#allocation27_spill] sm:$0xff] %v10762_v13  ;;  %v10941_v13 = vld [vmem:[#allocation2 + $0x58] sm:$0xff] }
 0x540   : > { %v10764_v49 = vpop.f32.mrf.mxu0  ;;  %14580 = vst [vmem:[#allocation41_spill] sm:$0xff] %v10948_v39  ;;  %v10951_v25 = vmul.f32 0.5, %v10941_v13 }
 0x541   : > { %14567 = vst [vmem:[#allocation28_spill] sm:$0xff] %v10764_v49  ;;  %v10932_v49 = vpop.permute.xlu1 %2384 }
 0x542   : > { %v10766_v47 = vpop.f32.mrf.mxu0  ;;  %14581 = vst [vmem:[#allocation42_spill] sm:$0xff] %v10951_v25 }
 0x543   : > { %14568 = vst [vmem:[#allocation29_spill] sm:$0xff] %v10766_v47 }
 0x544   : > { %v10768_v63 = vpop.f32.mrf.mxu0 }
 0x545   : > { %14569 = vst [vmem:[#allocation30_spill] sm:$0xff] %v10768_v63  ;;  %v10925_v63 = vld [vmem:[#allocation2 + $0x48] sm:$0xff]  ;;  %v10959_v34 = vpop.permute.xlu1 %2380 }
 0x546   : > { %v10770_v6 = vpop.f32.mrf.mxu0  ;;  %v10935_v47 = vmul.f32 0.5, %v10925_v63 }
 0x547   : > { %14570 = vst [vmem:[#allocation31_spill] sm:$0xff] %v10770_v6 }
 0x548   : > { %v10772_v45 = vpop.f32.mrf.mxu0  ;;  %14579 = vst [vmem:[#allocation40_spill] sm:$0xff] %v10935_v47 }
 0x549   : > { %14571 = vst [vmem:[#allocation32_spill] sm:$0xff] %v10772_v45  ;;  %v10982_v46 = vpop.permute.xlu1 %2376 }
 0x54a   : > { %v10774_v5 = vpop.f32.mrf.mxu0 }
 0x54b   : > { %14572 = vst [vmem:[#allocation33_spill] sm:$0xff] %v10774_v5  ;;  %v10921_v5 = vld [vmem:[#allocation2 + $0x30] sm:$0xff] }
 0x54c   : > { %v10776_v12 = vpop.f32.mrf.mxu0  ;;  %v10930_v6 = vmul.f32 0.5, %v10921_v5 }
 0x54d   : > { %14573 = vst [vmem:[#allocation34_spill] sm:$0xff] %v10776_v12  ;;  %v11000_v43 = vpop.permute.xlu1 %2372 }
 0x54e   : > { %14578 = vst [vmem:[#allocation39_spill] sm:$0xff] %v10930_v6 }
 0x564   : > { %v10778_v40 = vpop.f32.mrf.mxu0 }
 0x565   : > { %14574 = vst [vmem:[#allocation35_spill] sm:$0xff] %v10778_v40 }
 0x566   : > { %v10780_v14 = vpop.f32.mrf.mxu0 }
 0x567   : > { %14575 = vst [vmem:[#allocation36_spill] sm:$0xff] %v10780_v14  ;;  %v10909_v14 = vld [vmem:[#allocation2 + $0x38] sm:$0xff] }
 0x568   : > { %v8359_v15 = vpop.f32.mrf.mxu0  ;;  %v10919_v45 = vmul.f32 0.5, %v10909_v14 }
 0x569   : > { %v10784_v18 = vsel %vm768_vm3, %v8359_v15, -1e+30 }
 0x56a   : > { %1832 = vmax.xlane.f32.xlu1 %v10784_v18  ;;  %v1735_v19 = vpop.f32.mrf.mxu0  ;;  %14577 = vst [vmem:[#allocation38_spill] sm:$0xff] %v10919_v45 }
 0x56b   : > { %v10789_v16 = vsel %vm768_vm3, %v1735_v19, -1e+30 }
 0x56c   : > { %1830 = vmax.xlane.f32.xlu0 %v10789_v16  ;;  %v8362_v27 = vpop.f32.mrf.mxu0 }
 0x56d   : > { %v10794_v55 = vsel %vm768_vm3, %v8362_v27, -1e+30 }
 0x56e   : > { %v1745_v54 = vpop.f32.mrf.mxu0 }
 0x56f   : > { %v10798_v0 = vsel %vm768_vm3, %v1745_v54, -1e+30 }
 0x570   : > { %1836 = vmax.xlane.f32.xlu0 %v10794_v55  ;;  %1834 = vmax.xlane.f32.xlu1 %v10798_v0  ;;  %v8365_v33 = vpop.f32.mrf.mxu0 }
 0x571   : > { %v10804_v2 = vsel %vm768_vm3, %v8365_v33, -1e+30  ;;  %v10870_v33 = vpop.permute.xlu0 %2388 }
 0x572   : > { %v1755_v48 = vpop.f32.mrf.mxu0 }
 0x573   : > { %v10813_v61 = vsel %vm768_vm3, %v1755_v48, -1e+30  ;;  %v10872_v48 = vld [vmem:[#allocation2] sm:$0xff] }
 0x574   : > { %1840 = vmax.xlane.f32.xlu1 %v10804_v2  ;;  %v8368_v35 = vpop.f32.mrf.mxu0 }
 0x575   : > { %v10819_v44 = vsel %vm768_vm3, %v8368_v35, -1e+30  ;;  %v10876_v35 = vpop.permute.xlu0 %2386 }
 0x576   : > { %v1765_v26 = vpop.f32.mrf.mxu0 }
 0x577   : > { %v10809_v58 = vsel %vm768_vm3, %v1765_v26, -1e+30  ;;  %v10879_v26 = vmul.f32 0.5, %v10822_v20 }
 0x578   : > { %1838 = vmax.xlane.f32.xlu1 %v10813_v61  ;;  %1842 = vmax.xlane.f32.xlu0 %v10809_v58  ;;  %v8371_v30 = vpop.f32.mrf.mxu0 }
 0x579   : > { %v10837_v31 = vsel %vm768_vm3, %v8371_v30, -1e+30  ;;  %v10881_v30 = vld [vmem:[#allocation2 + $0x18] sm:$0xff] }
 0x57a   : > { %v1775_v10 = vpop.f32.mrf.mxu0 }
 0x57b   : > { %v10847_v53 = vsel %vm768_vm3, %v1775_v10, -1e+30  ;;  %v10886_v10 = vmul.f32 0.5, %v10872_v48 }
 0x57c   : > { %1844 = vmax.xlane.f32.xlu1 %v10819_v44  ;;  %v8374_v24 = vpop.f32.mrf.mxu0 }
 0x57d   : > { %v10857_v15 = vsel %vm768_vm3, %v8374_v24, -1e+30  ;;  %v10889_v24 = vmul.f32 0.5, %v10881_v30 }
 0x57e   : > { %v1785_v50 = vpop.f32.mrf.mxu0 }
 0x57f   : > { %v10832_v51 = vsel %vm768_vm3, %v1785_v50, -1e+30  ;;  %v10893_v50 = vld [vmem:[#allocation2 + $0x28] sm:$0xff] }
 0x580   : > { %v8377_v23 = vpop.f32.mrf.mxu0 }
 0x581   : > { %v10841_v28 = vsel %vm768_vm3, %v8377_v23, -1e+30  ;;  %v10895_v23 = vpop.permute.xlu0 %2382 }
 0x582   : > { %v1795_v52 = vpop.f32.mrf.mxu0 }
 0x583   : > { %v10862_v19 = vsel %vm768_vm3, %v1795_v52, -1e+30  ;;  %v10900_v52 = vmul.f32 0.5, %v10826_v38 }
 0x584   : > { %v8380_v29 = vpop.f32.mrf.mxu0 }
 0x585   : > { %v10851_v17 = vsel %vm768_vm3, %v8380_v29, -1e+30  ;;  %v10903_v29 = vmul.f32 0.5, %v10893_v50  ;;  %v10916_v40 = vpop.permute.xlu0 %2378 }
 0x586   : > { %v1805_v27 = vpop.f32.mrf.mxu0 }
 0x587   : > { %v10867_v54 = vsel %vm768_vm3, %v1805_v27, -1e+30  ;;  %v10905_v27 = vld [vmem:[#allocation2 + $0x20] sm:$0xff] }
 0x588   : > { %v10914_v12 = vmul.f32 0.5, %v10905_v27 }
 0x589   : > { %v10943_v4 = vpop.permute.xlu0 %2374 }
 0x58a   : > { %14576 = vst [vmem:[#allocation37_spill] sm:$0xff] %v10914_v12 }
 0x58d   : > { %2362 = vrot.lane.b32.xlu1 %v10822_v20, %s9839_s27  ;;  %v10966_v22 = vpop.permute.xlu0 %2370 }
 0x58e   : > { %2364 = vrot.lane.b32.xlu0 %v10826_v38, %s9839_s27 }
 0x591   : > { %v10991_v11 = vpop.permute.xlu0 %2368 }
 0x595   : > { %v11003_v8 = vpop.permute.xlu0 %2366 }
 0x5ad   : > { %1850 = vmax.xlane.f32.xlu0 %v10832_v51 }
 0x5b1   : > { %1848 = vmax.xlane.f32.xlu1 %v10837_v31  ;;  %1856 = vmax.xlane.f32.xlu0 %v10841_v28 }
 0x5b5   : > { %1846 = vmax.xlane.f32.xlu1 %v10847_v53  ;;  %1860 = vmax.xlane.f32.xlu0 %v10851_v17 }
 0x5b9   : > { %1852 = vmax.xlane.f32.xlu1 %v10857_v15 }
 0x5bd   : > { %1854 = vmax.xlane.f32.xlu1 %v10862_v19 }
 0x5c1   : > { %1858 = vmax.xlane.f32.xlu1 %v10867_v54 }
 0x5cb   : > { %2360 = vrot.lane.b32.xlu0 %v10872_v48, %s9839_s27  ;;  %s9857_s27 = smov 4  }
 0x5cf   : > { %2314 = vrot.lane.b32.xlu0 %v10879_v26, %s9840_s29 }
 0x5d2   : > { %2312 = vrot.lane.b32.xlu1 %v10886_v10, %s9840_s29 }
 0x5d3   : > { %2318 = vrot.lane.b32.xlu0 %v10889_v24, %s9840_s29 }
 0x5d6   : > { %2316 = vrot.lane.b32.xlu1 %v10900_v52, %s9840_s29 }
 0x5d7   : > { %2322 = vrot.lane.b32.xlu0 %v10903_v29, %s9840_s29 }
 0x5da   : > { %2320 = vrot.lane.b32.xlu1 %v10914_v12, %s9840_s29  ;;  %v9776_v12 = vld [vmem:[#allocation2 + $0x60] sm:$0xff] }
 0x5db   : > { %2326 = vrot.lane.b32.xlu0 %v10919_v45, %s9840_s29 }
 0x5de   : > { %2324 = vrot.lane.b32.xlu1 %v10930_v6, %s9840_s29 }
 0x5df   : > { %2330 = vrot.lane.b32.xlu0 %v10935_v47, %s9840_s29  ;;  %v9775_v47 = vld [vmem:[#allocation2 + $0x50] sm:$0xff] }
 0x5e2   : > { %2328 = vrot.lane.b32.xlu1 %v10948_v39, %s9840_s29 }
 0x5e3   : > { %2334 = vrot.lane.b32.xlu0 %v10951_v25, %s9840_s29  ;;  %v9774_v25 = vld [vmem:[#allocation2 + $0x70] sm:$0xff] }
 0x5e6   : > { %2332 = vrot.lane.b32.xlu1 %v10964_v62, %s9840_s29 }
 0x5e7   : > { %2338 = vrot.lane.b32.xlu0 %v10969_v59, %s9840_s29 }
 0x5ea   : > { %2336 = vrot.lane.b32.xlu1 %v10980_v21, %s9840_s29  ;;  %v9773_v21 = vld [vmem:[#allocation2 + $0x58] sm:$0xff] }
 0x5eb   : > { %2342 = vrot.lane.b32.xlu0 %v10985_v3, %s9840_s29 }
 0x5ee   : > { %2340 = vrot.lane.b32.xlu1 %v10996_v60, %s9840_s29  ;;  %s9858_s29 = smov 12  }
 0x5ef   : > { %2755 = vrot.lane.b32.xlu0 %v9771_v7, %s9841_s30 }
 0x5f2   : > { %2759 = vrot.lane.b32.xlu1 %v9772_v9, %s9841_s30 }
 0x5f3   : > { %2751 = vrot.lane.b32.xlu0 %v9773_v21, %s9841_s30  ;;  %v1833_v3 = vpop.xlane.xlu1 %1832 }
 0x5f4   : > { %v1863_v59 = vsub.f32 %v10784_v18, %v1833_v3  ;;  %v9777_v3 = vld [vmem:[#allocation2 + $0x40] sm:$0xff] }
 0x5f5   : > { %v1831_v62 = vpop.xlane.xlu0 %1830 }
 0x5f6   : > { %v1862_v60 = vsub.f32 %v10789_v16, %v1831_v62  ;;  %2757 = vrot.lane.b32.xlu1 %v9774_v25, %s9841_s30  ;;  %v1880_v39 = vmul.f32 1.442695, %v1863_v59  ;;  %v9780_v16 = vld [vmem:[#allocation2 + $0x38] sm:$0xff] }
 0x5f7   : > { %2749 = vrot.lane.b32.xlu0 %v9775_v47, %s9841_s30  ;;  %v9778_v47 = vld [vmem:[#allocation2 + $0x48] sm:$0xff] }
 0x5f8   : > { %v1878_v7 = vmul.f32 1.442695, %v1862_v60  ;;  %v9779_v60 = vld [vmem:[#allocation2 + $0x30] sm:$0xff] }
 0x5f9   : > { %v1837_v6 = vpop.xlane.xlu0 %1836  ;;  %v1835_v45 = vpop.xlane.xlu1 %1834 }
 0x5fa   : > { %9291 = vpow2.f32 %v1878_v7  ;;  %v1865_v9 = vsub.f32 %v10794_v55, %v1837_v6  ;;  %v1864_v21 = vsub.f32 %v10798_v0, %v1835_v45  ;;  %2753 = vrot.lane.b32.xlu1 %v9776_v12, %s9841_s30  ;;  %v9781_v55 = vld [vmem:[#allocation2 + $0x20] sm:$0xff] }
 0x5fb   : > { %9293 = vpow2.f32 %v1880_v39  ;;  %2745 = vrot.lane.b32.xlu0 %v9777_v3, %s9841_s30 }
 0x5fc   : > { %v1884_v62 = vmul.f32 1.442695, %v1865_v9  ;;  %v1882_v59 = vmul.f32 1.442695, %v1864_v21 }
 0x5fd   : > { %v1841_v25 = vpop.xlane.xlu1 %1840 }
 0x5fe   : > { %9295 = vpow2.f32 %v1884_v62  ;;  %2747 = vrot.lane.b32.xlu1 %v9778_v47, %s9841_s30  ;;  %v1867_v6 = vsub.f32 %v10804_v2, %v1841_v25  ;;  %v9782_v62 = vld [vmem:[#allocation2 + $0x28] sm:$0xff] }
 0x5ff   : > { %9297 = vpow2.f32 %v1882_v59  ;;  %2741 = vrot.lane.b32.xlu0 %v9779_v60, %s9841_s30 }
 0x600   : > { %v1888_v0 = vmul.f32 1.442695, %v1867_v6 }
 0x601   : > { %v1843_v45 = vpop.xlane.xlu0 %1842  ;;  %v1839_v18 = vpop.xlane.xlu1 %1838 }
 0x602   : > { %v1868_v39 = vsub.f32 %v10809_v58, %v1843_v45  ;;  %v1866_v12 = vsub.f32 %v10813_v61, %v1839_v18  ;;  %2743 = vrot.lane.b32.xlu1 %v9780_v16, %s9841_s30 }
 0x603   : > { %2737 = vrot.lane.b32.xlu0 %v9781_v55, %s9841_s30 }
 0x604   : > { %v1886_v7 = vmul.f32 1.442695, %v1866_v12  ;;  %v1890_v9 = vmul.f32 1.442695, %v1868_v39 }
 0x605   : > { %v1845_v21 = vpop.xlane.xlu1 %1844 }
 0x606   : > { %v1869_v3 = vsub.f32 %v10819_v44, %v1845_v21  ;;  %2739 = vrot.lane.b32.xlu1 %v9782_v62, %s9841_s30  ;;  %9299 = vpow2.f32 %v1886_v7  ;;  %v9783_v44 = vld [vmem:[#allocation2 + $0x18] sm:$0xff] }
 0x607   : > { %v11024_v2 = vpop.eup %9291  ;;  %2733 = vrot.lane.b32.xlu0 %v10826_v38, %s9841_s30  ;;  %9301 = vpow2.f32 %v1888_v0 }
 0x608   : > { %14587 = vst [vmem:[#allocation48_spill] sm:$0xff] %v11024_v2  ;;  %v11028_v58 = vpop.eup %9293  ;;  %v1892_v61 = vmul.f32 1.442695, %v1869_v3  ;;  %8413 = vmatprep.mubr.f32.mxu1 %v11024_v2  ;;  %9303 = vpow2.f32 %v1890_v9  ;;  %v9786_v2 = vld [vmem:[#allocation2 + $0x58] sm:$0xff] }
 0x609   : > { %14588 = vst [vmem:[#allocation49_spill] sm:$0xff] %v11028_v58  ;;  %8414 = vmatmul.mubr.f32.vlgmr.msra.gmra.mxu1 %v11028_v58  ;;  %v9785_v58 = vld [vmem:[#allocation2 + $0x78] sm:$0xff] }
 0x60a   : > { %9305 = vpow2.f32 %v1892_v61  ;;  %8438 = vmatpush3.xpose.msk.msra.mxu1 %vm866_vm2, %v10746_v56  ;;  %2735 = vrot.lane.b32.xlu1 %v9783_v44, %s9841_s30 }
 0x60b   : > { %v11035_v59 = vpop.eup %9295  ;;  %8439 = vmatprep.subr.msk.mxu1 %vm866_vm2, %v10870_v33  ;;  %2729 = vrot.lane.b32.xlu0 %v10872_v48, %s9841_s30 }
 0x60c   : > { %14589 = vst [vmem:[#allocation50_spill] sm:$0xff] %v11035_v59  ;;  %v11041_v25 = vpop.eup %9297 }
 0x60d   : > { %14590 = vst [vmem:[#allocation51_spill] sm:$0xff] %v11041_v25  ;;  %8416 = vmatprep.mubr.f32.mxu1 %v11041_v25 }
 0x60e   : > { %8417 = vmatmul.mubr.f32.gmra.mxu1 %v11035_v59  ;;  %2731 = vrot.lane.b32.xlu1 %v10822_v20, %s9841_s30  ;;  %s9859_s30 = smov 8  }
 0x60f   : > { %8440 = vmatpush3.xpose.msk.msra.mxu1 %vm866_vm2, %v10870_v33  ;;  %3175 = vrot.lane.b32.xlu0 %v10987_v41, %s9842_s7 }
 0x610   : > { %8441 = vmatprep.subr.msk.mxu1 %vm866_vm2, %v10876_v35 }
 0x612   : > { %3177 = vrot.lane.b32.xlu1 %v10975_v36, %s9842_s7 }
 0x613   : > { %8442 = vmatpush3.xpose.msk.msra.mxu1 %vm866_vm2, %v10876_v35  ;;  %3173 = vrot.lane.b32.xlu0 %v10957_v57, %s9842_s7  ;;  %v11059_v56 = vpop.eup %9299 }
 0x614   : > { %14591 = vst [vmem:[#allocation52_spill] sm:$0xff] %v11059_v56  ;;  %8443 = vmatprep.subr.msk.mxu1 %vm866_vm2, %v10932_v49  ;;  %v11063_v33 = vpop.eup %9301  ;;  %8419 = vmatprep.mubr.f32.mxu1 %v11059_v56 }
 0x615   : > { %14592 = vst [vmem:[#allocation53_spill] sm:$0xff] %v11063_v33  ;;  %v11066_v47 = vpop.eup %9303  ;;  %8420 = vmatmul.mubr.f32.gmra.mxu1 %v11063_v33 }
 0x616   : > { %14593 = vst [vmem:[#allocation54_spill] sm:$0xff] %v11066_v47  ;;  %3171 = vrot.lane.b32.xlu1 %v10971_v37, %s9842_s7  ;;  %8422 = vmatprep.mubr.f32.mxu1 %v11066_v47 }
 0x617   : > { %v11071_v35 = vpop.eup %9305  ;;  %8444 = vmatpush3.xpose.msk.msra.mxu1 %vm866_vm2, %v10932_v49  ;;  %3169 = vrot.lane.b32.xlu0 %v10941_v13, %s9842_s7 }
 0x618   : > { %14594 = vst [vmem:[#allocation55_spill] sm:$0xff] %v11071_v35  ;;  %8445 = vmatprep.subr.msk.mxu1 %vm866_vm2, %v10895_v23 }
 0x619   : > { %8423 = vmatmul.mubr.f32.gmra.mxu1 %v11071_v35  ;;  %v11763_v35 = vld [vmem:[#allocation2 + $0x60] sm:$0xff] }
 0x61a   : > { %3167 = vrot.lane.b32.xlu1 %v10953_v32, %s9842_s7 }
 0x61b   : > { %8446 = vmatpush3.xpose.msk.msra.mxu1 %vm866_vm2, %v10895_v23  ;;  %3165 = vrot.lane.b32.xlu0 %v10925_v63, %s9842_s7 }
 0x61c   : > { %8447 = vmatprep.subr.msk.mxu1 %vm866_vm2, %v10959_v34 }
 0x61e   : > { %3163 = vrot.lane.b32.xlu1 %v10937_v42, %s9842_s7 }
 0x61f   : > { %8448 = vmatpush3.xpose.msk.msra.mxu1 %vm866_vm2, %v10959_v34  ;;  %3161 = vrot.lane.b32.xlu0 %v10909_v14, %s9842_s7  ;;  %v2363_v34 = vpop.permute.xlu1 %2362 }
 0x620   : > { %8449 = vmatprep.subr.msk.mxu1 %vm866_vm2, %v10916_v40 }
 0x622   : > { %3159 = vrot.lane.b32.xlu1 %v10921_v5, %s9842_s7 }
 0x623   : > { %8450 = vmatpush3.xpose.msk.msra.mxu1 %vm866_vm2, %v10916_v40  ;;  %3157 = vrot.lane.b32.xlu0 %v10893_v50, %s9842_s7 }
 0x624   : > { %8451 = vmatprep.subr.msk.mxu1 %vm866_vm2, %v10982_v46 }
 0x627   : > { %8452 = vmatpush3.xpose.msk.msra.mxu1 %vm866_vm2, %v10982_v46  ;;  %3155 = vrot.lane.b32.xlu0 %v10905_v27, %s9842_s7  ;;  %v2365_v46 = vpop.permute.xlu0 %2364 }
 0x628   : > { %8453 = vmatprep.subr.msk.mxu1 %vm866_vm2, %v10943_v4 }
 0x62b   : > { %8454 = vmatpush3.xpose.msk.msra.mxu1 %vm866_vm2, %v10943_v4  ;;  %3153 = vrot.lane.b32.xlu0 %v10881_v30, %s9842_s7 }
 0x62c   : > { %8455 = vmatprep.subr.msk.mxu1 %vm866_vm2, %v11000_v43 }
 0x62f   : > { %8456 = vmatpush3.xpose.msk.msra.mxu1 %vm866_vm2, %v11000_v43 }
 0x630   : > { %8457 = vmatprep.subr.msk.mxu1 %vm866_vm2, %v10966_v22 }
 0x633   : > { %8458 = vmatpush3.xpose.msk.msra.mxu1 %vm866_vm2, %v10966_v22 }
 0x634   : > { %8459 = vmatprep.subr.msk.mxu1 %vm866_vm2, %v10991_v11 }
 0x636   : > { %v1851_v4 = vpop.xlane.xlu0 %1850 }
 0x637   : > { %8460 = vmatpush3.xpose.msk.msra.mxu1 %vm866_vm2, %v10991_v11  ;;  %v1872_v40 = vsub.f32 %v10832_v51, %v1851_v4 }
 0x638   : > { %8461 = vmatprep.subr.msk.mxu1 %vm866_vm2, %v11003_v8 }
 0x639   : > { %v1898_v18 = vmul.f32 1.442695, %v1872_v40 }
 0x63a   : > { %v1857_v49 = vpop.xlane.xlu0 %1856  ;;  %v1849_v43 = vpop.xlane.xlu1 %1848 }
 0x63b   : > { %8462 = vmatpush3.xpose.msk.msra.mxu1 %vm866_vm2, %v11003_v8  ;;  %v1871_v22 = vsub.f32 %v10837_v31, %v1849_v43  ;;  %v1875_v51 = vsub.f32 %v10841_v28, %v1857_v49 }
 0x63c   : > { %8463 = vmatprep.subr.msk.mxu1 %vm866_vm2, %v2365_v46 }
 0x63d   : > { %v1896_v6 = vmul.f32 1.442695, %v1871_v22  ;;  %v1904_v0 = vmul.f32 1.442695, %v1875_v51 }
 0x63e   : > { %v1861_v23 = vpop.xlane.xlu0 %1860  ;;  %v1847_v60 = vpop.xlane.xlu1 %1846 }
 0x63f   : > { %8464 = vmatpush3.xpose.msk.msra.mxu1 %vm866_vm2, %v2365_v46  ;;  %v1870_v11 = vsub.f32 %v10847_v53, %v1847_v60  ;;  %v1877_v7 = vsub.f32 %v10851_v17, %v1861_v23 }
 0x640   : > { %8465 = vmatprep.subr.msk.mxu1 %vm866_vm2, %v2363_v34 }
 0x641   : > { %v1894_v45 = vmul.f32 1.442695, %v1870_v11  ;;  %v1908_v28 = vmul.f32 1.442695, %v1877_v7 }
 0x642   : > { %v2361_v39 = vpop.permute.xlu0 %2360  ;;  %v1853_v12 = vpop.xlane.xlu1 %1852 }
 0x643   : > { %8466 = vmatpush3.xpose.msk.msra.mxu1 %vm866_vm2, %v2363_v34  ;;  %v1873_v8 = vsub.f32 %v10857_v15, %v1853_v12  ;;  %9307 = vpow2.f32 %v1894_v45 }
 0x644   : > { %8467 = vmatprep.subr.msk.mxu1 %vm866_vm2, %v2361_v39  ;;  %9309 = vpow2.f32 %v1896_v6 }
 0x645   : > { %v1900_v31 = vmul.f32 1.442695, %v1873_v8  ;;  %9311 = vpow2.f32 %v1898_v18 }
 0x646   : > { %v2315_v53 = vpop.permute.xlu0 %2314  ;;  %v1855_v16 = vpop.xlane.xlu1 %1854 }
 0x647   : > { %9313 = vpow2.f32 %v1900_v31  ;;  %8468 = vmatpush3.xpose.msk.msra.mxu1 %vm866_vm2, %v2361_v39  ;;  %v1874_v55 = vsub.f32 %v10862_v19, %v1855_v16 }
 0x649   : > { %v1902_v9 = vmul.f32 1.442695, %v1874_v55 }
 0x64a   : > { %v2319_v15 = vpop.permute.xlu0 %2318  ;;  %v1859_v21 = vpop.xlane.xlu1 %1858 }
 0x64b   : > { %9315 = vpow2.f32 %v1902_v9  ;;  %v1876_v3 = vsub.f32 %v10867_v54, %v1859_v21 }
 0x64c   : > { %9317 = vpow2.f32 %v1904_v0 }
 0x64d   : > { %v1906_v62 = vmul.f32 1.442695, %v1876_v3 }
 0x64e   : > { %v2323_v61 = vpop.permute.xlu0 %2322  ;;  %v2313_v44 = vpop.permute.xlu1 %2312 }
 0x64f   : > { %9319 = vpow2.f32 %v1906_v62 }
 0x650   : > { %v11145_v46 = vpop.eup %9307  ;;  %9321 = vpow2.f32 %v1908_v28 }
 0x651   : > { %14595 = vst [vmem:[#allocation56_spill] sm:$0xff] %v11145_v46  ;;  %v11147_v34 = vpop.eup %9309  ;;  %8425 = vmatprep.mubr.f32.mxu1 %v11145_v46 }
 0x652   : > { %14596 = vst [vmem:[#allocation57_spill] sm:$0xff] %v11147_v34  ;;  %v2327_v17 = vpop.permute.xlu0 %2326  ;;  %v2317_v19 = vpop.permute.xlu1 %2316  ;;  %8426 = vmatmul.mubr.f32.gmra.mxu1 %v11147_v34 }
 0x653   : > { %v11150_v4 = vpop.eup %9311 }
 0x654   : > { %14597 = vst [vmem:[#allocation58_spill] sm:$0xff] %v11150_v4  ;;  %v11153_v54 = vpop.eup %9313  ;;  %8428 = vmatprep.mubr.f32.mxu1 %v11150_v4 }
 0x655   : > { %14598 = vst [vmem:[#allocation59_spill] sm:$0xff] %v11153_v54 }
 0x656   : > { %v2331_v49 = vpop.permute.xlu0 %2330  ;;  %v2321_v43 = vpop.permute.xlu1 %2320  ;;  %8429 = vmatmul.mubr.f32.gmra.mxu1 %v11153_v54 }
 0x658   : > { %v11157_v22 = vpop.eup %9315 }
 0x659   : > { %14599 = vst [vmem:[#allocation60_spill] sm:$0xff] %v11157_v22  ;;  %8431 = vmatprep.mubr.f32.mxu1 %v11157_v22  ;;  %v11160_v40 = vpop.eup %9317 }
 0x65a   : > { %14600 = vst [vmem:[#allocation61_spill] sm:$0xff] %v11160_v40  ;;  %v2335_v23 = vpop.permute.xlu0 %2334  ;;  %v2325_v60 = vpop.permute.xlu1 %2324  ;;  %8432 = vmatmul.mubr.f32.gmra.mxu1 %v11160_v40  ;;  %v14628_v40 = vld [vmem:[#allocation46_spill] sm:$0xff] }
 0x65c   : > { %v11163_v11 = vpop.eup %9319 }
 0x65d   : > { %14601 = vst [vmem:[#allocation62_spill] sm:$0xff] %v11163_v11  ;;  %8434 = vmatprep.mubr.f32.mxu1 %v11163_v11  ;;  %v11166_v6 = vpop.eup %9321  ;;  %v14627_v11 = vld [vmem:[#allocation45_spill] sm:$0xff] }
 0x65e   : > { %14602 = vst [vmem:[#allocation63_spill] sm:$0xff] %v11166_v6  ;;  %v2339_v45 = vpop.permute.xlu0 %2338  ;;  %v2329_v18 = vpop.permute.xlu1 %2328  ;;  %8435 = vmatmul.mubr.f32.gmra.mxu1 %v11166_v6  ;;  %v14625_v6 = vld [vmem:[#allocation43_spill] sm:$0xff] }
 0x65f   : > { %8469 = vmatprep.mubr.msk.f32.mxu1 %vm866_vm2, %v2313_v44 }
 0x662   : > { %v2343_v39 = vpop.permute.xlu0 %2342  ;;  %v2333_v12 = vpop.permute.xlu1 %2332  ;;  %8470 = vmatmul.mubr.msk.f32.vlgmr.msra.gmra.mxu1 %vm866_vm2, %v2315_v53 }
 0x663   : > { %8472 = vmatprep.mubr.msk.f32.mxu1 %vm866_vm2, %v2317_v19 }
 0x666   : > { %v2756_v8 = vpop.permute.xlu0 %2755  ;;  %v2337_v51 = vpop.permute.xlu1 %2336  ;;  %8473 = vmatmul.mubr.msk.f32.gmra.mxu1 %vm866_vm2, %v2319_v15 }
 0x667   : > { %8475 = vmatprep.mubr.msk.f32.mxu1 %vm866_vm2, %v2321_v43 }
 0x66a   : > { %v2752_v31 = vpop.permute.xlu0 %2751  ;;  %v2341_v16 = vpop.permute.xlu1 %2340  ;;  %8476 = vmatmul.mubr.msk.f32.gmra.mxu1 %vm866_vm2, %v2323_v61 }
 0x66b   : > { %8478 = vmatprep.mubr.msk.f32.mxu1 %vm866_vm2, %v2325_v60 }
 0x66e   : > { %v2760_v55 = vpop.permute.xlu1 %2759  ;;  %8479 = vmatmul.mubr.msk.f32.gmra.mxu1 %vm866_vm2, %v2327_v17  ;;  %v2750_v0 = vpop.permute.xlu0 %2749 }
 0x66f   : > { %8493 = vmatprep.subr.mxu0 %v2760_v55  ;;  %8481 = vmatprep.mubr.msk.f32.mxu1 %vm866_vm2, %v2329_v18 }
 0x670   : > { %8494 = vmatpush3.msra.mxu0 %v2760_v55 }
 0x672   : > { %v2758_v53 = vpop.permute.xlu1 %2757  ;;  %8482 = vmatmul.mubr.msk.f32.gmra.mxu1 %vm866_vm2, %v2331_v49  ;;  %v2746_v7 = vpop.permute.xlu0 %2745 }
 0x673   : > { %8495 = vmatprep.subr.mxu0 %v2758_v53  ;;  %8484 = vmatprep.mubr.msk.f32.mxu1 %vm866_vm2, %v2333_v12 }
 0x674   : > { %8496 = vmatpush3.msra.mxu0 %v2758_v53 }
 0x675   : > { %8497 = vmatprep.subr.mxu0 %v2756_v8 }
 0x676   : > { %8498 = vmatpush3.msra.mxu0 %v2756_v8  ;;  %v2754_v9 = vpop.permute.xlu1 %2753  ;;  %8485 = vmatmul.mubr.msk.f32.gmra.mxu1 %vm866_vm2, %v2335_v23  ;;  %v2742_v21 = vpop.permute.xlu0 %2741 }
 0x677   : > { %8499 = vmatprep.subr.mxu0 %v2754_v9  ;;  %8487 = vmatprep.mubr.msk.f32.mxu1 %vm866_vm2, %v2337_v51 }
 0x678   : > { %8500 = vmatpush3.msra.mxu0 %v2754_v9 }
 0x679   : > { %8501 = vmatprep.subr.mxu0 %v2752_v31 }
 0x67a   : > { %8502 = vmatpush3.msra.mxu0 %v2752_v31  ;;  %v2748_v15 = vpop.permute.xlu1 %2747  ;;  %8488 = vmatmul.mubr.msk.f32.gmra.mxu1 %vm866_vm2, %v2339_v45  ;;  %v2738_v28 = vpop.permute.xlu0 %2737 }
 0x67b   : > { %8503 = vmatprep.subr.mxu0 %v2750_v0  ;;  %8490 = vmatprep.mubr.msk.f32.mxu1 %vm866_vm2, %v2341_v16 }
 0x67c   : > { %8504 = vmatpush3.msra.mxu0 %v2750_v0 }
 0x67d   : > { %8505 = vmatprep.subr.mxu0 %v2748_v15 }
 0x67e   : > { %8506 = vmatpush3.msra.mxu0 %v2748_v15  ;;  %v2744_v3 = vpop.permute.xlu1 %2743  ;;  %8491 = vmatmul.mubr.msk.f32.gmra.mxu1 %vm866_vm2, %v2343_v39  ;;  %v2734_v44 = vpop.permute.xlu0 %2733 }
 0x67f   : > { %8507 = vmatprep.subr.mxu0 %v2746_v7 }
 0x680   : > { %8508 = vmatpush3.msra.mxu0 %v2746_v7 }
 0x681   : > { %8509 = vmatprep.subr.mxu0 %v2744_v3 }
 0x682   : > { %8510 = vmatpush3.msra.mxu0 %v2744_v3  ;;  %v2740_v62 = vpop.permute.xlu1 %2739  ;;  %v2730_v19 = vpop.permute.xlu0 %2729 }
 0x683   : > { %8511 = vmatprep.subr.mxu0 %v2742_v21 }
 0x684   : > { %8512 = vmatpush3.msra.mxu0 %v2742_v21 }
 0x685   : > { %8513 = vmatprep.subr.mxu0 %v2740_v62 }
 0x686   : > { %8514 = vmatpush3.msra.mxu0 %v2740_v62  ;;  %v2736_v61 = vpop.permute.xlu1 %2735 }
 0x687   : > { %8515 = vmatprep.subr.mxu0 %v2738_v28 }
 0x688   : > { %8516 = vmatpush3.msra.mxu0 %v2738_v28 }
 0x689   : > { %8517 = vmatprep.subr.mxu0 %v2736_v61 }
 0x68a   : > { %8518 = vmatpush3.msra.mxu0 %v2736_v61  ;;  %v2732_v17 = vpop.permute.xlu1 %2731 }
 0x68b   : > { %8519 = vmatprep.subr.mxu0 %v2734_v44 }
 0x68c   : > { %8520 = vmatpush3.msra.mxu0 %v2734_v44 }
 0x68d   : > { %8521 = vmatprep.subr.mxu0 %v2732_v17 }
 0x68e   : > { %8522 = vmatpush3.msra.mxu0 %v2732_v17  ;;  %v11185_v49 = vpop.permute.xlu1 %3177 }
 0x68f   : > { %8523 = vmatprep.subr.mxu0 %v2730_v19 }
 0x690   : > { %8524 = vmatpush3.msra.mxu0 %v2730_v19 }
 0x691   : > { %8549 = vmatprep.subr.msk.mxu0 %vm866_vm2, %v11185_v49 }
 0x6c9   : > { %v11189_v43 = vpop.f32.mrf.mxu1 }
 0x6ca   : > { %14603 = vst [vmem:[#allocation64_spill] sm:$0xff] %v11189_v43  ;;  %v14623_v43 = vld [vmem:[#allocation41_spill] sm:$0xff] }
 0x6cb   : > { %v11191_v23 = vpop.f32.mrf.mxu1 }
 0x6cc   : > { %14604 = vst [vmem:[#allocation65_spill] sm:$0xff] %v11191_v23  ;;  %v14621_v23 = vld [vmem:[#allocation39_spill] sm:$0xff] }
 0x6ce   : > { %v11193_v60 = vpop.f32.mrf.mxu1 }
 0x6cf   : > { %14605 = vst [vmem:[#allocation66_spill] sm:$0xff] %v11193_v60  ;;  %v11322_v60 = vpop.permute.xlu1 %3171 }
 0x6d0   : > { %v11195_v45 = vpop.f32.mrf.mxu1 }
 0x6d1   : > { %14606 = vst [vmem:[#allocation67_spill] sm:$0xff] %v11195_v45  ;;  %v14620_v45 = vld [vmem:[#allocation38_spill] sm:$0xff] }
 0x6d5   : > { %v11197_v18 = vpop.f32.mrf.mxu1 }
 0x6d6   : > { %14607 = vst [vmem:[#allocation68_spill] sm:$0xff] %v11197_v18  ;;  %v11305_v18 = vpop.permute.xlu0 %3175 }
 0x6d7   : > { %v11199_v39 = vpop.f32.mrf.mxu1 }
 0x6d8   : > { %14608 = vst [vmem:[#allocation69_spill] sm:$0xff] %v11199_v39  ;;  %v14619_v39 = vld [vmem:[#allocation37_spill] sm:$0xff] }
 0x6d9   : > { %v11201_v12 = vpop.f32.mrf.mxu1 }
 0x6da   : > { %14609 = vst [vmem:[#allocation70_spill] sm:$0xff] %v11201_v12 }
 0x6db   : > { %v11203_v8 = vpop.f32.mrf.mxu1 }
 0x6dc   : > { %14610 = vst [vmem:[#allocation71_spill] sm:$0xff] %v11203_v8 }
 0x712   : > { %v11205_v51 = vpop.f32.mrf.mxu1 }
 0x713   : > { %14611 = vst [vmem:[#allocation72_spill] sm:$0xff] %v11205_v51 }
 0x714   : > { %v11207_v31 = vpop.f32.mrf.mxu1 }
 0x715   : > { %14612 = vst [vmem:[#allocation73_spill] sm:$0xff] %v11207_v31 }
 0x716   : > { %v11209_v16 = vpop.f32.mrf.mxu1 }
 0x717   : > { %14613 = vst [vmem:[#allocation74_spill] sm:$0xff] %v11209_v16 }
 0x718   : > { %v11211_v55 = vpop.f32.mrf.mxu1 }
 0x719   : > { %14614 = vst [vmem:[#allocation75_spill] sm:$0xff] %v11211_v55 }
 0x71a   : > { %v11213_v0 = vpop.f32.mrf.mxu1 }
 0x71b   : > { %14615 = vst [vmem:[#allocation76_spill] sm:$0xff] %v11213_v0 }
 0x71c   : > { %v11215_v53 = vpop.f32.mrf.mxu1 }
 0x71d   : > { %14616 = vst [vmem:[#allocation77_spill] sm:$0xff] %v11215_v53 }
 0x71e   : > { %v11217_v7 = vpop.f32.mrf.mxu1 }
 0x71f   : > { %14617 = vst [vmem:[#allocation78_spill] sm:$0xff] %v11217_v7 }
 0x720   : > { %v11219_v9 = vpop.f32.mrf.mxu1 }
 0x721   : > { %14618 = vst [vmem:[#allocation79_spill] sm:$0xff] %v11219_v9 }
 0x722   : > { %v8471_v15 = vpop.f32.mrf.mxu1 }
 0x723   : > { %v11223_v21 = vsel %vm768_vm3, %v8471_v15, -1e+30 }
 0x724   : > { %2619 = vmax.xlane.f32.xlu1 %v11223_v21  ;;  %v2522_v3 = vpop.f32.mrf.mxu1 }
 0x725   : > { %v11228_v28 = vsel %vm768_vm3, %v2522_v3, -1e+30 }
 0x726   : > { %2617 = vmax.xlane.f32.xlu0 %v11228_v28  ;;  %v8474_v62 = vpop.f32.mrf.mxu1 }
 0x727   : > { %v11233_v44 = vsel %vm768_vm3, %v8474_v62, -1e+30 }
 0x728   : > { %v2532_v61 = vpop.f32.mrf.mxu1 }
 0x729   : > { %v11237_v17 = vsel %vm768_vm3, %v2532_v61, -1e+30 }
 0x72a   : > { %2623 = vmax.xlane.f32.xlu0 %v11233_v44  ;;  %2621 = vmax.xlane.f32.xlu1 %v11237_v17  ;;  %v8477_v19 = vpop.f32.mrf.mxu1 }
 0x72b   : > { %v11243_v3 = vsel %vm768_vm3, %v8477_v19, -1e+30 }
 0x72c   : > { %v2542_v15 = vpop.f32.mrf.mxu1 }
 0x72d   : > { %v11248_v62 = vsel %vm768_vm3, %v2542_v15, -1e+30 }
 0x72e   : > { %2627 = vmax.xlane.f32.xlu1 %v11243_v3  ;;  %v8480_v7 = vpop.f32.mrf.mxu1 }
 0x72f   : > { %v11258_v19 = vsel %vm768_vm3, %v8480_v7, -1e+30 }
 0x730   : > { %v2552_v9 = vpop.f32.mrf.mxu1 }
 0x731   : > { %v11252_v61 = vsel %vm768_vm3, %v2552_v9, -1e+30 }
 0x732   : > { %2625 = vmax.xlane.f32.xlu1 %v11248_v62  ;;  %2629 = vmax.xlane.f32.xlu0 %v11252_v61  ;;  %v8483_v15 = vpop.f32.mrf.mxu1 }
 0x733   : > { %v11272_v7 = vsel %vm768_vm3, %v8483_v15, -1e+30 }
 0x734   : > { %v2562_v0 = vpop.f32.mrf.mxu1 }
 0x736   : > { %2631 = vmax.xlane.f32.xlu1 %v11258_v19  ;;  %v8486_v9 = vpop.f32.mrf.mxu1 }
 0x738   : > { %v2572_v53 = vpop.f32.mrf.mxu1 }
 0x739   : > { %v11267_v55 = vsel %vm768_vm3, %v2572_v53, -1e+30  ;;  %v11282_v53 = vsel %vm768_vm3, %v2562_v0, -1e+30 }
 0x73a   : > { %v8489_v16 = vpop.f32.mrf.mxu1 }
 0x73b   : > { %v11276_v31 = vsel %vm768_vm3, %v8489_v16, -1e+30  ;;  %v11292_v16 = vsel %vm768_vm3, %v8486_v9, -1e+30  ;;  %v11309_v9 = vpop.permute.xlu0 %3173 }
 0x73c   : > { %v2582_v51 = vpop.f32.mrf.mxu1 }
 0x73d   : > { %v11297_v15 = vsel %vm768_vm3, %v2582_v51, -1e+30 }
 0x73e   : > { %v8492_v12 = vpop.f32.mrf.mxu1 }
 0x73f   : > { %v11286_v8 = vsel %vm768_vm3, %v8492_v12, -1e+30  ;;  %v11313_v51 = vpop.permute.xlu0 %3169 }
 0x740   : > { %v2592_v0 = vpop.f32.mrf.mxu1 }
 0x741   : > { %v11302_v12 = vsel %vm768_vm3, %v2592_v0, -1e+30 }
 0x743   : > { %v11318_v0 = vpop.permute.xlu0 %3165 }
 0x747   : > { %3149 = vrot.lane.b32.xlu1 %v10822_v20, %s9842_s7 }
 0x748   : > { %3151 = vrot.lane.b32.xlu0 %v10826_v38, %s9842_s7 }
 0x767   : > { %2637 = vmax.xlane.f32.xlu0 %v11267_v55 }
 0x76b   : > { %2635 = vmax.xlane.f32.xlu1 %v11272_v7  ;;  %2643 = vmax.xlane.f32.xlu0 %v11276_v31 }
 0x76f   : > { %2633 = vmax.xlane.f32.xlu1 %v11282_v53  ;;  %2647 = vmax.xlane.f32.xlu0 %v11286_v8 }
 0x773   : > { %2639 = vmax.xlane.f32.xlu1 %v11292_v16 }
 0x777   : > { %2641 = vmax.xlane.f32.xlu1 %v11297_v15 }
 0x77b   : > { %2645 = vmax.xlane.f32.xlu1 %v11302_v12 }
 0x785   : > { %3147 = vrot.lane.b32.xlu0 %v10872_v48, %s9842_s7  ;;  %s9860_s7 = smov 16  }
 0x789   : > { %3101 = vrot.lane.b32.xlu0 %v10879_v26, %s9843_s8  ;;  %v11325_v26 = vpop.permute.xlu0 %3161 }
 0x78c   : > { %3099 = vrot.lane.b32.xlu1 %v10886_v10, %s9843_s8  ;;  %v14622_v10 = vld [vmem:[#allocation40_spill] sm:$0xff] }
 0x78d   : > { %3105 = vrot.lane.b32.xlu0 %v10889_v24, %s9843_s8  ;;  %v11329_v24 = vpop.permute.xlu1 %3167 }
 0x790   : > { %3103 = vrot.lane.b32.xlu1 %v10900_v52, %s9843_s8  ;;  %v14624_v52 = vld [vmem:[#allocation42_spill] sm:$0xff] }
 0x791   : > { %3109 = vrot.lane.b32.xlu0 %v10903_v29, %s9843_s8  ;;  %v11332_v29 = vpop.permute.xlu0 %3157 }
 0x794   : > { %3107 = vrot.lane.b32.xlu1 %v14619_v39, %s9843_s8  ;;  %v14626_v39 = vld [vmem:[#allocation44_spill] sm:$0xff] }
 0x795   : > { %3113 = vrot.lane.b32.xlu0 %v14620_v45, %s9843_s8  ;;  %v11336_v45 = vpop.permute.xlu1 %3163 }
 0x798   : > { %3111 = vrot.lane.b32.xlu1 %v14621_v23, %s9843_s8  ;;  %v11339_v23 = vpop.permute.xlu0 %3155 }
 0x799   : > { %3117 = vrot.lane.b32.xlu0 %v14622_v10, %s9843_s8  ;;  %v14629_v10 = vld [vmem:[#allocation47_spill] sm:$0xff] }
 0x79c   : > { %3115 = vrot.lane.b32.xlu1 %v14623_v43, %s9843_s8  ;;  %v11343_v43 = vpop.permute.xlu1 %3159 }
 0x79d   : > { %3121 = vrot.lane.b32.xlu0 %v14624_v52, %s9843_s8  ;;  %v11347_v52 = vpop.permute.xlu0 %3153 }
 0x7a0   : > { %3119 = vrot.lane.b32.xlu1 %v14625_v6, %s9843_s8 }
 0x7a1   : > { %3125 = vrot.lane.b32.xlu0 %v14626_v39, %s9843_s8 }
 0x7a4   : > { %3123 = vrot.lane.b32.xlu1 %v14627_v11, %s9843_s8 }
 0x7a5   : > { %3129 = vrot.lane.b32.xlu0 %v14628_v40, %s9843_s8 }
 0x7a8   : > { %3127 = vrot.lane.b32.xlu1 %v14629_v10, %s9843_s8  ;;  %s9861_s8 = smov 20  }
 0x7a9   : > { %3542 = vrot.lane.b32.xlu0 %v10957_v57, %s9844_s9 }
 0x7ac   : > { %3546 = vrot.lane.b32.xlu1 %v10975_v36, %s9844_s9 }
 0x7ad   : > { %3538 = vrot.lane.b32.xlu0 %v10941_v13, %s9844_s9  ;;  %v2620_v11 = vpop.xlane.xlu1 %2619 }
 0x7ae   : > { %v2650_v6 = vsub.f32 %v11223_v21, %v2620_v11 }
 0x7af   : > { %v2618_v40 = vpop.xlane.xlu0 %2617 }
 0x7b0   : > { %v2649_v39 = vsub.f32 %v11228_v28, %v2618_v40  ;;  %3544 = vrot.lane.b32.xlu1 %v10987_v41, %s9844_s9  ;;  %v2667_v10 = vmul.f32 1.442695, %v2650_v6 }
 0x7b1   : > { %3536 = vrot.lane.b32.xlu0 %v10953_v32, %s9844_s9 }
 0x7b2   : > { %v2665_v22 = vmul.f32 1.442695, %v2649_v39 }
 0x7b3   : > { %v2624_v54 = vpop.xlane.xlu0 %2623  ;;  %v2622_v4 = vpop.xlane.xlu1 %2621 }
 0x7b4   : > { %9323 = vpow2.f32 %v2665_v22  ;;  %v2652_v34 = vsub.f32 %v11233_v44, %v2624_v54  ;;  %v2651_v46 = vsub.f32 %v11237_v17, %v2622_v4  ;;  %3540 = vrot.lane.b32.xlu1 %v10971_v37, %s9844_s9 }
 0x7b5   : > { %9325 = vpow2.f32 %v2667_v10  ;;  %3532 = vrot.lane.b32.xlu0 %v10937_v42, %s9844_s9 }
 0x7b6   : > { %v2671_v21 = vmul.f32 1.442695, %v2652_v34  ;;  %v2669_v28 = vmul.f32 1.442695, %v2651_v46 }
 0x7b7   : > { %v2628_v11 = vpop.xlane.xlu1 %2627 }
 0x7b8   : > { %9327 = vpow2.f32 %v2671_v21  ;;  %3534 = vrot.lane.b32.xlu1 %v10925_v63, %s9844_s9  ;;  %v2654_v4 = vsub.f32 %v11243_v3, %v2628_v11 }
 0x7b9   : > { %9329 = vpow2.f32 %v2669_v28  ;;  %3528 = vrot.lane.b32.xlu0 %v10921_v5, %s9844_s9 }
 0x7ba   : > { %v2675_v46 = vmul.f32 1.442695, %v2654_v4 }
 0x7bb   : > { %v2630_v54 = vpop.xlane.xlu0 %2629  ;;  %v2626_v22 = vpop.xlane.xlu1 %2625 }
 0x7bc   : > { %v2655_v44 = vsub.f32 %v11252_v61, %v2630_v54  ;;  %v2653_v17 = vsub.f32 %v11248_v62, %v2626_v22  ;;  %3530 = vrot.lane.b32.xlu1 %v10909_v14, %s9844_s9 }
 0x7bd   : > { %3524 = vrot.lane.b32.xlu0 %v10905_v27, %s9844_s9 }
 0x7be   : > { %v2673_v34 = vmul.f32 1.442695, %v2653_v17  ;;  %v2677_v6 = vmul.f32 1.442695, %v2655_v44 }
 0x7bf   : > { %v2632_v40 = vpop.xlane.xlu1 %2631 }
 0x7c0   : > { %v2656_v39 = vsub.f32 %v11258_v19, %v2632_v40  ;;  %3526 = vrot.lane.b32.xlu1 %v10893_v50, %s9844_s9  ;;  %9331 = vpow2.f32 %v2673_v34 }
 0x7c1   : > { %v11379_v3 = vpop.eup %9323  ;;  %3520 = vrot.lane.b32.xlu0 %v10826_v38, %s9844_s9  ;;  %9333 = vpow2.f32 %v2675_v46 }
 0x7c2   : > { %14630 = vst [vmem:[#allocation37_spill] sm:$0xff] %v11379_v3  ;;  %v11383_v62 = vpop.eup %9325  ;;  %v2679_v61 = vmul.f32 1.442695, %v2656_v39  ;;  %8525 = vmatprep.mubr.f32.mxu0 %v11379_v3  ;;  %9335 = vpow2.f32 %v2677_v6 }
 0x7c3   : > { %14631 = vst [vmem:[#allocation38_spill] sm:$0xff] %v11383_v62  ;;  %8526 = vmatmul.mubr.f32.vlgmr.msra.gmra.mxu0 %v11383_v62  ;;  %v9784_v62 = vld [vmem:[#allocation2 + $0x68] sm:$0xff] }
 0x7c4   : > { %9337 = vpow2.f32 %v2679_v61  ;;  %8550 = vmatpush3.xpose.msk.msra.mxu0 %vm866_vm2, %v11185_v49  ;;  %3522 = vrot.lane.b32.xlu1 %v10881_v30, %s9844_s9 }
 0x7c5   : > { %v11391_v19 = vpop.eup %9327  ;;  %8551 = vmatprep.subr.msk.mxu0 %vm866_vm2, %v11305_v18  ;;  %3516 = vrot.lane.b32.xlu0 %v10872_v48, %s9844_s9 }
 0x7c6   : > { %14632 = vst [vmem:[#allocation39_spill] sm:$0xff] %v11391_v19  ;;  %v11397_v38 = vpop.eup %9329 }
 0x7c7   : > { %14633 = vst [vmem:[#allocation40_spill] sm:$0xff] %v11397_v38  ;;  %8528 = vmatprep.mubr.f32.mxu0 %v11397_v38 }
 0x7c8   : > { %8529 = vmatmul.mubr.f32.gmra.mxu0 %v11391_v19  ;;  %3518 = vrot.lane.b32.xlu1 %v10822_v20, %s9844_s9  ;;  %v11779_v19 = vld [vmem:[#allocation2 + $0x70] sm:$0xff]  ;;  %s9862_s9 = smov 24  }
 0x7c9   : > { %8552 = vmatpush3.xpose.msk.msra.mxu0 %vm866_vm2, %v11305_v18  ;;  %3962 = vrot.lane.b32.xlu0 %v10987_v41, %s9845_s10  ;;  %v11788_v59 = vmul.f32 0.5, %v11779_v19 }
 0x7ca   : > { %8553 = vmatprep.subr.msk.mxu0 %vm866_vm2, %v11309_v9 }
 0x7cb   : > { %14671 = vst [vmem:[#allocation110_spill] sm:$0xff] %v11788_v59 }
 0x7cc   : > { %3964 = vrot.lane.b32.xlu1 %v10975_v36, %s9845_s10 }
 0x7cd   : > { %8554 = vmatpush3.xpose.msk.msra.mxu0 %vm866_vm2, %v11309_v9  ;;  %3960 = vrot.lane.b32.xlu0 %v10957_v57, %s9845_s10  ;;  %v11415_v20 = vpop.eup %9331  ;;  %v3152_v57 = vpop.permute.xlu0 %3151 }
 0x7ce   : > { %14634 = vst [vmem:[#allocation41_spill] sm:$0xff] %v11415_v20  ;;  %8555 = vmatprep.subr.msk.mxu0 %vm866_vm2, %v11322_v60  ;;  %v11419_v48 = vpop.eup %9333  ;;  %8531 = vmatprep.mubr.f32.mxu0 %v11415_v20  ;;  %v11767_v20 = vld [vmem:[#allocation2 + $0x78] sm:$0xff] }
 0x7cf   : > { %14635 = vst [vmem:[#allocation42_spill] sm:$0xff] %v11419_v48  ;;  %v11422_v41 = vpop.eup %9335  ;;  %8532 = vmatmul.mubr.f32.gmra.mxu0 %v11419_v48  ;;  %v11772_v48 = vmul.f32 0.5, %v11763_v35  ;;  %v11777_v33 = vmul.f32 0.5, %v11767_v20 }
 0x7d0   : > { %14636 = vst [vmem:[#allocation43_spill] sm:$0xff] %v11422_v41  ;;  %3958 = vrot.lane.b32.xlu1 %v10971_v37, %s9845_s10  ;;  %8534 = vmatprep.mubr.f32.mxu0 %v11422_v41  ;;  %v11469_v37 = vld [vmem:[#allocation2 + $0x18] sm:$0xff] }
 0x7d1   : > { %v11427_v36 = vpop.eup %9337  ;;  %8556 = vmatpush3.xpose.msk.msra.mxu0 %vm866_vm2, %v11322_v60  ;;  %3956 = vrot.lane.b32.xlu0 %v10941_v13, %s9845_s10  ;;  %14669 = vst [vmem:[#allocation108_spill] sm:$0xff] %v11772_v48  ;;  %14670 = vst [vmem:[#allocation109_spill] sm:$0xff] %v11777_v33 }
 0x7d2   : > { %14637 = vst [vmem:[#allocation44_spill] sm:$0xff] %v11427_v36  ;;  %8557 = vmatprep.subr.msk.mxu0 %vm866_vm2, %v11313_v51 }
 0x7d3   : > { %8535 = vmatmul.mubr.f32.gmra.mxu0 %v11427_v36 }
 0x7d4   : > { %3954 = vrot.lane.b32.xlu1 %v10953_v32, %s9845_s10  ;;  %v3150_v32 = vpop.permute.xlu1 %3149 }
 0x7d5   : > { %8558 = vmatpush3.xpose.msk.msra.mxu0 %vm866_vm2, %v11313_v51  ;;  %3952 = vrot.lane.b32.xlu0 %v10925_v63, %s9845_s10 }
 0x7d6   : > { %8559 = vmatprep.subr.msk.mxu0 %vm866_vm2, %v11329_v24 }
 0x7d8   : > { %3950 = vrot.lane.b32.xlu1 %v10937_v42, %s9845_s10 }
 0x7d9   : > { %8560 = vmatpush3.xpose.msk.msra.mxu0 %vm866_vm2, %v11329_v24  ;;  %3948 = vrot.lane.b32.xlu0 %v10909_v14, %s9845_s10 }
 0x7da   : > { %8561 = vmatprep.subr.msk.mxu0 %vm866_vm2, %v11318_v0 }
 0x7dc   : > { %3946 = vrot.lane.b32.xlu1 %v10921_v5, %s9845_s10 }
 0x7dd   : > { %8562 = vmatpush3.xpose.msk.msra.mxu0 %vm866_vm2, %v11318_v0  ;;  %3944 = vrot.lane.b32.xlu0 %v10893_v50, %s9845_s10 }
 0x7de   : > { %8563 = vmatprep.subr.msk.mxu0 %vm866_vm2, %v11336_v45 }
 0x7e1   : > { %8564 = vmatpush3.xpose.msk.msra.mxu0 %vm866_vm2, %v11336_v45  ;;  %3942 = vrot.lane.b32.xlu0 %v10905_v27, %s9845_s10 }
 0x7e2   : > { %8565 = vmatprep.subr.msk.mxu0 %vm866_vm2, %v11325_v26 }
 0x7e5   : > { %8566 = vmatpush3.xpose.msk.msra.mxu0 %vm866_vm2, %v11325_v26  ;;  %3940 = vrot.lane.b32.xlu0 %v11469_v37, %s9845_s10 }
 0x7e6   : > { %8567 = vmatprep.subr.msk.mxu0 %vm866_vm2, %v11343_v43 }
 0x7e9   : > { %8568 = vmatpush3.xpose.msk.msra.mxu0 %vm866_vm2, %v11343_v43 }
 0x7ea   : > { %8569 = vmatprep.subr.msk.mxu0 %vm866_vm2, %v11332_v29 }
 0x7ed   : > { %8570 = vmatpush3.xpose.msk.msra.mxu0 %vm866_vm2, %v11332_v29 }
 0x7ee   : > { %8571 = vmatprep.subr.msk.mxu0 %vm866_vm2, %v11339_v23 }
 0x7f0   : > { %v2638_v42 = vpop.xlane.xlu0 %2637 }
 0x7f1   : > { %8572 = vmatpush3.xpose.msk.msra.mxu0 %vm866_vm2, %v11339_v23  ;;  %v2659_v14 = vsub.f32 %v11267_v55, %v2638_v42 }
 0x7f2   : > { %8573 = vmatprep.subr.msk.mxu0 %vm866_vm2, %v11347_v52 }
 0x7f3   : > { %v2685_v18 = vmul.f32 1.442695, %v2659_v14 }
 0x7f4   : > { %v2644_v13 = vpop.xlane.xlu0 %2643  ;;  %v2636_v63 = vpop.xlane.xlu1 %2635 }
 0x7f5   : > { %8574 = vmatpush3.xpose.msk.msra.mxu0 %vm866_vm2, %v11347_v52  ;;  %v2658_v5 = vsub.f32 %v11272_v7, %v2636_v63  ;;  %v2662_v55 = vsub.f32 %v11276_v31, %v2644_v13 }
 0x7f6   : > { %8575 = vmatprep.subr.msk.mxu0 %vm866_vm2, %v3152_v57 }
 0x7f7   : > { %v2683_v49 = vmul.f32 1.442695, %v2658_v5  ;;  %v2691_v29 = vmul.f32 1.442695, %v2662_v55 }
 0x7f8   : > { %v2648_v30 = vpop.xlane.xlu0 %2647  ;;  %v2634_v50 = vpop.xlane.xlu1 %2633 }
 0x7f9   : > { %8576 = vmatpush3.xpose.msk.msra.mxu0 %vm866_vm2, %v3152_v57  ;;  %v2657_v27 = vsub.f32 %v11282_v53, %v2634_v50  ;;  %v2664_v45 = vsub.f32 %v11286_v8, %v2648_v30 }
 0x7fa   : > { %8577 = vmatprep.subr.msk.mxu0 %vm866_vm2, %v3150_v32 }
 0x7fb   : > { %v2681_v60 = vmul.f32 1.442695, %v2657_v27  ;;  %v2695_v31 = vmul.f32 1.442695, %v2664_v45 }
 0x7fc   : > { %v3148_v9 = vpop.permute.xlu0 %3147  ;;  %v2640_v51 = vpop.xlane.xlu1 %2639 }
 0x7fd   : > { %8578 = vmatpush3.xpose.msk.msra.mxu0 %vm866_vm2, %v3150_v32  ;;  %v2660_v0 = vsub.f32 %v11292_v16, %v2640_v51  ;;  %9339 = vpow2.f32 %v2681_v60 }
 0x7fe   : > { %8579 = vmatprep.subr.msk.mxu0 %vm866_vm2, %v3148_v9  ;;  %9341 = vpow2.f32 %v2683_v49 }
 0x7ff   : > { %v2687_v7 = vmul.f32 1.442695, %v2660_v0  ;;  %9343 = vpow2.f32 %v2685_v18 }
 0x800   : > { %v3102_v53 = vpop.permute.xlu0 %3101  ;;  %v2642_v26 = vpop.xlane.xlu1 %2641 }
 0x801   : > { %9345 = vpow2.f32 %v2687_v7  ;;  %8580 = vmatpush3.xpose.msk.msra.mxu0 %vm866_vm2, %v3148_v9  ;;  %v2661_v24 = vsub.f32 %v11297_v15, %v2642_v26 }
 0x803   : > { %v2689_v23 = vmul.f32 1.442695, %v2661_v24 }
 0x804   : > { %v3106_v16 = vpop.permute.xlu0 %3105  ;;  %v2646_v43 = vpop.xlane.xlu1 %2645 }
 0x805   : > { %9347 = vpow2.f32 %v2689_v23  ;;  %v2663_v52 = vsub.f32 %v11302_v12, %v2646_v43 }
 0x806   : > { %9349 = vpow2.f32 %v2691_v29 }
 0x807   : > { %v2693_v10 = vmul.f32 1.442695, %v2663_v52 }
 0x808   : > { %v3110_v21 = vpop.permute.xlu0 %3109  ;;  %v3100_v28 = vpop.permute.xlu1 %3099 }
 0x809   : > { %9351 = vpow2.f32 %v2693_v10 }
 0x80a   : > { %v11503_v11 = vpop.eup %9339  ;;  %9353 = vpow2.f32 %v2695_v31 }
 0x80b   : > { %14638 = vst [vmem:[#allocation45_spill] sm:$0xff] %v11503_v11  ;;  %v11505_v4 = vpop.eup %9341  ;;  %8537 = vmatprep.mubr.f32.mxu0 %v11503_v11 }
 0x80c   : > { %14639 = vst [vmem:[#allocation46_spill] sm:$0xff] %v11505_v4  ;;  %v3114_v8 = vpop.permute.xlu0 %3113  ;;  %v3104_v15 = vpop.permute.xlu1 %3103  ;;  %8538 = vmatmul.mubr.f32.gmra.mxu0 %v11505_v4  ;;  %v11749_v4 = vld [vmem:[#allocation2 + $0x68] sm:$0xff] }
 0x80d   : > { %v11508_v54 = vpop.eup %9343  ;;  %v11761_v47 = vmul.f32 0.5, %v11749_v4 }
 0x80e   : > { %14640 = vst [vmem:[#allocation47_spill] sm:$0xff] %v11508_v54  ;;  %v11511_v12 = vpop.eup %9345  ;;  %8540 = vmatprep.mubr.f32.mxu0 %v11508_v54  ;;  %v11745_v54 = vld [vmem:[#allocation2 + $0x50] sm:$0xff] }
 0x80f   : > { %14641 = vst [vmem:[#allocation80_spill] sm:$0xff] %v11511_v12  ;;  %v11756_v36 = vmul.f32 0.5, %v11745_v54  ;;  %14668 = vst [vmem:[#allocation107_spill] sm:$0xff] %v11761_v47 }
 0x810   : > { %v3118_v22 = vpop.permute.xlu0 %3117  ;;  %v3108_v44 = vpop.permute.xlu1 %3107  ;;  %8541 = vmatmul.mubr.f32.gmra.mxu0 %v11511_v12 }
 0x811   : > { %14667 = vst [vmem:[#allocation106_spill] sm:$0xff] %v11756_v36 }
 0x812   : > { %v11515_v17 = vpop.eup %9347 }
 0x813   : > { %14642 = vst [vmem:[#allocation81_spill] sm:$0xff] %v11515_v17  ;;  %8543 = vmatprep.mubr.f32.mxu0 %v11515_v17  ;;  %v11518_v46 = vpop.eup %9349 }
 0x814   : > { %14643 = vst [vmem:[#allocation82_spill] sm:$0xff] %v11518_v46  ;;  %v3122_v34 = vpop.permute.xlu0 %3121  ;;  %v3112_v6 = vpop.permute.xlu1 %3111  ;;  %8544 = vmatmul.mubr.f32.gmra.mxu0 %v11518_v46 }
 0x816   : > { %v11521_v40 = vpop.eup %9351 }
 0x817   : > { %14644 = vst [vmem:[#allocation83_spill] sm:$0xff] %v11521_v40  ;;  %8546 = vmatprep.mubr.f32.mxu0 %v11521_v40  ;;  %v11524_v39 = vpop.eup %9353  ;;  %v11733_v40 = vld [vmem:[#allocation2 + $0x58] sm:$0xff] }
 0x818   : > { %14645 = vst [vmem:[#allocation84_spill] sm:$0xff] %v11524_v39  ;;  %v3126_v61 = vpop.permute.xlu0 %3125  ;;  %v3116_v57 = vpop.permute.xlu1 %3115  ;;  %8547 = vmatmul.mubr.f32.gmra.mxu0 %v11524_v39  ;;  %v11729_v39 = vld [vmem:[#allocation2 + $0x40] sm:$0xff]  ;;  %v11743_v12 = vmul.f32 0.5, %v11733_v40 }
 0x819   : > { %8581 = vmatprep.mubr.msk.f32.mxu0 %vm866_vm2, %v3100_v28  ;;  %v11740_v17 = vmul.f32 0.5, %v11729_v39 }
 0x81a   : > { %14666 = vst [vmem:[#allocation105_spill] sm:$0xff] %v11743_v12 }
 0x81b   : > { %14665 = vst [vmem:[#allocation104_spill] sm:$0xff] %v11740_v17 }
 0x81c   : > { %v3130_v32 = vpop.permute.xlu0 %3129  ;;  %v3120_v42 = vpop.permute.xlu1 %3119  ;;  %8582 = vmatmul.mubr.msk.f32.vlgmr.msra.gmra.mxu0 %vm866_vm2, %v3102_v53 }
 0x81d   : > { %8584 = vmatprep.mubr.msk.f32.mxu0 %vm866_vm2, %v3104_v15 }
 0x820   : > { %v3543_v13 = vpop.permute.xlu0 %3542  ;;  %v3124_v63 = vpop.permute.xlu1 %3123  ;;  %8585 = vmatmul.mubr.msk.f32.gmra.mxu0 %vm866_vm2, %v3106_v16 }
 0x821   : > { %8587 = vmatprep.mubr.msk.f32.mxu0 %vm866_vm2, %v3108_v44 }
 0x824   : > { %v3539_v5 = vpop.permute.xlu0 %3538  ;;  %v3128_v14 = vpop.permute.xlu1 %3127  ;;  %8588 = vmatmul.mubr.msk.f32.gmra.mxu0 %vm866_vm2, %v3110_v21 }
 0x825   : > { %8590 = vmatprep.mubr.msk.f32.mxu0 %vm866_vm2, %v3112_v6 }
 0x828   : > { %v3547_v30 = vpop.permute.xlu1 %3546  ;;  %8591 = vmatmul.mubr.msk.f32.gmra.mxu0 %vm866_vm2, %v3114_v8  ;;  %v3537_v50 = vpop.permute.xlu0 %3536 }
 0x829   : > { %8605 = vmatprep.subr.mxu1 %v3547_v30  ;;  %8593 = vmatprep.mubr.msk.f32.mxu0 %vm866_vm2, %v3116_v57 }
 0x82a   : > { %8606 = vmatpush3.msra.mxu1 %v3547_v30 }
 0x82c   : > { %v3545_v27 = vpop.permute.xlu1 %3544  ;;  %8594 = vmatmul.mubr.msk.f32.gmra.mxu0 %vm866_vm2, %v3118_v22  ;;  %v3533_v49 = vpop.permute.xlu0 %3532 }
 0x82d   : > { %8607 = vmatprep.subr.mxu1 %v3545_v27  ;;  %8596 = vmatprep.mubr.msk.f32.mxu0 %vm866_vm2, %v3120_v42 }
 0x82e   : > { %8608 = vmatpush3.msra.mxu1 %v3545_v27 }
 0x82f   : > { %8609 = vmatprep.subr.mxu1 %v3543_v13 }
 0x830   : > { %8610 = vmatpush3.msra.mxu1 %v3543_v13  ;;  %v3541_v60 = vpop.permute.xlu1 %3540  ;;  %8597 = vmatmul.mubr.msk.f32.gmra.mxu0 %vm866_vm2, %v3122_v34  ;;  %v3529_v9 = vpop.permute.xlu0 %3528 }
 0x831   : > { %8611 = vmatprep.subr.mxu1 %v3541_v60  ;;  %8599 = vmatprep.mubr.msk.f32.mxu0 %vm866_vm2, %v3124_v63 }
 0x832   : > { %8612 = vmatpush3.msra.mxu1 %v3541_v60 }
 0x833   : > { %8613 = vmatprep.subr.mxu1 %v3539_v5 }
 0x834   : > { %8614 = vmatpush3.msra.mxu1 %v3539_v5  ;;  %v3535_v18 = vpop.permute.xlu1 %3534  ;;  %8600 = vmatmul.mubr.msk.f32.gmra.mxu0 %vm866_vm2, %v3126_v61  ;;  %v3525_v0 = vpop.permute.xlu0 %3524 }
 0x835   : > { %8615 = vmatprep.subr.mxu1 %v3537_v50  ;;  %8602 = vmatprep.mubr.msk.f32.mxu0 %vm866_vm2, %v3128_v14 }
 0x836   : > { %8616 = vmatpush3.msra.mxu1 %v3537_v50 }
 0x837   : > { %8617 = vmatprep.subr.mxu1 %v3535_v18 }
 0x838   : > { %8618 = vmatpush3.msra.mxu1 %v3535_v18  ;;  %v3531_v51 = vpop.permute.xlu1 %3530  ;;  %8603 = vmatmul.mubr.msk.f32.gmra.mxu0 %vm866_vm2, %v3130_v32  ;;  %v3521_v53 = vpop.permute.xlu0 %3520 }
 0x839   : > { %8619 = vmatprep.subr.mxu1 %v3533_v49 }
 0x83a   : > { %8620 = vmatpush3.msra.mxu1 %v3533_v49 }
 0x83b   : > { %8621 = vmatprep.subr.mxu1 %v3531_v51 }
 0x83c   : > { %8622 = vmatpush3.msra.mxu1 %v3531_v51  ;;  %v3527_v55 = vpop.permute.xlu1 %3526  ;;  %v3517_v24 = vpop.permute.xlu0 %3516 }
 0x83d   : > { %8623 = vmatprep.subr.mxu1 %v3529_v9 }
 0x83e   : > { %8624 = vmatpush3.msra.mxu1 %v3529_v9 }
 0x83f   : > { %8625 = vmatprep.subr.mxu1 %v3527_v55 }
 0x840   : > { %8626 = vmatpush3.msra.mxu1 %v3527_v55  ;;  %v3523_v7 = vpop.permute.xlu1 %3522  ;;  %v11619_v55 = vld [vmem:[#allocation2 + $0x8] sm:$0xff] }
 0x841   : > { %8627 = vmatprep.subr.mxu1 %v3525_v0 }
 0x842   : > { %8628 = vmatpush3.msra.mxu1 %v3525_v0 }
 0x843   : > { %8629 = vmatprep.subr.mxu1 %v3523_v7 }
 0x844   : > { %8630 = vmatpush3.msra.mxu1 %v3523_v7  ;;  %v3519_v26 = vpop.permute.xlu1 %3518  ;;  %v11623_v7 = vld [vmem:[#allocation2 + $0x10] sm:$0xff] }
 0x845   : > { %8631 = vmatprep.subr.mxu1 %v3521_v53 }
 0x846   : > { %8632 = vmatpush3.msra.mxu1 %v3521_v53 }
 0x847   : > { %8633 = vmatprep.subr.mxu1 %v3519_v26 }
 0x848   : > { %8634 = vmatpush3.msra.mxu1 %v3519_v26  ;;  %v11543_v29 = vpop.permute.xlu1 %3964 }
 0x849   : > { %8635 = vmatprep.subr.mxu1 %v3517_v24 }
 0x84a   : > { %8636 = vmatpush3.msra.mxu1 %v3517_v24 }
 0x84b   : > { %8661 = vmatprep.subr.msk.mxu1 %vm866_vm2, %v11543_v29 }
 0x883   : > { %v11547_v45 = vpop.f32.mrf.mxu0 }
 0x884   : > { %14646 = vst [vmem:[#allocation85_spill] sm:$0xff] %v11547_v45  ;;  %v11724_v45 = vpop.permute.xlu1 %3958 }
 0x885   : > { %v11549_v23 = vpop.f32.mrf.mxu0 }
 0x886   : > { %14647 = vst [vmem:[#allocation86_spill] sm:$0xff] %v11549_v23 }
 0x888   : > { %v11551_v16 = vpop.f32.mrf.mxu0  ;;  %v11751_v11 = vpop.permute.xlu1 %3954 }
 0x889   : > { %14648 = vst [vmem:[#allocation87_spill] sm:$0xff] %v11551_v16 }
 0x88a   : > { %v11553_v43 = vpop.f32.mrf.mxu0 }
 0x88b   : > { %14649 = vst [vmem:[#allocation88_spill] sm:$0xff] %v11553_v43  ;;  %v11717_v43 = vld [vmem:[#allocation2 + $0x48] sm:$0xff] }
 0x88c   : > { %v11727_v23 = vmul.f32 0.5, %v11717_v43  ;;  %v11774_v56 = vpop.permute.xlu1 %3950 }
 0x88e   : > { %14664 = vst [vmem:[#allocation103_spill] sm:$0xff] %v11727_v23 }
 0x88f   : > { %v11555_v52 = vpop.f32.mrf.mxu0 }
 0x890   : > { %14650 = vst [vmem:[#allocation89_spill] sm:$0xff] %v11555_v52  ;;  %v11792_v25 = vpop.permute.xlu1 %3946 }
 0x891   : > { %v11557_v31 = vpop.f32.mrf.mxu0 }
 0x892   : > { %14651 = vst [vmem:[#allocation90_spill] sm:$0xff] %v11557_v31  ;;  %v11713_v31 = vld [vmem:[#allocation2 + $0x30] sm:$0xff] }
 0x893   : > { %v11559_v10 = vpop.f32.mrf.mxu0  ;;  %v11722_v16 = vmul.f32 0.5, %v11713_v31 }
 0x894   : > { %14652 = vst [vmem:[#allocation91_spill] sm:$0xff] %v11559_v10  ;;  %v11701_v10 = vld [vmem:[#allocation2 + $0x38] sm:$0xff] }
 0x895   : > { %v11561_v21 = vpop.f32.mrf.mxu0  ;;  %v11711_v52 = vmul.f32 0.5, %v11701_v10  ;;  %14663 = vst [vmem:[#allocation102_spill] sm:$0xff] %v11722_v16 }
 0x896   : > { %14653 = vst [vmem:[#allocation92_spill] sm:$0xff] %v11561_v21 }
 0x897   : > { %14662 = vst [vmem:[#allocation101_spill] sm:$0xff] %v11711_v52 }
 0x8cc   : > { %v11563_v28 = vpop.f32.mrf.mxu0 }
 0x8cd   : > { %14654 = vst [vmem:[#allocation93_spill] sm:$0xff] %v11563_v28 }
 0x8ce   : > { %v11565_v8 = vpop.f32.mrf.mxu0 }
 0x8cf   : > { %14655 = vst [vmem:[#allocation94_spill] sm:$0xff] %v11565_v8  ;;  %v11697_v8 = vld [vmem:[#allocation2 + $0x20] sm:$0xff] }
 0x8d0   : > { %v11567_v15 = vpop.f32.mrf.mxu0  ;;  %v11706_v21 = vmul.f32 0.5, %v11697_v8 }
 0x8d1   : > { %14656 = vst [vmem:[#allocation95_spill] sm:$0xff] %v11567_v15 }
 0x8d2   : > { %v11569_v22 = vpop.f32.mrf.mxu0 }
 0x8d3   : > { %14657 = vst [vmem:[#allocation96_spill] sm:$0xff] %v11569_v22  ;;  %v11692_v22 = vmul.f32 0.5, %v11623_v7 }
 0x8d4   : > { %v11571_v44 = vpop.f32.mrf.mxu0 }
 0x8d5   : > { %14658 = vst [vmem:[#allocation97_spill] sm:$0xff] %v11571_v44  ;;  %v3841_v44 = vmul.f32 0.5, %v11469_v37 }
 0x8d6   : > { %v11573_v34 = vpop.f32.mrf.mxu0 }
 0x8d7   : > { %14659 = vst [vmem:[#allocation98_spill] sm:$0xff] %v11573_v34  ;;  %v11686_v34 = vld [vmem:[#allocation2 + $0x28] sm:$0xff] }
 0x8d8   : > { %v11575_v6 = vpop.f32.mrf.mxu0  ;;  %v11695_v28 = vmul.f32 0.5, %v11686_v34 }
 0x8d9   : > { %14660 = vst [vmem:[#allocation99_spill] sm:$0xff] %v11575_v6  ;;  %v11667_v6 = vpop.permute.xlu0 %3962 }
 0x8da   : > { %v11577_v61 = vpop.f32.mrf.mxu0 }
 0x8db   : > { %14661 = vst [vmem:[#allocation100_spill] sm:$0xff] %v11577_v61  ;;  %v11669_v61 = vld [vmem:[#allocation2] sm:$0xff] }
 0x8dc   : > { %v8583_v57 = vpop.f32.mrf.mxu0 }
 0x8dd   : > { %v11581_v32 = vsel %vm768_vm3, %v8583_v57, -1e+30 }
 0x8de   : > { %3406 = vmax.xlane.f32.xlu1 %v11581_v32  ;;  %v3309_v42 = vpop.f32.mrf.mxu0 }
 0x8df   : > { %v11586_v13 = vsel %vm768_vm3, %v3309_v42, -1e+30 }
 0x8e0   : > { %3404 = vmax.xlane.f32.xlu0 %v11586_v13  ;;  %v8586_v63 = vpop.f32.mrf.mxu0 }
 0x8e1   : > { %v11591_v14 = vsel %vm768_vm3, %v8586_v63, -1e+30 }
 0x8e2   : > { %v3319_v5 = vpop.f32.mrf.mxu0 }
 0x8e3   : > { %v11595_v30 = vsel %vm768_vm3, %v3319_v5, -1e+30 }
 0x8e4   : > { %3410 = vmax.xlane.f32.xlu0 %v11591_v14  ;;  %3408 = vmax.xlane.f32.xlu1 %v11595_v30  ;;  %v8589_v50 = vpop.f32.mrf.mxu0 }
 0x8e5   : > { %v11601_v49 = vsel %vm768_vm3, %v8589_v50, -1e+30 }
 0x8e6   : > { %v3329_v27 = vpop.f32.mrf.mxu0 }
 0x8e7   : > { %v11606_v9 = vsel %vm768_vm3, %v3329_v27, -1e+30 }
 0x8e8   : > { %3414 = vmax.xlane.f32.xlu1 %v11601_v49  ;;  %v8592_v60 = vpop.f32.mrf.mxu0 }
 0x8e9   : > { %v11616_v0 = vsel %vm768_vm3, %v8592_v60, -1e+30 }
 0x8ea   : > { %v3339_v18 = vpop.f32.mrf.mxu0 }
 0x8eb   : > { %v11610_v51 = vsel %vm768_vm3, %v3339_v18, -1e+30 }
 0x8ec   : > { %3412 = vmax.xlane.f32.xlu1 %v11606_v9  ;;  %3416 = vmax.xlane.f32.xlu0 %v11610_v51  ;;  %v8595_v53 = vpop.f32.mrf.mxu0 }
 0x8ed   : > { %v11634_v50 = vsel %vm768_vm3, %v8595_v53, -1e+30 }
 0x8ee   : > { %v3349_v26 = vpop.f32.mrf.mxu0 }
 0x8ef   : > { %v11644_v18 = vsel %vm768_vm3, %v3349_v26, -1e+30 }
 0x8f0   : > { %3418 = vmax.xlane.f32.xlu1 %v11616_v0  ;;  %v8598_v24 = vpop.f32.mrf.mxu0 }
 0x8f1   : > { %v11654_v53 = vsel %vm768_vm3, %v8598_v24, -1e+30  ;;  %v11673_v24 = vpop.permute.xlu0 %3960 }
 0x8f2   : > { %v3359_v57 = vpop.f32.mrf.mxu0 }
 0x8f3   : > { %v11629_v63 = vsel %vm768_vm3, %v3359_v57, -1e+30 }
 0x8f4   : > { %v8601_v42 = vpop.f32.mrf.mxu0 }
 0x8f5   : > { %v11638_v27 = vsel %vm768_vm3, %v8601_v42, -1e+30  ;;  %v11688_v15 = vpop.permute.xlu0 %3956 }
 0x8f6   : > { %v3369_v5 = vpop.f32.mrf.mxu0 }
 0x8f7   : > { %v11659_v42 = vsel %vm768_vm3, %v3369_v5, -1e+30  ;;  %v11676_v5 = vmul.f32 0.5, %v11619_v55 }
 0x8f8   : > { %v8604_v60 = vpop.f32.mrf.mxu0 }
 0x8f9   : > { %v11648_v57 = vsel %vm768_vm3, %v8604_v60, -1e+30 }
 0x8fa   : > { %v3379_v26 = vpop.f32.mrf.mxu0 }
 0x8fb   : > { %v11664_v60 = vsel %vm768_vm3, %v3379_v26, -1e+30  ;;  %v11681_v26 = vmul.f32 0.5, %v11669_v61 }
 0x901   : > { %3936 = vrot.lane.b32.xlu1 %v11619_v55, %s9845_s10 }
 0x902   : > { %3938 = vrot.lane.b32.xlu0 %v11623_v7, %s9845_s10 }
 0x921   : > { %3424 = vmax.xlane.f32.xlu0 %v11629_v63 }
 0x925   : > { %3422 = vmax.xlane.f32.xlu1 %v11634_v50  ;;  %3430 = vmax.xlane.f32.xlu0 %v11638_v27 }
 0x929   : > { %3420 = vmax.xlane.f32.xlu1 %v11644_v18  ;;  %3434 = vmax.xlane.f32.xlu0 %v11648_v57 }
 0x92d   : > { %3426 = vmax.xlane.f32.xlu1 %v11654_v53 }
 0x931   : > { %3428 = vmax.xlane.f32.xlu1 %v11659_v42 }
 0x935   : > { %3432 = vmax.xlane.f32.xlu1 %v11664_v60 }
 0x93f   : > { %3934 = vrot.lane.b32.xlu0 %v11669_v61, %s9845_s10 }
 0x943   : > { %3888 = vrot.lane.b32.xlu0 %v11676_v5, %s9846_s11 }
 0x946   : > { %3886 = vrot.lane.b32.xlu1 %v11681_v26, %s9846_s11 }
 0x947   : > { %3892 = vrot.lane.b32.xlu0 %v3841_v44, %s9846_s11  ;;  %v11708_v44 = vpop.permute.xlu0 %3952 }
 0x94a   : > { %3890 = vrot.lane.b32.xlu1 %v11692_v22, %s9846_s11 }
 0x94b   : > { %3896 = vrot.lane.b32.xlu0 %v11695_v28, %s9846_s11  ;;  %v11735_v46 = vpop.permute.xlu0 %3948 }
 0x94e   : > { %3894 = vrot.lane.b32.xlu1 %v11706_v21, %s9846_s11 }
 0x94f   : > { %3900 = vrot.lane.b32.xlu0 %v11711_v52, %s9846_s11  ;;  %v11758_v41 = vpop.permute.xlu0 %3944  ;;  %v9789_v52 = vld [vmem:[#allocation2 + $0x60] sm:$0xff] }
 0x952   : > { %3898 = vrot.lane.b32.xlu1 %v11722_v16, %s9846_s11 }
 0x953   : > { %3904 = vrot.lane.b32.xlu0 %v11727_v23, %s9846_s11  ;;  %v11783_v38 = vpop.permute.xlu0 %3942 }
 0x956   : > { %3902 = vrot.lane.b32.xlu1 %v11740_v17, %s9846_s11  ;;  %v9788_v17 = vld [vmem:[#allocation2 + $0x50] sm:$0xff] }
 0x957   : > { %3908 = vrot.lane.b32.xlu0 %v11743_v12, %s9846_s11  ;;  %v11795_v3 = vpop.permute.xlu0 %3940 }
 0x95a   : > { %3906 = vrot.lane.b32.xlu1 %v11756_v36, %s9846_s11  ;;  %v9787_v36 = vld [vmem:[#allocation2 + $0x70] sm:$0xff] }
 0x95b   : > { %3912 = vrot.lane.b32.xlu0 %v11761_v47, %s9846_s11 }
 0x95e   : > { %3910 = vrot.lane.b32.xlu1 %v11772_v48, %s9846_s11 }
 0x95f   : > { %3916 = vrot.lane.b32.xlu0 %v11777_v33, %s9846_s11 }
 0x962   : > { %3914 = vrot.lane.b32.xlu1 %v11788_v59, %s9846_s11 }
 0x963   : > { %4329 = vrot.lane.b32.xlu0 %v9784_v62, %s9847_s12 }
 0x966   : > { %4333 = vrot.lane.b32.xlu1 %v9785_v58, %s9847_s12 }
 0x967   : > { %4325 = vrot.lane.b32.xlu0 %v9786_v2, %s9847_s12  ;;  %v3407_v33 = vpop.xlane.xlu1 %3406 }
 0x968   : > { %v3437_v48 = vsub.f32 %v11581_v32, %v3407_v33  ;;  %v9790_v33 = vld [vmem:[#allocation2 + $0x40] sm:$0xff] }
 0x969   : > { %v3405_v47 = vpop.xlane.xlu0 %3404 }
 0x96a   : > { %v3436_v59 = vsub.f32 %v11586_v13, %v3405_v47  ;;  %4331 = vrot.lane.b32.xlu1 %v9787_v36, %s9847_s12  ;;  %v3454_v12 = vmul.f32 1.442695, %v3437_v48  ;;  %v9793_v13 = vld [vmem:[#allocation2 + $0x38] sm:$0xff] }
 0x96b   : > { %4323 = vrot.lane.b32.xlu0 %v9788_v17, %s9847_s12  ;;  %v9791_v17 = vld [vmem:[#allocation2 + $0x48] sm:$0xff] }
 0x96c   : > { %v3452_v62 = vmul.f32 1.442695, %v3436_v59  ;;  %v9792_v59 = vld [vmem:[#allocation2 + $0x30] sm:$0xff] }
 0x96d   : > { %v3411_v23 = vpop.xlane.xlu0 %3410  ;;  %v3409_v16 = vpop.xlane.xlu1 %3408 }
 0x96e   : > { %9355 = vpow2.f32 %v3452_v62  ;;  %v3439_v58 = vsub.f32 %v11591_v14, %v3411_v23  ;;  %v3438_v2 = vsub.f32 %v11595_v30, %v3409_v16  ;;  %4327 = vrot.lane.b32.xlu1 %v9789_v52, %s9847_s12  ;;  %v9794_v14 = vld [vmem:[#allocation2 + $0x20] sm:$0xff] }
 0x96f   : > { %9357 = vpow2.f32 %v3454_v12  ;;  %4319 = vrot.lane.b32.xlu0 %v9790_v33, %s9847_s12 }
 0x970   : > { %v3458_v47 = vmul.f32 1.442695, %v3439_v58  ;;  %v3456_v48 = vmul.f32 1.442695, %v3438_v2 }
 0x971   : > { %v3415_v36 = vpop.xlane.xlu1 %3414 }
 0x972   : > { %9359 = vpow2.f32 %v3458_v47  ;;  %4321 = vrot.lane.b32.xlu1 %v9791_v17, %s9847_s12  ;;  %v3441_v23 = vsub.f32 %v11601_v49, %v3415_v36  ;;  %v9795_v47 = vld [vmem:[#allocation2 + $0x28] sm:$0xff] }
 0x973   : > { %9361 = vpow2.f32 %v3456_v48  ;;  %4315 = vrot.lane.b32.xlu0 %v9792_v59, %s9847_s12 }
 0x974   : > { %v3462_v30 = vmul.f32 1.442695, %v3441_v23 }
 0x975   : > { %v3417_v16 = vpop.xlane.xlu0 %3416  ;;  %v3413_v32 = vpop.xlane.xlu1 %3412 }
 0x976   : > { %v3442_v12 = vsub.f32 %v11610_v51, %v3417_v16  ;;  %v3440_v52 = vsub.f32 %v11606_v9, %v3413_v32  ;;  %4317 = vrot.lane.b32.xlu1 %v9793_v13, %s9847_s12 }
 0x977   : > { %4311 = vrot.lane.b32.xlu0 %v9794_v14, %s9847_s12 }
 0x978   : > { %v3460_v62 = vmul.f32 1.442695, %v3440_v52  ;;  %v3464_v58 = vmul.f32 1.442695, %v3442_v12 }
 0x979   : > { %v3419_v2 = vpop.xlane.xlu1 %3418 }
 0x97a   : > { %v3443_v33 = vsub.f32 %v11616_v0, %v3419_v2  ;;  %4313 = vrot.lane.b32.xlu1 %v9795_v47, %s9847_s12  ;;  %9363 = vpow2.f32 %v3460_v62 }
 0x97b   : > { %v11816_v49 = vpop.eup %9355  ;;  %4307 = vrot.lane.b32.xlu0 %v11623_v7, %s9847_s12  ;;  %9365 = vpow2.f32 %v3462_v30 }
 0x97c   : > { %14672 = vst [vmem:[#allocation111_spill] sm:$0xff] %v11816_v49  ;;  %v11820_v9 = vpop.eup %9357  ;;  %v3466_v51 = vmul.f32 1.442695, %v3443_v33  ;;  %8637 = vmatprep.mubr.f32.mxu1 %v11816_v49  ;;  %9367 = vpow2.f32 %v3464_v58 }
 0x97d   : > { %14673 = vst [vmem:[#allocation112_spill] sm:$0xff] %v11820_v9  ;;  %8638 = vmatmul.mubr.f32.vlgmr.msra.gmra.mxu1 %v11820_v9  ;;  %v9798_v9 = vld [vmem:[#allocation2 + $0x58] sm:$0xff] }
 0x97e   : > { %9369 = vpow2.f32 %v3466_v51  ;;  %8662 = vmatpush3.xpose.msk.msra.mxu1 %vm866_vm2, %v11543_v29  ;;  %4309 = vrot.lane.b32.xlu1 %v11469_v37, %s9847_s12 }
 0x97f   : > { %v11828_v0 = vpop.eup %9359  ;;  %8663 = vmatprep.subr.msk.mxu1 %vm866_vm2, %v11667_v6  ;;  %4303 = vrot.lane.b32.xlu0 %v11669_v61, %s9847_s12 }
 0x980   : > { %14674 = vst [vmem:[#allocation113_spill] sm:$0xff] %v11828_v0  ;;  %v11834_v48 = vpop.eup %9361 }
 0x981   : > { %14675 = vst [vmem:[#allocation114_spill] sm:$0xff] %v11834_v48  ;;  %8640 = vmatprep.mubr.f32.mxu1 %v11834_v48 }
 0x982   : > { %8641 = vmatmul.mubr.f32.gmra.mxu1 %v11828_v0  ;;  %4305 = vrot.lane.b32.xlu1 %v11619_v55, %s9847_s12 }
 0x983   : > { %8664 = vmatpush3.xpose.msk.msra.mxu1 %vm866_vm2, %v11667_v6  ;;  %4749 = vrot.lane.b32.xlu0 %v11779_v19, %s9848_s13 }
 0x984   : > { %8665 = vmatprep.subr.msk.mxu1 %vm866_vm2, %v11673_v24 }
 0x986   : > { %4751 = vrot.lane.b32.xlu1 %v11767_v20, %s9848_s13 }
 0x987   : > { %8666 = vmatpush3.xpose.msk.msra.mxu1 %vm866_vm2, %v11673_v24  ;;  %4747 = vrot.lane.b32.xlu0 %v11749_v4, %s9848_s13  ;;  %v11852_v29 = vpop.eup %9363 }
 0x988   : > { %14676 = vst [vmem:[#allocation115_spill] sm:$0xff] %v11852_v29  ;;  %8667 = vmatprep.subr.msk.mxu1 %vm866_vm2, %v11724_v45  ;;  %v11856_v6 = vpop.eup %9365  ;;  %8643 = vmatprep.mubr.f32.mxu1 %v11852_v29 }
 0x989   : > { %14677 = vst [vmem:[#allocation116_spill] sm:$0xff] %v11856_v6  ;;  %v11859_v36 = vpop.eup %9367  ;;  %8644 = vmatmul.mubr.f32.gmra.mxu1 %v11856_v6 }
 0x98a   : > { %14678 = vst [vmem:[#allocation117_spill] sm:$0xff] %v11859_v36  ;;  %4745 = vrot.lane.b32.xlu1 %v11763_v35, %s9848_s13  ;;  %8646 = vmatprep.mubr.f32.mxu1 %v11859_v36 }
 0x98b   : > { %v11864_v24 = vpop.eup %9369  ;;  %8668 = vmatpush3.xpose.msk.msra.mxu1 %vm866_vm2, %v11724_v45  ;;  %4743 = vrot.lane.b32.xlu0 %v11733_v40, %s9848_s13 }
 0x98c   : > { %14679 = vst [vmem:[#allocation118_spill] sm:$0xff] %v11864_v24  ;;  %8669 = vmatprep.subr.msk.mxu1 %vm866_vm2, %v11688_v15 }
 0x98d   : > { %8647 = vmatmul.mubr.f32.gmra.mxu1 %v11864_v24 }
 0x98e   : > { %4741 = vrot.lane.b32.xlu1 %v11745_v54, %s9848_s13 }
 0x98f   : > { %8670 = vmatpush3.xpose.msk.msra.mxu1 %vm866_vm2, %v11688_v15  ;;  %4739 = vrot.lane.b32.xlu0 %v11717_v43, %s9848_s13 }
 0x990   : > { %8671 = vmatprep.subr.msk.mxu1 %vm866_vm2, %v11751_v11 }
 0x992   : > { %4737 = vrot.lane.b32.xlu1 %v11729_v39, %s9848_s13 }
 0x993   : > { %8672 = vmatpush3.xpose.msk.msra.mxu1 %vm866_vm2, %v11751_v11  ;;  %4735 = vrot.lane.b32.xlu0 %v11701_v10, %s9848_s13  ;;  %v3937_v11 = vpop.permute.xlu1 %3936 }
 0x994   : > { %8673 = vmatprep.subr.msk.mxu1 %vm866_vm2, %v11708_v44 }
 0x996   : > { %4733 = vrot.lane.b32.xlu1 %v11713_v31, %s9848_s13 }
 0x997   : > { %8674 = vmatpush3.xpose.msk.msra.mxu1 %vm866_vm2, %v11708_v44  ;;  %4731 = vrot.lane.b32.xlu0 %v11686_v34, %s9848_s13 }
 0x998   : > { %8675 = vmatprep.subr.msk.mxu1 %vm866_vm2, %v11774_v56 }
 0x99b   : > { %8676 = vmatpush3.xpose.msk.msra.mxu1 %vm866_vm2, %v11774_v56  ;;  %4729 = vrot.lane.b32.xlu0 %v11697_v8, %s9848_s13  ;;  %v3939_v56 = vpop.permute.xlu0 %3938 }
 0x99c   : > { %8677 = vmatprep.subr.msk.mxu1 %vm866_vm2, %v11735_v46 }
 0x99f   : > { %8678 = vmatpush3.xpose.msk.msra.mxu1 %vm866_vm2, %v11735_v46  ;;  %4727 = vrot.lane.b32.xlu0 %v11469_v37, %s9848_s13 }
 0x9a0   : > { %8679 = vmatprep.subr.msk.mxu1 %vm866_vm2, %v11792_v25 }
 0x9a3   : > { %8680 = vmatpush3.xpose.msk.msra.mxu1 %vm866_vm2, %v11792_v25 }
 0x9a4   : > { %8681 = vmatprep.subr.msk.mxu1 %vm866_vm2, %v11758_v41 }
 0x9a7   : > { %8682 = vmatpush3.xpose.msk.msra.mxu1 %vm866_vm2, %v11758_v41 }
 0x9a8   : > { %8683 = vmatprep.subr.msk.mxu1 %vm866_vm2, %v11783_v38 }
 0x9aa   : > { %v3425_v46 = vpop.xlane.xlu0 %3424 }
 0x9ab   : > { %8684 = vmatpush3.xpose.msk.msra.mxu1 %vm866_vm2, %v11783_v38  ;;  %v3446_v45 = vsub.f32 %v11629_v63, %v3425_v46 }
 0x9ac   : > { %8685 = vmatprep.subr.msk.mxu1 %vm866_vm2, %v11795_v3 }
 0x9ad   : > { %v3472_v23 = vmul.f32 1.442695, %v3446_v45 }
 0x9ae   : > { %v3431_v37 = vpop.xlane.xlu0 %3430  ;;  %v3423_v25 = vpop.xlane.xlu1 %3422 }
 0x9af   : > { %8686 = vmatpush3.xpose.msk.msra.mxu1 %vm866_vm2, %v11795_v3  ;;  %v3445_v41 = vsub.f32 %v11634_v50, %v3423_v25  ;;  %v3449_v63 = vsub.f32 %v11638_v27, %v3431_v37 }
 0x9b0   : > { %8687 = vmatprep.subr.msk.mxu1 %vm866_vm2, %v3939_v56 }
 0x9b1   : > { %v3470_v17 = vmul.f32 1.442695, %v3445_v41  ;;  %v3478_v13 = vmul.f32 1.442695, %v3449_v63 }
 0x9b2   : > { %v3435_v15 = vpop.xlane.xlu0 %3434  ;;  %v3421_v44 = vpop.xlane.xlu1 %3420 }
 0x9b3   : > { %8688 = vmatpush3.xpose.msk.msra.mxu1 %vm866_vm2, %v3939_v56  ;;  %v3444_v38 = vsub.f32 %v11644_v18, %v3421_v44  ;;  %v3451_v14 = vsub.f32 %v11648_v57, %v3435_v15 }
 0x9b4   : > { %8689 = vmatprep.subr.msk.mxu1 %vm866_vm2, %v3937_v11 }
 0x9b5   : > { %v3468_v59 = vmul.f32 1.442695, %v3444_v38  ;;  %v3482_v27 = vmul.f32 1.442695, %v3451_v14 }
 0x9b6   : > { %v3935_v16 = vpop.permute.xlu0 %3934  ;;  %v3427_v32 = vpop.xlane.xlu1 %3426 }
 0x9b7   : > { %8690 = vmatpush3.xpose.msk.msra.mxu1 %vm866_vm2, %v3937_v11  ;;  %v3447_v3 = vsub.f32 %v11654_v53, %v3427_v32  ;;  %9371 = vpow2.f32 %v3468_v59 }
 0x9b8   : > { %8691 = vmatprep.subr.msk.mxu1 %vm866_vm2, %v3935_v16  ;;  %9373 = vpow2.f32 %v3470_v17 }
 0x9b9   : > { %v3474_v50 = vmul.f32 1.442695, %v3447_v3  ;;  %9375 = vpow2.f32 %v3472_v23 }
 0x9ba   : > { %v3889_v18 = vpop.permute.xlu0 %3888  ;;  %v3429_v12 = vpop.xlane.xlu1 %3428 }
 0x9bb   : > { %9377 = vpow2.f32 %v3474_v50  ;;  %8692 = vmatpush3.xpose.msk.msra.mxu1 %vm866_vm2, %v3935_v16  ;;  %v3448_v52 = vsub.f32 %v11659_v42, %v3429_v12 }
 0x9bd   : > { %v3476_v30 = vmul.f32 1.442695, %v3448_v52 }
 0x9be   : > { %v3893_v53 = vpop.permute.xlu0 %3892  ;;  %v3433_v62 = vpop.xlane.xlu1 %3432 }
 0x9bf   : > { %9379 = vpow2.f32 %v3476_v30  ;;  %v3450_v58 = vsub.f32 %v11664_v60, %v3433_v62 }
 0x9c0   : > { %9381 = vpow2.f32 %v3478_v13 }
 0x9c1   : > { %v3480_v2 = vmul.f32 1.442695, %v3450_v58 }
 0x9c2   : > { %v3897_v33 = vpop.permute.xlu0 %3896  ;;  %v3887_v47 = vpop.permute.xlu1 %3886 }
 0x9c3   : > { %9383 = vpow2.f32 %v3480_v2 }
 0x9c4   : > { %v11938_v51 = vpop.eup %9371  ;;  %9385 = vpow2.f32 %v3482_v27 }
 0x9c5   : > { %14680 = vst [vmem:[#allocation119_spill] sm:$0xff] %v11938_v51  ;;  %v11940_v56 = vpop.eup %9373  ;;  %8649 = vmatprep.mubr.f32.mxu1 %v11938_v51 }
 0x9c6   : > { %14681 = vst [vmem:[#allocation120_spill] sm:$0xff] %v11940_v56  ;;  %v3901_v57 = vpop.permute.xlu0 %3900  ;;  %v3891_v42 = vpop.permute.xlu1 %3890  ;;  %8650 = vmatmul.mubr.f32.gmra.mxu1 %v11940_v56 }
 0x9c7   : > { %v11943_v11 = vpop.eup %9375 }
 0x9c8   : > { %14682 = vst [vmem:[#allocation121_spill] sm:$0xff] %v11943_v11  ;;  %v11946_v60 = vpop.eup %9377  ;;  %8652 = vmatprep.mubr.f32.mxu1 %v11943_v11 }
 0x9c9   : > { %14683 = vst [vmem:[#allocation122_spill] sm:$0xff] %v11946_v60 }
 0x9ca   : > { %v3905_v46 = vpop.permute.xlu0 %3904  ;;  %v3895_v37 = vpop.permute.xlu1 %3894  ;;  %8653 = vmatmul.mubr.f32.gmra.mxu1 %v11946_v60 }
 0x9cc   : > { %v11950_v25 = vpop.eup %9379 }
 0x9cd   : > { %14684 = vst [vmem:[#allocation123_spill] sm:$0xff] %v11950_v25  ;;  %8655 = vmatprep.mubr.f32.mxu1 %v11950_v25  ;;  %v11953_v41 = vpop.eup %9381  ;;  %v14712_v25 = vld [vmem:[#allocation109_spill] sm:$0xff] }
 0x9ce   : > { %14685 = vst [vmem:[#allocation124_spill] sm:$0xff] %v11953_v41  ;;  %v3909_v45 = vpop.permute.xlu0 %3908  ;;  %v3899_v15 = vpop.permute.xlu1 %3898  ;;  %8656 = vmatmul.mubr.f32.gmra.mxu1 %v11953_v41  ;;  %v14711_v41 = vld [vmem:[#allocation108_spill] sm:$0xff] }
 0x9d0   : > { %v11956_v44 = vpop.eup %9383 }
 0x9d1   : > { %14686 = vst [vmem:[#allocation125_spill] sm:$0xff] %v11956_v44  ;;  %8658 = vmatprep.mubr.f32.mxu1 %v11956_v44  ;;  %v11959_v38 = vpop.eup %9385  ;;  %v14709_v44 = vld [vmem:[#allocation106_spill] sm:$0xff] }
 0x9d2   : > { %14687 = vst [vmem:[#allocation126_spill] sm:$0xff] %v11959_v38  ;;  %v3913_v17 = vpop.permute.xlu0 %3912  ;;  %v3903_v59 = vpop.permute.xlu1 %3902  ;;  %8659 = vmatmul.mubr.f32.gmra.mxu1 %v11959_v38 }
 0x9d3   : > { %8693 = vmatprep.mubr.msk.f32.mxu1 %vm866_vm2, %v3887_v47 }
 0x9d6   : > { %v3917_v23 = vpop.permute.xlu0 %3916  ;;  %v3907_v16 = vpop.permute.xlu1 %3906  ;;  %8694 = vmatmul.mubr.msk.f32.vlgmr.msra.gmra.mxu1 %vm866_vm2, %v3889_v18 }
 0x9d7   : > { %8696 = vmatprep.mubr.msk.f32.mxu1 %vm866_vm2, %v3891_v42 }
 0x9da   : > { %v4330_v32 = vpop.permute.xlu0 %4329  ;;  %v3911_v3 = vpop.permute.xlu1 %3910  ;;  %8697 = vmatmul.mubr.msk.f32.gmra.mxu1 %vm866_vm2, %v3893_v53 }
 0x9db   : > { %8699 = vmatprep.mubr.msk.f32.mxu1 %vm866_vm2, %v3895_v37 }
 0x9de   : > { %v4326_v63 = vpop.permute.xlu0 %4325  ;;  %v3915_v50 = vpop.permute.xlu1 %3914  ;;  %8700 = vmatmul.mubr.msk.f32.gmra.mxu1 %vm866_vm2, %v3897_v33 }
 0x9df   : > { %8702 = vmatprep.mubr.msk.f32.mxu1 %vm866_vm2, %v3899_v15 }
 0x9e2   : > { %v4334_v12 = vpop.permute.xlu1 %4333  ;;  %8703 = vmatmul.mubr.msk.f32.gmra.mxu1 %vm866_vm2, %v3901_v57  ;;  %v4324_v52 = vpop.permute.xlu0 %4323 }
 0x9e3   : > { %8717 = vmatprep.subr.mxu0 %v4334_v12  ;;  %8705 = vmatprep.mubr.msk.f32.mxu1 %vm866_vm2, %v3903_v59 }
 0x9e4   : > { %8718 = vmatpush3.msra.mxu0 %v4334_v12 }
 0x9e6   : > { %v4332_v18 = vpop.permute.xlu1 %4331  ;;  %8706 = vmatmul.mubr.msk.f32.gmra.mxu1 %vm866_vm2, %v3905_v46  ;;  %v4320_v13 = vpop.permute.xlu0 %4319 }
 0x9e7   : > { %8719 = vmatprep.subr.mxu0 %v4332_v18  ;;  %8708 = vmatprep.mubr.msk.f32.mxu1 %vm866_vm2, %v3907_v16 }
 0x9e8   : > { %8720 = vmatpush3.msra.mxu0 %v4332_v18 }
 0x9e9   : > { %8721 = vmatprep.subr.mxu0 %v4330_v32 }
 0x9ea   : > { %8722 = vmatpush3.msra.mxu0 %v4330_v32  ;;  %v4328_v14 = vpop.permute.xlu1 %4327  ;;  %8709 = vmatmul.mubr.msk.f32.gmra.mxu1 %vm866_vm2, %v3909_v45  ;;  %v4316_v53 = vpop.permute.xlu0 %4315 }
 0x9eb   : > { %8723 = vmatprep.subr.mxu0 %v4328_v14  ;;  %8711 = vmatprep.mubr.msk.f32.mxu1 %vm866_vm2, %v3911_v3 }
 0x9ec   : > { %8724 = vmatpush3.msra.mxu0 %v4328_v14 }
 0x9ed   : > { %8725 = vmatprep.subr.mxu0 %v4326_v63 }
 0x9ee   : > { %8726 = vmatpush3.msra.mxu0 %v4326_v63  ;;  %v4322_v30 = vpop.permute.xlu1 %4321  ;;  %8712 = vmatmul.mubr.msk.f32.gmra.mxu1 %vm866_vm2, %v3913_v17  ;;  %v4312_v58 = vpop.permute.xlu0 %4311 }
 0x9ef   : > { %8727 = vmatprep.subr.mxu0 %v4324_v52  ;;  %8714 = vmatprep.mubr.msk.f32.mxu1 %vm866_vm2, %v3915_v50 }
 0x9f0   : > { %8728 = vmatpush3.msra.mxu0 %v4324_v52 }
 0x9f1   : > { %8729 = vmatprep.subr.mxu0 %v4322_v30 }
 0x9f2   : > { %8730 = vmatpush3.msra.mxu0 %v4322_v30  ;;  %v4318_v62 = vpop.permute.xlu1 %4317  ;;  %8715 = vmatmul.mubr.msk.f32.gmra.mxu1 %vm866_vm2, %v3917_v23  ;;  %v4308_v33 = vpop.permute.xlu0 %4307 }
 0x9f3   : > { %8731 = vmatprep.subr.mxu0 %v4320_v13 }
 0x9f4   : > { %8732 = vmatpush3.msra.mxu0 %v4320_v13 }
 0x9f5   : > { %8733 = vmatprep.subr.mxu0 %v4318_v62 }
 0x9f6   : > { %8734 = vmatpush3.msra.mxu0 %v4318_v62  ;;  %v4314_v27 = vpop.permute.xlu1 %4313  ;;  %v4304_v57 = vpop.permute.xlu0 %4303 }
 0x9f7   : > { %8735 = vmatprep.subr.mxu0 %v4316_v53 }
 0x9f8   : > { %8736 = vmatpush3.msra.mxu0 %v4316_v53 }
 0x9f9   : > { %8737 = vmatprep.subr.mxu0 %v4314_v27 }
 0x9fa   : > { %8738 = vmatpush3.msra.mxu0 %v4314_v27  ;;  %v4310_v2 = vpop.permute.xlu1 %4309 }
 0x9fb   : > { %8739 = vmatprep.subr.mxu0 %v4312_v58 }
 0x9fc   : > { %8740 = vmatpush3.msra.mxu0 %v4312_v58 }
 0x9fd   : > { %8741 = vmatprep.subr.mxu0 %v4310_v2 }
 0x9fe   : > { %8742 = vmatpush3.msra.mxu0 %v4310_v2  ;;  %v4306_v47 = vpop.permute.xlu1 %4305 }
 0x9ff   : > { %8743 = vmatprep.subr.mxu0 %v4308_v33 }
 0xa00   : > { %8744 = vmatpush3.msra.mxu0 %v4308_v33 }
 0xa01   : > { %8745 = vmatprep.subr.mxu0 %v4306_v47 }
 0xa02   : > { %8746 = vmatpush3.msra.mxu0 %v4306_v47  ;;  %v11978_v42 = vpop.permute.xlu1 %4751 }
 0xa03   : > { %8747 = vmatprep.subr.mxu0 %v4304_v57 }
 0xa04   : > { %8748 = vmatpush3.msra.mxu0 %v4304_v57 }
 0xa05   : > { %8773 = vmatprep.subr.msk.mxu0 %vm866_vm2, %v11978_v42 }
 0xa3d   : > { %v11982_v46 = vpop.f32.mrf.mxu1 }
 0xa3e   : > { %14688 = vst [vmem:[#allocation127_spill] sm:$0xff] %v11982_v46 }
 0xa3f   : > { %v11984_v37 = vpop.f32.mrf.mxu1 }
 0xa40   : > { %14689 = vst [vmem:[#allocation128_spill] sm:$0xff] %v11984_v37  ;;  %v14707_v37 = vld [vmem:[#allocation104_spill] sm:$0xff] }
 0xa42   : > { %v11986_v45 = vpop.f32.mrf.mxu1 }
 0xa43   : > { %14690 = vst [vmem:[#allocation129_spill] sm:$0xff] %v11986_v45  ;;  %v14705_v45 = vld [vmem:[#allocation102_spill] sm:$0xff] }
 0xa44   : > { %v11988_v15 = vpop.f32.mrf.mxu1 }
 0xa45   : > { %14691 = vst [vmem:[#allocation130_spill] sm:$0xff] %v11988_v15  ;;  %v14704_v15 = vld [vmem:[#allocation101_spill] sm:$0xff] }
 0xa49   : > { %v11990_v17 = vpop.f32.mrf.mxu1 }
 0xa4a   : > { %14692 = vst [vmem:[#allocation131_spill] sm:$0xff] %v11990_v17  ;;  %v12104_v17 = vld [vmem:[#allocation2 + $0x18] sm:$0xff] }
 0xa4b   : > { %v11992_v59 = vpop.f32.mrf.mxu1 }
 0xa4c   : > { %14693 = vst [vmem:[#allocation132_spill] sm:$0xff] %v11992_v59 }
 0xa4d   : > { %v11994_v23 = vpop.f32.mrf.mxu1 }
 0xa4e   : > { %14694 = vst [vmem:[#allocation133_spill] sm:$0xff] %v11994_v23 }
 0xa4f   : > { %v11996_v16 = vpop.f32.mrf.mxu1 }
 0xa50   : > { %14695 = vst [vmem:[#allocation134_spill] sm:$0xff] %v11996_v16  ;;  %v12098_v16 = vpop.permute.xlu0 %4749 }
 0xa86   : > { %v11998_v32 = vpop.f32.mrf.mxu1 }
 0xa87   : > { %14696 = vst [vmem:[#allocation135_spill] sm:$0xff] %v11998_v32 }
 0xa88   : > { %v12000_v3 = vpop.f32.mrf.mxu1 }
 0xa89   : > { %14697 = vst [vmem:[#allocation136_spill] sm:$0xff] %v12000_v3 }
 0xa8a   : > { %v12002_v63 = vpop.f32.mrf.mxu1 }
 0xa8b   : > { %14698 = vst [vmem:[#allocation137_spill] sm:$0xff] %v12002_v63 }
 0xa8c   : > { %v12004_v50 = vpop.f32.mrf.mxu1 }
 0xa8d   : > { %14699 = vst [vmem:[#allocation138_spill] sm:$0xff] %v12004_v50 }
 0xa8e   : > { %v12006_v12 = vpop.f32.mrf.mxu1 }
 0xa8f   : > { %14700 = vst [vmem:[#allocation139_spill] sm:$0xff] %v12006_v12 }
 0xa90   : > { %v12008_v52 = vpop.f32.mrf.mxu1 }
 0xa91   : > { %14701 = vst [vmem:[#allocation140_spill] sm:$0xff] %v12008_v52 }
 0xa92   : > { %v12010_v18 = vpop.f32.mrf.mxu1 }
 0xa93   : > { %14702 = vst [vmem:[#allocation141_spill] sm:$0xff] %v12010_v18 }
 0xa94   : > { %v12012_v13 = vpop.f32.mrf.mxu1 }
 0xa95   : > { %14703 = vst [vmem:[#allocation142_spill] sm:$0xff] %v12012_v13 }
 0xa96   : > { %v8695_v14 = vpop.f32.mrf.mxu1 }
 0xa97   : > { %v12016_v30 = vsel %vm768_vm3, %v8695_v14, -1e+30 }
 0xa98   : > { %4193 = vmax.xlane.f32.xlu1 %v12016_v30  ;;  %v4096_v53 = vpop.f32.mrf.mxu1 }
 0xa99   : > { %v12021_v62 = vsel %vm768_vm3, %v4096_v53, -1e+30 }
 0xa9a   : > { %4191 = vmax.xlane.f32.xlu0 %v12021_v62  ;;  %v8698_v58 = vpop.f32.mrf.mxu1 }
 0xa9b   : > { %v12026_v2 = vsel %vm768_vm3, %v8698_v58, -1e+30 }
 0xa9c   : > { %v4106_v27 = vpop.f32.mrf.mxu1 }
 0xa9d   : > { %v12030_v33 = vsel %vm768_vm3, %v4106_v27, -1e+30 }
 0xa9e   : > { %4197 = vmax.xlane.f32.xlu0 %v12026_v2  ;;  %4195 = vmax.xlane.f32.xlu1 %v12030_v33  ;;  %v8701_v47 = vpop.f32.mrf.mxu1 }
 0xa9f   : > { %v12036_v14 = vsel %vm768_vm3, %v8701_v47, -1e+30 }
 0xaa0   : > { %v4116_v57 = vpop.f32.mrf.mxu1 }
 0xaa1   : > { %v12041_v58 = vsel %vm768_vm3, %v4116_v57, -1e+30 }
 0xaa2   : > { %4201 = vmax.xlane.f32.xlu1 %v12036_v14  ;;  %v8704_v53 = vpop.f32.mrf.mxu1 }
 0xaa3   : > { %v12051_v47 = vsel %vm768_vm3, %v8704_v53, -1e+30 }
 0xaa4   : > { %v4126_v13 = vpop.f32.mrf.mxu1 }
 0xaa5   : > { %v12045_v27 = vsel %vm768_vm3, %v4126_v13, -1e+30 }
 0xaa6   : > { %4199 = vmax.xlane.f32.xlu1 %v12041_v58  ;;  %4203 = vmax.xlane.f32.xlu0 %v12045_v27  ;;  %v8707_v57 = vpop.f32.mrf.mxu1 }
 0xaa7   : > { %v12065_v53 = vsel %vm768_vm3, %v8707_v57, -1e+30 }
 0xaa8   : > { %v4136_v18 = vpop.f32.mrf.mxu1 }
 0xaaa   : > { %4205 = vmax.xlane.f32.xlu1 %v12051_v47  ;;  %v8710_v13 = vpop.f32.mrf.mxu1 }
 0xaac   : > { %v4146_v12 = vpop.f32.mrf.mxu1 }
 0xaad   : > { %v12060_v63 = vsel %vm768_vm3, %v4146_v12, -1e+30  ;;  %v12075_v12 = vsel %vm768_vm3, %v4136_v18, -1e+30 }
 0xaae   : > { %v8713_v52 = vpop.f32.mrf.mxu1 }
 0xaaf   : > { %v12069_v32 = vsel %vm768_vm3, %v8713_v52, -1e+30  ;;  %v12085_v52 = vsel %vm768_vm3, %v8710_v13, -1e+30  ;;  %v12102_v13 = vpop.permute.xlu0 %4747 }
 0xab0   : > { %v4156_v50 = vpop.f32.mrf.mxu1 }
 0xab1   : > { %v12090_v57 = vsel %vm768_vm3, %v4156_v50, -1e+30  ;;  %v12108_v50 = vmul.f32 0.5, %v12104_v17 }
 0xab2   : > { %v8716_v3 = vpop.f32.mrf.mxu1 }
 0xab3   : > { %v12079_v23 = vsel %vm768_vm3, %v8716_v3, -1e+30 }
 0xab4   : > { %v4166_v18 = vpop.f32.mrf.mxu1 }
 0xab5   : > { %v12095_v3 = vsel %vm768_vm3, %v4166_v18, -1e+30  ;;  %v12111_v18 = vpop.permute.xlu0 %4743 }
 0xab9   : > { %v12116_v59 = vpop.permute.xlu0 %4739 }
 0xabb   : > { %4723 = vrot.lane.b32.xlu1 %v11619_v55, %s9848_s13 }
 0xabc   : > { %4725 = vrot.lane.b32.xlu0 %v11623_v7, %s9848_s13 }
 0xabd   : > { %v12123_v46 = vpop.permute.xlu0 %4735 }
 0xadb   : > { %4211 = vmax.xlane.f32.xlu0 %v12060_v63 }
 0xadf   : > { %4209 = vmax.xlane.f32.xlu1 %v12065_v53  ;;  %4217 = vmax.xlane.f32.xlu0 %v12069_v32 }
 0xae3   : > { %4207 = vmax.xlane.f32.xlu1 %v12075_v12  ;;  %4221 = vmax.xlane.f32.xlu0 %v12079_v23 }
 0xae7   : > { %4213 = vmax.xlane.f32.xlu1 %v12085_v52 }
 0xaeb   : > { %4215 = vmax.xlane.f32.xlu1 %v12090_v57 }
 0xaef   : > { %4219 = vmax.xlane.f32.xlu1 %v12095_v3 }
 0xaf9   : > { %4721 = vrot.lane.b32.xlu0 %v11669_v61, %s9848_s13 }
 0xafd   : > { %4675 = vrot.lane.b32.xlu0 %v11676_v5, %s9849_s14  ;;  %v12120_v5 = vpop.permute.xlu1 %4745 }
 0xb00   : > { %4673 = vrot.lane.b32.xlu1 %v11681_v26, %s9849_s14  ;;  %v14706_v26 = vld [vmem:[#allocation103_spill] sm:$0xff] }
 0xb01   : > { %4679 = vrot.lane.b32.xlu0 %v12108_v50, %s9849_s14  ;;  %v12127_v38 = vpop.permute.xlu1 %4741 }
 0xb04   : > { %4677 = vrot.lane.b32.xlu1 %v11692_v22, %s9849_s14  ;;  %v14708_v22 = vld [vmem:[#allocation105_spill] sm:$0xff] }
 0xb05   : > { %4683 = vrot.lane.b32.xlu0 %v11695_v28, %s9849_s14  ;;  %v12130_v28 = vpop.permute.xlu0 %4731 }
 0xb08   : > { %4681 = vrot.lane.b32.xlu1 %v11706_v21, %s9849_s14  ;;  %v14710_v21 = vld [vmem:[#allocation107_spill] sm:$0xff] }
 0xb09   : > { %4687 = vrot.lane.b32.xlu0 %v14704_v15, %s9849_s14  ;;  %v12134_v15 = vpop.permute.xlu1 %4737 }
 0xb0c   : > { %4685 = vrot.lane.b32.xlu1 %v14705_v45, %s9849_s14  ;;  %v12137_v45 = vpop.permute.xlu0 %4729 }
 0xb0d   : > { %4691 = vrot.lane.b32.xlu0 %v14706_v26, %s9849_s14  ;;  %v14713_v26 = vld [vmem:[#allocation110_spill] sm:$0xff] }
 0xb10   : > { %4689 = vrot.lane.b32.xlu1 %v14707_v37, %s9849_s14  ;;  %v12141_v37 = vpop.permute.xlu1 %4733 }
 0xb11   : > { %4695 = vrot.lane.b32.xlu0 %v14708_v22, %s9849_s14  ;;  %v12145_v22 = vpop.permute.xlu0 %4727 }
 0xb14   : > { %4693 = vrot.lane.b32.xlu1 %v14709_v44, %s9849_s14 }
 0xb15   : > { %4699 = vrot.lane.b32.xlu0 %v14710_v21, %s9849_s14 }
 0xb18   : > { %4697 = vrot.lane.b32.xlu1 %v14711_v41, %s9849_s14 }
 0xb19   : > { %4703 = vrot.lane.b32.xlu0 %v14712_v25, %s9849_s14 }
 0xb1c   : > { %4701 = vrot.lane.b32.xlu1 %v14713_v26, %s9849_s14 }
 0xb1d   : > { %5116 = vrot.lane.b32.xlu0 %v11749_v4, %s9850_s15 }
 0xb20   : > { %5120 = vrot.lane.b32.xlu1 %v11767_v20, %s9850_s15 }
 0xb21   : > { %5112 = vrot.lane.b32.xlu0 %v11733_v40, %s9850_s15  ;;  %v4194_v41 = vpop.xlane.xlu1 %4193 }
 0xb22   : > { %v4224_v44 = vsub.f32 %v12016_v30, %v4194_v41 }
 0xb23   : > { %v4192_v25 = vpop.xlane.xlu0 %4191 }
 0xb24   : > { %v4223_v21 = vsub.f32 %v12021_v62, %v4192_v25  ;;  %5118 = vrot.lane.b32.xlu1 %v11779_v19, %s9850_s15  ;;  %v4241_v26 = vmul.f32 1.442695, %v4224_v44 }
 0xb25   : > { %5110 = vrot.lane.b32.xlu0 %v11745_v54, %s9850_s15 }
 0xb26   : > { %v4239_v60 = vmul.f32 1.442695, %v4223_v21 }
 0xb27   : > { %v4198_v11 = vpop.xlane.xlu0 %4197  ;;  %v4196_v56 = vpop.xlane.xlu1 %4195 }
 0xb28   : > { %9387 = vpow2.f32 %v4239_v60  ;;  %v4226_v51 = vsub.f32 %v12026_v2, %v4198_v11  ;;  %v4225_v24 = vsub.f32 %v12030_v33, %v4196_v56  ;;  %5114 = vrot.lane.b32.xlu1 %v11763_v35, %s9850_s15 }
 0xb29   : > { %9389 = vpow2.f32 %v4241_v26  ;;  %5106 = vrot.lane.b32.xlu0 %v11729_v39, %s9850_s15 }
 0xb2a   : > { %v4245_v30 = vmul.f32 1.442695, %v4226_v51  ;;  %v4243_v62 = vmul.f32 1.442695, %v4225_v24 }
 0xb2b   : > { %v4202_v41 = vpop.xlane.xlu1 %4201 }
 0xb2c   : > { %9391 = vpow2.f32 %v4245_v30  ;;  %5108 = vrot.lane.b32.xlu1 %v11717_v43, %s9850_s15  ;;  %v4228_v56 = vsub.f32 %v12036_v14, %v4202_v41 }
 0xb2d   : > { %9393 = vpow2.f32 %v4243_v62  ;;  %5102 = vrot.lane.b32.xlu0 %v11713_v31, %s9850_s15 }
 0xb2e   : > { %v4249_v24 = vmul.f32 1.442695, %v4228_v56 }
 0xb2f   : > { %v4204_v11 = vpop.xlane.xlu0 %4203  ;;  %v4200_v60 = vpop.xlane.xlu1 %4199 }
 0xb30   : > { %v4229_v2 = vsub.f32 %v12045_v27, %v4204_v11  ;;  %v4227_v33 = vsub.f32 %v12041_v58, %v4200_v60  ;;  %5104 = vrot.lane.b32.xlu1 %v11701_v10, %s9850_s15 }
 0xb31   : > { %5098 = vrot.lane.b32.xlu0 %v11697_v8, %s9850_s15 }
 0xb32   : > { %v4247_v51 = vmul.f32 1.442695, %v4227_v33  ;;  %v4251_v44 = vmul.f32 1.442695, %v4229_v2 }
 0xb33   : > { %v4206_v25 = vpop.xlane.xlu1 %4205 }
 0xb34   : > { %v4230_v21 = vsub.f32 %v12051_v47, %v4206_v25  ;;  %5100 = vrot.lane.b32.xlu1 %v11686_v34, %s9850_s15  ;;  %9395 = vpow2.f32 %v4247_v51  ;;  %v9796_v47 = vld [vmem:[#allocation2 + $0x18] sm:$0xff] }
 0xb35   : > { %v12177_v14 = vpop.eup %9387  ;;  %5094 = vrot.lane.b32.xlu0 %v11623_v7, %s9850_s15  ;;  %9397 = vpow2.f32 %v4249_v24 }
 0xb36   : > { %14714 = vst [vmem:[#allocation101_spill] sm:$0xff] %v12177_v14  ;;  %v12181_v58 = vpop.eup %9389  ;;  %v4253_v27 = vmul.f32 1.442695, %v4230_v21  ;;  %8749 = vmatprep.mubr.f32.mxu0 %v12177_v14  ;;  %9399 = vpow2.f32 %v4251_v44 }
 0xb37   : > { %14715 = vst [vmem:[#allocation102_spill] sm:$0xff] %v12181_v58  ;;  %8750 = vmatmul.mubr.f32.vlgmr.msra.gmra.mxu0 %v12181_v58  ;;  %v9797_v58 = vld [vmem:[#allocation2 + $0x68] sm:$0xff] }
 0xb38   : > { %9401 = vpow2.f32 %v4253_v27  ;;  %8774 = vmatpush3.xpose.msk.msra.mxu0 %vm866_vm2, %v11978_v42  ;;  %5096 = vrot.lane.b32.xlu1 %v9796_v47, %s9850_s15 }
 0xb39   : > { %v12188_v26 = vpop.eup %9391  ;;  %8775 = vmatprep.subr.msk.mxu0 %vm866_vm2, %v12098_v16  ;;  %5090 = vrot.lane.b32.xlu0 %v11669_v61, %s9850_s15 }
 0xb3a   : > { %14716 = vst [vmem:[#allocation103_spill] sm:$0xff] %v12188_v26  ;;  %v12194_v7 = vpop.eup %9393 }
 0xb3b   : > { %14717 = vst [vmem:[#allocation104_spill] sm:$0xff] %v12194_v7  ;;  %8752 = vmatprep.mubr.f32.mxu0 %v12194_v7 }
 0xb3c   : > { %8753 = vmatmul.mubr.f32.gmra.mxu0 %v12188_v26  ;;  %5092 = vrot.lane.b32.xlu1 %v11619_v55, %s9850_s15 }
 0xb3d   : > { %8776 = vmatpush3.xpose.msk.msra.mxu0 %vm866_vm2, %v12098_v16  ;;  %5536 = vrot.lane.b32.xlu0 %v11779_v19, %s9851_s16 }
 0xb3e   : > { %8777 = vmatprep.subr.msk.mxu0 %vm866_vm2, %v12102_v13 }
 0xb40   : > { %5538 = vrot.lane.b32.xlu1 %v11767_v20, %s9851_s16 }
 0xb41   : > { %8778 = vmatpush3.xpose.msk.msra.mxu0 %vm866_vm2, %v12102_v13  ;;  %5534 = vrot.lane.b32.xlu0 %v11749_v4, %s9851_s16  ;;  %v12212_v61 = vpop.eup %9395  ;;  %v4724_v4 = vpop.permute.xlu1 %4723 }
 0xb42   : > { %14718 = vst [vmem:[#allocation105_spill] sm:$0xff] %v12212_v61  ;;  %8779 = vmatprep.subr.msk.mxu0 %vm866_vm2, %v12120_v5  ;;  %v12216_v55 = vpop.eup %9397  ;;  %8755 = vmatprep.mubr.f32.mxu0 %v12212_v61  ;;  %v12560_v61 = vld [vmem:[#allocation2 + $0x70] sm:$0xff] }
 0xb43   : > { %14719 = vst [vmem:[#allocation106_spill] sm:$0xff] %v12216_v55  ;;  %v12219_v19 = vpop.eup %9399  ;;  %8756 = vmatmul.mubr.f32.gmra.mxu0 %v12216_v55  ;;  %v12564_v55 = vld [vmem:[#allocation2 + $0x78] sm:$0xff]  ;;  %v12569_v29 = vmul.f32 0.5, %v12560_v61 }
 0xb44   : > { %14720 = vst [vmem:[#allocation107_spill] sm:$0xff] %v12219_v19  ;;  %5532 = vrot.lane.b32.xlu1 %v11763_v35, %s9851_s16  ;;  %8758 = vmatprep.mubr.f32.mxu0 %v12219_v19  ;;  %v4726_v35 = vpop.permute.xlu0 %4725  ;;  %v12574_v7 = vmul.f32 0.5, %v12564_v55 }
 0xb45   : > { %v12224_v20 = vpop.eup %9401  ;;  %8780 = vmatpush3.xpose.msk.msra.mxu0 %vm866_vm2, %v12120_v5  ;;  %5530 = vrot.lane.b32.xlu0 %v11733_v40, %s9851_s16  ;;  %14754 = vst [vmem:[#allocation173_spill] sm:$0xff] %v12569_v29 }
 0xb46   : > { %14721 = vst [vmem:[#allocation108_spill] sm:$0xff] %v12224_v20  ;;  %8781 = vmatprep.subr.msk.mxu0 %vm866_vm2, %v12111_v18 }
 0xb47   : > { %8759 = vmatmul.mubr.f32.gmra.mxu0 %v12224_v20 }
 0xb48   : > { %5528 = vrot.lane.b32.xlu1 %v11745_v54, %s9851_s16 }
 0xb49   : > { %8782 = vmatpush3.xpose.msk.msra.mxu0 %vm866_vm2, %v12111_v18  ;;  %5526 = vrot.lane.b32.xlu0 %v11717_v43, %s9851_s16 }
 0xb4a   : > { %8783 = vmatprep.subr.msk.mxu0 %vm866_vm2, %v12127_v38 }
 0xb4c   : > { %5524 = vrot.lane.b32.xlu1 %v11729_v39, %s9851_s16 }
 0xb4d   : > { %8784 = vmatpush3.xpose.msk.msra.mxu0 %vm866_vm2, %v12127_v38  ;;  %5522 = vrot.lane.b32.xlu0 %v11701_v10, %s9851_s16 }
 0xb4e   : > { %8785 = vmatprep.subr.msk.mxu0 %vm866_vm2, %v12116_v59 }
 0xb50   : > { %5520 = vrot.lane.b32.xlu1 %v11713_v31, %s9851_s16 }
 0xb51   : > { %8786 = vmatpush3.xpose.msk.msra.mxu0 %vm866_vm2, %v12116_v59  ;;  %5518 = vrot.lane.b32.xlu0 %v11686_v34, %s9851_s16 }
 0xb52   : > { %8787 = vmatprep.subr.msk.mxu0 %vm866_vm2, %v12134_v15 }
 0xb55   : > { %8788 = vmatpush3.xpose.msk.msra.mxu0 %vm866_vm2, %v12134_v15  ;;  %5516 = vrot.lane.b32.xlu0 %v11697_v8, %s9851_s16 }
 0xb56   : > { %8789 = vmatprep.subr.msk.mxu0 %vm866_vm2, %v12123_v46 }
 0xb59   : > { %8790 = vmatpush3.xpose.msk.msra.mxu0 %vm866_vm2, %v12123_v46  ;;  %5514 = vrot.lane.b32.xlu0 %v12104_v17, %s9851_s16 }
 0xb5a   : > { %8791 = vmatprep.subr.msk.mxu0 %vm866_vm2, %v12141_v37 }
 0xb5d   : > { %8792 = vmatpush3.xpose.msk.msra.mxu0 %vm866_vm2, %v12141_v37 }
 0xb5e   : > { %8793 = vmatprep.subr.msk.mxu0 %vm866_vm2, %v12130_v28 }
 0xb61   : > { %8794 = vmatpush3.xpose.msk.msra.mxu0 %vm866_vm2, %v12130_v28 }
 0xb62   : > { %8795 = vmatprep.subr.msk.mxu0 %vm866_vm2, %v12137_v45 }
 0xb64   : > { %v4212_v54 = vpop.xlane.xlu0 %4211 }
 0xb65   : > { %8796 = vmatpush3.xpose.msk.msra.mxu0 %vm866_vm2, %v12137_v45  ;;  %v4233_v31 = vsub.f32 %v12060_v63, %v4212_v54 }
 0xb66   : > { %8797 = vmatprep.subr.msk.mxu0 %vm866_vm2, %v12145_v22 }
 0xb67   : > { %v4259_v46 = vmul.f32 1.442695, %v4233_v31 }
 0xb68   : > { %v4218_v40 = vpop.xlane.xlu0 %4217  ;;  %v4210_v39 = vpop.xlane.xlu1 %4209 }
 0xb69   : > { %8798 = vmatpush3.xpose.msk.msra.mxu0 %vm866_vm2, %v12145_v22  ;;  %v4232_v43 = vsub.f32 %v12065_v53, %v4210_v39  ;;  %v4236_v63 = vsub.f32 %v12069_v32, %v4218_v40 }
 0xb6a   : > { %8799 = vmatprep.subr.msk.mxu0 %vm866_vm2, %v4726_v35 }
 0xb6b   : > { %v4257_v38 = vmul.f32 1.442695, %v4232_v43  ;;  %v4265_v28 = vmul.f32 1.442695, %v4236_v63 }
 0xb6c   : > { %v4222_v10 = vpop.xlane.xlu0 %4221  ;;  %v4208_v8 = vpop.xlane.xlu1 %4207 }
 0xb6d   : > { %8800 = vmatpush3.xpose.msk.msra.mxu0 %vm866_vm2, %v4726_v35  ;;  %v4231_v34 = vsub.f32 %v12075_v12, %v4208_v8  ;;  %v4238_v15 = vsub.f32 %v12079_v23, %v4222_v10 }
 0xb6e   : > { %8801 = vmatprep.subr.msk.mxu0 %vm866_vm2, %v4724_v4 }
 0xb6f   : > { %v4255_v42 = vmul.f32 1.442695, %v4231_v34  ;;  %v4269_v32 = vmul.f32 1.442695, %v4238_v15 }
 0xb70   : > { %v4722_v59 = vpop.permute.xlu0 %4721  ;;  %v4214_v16 = vpop.xlane.xlu1 %4213 }
 0xb71   : > { %8802 = vmatpush3.xpose.msk.msra.mxu0 %vm866_vm2, %v4724_v4  ;;  %v4234_v13 = vsub.f32 %v12085_v52, %v4214_v16  ;;  %9403 = vpow2.f32 %v4255_v42 }
 0xb72   : > { %8803 = vmatprep.subr.msk.mxu0 %vm866_vm2, %v4722_v59  ;;  %9405 = vpow2.f32 %v4257_v38 }
 0xb73   : > { %v4261_v53 = vmul.f32 1.442695, %v4234_v13  ;;  %9407 = vpow2.f32 %v4259_v46 }
 0xb74   : > { %v4676_v12 = vpop.permute.xlu0 %4675  ;;  %v4216_v18 = vpop.xlane.xlu1 %4215 }
 0xb75   : > { %9409 = vpow2.f32 %v4261_v53  ;;  %8804 = vmatpush3.xpose.msk.msra.mxu0 %vm866_vm2, %v4722_v59  ;;  %v4235_v5 = vsub.f32 %v12090_v57, %v4216_v18 }
 0xb77   : > { %v4263_v45 = vmul.f32 1.442695, %v4235_v5 }
 0xb78   : > { %v4680_v52 = vpop.permute.xlu0 %4679  ;;  %v4220_v37 = vpop.xlane.xlu1 %4219 }
 0xb79   : > { %9411 = vpow2.f32 %v4263_v45  ;;  %v4237_v22 = vsub.f32 %v12095_v3, %v4220_v37 }
 0xb7a   : > { %9413 = vpow2.f32 %v4265_v28 }
 0xb7b   : > { %v4267_v30 = vmul.f32 1.442695, %v4237_v22 }
 0xb7c   : > { %v4684_v62 = vpop.permute.xlu0 %4683  ;;  %v4674_v41 = vpop.permute.xlu1 %4673 }
 0xb7d   : > { %9415 = vpow2.f32 %v4267_v30 }
 0xb7e   : > { %v12298_v56 = vpop.eup %9403  ;;  %9417 = vpow2.f32 %v4269_v32 }
 0xb7f   : > { %14722 = vst [vmem:[#allocation109_spill] sm:$0xff] %v12298_v56  ;;  %v12300_v11 = vpop.eup %9405  ;;  %8761 = vmatprep.mubr.f32.mxu0 %v12298_v56 }
 0xb80   : > { %14723 = vst [vmem:[#allocation110_spill] sm:$0xff] %v12300_v11  ;;  %v4688_v23 = vpop.permute.xlu0 %4687  ;;  %v4678_v57 = vpop.permute.xlu1 %4677  ;;  %8762 = vmatmul.mubr.f32.gmra.mxu0 %v12300_v11  ;;  %v12546_v11 = vld [vmem:[#allocation2 + $0x68] sm:$0xff] }
 0xb81   : > { %v12303_v60 = vpop.eup %9407  ;;  %v12558_v36 = vmul.f32 0.5, %v12546_v11 }
 0xb82   : > { %14724 = vst [vmem:[#allocation143_spill] sm:$0xff] %v12303_v60  ;;  %v12306_v3 = vpop.eup %9409  ;;  %8764 = vmatprep.mubr.f32.mxu0 %v12303_v60  ;;  %v12542_v60 = vld [vmem:[#allocation2 + $0x60] sm:$0xff] }
 0xb83   : > { %14725 = vst [vmem:[#allocation144_spill] sm:$0xff] %v12306_v3  ;;  %v12553_v20 = vmul.f32 0.5, %v12542_v60 }
 0xb84   : > { %v4692_v2 = vpop.permute.xlu0 %4691  ;;  %v4682_v33 = vpop.permute.xlu1 %4681  ;;  %8765 = vmatmul.mubr.f32.gmra.mxu0 %v12306_v3 }
 0xb85   : > { %14753 = vst [vmem:[#allocation172_spill] sm:$0xff] %v12553_v20 }
 0xb86   : > { %v12310_v24 = vpop.eup %9411 }
 0xb87   : > { %14726 = vst [vmem:[#allocation145_spill] sm:$0xff] %v12310_v24  ;;  %8767 = vmatprep.mubr.f32.mxu0 %v12310_v24  ;;  %v12313_v51 = vpop.eup %9413 }
 0xb88   : > { %14727 = vst [vmem:[#allocation146_spill] sm:$0xff] %v12313_v51  ;;  %v4696_v44 = vpop.permute.xlu0 %4695  ;;  %v4686_v25 = vpop.permute.xlu1 %4685  ;;  %8768 = vmatmul.mubr.f32.gmra.mxu0 %v12313_v51 }
 0xb8a   : > { %v12316_v21 = vpop.eup %9415 }
 0xb8b   : > { %14728 = vst [vmem:[#allocation147_spill] sm:$0xff] %v12316_v21  ;;  %8770 = vmatprep.mubr.f32.mxu0 %v12316_v21  ;;  %v12319_v27 = vpop.eup %9417  ;;  %v12530_v21 = vld [vmem:[#allocation2 + $0x58] sm:$0xff] }
 0xb8c   : > { %14729 = vst [vmem:[#allocation148_spill] sm:$0xff] %v12319_v27  ;;  %v4700_v47 = vpop.permute.xlu0 %4699  ;;  %v4690_v35 = vpop.permute.xlu1 %4689  ;;  %8771 = vmatmul.mubr.f32.gmra.mxu0 %v12319_v27  ;;  %v12526_v27 = vld [vmem:[#allocation2 + $0x50] sm:$0xff]  ;;  %v12540_v3 = vmul.f32 0.5, %v12530_v21 }
 0xb8d   : > { %8805 = vmatprep.mubr.msk.f32.mxu0 %vm866_vm2, %v4674_v41  ;;  %v12537_v24 = vmul.f32 0.5, %v12526_v27 }
 0xb8f   : > { %14752 = vst [vmem:[#allocation171_spill] sm:$0xff] %v12537_v24 }
 0xb90   : > { %v4704_v4 = vpop.permute.xlu0 %4703  ;;  %v4694_v54 = vpop.permute.xlu1 %4693  ;;  %8806 = vmatmul.mubr.msk.f32.vlgmr.msra.gmra.mxu0 %vm866_vm2, %v4676_v12 }
 0xb91   : > { %8808 = vmatprep.mubr.msk.f32.mxu0 %vm866_vm2, %v4678_v57 }
 0xb94   : > { %v5117_v40 = vpop.permute.xlu0 %5116  ;;  %v4698_v39 = vpop.permute.xlu1 %4697  ;;  %8809 = vmatmul.mubr.msk.f32.gmra.mxu0 %vm866_vm2, %v4680_v52 }
 0xb95   : > { %8811 = vmatprep.mubr.msk.f32.mxu0 %vm866_vm2, %v4682_v33 }
 0xb98   : > { %v5113_v43 = vpop.permute.xlu0 %5112  ;;  %v4702_v31 = vpop.permute.xlu1 %4701  ;;  %8812 = vmatmul.mubr.msk.f32.gmra.mxu0 %vm866_vm2, %v4684_v62 }
 0xb99   : > { %8814 = vmatprep.mubr.msk.f32.mxu0 %vm866_vm2, %v4686_v25 }
 0xb9c   : > { %v5121_v10 = vpop.permute.xlu1 %5120  ;;  %8815 = vmatmul.mubr.msk.f32.gmra.mxu0 %vm866_vm2, %v4688_v23  ;;  %v5111_v8 = vpop.permute.xlu0 %5110 }
 0xb9d   : > { %8829 = vmatprep.subr.mxu1 %v5121_v10  ;;  %8817 = vmatprep.mubr.msk.f32.mxu0 %vm866_vm2, %v4690_v35 }
 0xb9e   : > { %8830 = vmatpush3.msra.mxu1 %v5121_v10 }
 0xba0   : > { %v5119_v34 = vpop.permute.xlu1 %5118  ;;  %8818 = vmatmul.mubr.msk.f32.gmra.mxu0 %vm866_vm2, %v4692_v2  ;;  %v5107_v38 = vpop.permute.xlu0 %5106 }
 0xba1   : > { %8831 = vmatprep.subr.mxu1 %v5119_v34  ;;  %8820 = vmatprep.mubr.msk.f32.mxu0 %vm866_vm2, %v4694_v54 }
 0xba2   : > { %8832 = vmatpush3.msra.mxu1 %v5119_v34 }
 0xba3   : > { %8833 = vmatprep.subr.mxu1 %v5117_v40 }
 0xba4   : > { %8834 = vmatpush3.msra.mxu1 %v5117_v40  ;;  %v5115_v42 = vpop.permute.xlu1 %5114  ;;  %8821 = vmatmul.mubr.msk.f32.gmra.mxu0 %vm866_vm2, %v4696_v44  ;;  %v5103_v59 = vpop.permute.xlu0 %5102 }
 0xba5   : > { %8835 = vmatprep.subr.mxu1 %v5115_v42  ;;  %8823 = vmatprep.mubr.msk.f32.mxu0 %vm866_vm2, %v4698_v39 }
 0xba6   : > { %8836 = vmatpush3.msra.mxu1 %v5115_v42 }
 0xba7   : > { %8837 = vmatprep.subr.mxu1 %v5113_v43 }
 0xba8   : > { %8838 = vmatpush3.msra.mxu1 %v5113_v43  ;;  %v5109_v46 = vpop.permute.xlu1 %5108  ;;  %8824 = vmatmul.mubr.msk.f32.gmra.mxu0 %vm866_vm2, %v4700_v47  ;;  %v5099_v13 = vpop.permute.xlu0 %5098 }
 0xba9   : > { %8839 = vmatprep.subr.mxu1 %v5111_v8  ;;  %8826 = vmatprep.mubr.msk.f32.mxu0 %vm866_vm2, %v4702_v31 }
 0xbaa   : > { %8840 = vmatpush3.msra.mxu1 %v5111_v8 }
 0xbab   : > { %8841 = vmatprep.subr.mxu1 %v5109_v46 }
 0xbac   : > { %8842 = vmatpush3.msra.mxu1 %v5109_v46  ;;  %v5105_v16 = vpop.permute.xlu1 %5104  ;;  %8827 = vmatmul.mubr.msk.f32.gmra.mxu0 %vm866_vm2, %v4704_v4  ;;  %v5095_v12 = vpop.permute.xlu0 %5094 }
 0xbad   : > { %8843 = vmatprep.subr.mxu1 %v5107_v38 }
 0xbae   : > { %8844 = vmatpush3.msra.mxu1 %v5107_v38 }
 0xbaf   : > { %8845 = vmatprep.subr.mxu1 %v5105_v16 }
 0xbb0   : > { %8846 = vmatpush3.msra.mxu1 %v5105_v16  ;;  %v5101_v63 = vpop.permute.xlu1 %5100  ;;  %v5091_v5 = vpop.permute.xlu0 %5090 }
 0xbb1   : > { %8847 = vmatprep.subr.mxu1 %v5103_v59 }
 0xbb2   : > { %8848 = vmatpush3.msra.mxu1 %v5103_v59 }
 0xbb3   : > { %8849 = vmatprep.subr.mxu1 %v5101_v63 }
 0xbb4   : > { %8850 = vmatpush3.msra.mxu1 %v5101_v63  ;;  %v5097_v53 = vpop.permute.xlu1 %5096  ;;  %v12414_v63 = vld [vmem:[#allocation2 + $0x8] sm:$0xff] }
 0xbb5   : > { %8851 = vmatprep.subr.mxu1 %v5099_v13 }
 0xbb6   : > { %8852 = vmatpush3.msra.mxu1 %v5099_v13 }
 0xbb7   : > { %8853 = vmatprep.subr.mxu1 %v5097_v53 }
 0xbb8   : > { %8854 = vmatpush3.msra.mxu1 %v5097_v53  ;;  %v5093_v18 = vpop.permute.xlu1 %5092  ;;  %v12418_v53 = vld [vmem:[#allocation2 + $0x10] sm:$0xff] }
 0xbb9   : > { %8855 = vmatprep.subr.mxu1 %v5095_v12 }
 0xbba   : > { %8856 = vmatpush3.msra.mxu1 %v5095_v12 }
 0xbbb   : > { %8857 = vmatprep.subr.mxu1 %v5093_v18 }
 0xbbc   : > { %8858 = vmatpush3.msra.mxu1 %v5093_v18  ;;  %v12338_v28 = vpop.permute.xlu1 %5538 }
 0xbbd   : > { %8859 = vmatprep.subr.mxu1 %v5091_v5 }
 0xbbe   : > { %8860 = vmatpush3.msra.mxu1 %v5091_v5 }
 0xbbf   : > { %8885 = vmatprep.subr.msk.mxu1 %vm866_vm2, %v12338_v28 }
 0xbf7   : > { %v12342_v15 = vpop.f32.mrf.mxu0 }
 0xbf8   : > { %14730 = vst [vmem:[#allocation149_spill] sm:$0xff] %v12342_v15  ;;  %v12521_v15 = vpop.permute.xlu1 %5532 }
 0xbf9   : > { %v12344_v45 = vpop.f32.mrf.mxu0 }
 0xbfa   : > { %14731 = vst [vmem:[#allocation150_spill] sm:$0xff] %v12344_v45 }
 0xbfc   : > { %v12346_v52 = vpop.f32.mrf.mxu0  ;;  %v12548_v56 = vpop.permute.xlu1 %5528 }
 0xbfd   : > { %14732 = vst [vmem:[#allocation151_spill] sm:$0xff] %v12346_v52  ;;  %v12514_v52 = vld [vmem:[#allocation2 + $0x48] sm:$0xff] }
 0xbfe   : > { %v12348_v37 = vpop.f32.mrf.mxu0  ;;  %v12524_v45 = vmul.f32 0.5, %v12514_v52 }
 0xbff   : > { %14733 = vst [vmem:[#allocation152_spill] sm:$0xff] %v12348_v37 }
 0xc00   : > { %v12571_v6 = vpop.permute.xlu1 %5524 }
 0xc03   : > { %v12350_v22 = vpop.f32.mrf.mxu0 }
 0xc04   : > { %14734 = vst [vmem:[#allocation153_spill] sm:$0xff] %v12350_v22  ;;  %v12582_v0 = vpop.permute.xlu1 %5520 }
 0xc05   : > { %v12352_v32 = vpop.f32.mrf.mxu0 }
 0xc06   : > { %14735 = vst [vmem:[#allocation154_spill] sm:$0xff] %v12352_v32  ;;  %v12510_v32 = vld [vmem:[#allocation2 + $0x40] sm:$0xff] }
 0xc07   : > { %v12354_v30 = vpop.f32.mrf.mxu0  ;;  %v12519_v37 = vmul.f32 0.5, %v12510_v32 }
 0xc08   : > { %14736 = vst [vmem:[#allocation155_spill] sm:$0xff] %v12354_v30  ;;  %v12498_v30 = vld [vmem:[#allocation2 + $0x38] sm:$0xff] }
 0xc09   : > { %v12356_v62 = vpop.f32.mrf.mxu0  ;;  %v12508_v22 = vmul.f32 0.5, %v12498_v30  ;;  %14751 = vst [vmem:[#allocation170_spill] sm:$0xff] %v12519_v37 }
 0xc0a   : > { %14737 = vst [vmem:[#allocation156_spill] sm:$0xff] %v12356_v62 }
 0xc40   : > { %v12358_v41 = vpop.f32.mrf.mxu0 }
 0xc41   : > { %14738 = vst [vmem:[#allocation157_spill] sm:$0xff] %v12358_v41 }
 0xc42   : > { %v12360_v23 = vpop.f32.mrf.mxu0 }
 0xc43   : > { %14739 = vst [vmem:[#allocation158_spill] sm:$0xff] %v12360_v23  ;;  %v12494_v23 = vld [vmem:[#allocation2 + $0x30] sm:$0xff] }
 0xc44   : > { %v12362_v57 = vpop.f32.mrf.mxu0  ;;  %v12503_v62 = vmul.f32 0.5, %v12494_v23 }
 0xc45   : > { %14740 = vst [vmem:[#allocation159_spill] sm:$0xff] %v12362_v57 }
 0xc46   : > { %v12364_v2 = vpop.f32.mrf.mxu0  ;;  %14750 = vst [vmem:[#allocation169_spill] sm:$0xff] %v12503_v62 }
 0xc47   : > { %14741 = vst [vmem:[#allocation160_spill] sm:$0xff] %v12364_v2 }
 0xc48   : > { %v12366_v33 = vpop.f32.mrf.mxu0 }
 0xc49   : > { %14742 = vst [vmem:[#allocation161_spill] sm:$0xff] %v12366_v33  ;;  %v12478_v33 = vld [vmem:[#allocation2 + $0x20] sm:$0xff] }
 0xc4a   : > { %v12368_v44 = vpop.f32.mrf.mxu0  ;;  %v12489_v2 = vmul.f32 0.5, %v12478_v33 }
 0xc4b   : > { %14743 = vst [vmem:[#allocation162_spill] sm:$0xff] %v12368_v44  ;;  %v12482_v44 = vld [vmem:[#allocation2 + $0x28] sm:$0xff] }
 0xc4c   : > { %v12370_v25 = vpop.f32.mrf.mxu0  ;;  %14749 = vst [vmem:[#allocation168_spill] sm:$0xff] %v12489_v2  ;;  %v12492_v41 = vmul.f32 0.5, %v12482_v44 }
 0xc4d   : > { %14744 = vst [vmem:[#allocation163_spill] sm:$0xff] %v12370_v25 }
 0xc4e   : > { %v12372_v47 = vpop.f32.mrf.mxu0 }
 0xc4f   : > { %14745 = vst [vmem:[#allocation164_spill] sm:$0xff] %v12372_v47  ;;  %v12469_v47 = vmul.f32 0.5, %v12414_v63 }
 0xc50   : > { %v8807_v35 = vpop.f32.mrf.mxu0 }
 0xc51   : > { %v12376_v4 = vsel %vm768_vm3, %v8807_v35, -1e+30 }
 0xc52   : > { %4980 = vmax.xlane.f32.xlu1 %v12376_v4  ;;  %v4883_v54 = vpop.f32.mrf.mxu0 }
 0xc53   : > { %v12381_v40 = vsel %vm768_vm3, %v4883_v54, -1e+30 }
 0xc54   : > { %4978 = vmax.xlane.f32.xlu0 %v12381_v40  ;;  %v8810_v39 = vpop.f32.mrf.mxu0 }
 0xc55   : > { %v12386_v31 = vsel %vm768_vm3, %v8810_v39, -1e+30 }
 0xc56   : > { %v4893_v43 = vpop.f32.mrf.mxu0 }
 0xc57   : > { %v12390_v10 = vsel %vm768_vm3, %v4893_v43, -1e+30 }
 0xc58   : > { %4984 = vmax.xlane.f32.xlu0 %v12386_v31  ;;  %4982 = vmax.xlane.f32.xlu1 %v12390_v10  ;;  %v8813_v8 = vpop.f32.mrf.mxu0 }
 0xc59   : > { %v12396_v38 = vsel %vm768_vm3, %v8813_v8, -1e+30 }
 0xc5a   : > { %v4903_v34 = vpop.f32.mrf.mxu0 }
 0xc5b   : > { %v12401_v59 = vsel %vm768_vm3, %v4903_v34, -1e+30 }
 0xc5c   : > { %4988 = vmax.xlane.f32.xlu1 %v12396_v38  ;;  %v8816_v42 = vpop.f32.mrf.mxu0 }
 0xc5d   : > { %v12411_v13 = vsel %vm768_vm3, %v8816_v42, -1e+30 }
 0xc5e   : > { %v4913_v46 = vpop.f32.mrf.mxu0 }
 0xc5f   : > { %v12405_v16 = vsel %vm768_vm3, %v4913_v46, -1e+30 }
 0xc60   : > { %4986 = vmax.xlane.f32.xlu1 %v12401_v59  ;;  %4990 = vmax.xlane.f32.xlu0 %v12405_v16  ;;  %v8819_v12 = vpop.f32.mrf.mxu0 }
 0xc61   : > { %v12429_v8 = vsel %vm768_vm3, %v8819_v12, -1e+30 }
 0xc62   : > { %v4923_v18 = vpop.f32.mrf.mxu0 }
 0xc63   : > { %v12439_v46 = vsel %vm768_vm3, %v4923_v18, -1e+30  ;;  %v12457_v18 = vpop.permute.xlu0 %5536 }
 0xc64   : > { %4992 = vmax.xlane.f32.xlu1 %v12411_v13  ;;  %v8822_v5 = vpop.f32.mrf.mxu0 }
 0xc65   : > { %v12449_v12 = vsel %vm768_vm3, %v8822_v5, -1e+30 }
 0xc66   : > { %v4933_v35 = vpop.f32.mrf.mxu0 }
 0xc67   : > { %v12424_v39 = vsel %vm768_vm3, %v4933_v35, -1e+30  ;;  %v12466_v5 = vpop.permute.xlu0 %5534 }
 0xc68   : > { %v8825_v54 = vpop.f32.mrf.mxu0 }
 0xc69   : > { %v12433_v34 = vsel %vm768_vm3, %v8825_v54, -1e+30 }
 0xc6a   : > { %v4943_v43 = vpop.f32.mrf.mxu0 }
 0xc6b   : > { %v12454_v54 = vsel %vm768_vm3, %v4943_v43, -1e+30  ;;  %v12476_v43 = vmul.f32 0.5, %v12418_v53  ;;  %v12484_v57 = vpop.permute.xlu0 %5530 }
 0xc6c   : > { %v8828_v42 = vpop.f32.mrf.mxu0 }
 0xc6d   : > { %v12443_v35 = vsel %vm768_vm3, %v8828_v42, -1e+30  ;;  %v12459_v42 = vld [vmem:[#allocation2] sm:$0xff]  ;;  %14748 = vst [vmem:[#allocation167_spill] sm:$0xff] %v12476_v43 }
 0xc6e   : > { %14746 = vst [vmem:[#allocation165_spill] sm:$0xff] %v12443_v35  ;;  %v12464_v25 = vmul.f32 0.5, %v12459_v42 }
 0xc70   : > { %14747 = vst [vmem:[#allocation166_spill] sm:$0xff] %v12464_v25 }
 0xc75   : > { %5510 = vrot.lane.b32.xlu1 %v12414_v63, %s9851_s16 }
 0xc76   : > { %5512 = vrot.lane.b32.xlu0 %v12418_v53, %s9851_s16 }
 0xc95   : > { %4998 = vmax.xlane.f32.xlu0 %v12424_v39 }
 0xc99   : > { %4996 = vmax.xlane.f32.xlu1 %v12429_v8  ;;  %5004 = vmax.xlane.f32.xlu0 %v12433_v34 }
 0xc9d   : > { %4994 = vmax.xlane.f32.xlu1 %v12439_v46  ;;  %5008 = vmax.xlane.f32.xlu0 %v12443_v35 }
 0xca1   : > { %5000 = vmax.xlane.f32.xlu1 %v12449_v12 }
 0xca5   : > { %5002 = vmax.xlane.f32.xlu1 %v12454_v54 }
 0xcb3   : > { %5508 = vrot.lane.b32.xlu0 %v12459_v42, %s9851_s16 }
 0xcb6   : > { %5460 = vrot.lane.b32.xlu1 %v12464_v25, %s9852_s17 }
 0xcb7   : > { %5462 = vrot.lane.b32.xlu0 %v12469_v47, %s9852_s17 }
 0xcba   : > { %5464 = vrot.lane.b32.xlu1 %v12476_v43, %s9852_s17 }
 0xcbb   : > { %5466 = vrot.lane.b32.xlu0 %v12108_v50, %s9852_s17  ;;  %v12505_v50 = vpop.permute.xlu0 %5526 }
 0xcbe   : > { %5468 = vrot.lane.b32.xlu1 %v12489_v2, %s9852_s17 }
 0xcbf   : > { %5470 = vrot.lane.b32.xlu0 %v12492_v41, %s9852_s17  ;;  %v12532_v51 = vpop.permute.xlu0 %5522 }
 0xcc2   : > { %5472 = vrot.lane.b32.xlu1 %v12503_v62, %s9852_s17 }
 0xcc3   : > { %5474 = vrot.lane.b32.xlu0 %v12508_v22, %s9852_s17  ;;  %v12555_v19 = vpop.permute.xlu0 %5518 }
 0xcc6   : > { %5476 = vrot.lane.b32.xlu1 %v12519_v37, %s9852_s17 }
 0xcc7   : > { %5478 = vrot.lane.b32.xlu0 %v12524_v45, %s9852_s17  ;;  %v12578_v26 = vpop.permute.xlu0 %5516 }
 0xcca   : > { %5480 = vrot.lane.b32.xlu1 %v12537_v24, %s9852_s17  ;;  %v9799_v24 = vld [vmem:[#allocation2 + $0x50] sm:$0xff] }
 0xccb   : > { %5482 = vrot.lane.b32.xlu0 %v12540_v3, %s9852_s17  ;;  %v12585_v14 = vpop.permute.xlu0 %5514 }
 0xcce   : > { %5484 = vrot.lane.b32.xlu1 %v12553_v20, %s9852_s17 }
 0xccf   : > { %5486 = vrot.lane.b32.xlu0 %v12558_v36, %s9852_s17 }
 0xcd2   : > { %5488 = vrot.lane.b32.xlu1 %v12569_v29, %s9852_s17 }
 0xcd3   : > { %5490 = vrot.lane.b32.xlu0 %v12574_v7, %s9852_s17 }
 0xcd7   : > { %5903 = vrot.lane.b32.xlu0 %v9797_v58, %s9853_s18 }
 0xcdb   : > { %5899 = vrot.lane.b32.xlu0 %v9798_v9, %s9853_s18  ;;  %v4981_v48 = vpop.xlane.xlu1 %4980  ;;  %v9800_v9 = vld [vmem:[#allocation2 + $0x40] sm:$0xff] }
 0xcdc   : > { %v5011_v35 = vsub.f32 %v12376_v4, %v4981_v48 }
 0xcdd   : > { %v4979_v49 = vpop.xlane.xlu0 %4978 }
 0xcde   : > { %v5010_v29 = vsub.f32 %v12381_v40, %v4979_v49  ;;  %v5028_v20 = vmul.f32 1.442695, %v5011_v35  ;;  %v9801_v49 = vld [vmem:[#allocation2 + $0x30] sm:$0xff] }
 0xcdf   : > { %5897 = vrot.lane.b32.xlu0 %v9799_v24, %s9853_s18 }
 0xce0   : > { %v5026_v37 = vmul.f32 1.442695, %v5010_v29 }
 0xce1   : > { %v4985_v62 = vpop.xlane.xlu0 %4984  ;;  %v4983_v2 = vpop.xlane.xlu1 %4982 }
 0xce2   : > { %9419 = vpow2.f32 %v5026_v37  ;;  %v5013_v58 = vsub.f32 %v12386_v31, %v4985_v62  ;;  %v5012_v43 = vsub.f32 %v12390_v10, %v4983_v2 }
 0xce3   : > { %9421 = vpow2.f32 %v5028_v20  ;;  %5893 = vrot.lane.b32.xlu0 %v9800_v9, %s9853_s18  ;;  %v9802_v20 = vld [vmem:[#allocation2 + $0x20] sm:$0xff] }
 0xce4   : > { %v5032_v48 = vmul.f32 1.442695, %v5013_v58  ;;  %v5030_v4 = vmul.f32 1.442695, %v5012_v43 }
 0xce5   : > { %v4989_v25 = vpop.xlane.xlu1 %4988 }
 0xce6   : > { %9423 = vpow2.f32 %v5032_v48  ;;  %v5015_v29 = vsub.f32 %v12396_v38, %v4989_v25 }
 0xce7   : > { %9425 = vpow2.f32 %v5030_v4  ;;  %5889 = vrot.lane.b32.xlu0 %v9801_v49, %s9853_s18 }
 0xce8   : > { %v5036_v40 = vmul.f32 1.442695, %v5015_v29  ;;  %v6186_v29 = vld [vmem:[#allocation2 + $0x18] sm:$0xff] }
 0xce9   : > { %v4991_v24 = vpop.xlane.xlu0 %4990  ;;  %v4987_v37 = vpop.xlane.xlu1 %4986 }
 0xcea   : > { %v5016_v62 = vsub.f32 %v12405_v16, %v4991_v24  ;;  %v5014_v2 = vsub.f32 %v12401_v59, %v4987_v37  ;;  %v4953_v59 = vpop.f32.mrf.mxu0  ;;  %v6202_v37 = vmul.f32 0.5, %v6186_v29  ;;  %v14759_v29 = vld [vmem:[#allocation170_spill] sm:$0xff] }
 0xceb   : > { %5885 = vrot.lane.b32.xlu0 %v9802_v20, %s9853_s18  ;;  %v12620_v9 = vsel %vm768_vm3, %v4953_v59, -1e+30 }
 0xcec   : > { %v5034_v31 = vmul.f32 1.442695, %v5014_v2  ;;  %v5038_v10 = vmul.f32 1.442695, %v5016_v62 }
 0xced   : > { %v4993_v35 = vpop.xlane.xlu1 %4992 }
 0xcee   : > { %v5017_v43 = vsub.f32 %v12411_v13, %v4993_v35  ;;  %9427 = vpow2.f32 %v5034_v31 }
 0xcef   : > { %v12600_v58 = vpop.eup %9419  ;;  %5881 = vrot.lane.b32.xlu0 %v12418_v53, %s9853_s18  ;;  %9429 = vpow2.f32 %v5036_v40 }
 0xcf0   : > { %v12604_v25 = vpop.eup %9421  ;;  %v5040_v38 = vmul.f32 1.442695, %v5017_v43  ;;  %8861 = vmatprep.mubr.f32.mxu1 %v12600_v58  ;;  %9431 = vpow2.f32 %v5038_v10 }
 0xcf1   : > { %8862 = vmatmul.mubr.f32.vlgmr.msra.gmra.mxu1 %v12604_v25 }
 0xcf2   : > { %9433 = vpow2.f32 %v5040_v38  ;;  %8886 = vmatpush3.xpose.msk.msra.mxu1 %vm866_vm2, %v12338_v28 }
 0xcf3   : > { %v12610_v16 = vpop.eup %9423  ;;  %8887 = vmatprep.subr.msk.mxu1 %vm866_vm2, %v12457_v18  ;;  %5877 = vrot.lane.b32.xlu0 %v12459_v42, %s9853_s18 }
 0xcf4   : > { %v12616_v13 = vpop.eup %9425 }
 0xcf5   : > { %8864 = vmatprep.mubr.f32.mxu1 %v12616_v13 }
 0xcf6   : > { %8865 = vmatmul.mubr.f32.gmra.mxu1 %v12610_v16  ;;  %5006 = vmax.xlane.f32.xlu1 %v12620_v9 }
 0xcf7   : > { %8888 = vmatpush3.xpose.msk.msra.mxu1 %vm866_vm2, %v12457_v18  ;;  %6323 = vrot.lane.b32.xlu0 %v12560_v61, %s9854_s19 }
 0xcf8   : > { %8889 = vmatprep.subr.msk.mxu1 %vm866_vm2, %v12466_v5 }
 0xcfb   : > { %8890 = vmatpush3.xpose.msk.msra.mxu1 %vm866_vm2, %v12466_v5  ;;  %6321 = vrot.lane.b32.xlu0 %v12546_v11, %s9854_s19  ;;  %v12635_v28 = vpop.eup %9427  ;;  %v9806_v5 = vld [vmem:[#allocation2 + $0x48] sm:$0xff] }
 0xcfc   : > { %8891 = vmatprep.subr.msk.mxu1 %vm866_vm2, %v12521_v15  ;;  %v12639_v48 = vpop.eup %9429  ;;  %8867 = vmatprep.mubr.f32.mxu1 %v12635_v28 }
 0xcfd   : > { %v12642_v18 = vpop.eup %9431  ;;  %8868 = vmatmul.mubr.f32.gmra.mxu1 %v12639_v48 }
 0xcfe   : > { %8870 = vmatprep.mubr.f32.mxu1 %v12642_v18 }
 0xcff   : > { %v12645_v4 = vpop.eup %9433  ;;  %8892 = vmatpush3.xpose.msk.msra.mxu1 %vm866_vm2, %v12521_v15  ;;  %6317 = vrot.lane.b32.xlu0 %v12530_v21, %s9854_s19  ;;  %v9803_v15 = vld [vmem:[#allocation2 + $0x78] sm:$0xff] }
 0xd00   : > { %8893 = vmatprep.subr.msk.mxu1 %vm866_vm2, %v12484_v57 }
 0xd01   : > { %8871 = vmatmul.mubr.f32.gmra.mxu1 %v12645_v4 }
 0xd03   : > { %8894 = vmatpush3.xpose.msk.msra.mxu1 %vm866_vm2, %v12484_v57  ;;  %6313 = vrot.lane.b32.xlu0 %v12514_v52, %s9854_s19  ;;  %v9804_v57 = vld [vmem:[#allocation2 + $0x70] sm:$0xff] }
 0xd04   : > { %8895 = vmatprep.subr.msk.mxu1 %vm866_vm2, %v12548_v56 }
 0xd07   : > { %8896 = vmatpush3.xpose.msk.msra.mxu1 %vm866_vm2, %v12548_v56  ;;  %5907 = vrot.lane.b32.xlu1 %v9803_v15, %s9853_s18  ;;  %v9805_v56 = vld [vmem:[#allocation2 + $0x60] sm:$0xff] }
 0xd08   : > { %8897 = vmatprep.subr.msk.mxu1 %vm866_vm2, %v12505_v50  ;;  %6309 = vrot.lane.b32.xlu0 %v12498_v30, %s9854_s19 }
 0xd0b   : > { %8898 = vmatpush3.xpose.msk.msra.mxu1 %vm866_vm2, %v12505_v50  ;;  %5905 = vrot.lane.b32.xlu1 %v9804_v57, %s9853_s18  ;;  %v9808_v50 = vld [vmem:[#allocation2 + $0x28] sm:$0xff]  ;;  %v14755_v57 = vld [vmem:[#allocation166_spill] sm:$0xff] }
 0xd0c   : > { %8899 = vmatprep.subr.msk.mxu1 %vm866_vm2, %v12571_v6  ;;  %6305 = vrot.lane.b32.xlu0 %v12482_v44, %s9854_s19 }
 0xd0f   : > { %8900 = vmatpush3.xpose.msk.msra.mxu1 %vm866_vm2, %v12571_v6  ;;  %5901 = vrot.lane.b32.xlu1 %v9805_v56, %s9853_s18  ;;  %v9807_v6 = vld [vmem:[#allocation2 + $0x38] sm:$0xff] }
 0xd10   : > { %8901 = vmatprep.subr.msk.mxu1 %vm866_vm2, %v12532_v51  ;;  %6303 = vrot.lane.b32.xlu0 %v12478_v33, %s9854_s19 }
 0xd13   : > { %8902 = vmatpush3.xpose.msk.msra.mxu1 %vm866_vm2, %v12532_v51  ;;  %5895 = vrot.lane.b32.xlu1 %v9806_v5, %s9853_s18  ;;  %v5513_v51 = vpop.permute.xlu0 %5512 }
 0xd14   : > { %8903 = vmatprep.subr.msk.mxu1 %vm866_vm2, %v12582_v0  ;;  %6301 = vrot.lane.b32.xlu0 %v12104_v17, %s9854_s19 }
 0xd17   : > { %8904 = vmatpush3.xpose.msk.msra.mxu1 %vm866_vm2, %v12582_v0  ;;  %5891 = vrot.lane.b32.xlu1 %v9807_v6, %s9853_s18  ;;  %v5511_v0 = vpop.permute.xlu1 %5510  ;;  %v14756_v6 = vld [vmem:[#allocation167_spill] sm:$0xff] }
 0xd18   : > { %8905 = vmatprep.subr.msk.mxu1 %vm866_vm2, %v12555_v19  ;;  %6299 = vrot.lane.b32.xlu0 %v12418_v53, %s9854_s19 }
 0xd1b   : > { %8906 = vmatpush3.xpose.msk.msra.mxu1 %vm866_vm2, %v12555_v19  ;;  %5887 = vrot.lane.b32.xlu1 %v9808_v50, %s9853_s18  ;;  %v14757_v50 = vld [vmem:[#allocation168_spill] sm:$0xff] }
 0xd1c   : > { %8907 = vmatprep.subr.msk.mxu1 %vm866_vm2, %v12578_v26  ;;  %6295 = vrot.lane.b32.xlu0 %v12459_v42, %s9854_s19 }
 0xd1e   : > { %v4999_v49 = vpop.xlane.xlu0 %4998 }
 0xd1f   : > { %8908 = vmatpush3.xpose.msk.msra.mxu1 %vm866_vm2, %v12578_v26  ;;  %5883 = vrot.lane.b32.xlu1 %v12104_v17, %s9853_s18  ;;  %v5020_v26 = vsub.f32 %v12424_v39, %v4999_v49 }
 0xd20   : > { %8909 = vmatprep.subr.msk.mxu1 %vm866_vm2, %v12585_v14  ;;  %6249 = vrot.lane.b32.xlu0 %v12469_v47, %s9855_s20 }
 0xd22   : > { %v5005_v19 = vpop.xlane.xlu0 %5004  ;;  %v4997_v24 = vpop.xlane.xlu1 %4996 }
 0xd23   : > { %8910 = vmatpush3.xpose.msk.msra.mxu1 %vm866_vm2, %v12585_v14  ;;  %5879 = vrot.lane.b32.xlu1 %v12414_v63, %s9853_s18  ;;  %v5019_v17 = vsub.f32 %v12429_v8, %v4997_v24  ;;  %v5046_v8 = vmul.f32 1.442695, %v5020_v26  ;;  %s9863_s18 = smov 28  }
 0xd24   : > { %8911 = vmatprep.subr.msk.mxu1 %vm866_vm2, %v5513_v51  ;;  %6253 = vrot.lane.b32.xlu0 %v6202_v37, %s9855_s20 }
 0xd25   : > { %v5044_v14 = vmul.f32 1.442695, %v5019_v17 }
 0xd26   : > { %v12719_v62 = vpop.xlane.xlu0 %5008  ;;  %v4995_v47 = vpop.xlane.xlu1 %4994 }
 0xd27   : > { %8912 = vmatpush3.xpose.msk.msra.mxu1 %vm866_vm2, %v5513_v51  ;;  %v5018_v2 = vsub.f32 %v12439_v46, %v4995_v47  ;;  %6325 = vrot.lane.b32.xlu1 %v12564_v55, %s9854_s19 }
 0xd28   : > { %8913 = vmatprep.subr.msk.mxu1 %vm866_vm2, %v5511_v0  ;;  %6257 = vrot.lane.b32.xlu0 %v12492_v41, %s9855_s20  ;;  %v5023_v41 = vsub.f32 %v12433_v34, %v5005_v19 }
 0xd29   : > { %v5042_v20 = vmul.f32 1.442695, %v5018_v2 }
 0xd2a   : > { %v5509_v40 = vpop.permute.xlu0 %5508  ;;  %v5001_v39 = vpop.xlane.xlu1 %5000 }
 0xd2b   : > { %8914 = vmatpush3.xpose.msk.msra.mxu1 %vm866_vm2, %v5511_v0  ;;  %v5021_v31 = vsub.f32 %v12449_v12, %v5001_v39  ;;  %6319 = vrot.lane.b32.xlu1 %v12542_v60, %s9854_s19  ;;  %9435 = vpow2.f32 %v5042_v20  ;;  %v14758_v0 = vld [vmem:[#allocation169_spill] sm:$0xff] }
 0xd2c   : > { %6261 = vrot.lane.b32.xlu0 %v12508_v22, %s9855_s20  ;;  %8915 = vmatprep.subr.msk.mxu1 %vm866_vm2, %v5509_v40  ;;  %9437 = vpow2.f32 %v5044_v14  ;;  %v5052_v22 = vmul.f32 1.442695, %v5023_v41 }
 0xd2d   : > { %v5048_v46 = vmul.f32 1.442695, %v5021_v31  ;;  %9439 = vpow2.f32 %v5046_v8  ;;  %v14763_v31 = vld [vmem:[#allocation111_spill] sm:$0xff] }
 0xd2e   : > { %v12736_v10 = vpop.permute.xlu0 %5462  ;;  %v5003_v35 = vpop.xlane.xlu1 %5002 }
 0xd2f   : > { %9441 = vpow2.f32 %v5048_v46  ;;  %8916 = vmatpush3.xpose.msk.msra.mxu1 %vm866_vm2, %v5509_v40  ;;  %v5022_v12 = vsub.f32 %v12454_v54, %v5003_v35  ;;  %6315 = vrot.lane.b32.xlu1 %v12526_v27, %s9854_s19  ;;  %v9809_v40 = vld [vmem:[#allocation2 + $0x18] sm:$0xff]  ;;  %v14765_v46 = vld [vmem:[#allocation114_spill] sm:$0xff] }
 0xd30   : > { %6265 = vrot.lane.b32.xlu0 %v12524_v45, %s9855_s20 }
 0xd31   : > { %v5050_v43 = vmul.f32 1.442695, %v5022_v12 }
 0xd32   : > { %v12744_v34 = vpop.permute.xlu0 %5466 }
 0xd33   : > { %9443 = vpow2.f32 %v5050_v43  ;;  %6311 = vrot.lane.b32.xlu1 %v12510_v32, %s9854_s19 }
 0xd34   : > { %6269 = vrot.lane.b32.xlu0 %v12540_v3, %s9855_s20  ;;  %9445 = vpow2.f32 %v5052_v22 }
 0xd36   : > { %v12750_v38 = vpop.permute.xlu0 %5470 }
 0xd37   : > { %6307 = vrot.lane.b32.xlu1 %v12494_v23, %s9854_s19 }
 0xd38   : > { %6273 = vrot.lane.b32.xlu0 %v12558_v36, %s9855_s20  ;;  %v12756_v45 = vpop.eup %9435 }
 0xd39   : > { %v12758_v54 = vpop.eup %9437  ;;  %8873 = vmatprep.mubr.f32.mxu1 %v12756_v45 }
 0xd3a   : > { %v12761_v59 = vpop.permute.xlu0 %5474  ;;  %v12763_v15 = vpop.eup %9439  ;;  %8874 = vmatmul.mubr.f32.gmra.mxu1 %v12758_v54 }
 0xd3b   : > { %6297 = vrot.lane.b32.xlu1 %v12414_v63, %s9854_s19  ;;  %8876 = vmatprep.mubr.f32.mxu1 %v12763_v15 }
 0xd3c   : > { %v12768_v3 = vpop.eup %9441  ;;  %6277 = vrot.lane.b32.xlu0 %v12574_v7, %s9855_s20 }
 0xd3e   : > { %v12773_v36 = vpop.permute.xlu0 %5478  ;;  %8877 = vmatmul.mubr.f32.gmra.mxu1 %v12768_v3 }
 0xd3f   : > { %6247 = vrot.lane.b32.xlu1 %v14755_v57, %s9855_s20 }
 0xd40   : > { %v12778_v56 = vpop.eup %9443  ;;  %6692 = vrot.lane.b32.xlu0 %v12560_v61, %s9856_s26 }
 0xd41   : > { %8879 = vmatprep.mubr.f32.mxu1 %v12778_v56  ;;  %v12783_v5 = vpop.eup %9445 }
 0xd42   : > { %v12785_v7 = vpop.permute.xlu0 %5482  ;;  %8880 = vmatmul.mubr.f32.gmra.mxu1 %v12783_v5 }
 0xd43   : > { %6251 = vrot.lane.b32.xlu1 %v14756_v6, %s9855_s20 }
 0xd44   : > { %6688 = vrot.lane.b32.xlu0 %v12542_v60, %s9856_s26  ;;  %v12808_v60 = vpop.permute.xlu1 %5460 }
 0xd46   : > { %v12792_v51 = vpop.permute.xlu0 %5486 }
 0xd47   : > { %6255 = vrot.lane.b32.xlu1 %v14757_v50, %s9855_s20 }
 0xd48   : > { %6684 = vrot.lane.b32.xlu0 %v12526_v27, %s9856_s26  ;;  %v14760_v27 = vld [vmem:[#allocation171_spill] sm:$0xff]  ;;  %v12814_v37 = vpop.permute.xlu1 %5464 }
 0xd4a   : > { %v12798_v61 = vpop.permute.xlu0 %5490 }
 0xd4b   : > { %6259 = vrot.lane.b32.xlu1 %v14758_v0, %s9855_s20 }
 0xd4c   : > { %6680 = vrot.lane.b32.xlu0 %v12510_v32, %s9856_s26  ;;  %v14761_v32 = vld [vmem:[#allocation172_spill] sm:$0xff]  ;;  %v12826_v26 = vpop.permute.xlu1 %5468 }
 0xd4e   : > { %v5904_v49 = vpop.permute.xlu0 %5903 }
 0xd4f   : > { %6263 = vrot.lane.b32.xlu1 %v14759_v29, %s9855_s20 }
 0xd50   : > { %6676 = vrot.lane.b32.xlu0 %v12494_v23, %s9856_s26  ;;  %v14762_v23 = vld [vmem:[#allocation173_spill] sm:$0xff]  ;;  %v12834_v2 = vpop.permute.xlu1 %5472 }
 0xd52   : > { %v5900_v19 = vpop.permute.xlu0 %5899 }
 0xd53   : > { %6267 = vrot.lane.b32.xlu1 %v14760_v27, %s9855_s20 }
 0xd54   : > { %6672 = vrot.lane.b32.xlu0 %v12478_v33, %s9856_s26 }
 0xd56   : > { %v5898_v24 = vpop.permute.xlu0 %5897 }
 0xd57   : > { %6271 = vrot.lane.b32.xlu1 %v14761_v32, %s9855_s20 }
 0xd58   : > { %6668 = vrot.lane.b32.xlu0 %v12418_v53, %s9856_s26 }
 0xd5a   : > { %v12820_v17 = vpop.permute.xlu0 %5893 }
 0xd5b   : > { %6275 = vrot.lane.b32.xlu1 %v14762_v23, %s9855_s20 }
 0xd5c   : > { %6664 = vrot.lane.b32.xlu0 %v12459_v42, %s9856_s26  ;;  %v12842_v42 = vpop.permute.xlu1 %5476 }
 0xd5e   : > { %v12828_v33 = vpop.permute.xlu0 %5889 }
 0xd5f   : > { %6694 = vrot.lane.b32.xlu1 %v12564_v55, %s9856_s26 }
 0xd60   : > { %v12850_v20 = vpop.permute.xlu1 %5480 }
 0xd62   : > { %v12832_v47 = vpop.permute.xlu0 %5885 }
 0xd63   : > { %6690 = vrot.lane.b32.xlu1 %v12546_v11, %s9856_s26 }
 0xd66   : > { %v12838_v53 = vpop.permute.xlu0 %5881 }
 0xd67   : > { %6686 = vrot.lane.b32.xlu1 %v12530_v21, %s9856_s26  ;;  %v12858_v21 = vpop.permute.xlu1 %5484 }
 0xd6a   : > { %v12844_v14 = vpop.permute.xlu0 %5877 }
 0xd6b   : > { %6682 = vrot.lane.b32.xlu1 %v12514_v52, %s9856_s26  ;;  %v12865_v39 = vpop.permute.xlu1 %5488 }
 0xd6e   : > { %v12848_v55 = vpop.permute.xlu0 %6323 }
 0xd6f   : > { %6678 = vrot.lane.b32.xlu1 %v12498_v30, %s9856_s26  ;;  %v14764_v30 = vld [vmem:[#allocation165_spill] sm:$0xff] }
 0xd70   : > { %v5025_v41 = vsub.f32 %v14764_v30, %v12719_v62 }
 0xd72   : > { %v12854_v11 = vpop.permute.xlu0 %6321  ;;  %v5056_v22 = vmul.f32 1.442695, %v5025_v41 }
 0xd73   : > { %6674 = vrot.lane.b32.xlu1 %v12482_v44, %s9856_s26 }
 0xd76   : > { %v12860_v8 = vpop.permute.xlu0 %6317 }
 0xd77   : > { %6670 = vrot.lane.b32.xlu1 %v9809_v40, %s9856_s26 }
 0xd7a   : > { %v12863_v52 = vpop.permute.xlu0 %6313 }
 0xd7b   : > { %3484 = vadd.xlane.f32.xlu0 %v14763_v31  ;;  %6666 = vrot.lane.b32.xlu1 %v12414_v63, %s9856_s26  ;;  %v14778_v31 = vld [vmem:[#allocation102_spill] sm:$0xff] }
 0xd7e   : > { %v12872_v44 = vpop.permute.xlu0 %6309 }
 0xd7f   : > { %3488 = vadd.xlane.f32.xlu0 %v14765_v46  ;;  %v5007_v35 = vpop.xlane.xlu1 %5006 }
 0xd80   : > { %v5024_v12 = vsub.f32 %v12620_v9, %v5007_v35  ;;  %v14784_v35 = vld [vmem:[#allocation40_spill] sm:$0xff] }
 0xd82   : > { %v5054_v43 = vmul.f32 1.442695, %v5024_v12  ;;  %v12876_v57 = vpop.permute.xlu0 %6305  ;;  %v14786_v12 = vld [vmem:[#allocation39_spill] sm:$0xff] }
 0xd83   : > { %v5908_v6 = vpop.permute.xlu1 %5907 }
 0xd84   : > { %9447 = vpow2.f32 %v5054_v43  ;;  %8941 = vmatprep.subr.mxu0 %v5908_v6 }
 0xd85   : > { %9449 = vpow2.f32 %v5056_v22  ;;  %8942 = vmatpush3.msra.mxu0 %v5908_v6  ;;  %v14789_v6 = vld [vmem:[#allocation113_spill] sm:$0xff] }
 0xd86   : > { %v12878_v63 = vpop.permute.xlu0 %6303 }
 0xd87   : > { %v5906_v50 = vpop.permute.xlu1 %5905 }
 0xd88   : > { %8943 = vmatprep.subr.mxu0 %v5906_v50 }
 0xd89   : > { %8944 = vmatpush3.msra.mxu0 %v5906_v50 }
 0xd8a   : > { %8945 = vmatprep.subr.mxu0 %v5904_v49  ;;  %v12880_v0 = vpop.permute.xlu0 %6301 }
 0xd8b   : > { %8946 = vmatpush3.msra.mxu0 %v5904_v49  ;;  %v5902_v62 = vpop.permute.xlu1 %5901 }
 0xd8c   : > { %8947 = vmatprep.subr.mxu0 %v5902_v62 }
 0xd8d   : > { %8948 = vmatpush3.msra.mxu0 %v5902_v62 }
 0xd8e   : > { %8949 = vmatprep.subr.mxu0 %v5900_v19  ;;  %v12887_v32 = vpop.permute.xlu0 %6299 }
 0xd8f   : > { %8950 = vmatpush3.msra.mxu0 %v5900_v19  ;;  %v5896_v9 = vpop.permute.xlu1 %5895 }
 0xd90   : > { %8951 = vmatprep.subr.mxu0 %v5898_v24 }
 0xd91   : > { %v12882_v29 = vpop.eup %9447  ;;  %8952 = vmatpush3.msra.mxu0 %v5898_v24 }
 0xd92   : > { %v12884_v27 = vpop.eup %9449  ;;  %8882 = vmatprep.mubr.f32.mxu1 %v12882_v29  ;;  %8953 = vmatprep.subr.mxu0 %v5896_v9  ;;  %v12899_v24 = vpop.permute.xlu0 %6295 }
 0xd93   : > { %8883 = vmatmul.mubr.f32.gmra.mxu1 %v12884_v27  ;;  %8954 = vmatpush3.msra.mxu0 %v5896_v9  ;;  %v5892_v49 = vpop.permute.xlu1 %5891 }
 0xd94   : > { %8917 = vmatprep.mubr.msk.f32.mxu1 %vm866_vm2, %v12808_v60  ;;  %8955 = vmatprep.subr.mxu0 %v12820_v17 }
 0xd95   : > { %8956 = vmatpush3.msra.mxu0 %v12820_v17 }
 0xd96   : > { %8957 = vmatprep.subr.mxu0 %v5892_v49 }
 0xd97   : > { %8918 = vmatmul.mubr.msk.f32.vlgmr.msra.gmra.mxu1 %vm866_vm2, %v12736_v10  ;;  %8958 = vmatpush3.msra.mxu0 %v5892_v49  ;;  %v5888_v19 = vpop.permute.xlu1 %5887  ;;  %v12908_v10 = vpop.permute.xlu0 %6249 }
 0xd98   : > { %8920 = vmatprep.mubr.msk.f32.mxu1 %vm866_vm2, %v12814_v37  ;;  %8959 = vmatprep.subr.mxu0 %v12828_v33  ;;  %14766 = vst [vmem:[#allocation166_spill] sm:$0xff] %v12908_v10  ;;  %v14767_v37 = vld [vmem:[#allocation48_spill] sm:$0xff] }
 0xd99   : > { %8960 = vmatpush3.msra.mxu0 %v12828_v33 }
 0xd9a   : > { %8961 = vmatprep.subr.mxu0 %v5888_v19 }
 0xd9b   : > { %8921 = vmatmul.mubr.msk.f32.gmra.mxu1 %vm866_vm2, %v12744_v34  ;;  %8962 = vmatpush3.msra.mxu0 %v5888_v19  ;;  %v5884_v60 = vpop.permute.xlu1 %5883  ;;  %v14768_v34 = vld [vmem:[#allocation49_spill] sm:$0xff] }
 0xd9c   : > { %8923 = vmatprep.mubr.msk.f32.mxu1 %vm866_vm2, %v12826_v26  ;;  %8963 = vmatprep.subr.mxu0 %v12832_v47  ;;  %v12922_v26 = vpop.permute.xlu0 %6253 }
 0xd9d   : > { %8964 = vmatpush3.msra.mxu0 %v12832_v47  ;;  %14769 = vst [vmem:[#allocation167_spill] sm:$0xff] %v12922_v26  ;;  %v14772_v47 = vld [vmem:[#allocation38_spill] sm:$0xff]  ;;  %v14853_v26 = vld [vmem:[#allocation121_spill] sm:$0xff] }
 0xd9e   : > { %8965 = vmatprep.subr.mxu0 %v5884_v60 }
 0xd9f   : > { %1910 = vadd.xlane.f32.xlu1 %v14767_v37  ;;  %8924 = vmatmul.mubr.msk.f32.gmra.mxu1 %vm866_vm2, %v12750_v38  ;;  %v5880_v17 = vpop.permute.xlu1 %5879  ;;  %v14770_v38 = vld [vmem:[#allocation37_spill] sm:$0xff] }
 0xda0   : > { %8966 = vmatpush3.msra.mxu0 %v5884_v60  ;;  %8926 = vmatprep.mubr.msk.f32.mxu1 %vm866_vm2, %v12834_v2 }
 0xda1   : > { %8967 = vmatprep.subr.mxu0 %v12838_v53 }
 0xda2   : > { %8968 = vmatpush3.msra.mxu0 %v12838_v53  ;;  %v14773_v53 = vld [vmem:[#allocation112_spill] sm:$0xff] }
 0xda3   : > { %8969 = vmatprep.subr.mxu0 %v5880_v17  ;;  %1912 = vadd.xlane.f32.xlu1 %v14768_v34  ;;  %v12918_v23 = vpop.permute.xlu1 %6325 }
 0xda4   : > { %8927 = vmatmul.mubr.msk.f32.gmra.mxu1 %vm866_vm2, %v12761_v59  ;;  %8970 = vmatpush3.msra.mxu0 %v5880_v17  ;;  %v12937_v59 = vpop.permute.xlu0 %6257 }
 0xda5   : > { %8929 = vmatprep.mubr.msk.f32.mxu1 %vm866_vm2, %v12842_v42  ;;  %8971 = vmatprep.subr.mxu0 %v12844_v14  ;;  %14771 = vst [vmem:[#allocation168_spill] sm:$0xff] %v12937_v59  ;;  %v14843_v59 = vld [vmem:[#allocation45_spill] sm:$0xff] }
 0xda6   : > { %8972 = vmatpush3.msra.mxu0 %v12844_v14  ;;  %v14775_v14 = vld [vmem:[#allocation101_spill] sm:$0xff] }
 0xda7   : > { %8997 = vmatprep.subr.msk.mxu0 %vm866_vm2, %v12918_v23  ;;  %2697 = vadd.xlane.f32.xlu1 %v14770_v38  ;;  %v12931_v33 = vpop.permute.xlu1 %6319 }
 0xda8   : > { %8930 = vmatmul.mubr.msk.f32.gmra.mxu1 %vm866_vm2, %v12773_v36  ;;  %v12951_v36 = vpop.permute.xlu0 %6261 }
 0xda9   : > { %8932 = vmatprep.mubr.msk.f32.mxu1 %vm866_vm2, %v12850_v20  ;;  %14774 = vst [vmem:[#allocation169_spill] sm:$0xff] %v12951_v36 }
 0xdab   : > { %2699 = vadd.xlane.f32.xlu1 %v14772_v47  ;;  %v12940_v2 = vpop.permute.xlu1 %6315 }
 0xdac   : > { %8933 = vmatmul.mubr.msk.f32.gmra.mxu1 %vm866_vm2, %v12785_v7  ;;  %v12960_v7 = vpop.permute.xlu0 %6265 }
 0xdad   : > { %8935 = vmatprep.mubr.msk.f32.mxu1 %vm866_vm2, %v12858_v21  ;;  %14776 = vst [vmem:[#allocation170_spill] sm:$0xff] %v12960_v7  ;;  %v14777_v21 = vld [vmem:[#allocation51_spill] sm:$0xff] }
 0xdae   : > { %v14830_v7 = vld [vmem:[#allocation115_spill] sm:$0xff] }
 0xdaf   : > { %3486 = vadd.xlane.f32.xlu1 %v14773_v53  ;;  %v12947_v42 = vpop.permute.xlu1 %6311 }
 0xdb0   : > { %8936 = vmatmul.mubr.msk.f32.gmra.mxu1 %vm866_vm2, %v12792_v51  ;;  %v12968_v30 = vpop.permute.xlu0 %6269 }
 0xdb1   : > { %8938 = vmatprep.mubr.msk.f32.mxu1 %vm866_vm2, %v12865_v39  ;;  %14780 = vst [vmem:[#allocation172_spill] sm:$0xff] %v12968_v30  ;;  %v14781_v39 = vld [vmem:[#allocation50_spill] sm:$0xff] }
 0xdb3   : > { %4271 = vadd.xlane.f32.xlu1 %v14775_v14  ;;  %v12956_v20 = vpop.permute.xlu1 %6307 }
 0xdb4   : > { %8939 = vmatmul.mubr.msk.f32.gmra.mxu1 %vm866_vm2, %v12798_v61  ;;  %v12973_v46 = vpop.permute.xlu0 %6273 }
 0xdb5   : > { %14783 = vst [vmem:[#allocation111_spill] sm:$0xff] %v12973_v46 }
 0xdb7   : > { %1914 = vadd.xlane.f32.xlu1 %v14777_v21  ;;  %v12963_v40 = vpop.permute.xlu1 %6297 }
 0xdb8   : > { %v12981_v43 = vpop.permute.xlu0 %6277 }
 0xdb9   : > { %14788 = vst [vmem:[#allocation48_spill] sm:$0xff] %v12981_v43 }
 0xdbb   : > { %4273 = vadd.xlane.f32.xlu1 %v14778_v31  ;;  %v12966_v51 = vpop.permute.xlu1 %6247 }
 0xdbc   : > { %14779 = vst [vmem:[#allocation171_spill] sm:$0xff] %v12966_v51  ;;  %v12986_v62 = vpop.permute.xlu0 %6692  ;;  %v14868_v51 = vld [vmem:[#allocation146_spill] sm:$0xff] }
 0xdbd   : > { %14791 = vst [vmem:[#allocation37_spill] sm:$0xff] %v12986_v62 }
 0xdbf   : > { %1916 = vadd.xlane.f32.xlu1 %v14781_v39  ;;  %v12971_v41 = vpop.permute.xlu1 %6251 }
 0xdc0   : > { %14782 = vst [vmem:[#allocation173_spill] sm:$0xff] %v12971_v41  ;;  %v12994_v19 = vpop.permute.xlu0 %6688  ;;  %v14867_v41 = vld [vmem:[#allocation83_spill] sm:$0xff] }
 0xdc1   : > { %14794 = vst [vmem:[#allocation101_spill] sm:$0xff] %v12994_v19 }
 0xdc3   : > { %2701 = vadd.xlane.f32.xlu1 %v14784_v35  ;;  %v12976_v61 = vpop.permute.xlu1 %6255 }
 0xdc4   : > { %14785 = vst [vmem:[#allocation165_spill] sm:$0xff] %v12976_v61  ;;  %v12998_v37 = vpop.permute.xlu0 %6684  ;;  %v14848_v61 = vld [vmem:[#allocation58_spill] sm:$0xff] }
 0xdc5   : > { %14796 = vst [vmem:[#allocation102_spill] sm:$0xff] %v12998_v37 }
 0xdc7   : > { %2703 = vadd.xlane.f32.xlu1 %v14786_v12  ;;  %v12979_v22 = vpop.permute.xlu1 %6259 }
 0xdc8   : > { %14787 = vst [vmem:[#allocation114_spill] sm:$0xff] %v12979_v22 }
 0xdcb   : > { %3490 = vadd.xlane.f32.xlu1 %v14789_v6  ;;  %v12984_v50 = vpop.permute.xlu1 %6263  ;;  %v13058_v6 = vpop.f32.mrf.mxu1 }
 0xdcc   : > { %14790 = vst [vmem:[#allocation49_spill] sm:$0xff] %v12984_v50  ;;  %v14837_v50 = vld [vmem:[#allocation117_spill] sm:$0xff] }
 0xdcd   : > { %v13060_v43 = vpop.f32.mrf.mxu1 }
 0xdcf   : > { %5060 = vadd.xlane.f32.xlu1 %v12604_v25  ;;  %v12989_v9 = vpop.permute.xlu1 %6267 }
 0xdd0   : > { %14792 = vst [vmem:[#allocation38_spill] sm:$0xff] %v12989_v9  ;;  %v14829_v9 = vld [vmem:[#allocation116_spill] sm:$0xff] }
 0xdd3   : > { %5058 = vadd.xlane.f32.xlu1 %v12600_v58  ;;  %v12992_v49 = vpop.permute.xlu1 %6271  ;;  %v13009_v58 = vpop.permute.xlu0 %6680 }
 0xdd4   : > { %14793 = vst [vmem:[#allocation112_spill] sm:$0xff] %v12992_v49  ;;  %14798 = vst [vmem:[#allocation40_spill] sm:$0xff] %v13009_v58 }
 0xdd7   : > { %v12996_v60 = vpop.permute.xlu1 %6275  ;;  %v13019_v38 = vpop.permute.xlu0 %6676 }
 0xdd8   : > { %14795 = vst [vmem:[#allocation51_spill] sm:$0xff] %v12996_v60  ;;  %14800 = vst [vmem:[#allocation113_spill] sm:$0xff] %v13019_v38  ;;  %v13062_v60 = vpop.f32.mrf.mxu1 }
 0xdd9   : > { %14809 = vst [vmem:[#allocation182_spill] sm:$0xff] %v13062_v60 }
 0xdda   : > { %v13064_v46 = vpop.f32.mrf.mxu1 }
 0xddb   : > { %v13000_v17 = vpop.permute.xlu1 %6694  ;;  %v13031_v14 = vpop.permute.xlu0 %6672  ;;  %14810 = vst [vmem:[#allocation183_spill] sm:$0xff] %v13064_v46 }
 0xddc   : > { %9141 = vmatprep.subr.mxu1 %v13000_v17  ;;  %14803 = vst [vmem:[#allocation176_spill] sm:$0xff] %v13031_v14 }
 0xddd   : > { %9157 = vmatpush3.msra.mxu1 %v13000_v17 }
 0xdde   : > { %9142 = vmatprep.subr.mxu1 %v12986_v62 }
 0xddf   : > { %9158 = vmatpush3.msra.mxu1 %v12986_v62  ;;  %v13006_v25 = vpop.permute.xlu1 %6690  ;;  %v13041_v31 = vpop.permute.xlu0 %6668 }
 0xde0   : > { %14797 = vst [vmem:[#allocation50_spill] sm:$0xff] %v13006_v25  ;;  %9143 = vmatprep.subr.mxu1 %v13006_v25  ;;  %14805 = vst [vmem:[#allocation178_spill] sm:$0xff] %v13041_v31 }
 0xde1   : > { %9159 = vmatpush3.msra.mxu1 %v13006_v25 }
 0xde2   : > { %9144 = vmatprep.subr.mxu1 %v12994_v19 }
 0xde3   : > { %9160 = vmatpush3.msra.mxu1 %v12994_v19  ;;  %v13014_v34 = vpop.permute.xlu1 %6686  ;;  %v13053_v12 = vpop.permute.xlu0 %6664  ;;  %v14847_v19 = vld [vmem:[#allocation46_spill] sm:$0xff] }
 0xde4   : > { %14799 = vst [vmem:[#allocation39_spill] sm:$0xff] %v13014_v34  ;;  %9145 = vmatprep.subr.mxu1 %v13014_v34  ;;  %14808 = vst [vmem:[#allocation181_spill] sm:$0xff] %v13053_v12 }
 0xde5   : > { %9161 = vmatpush3.msra.mxu1 %v13014_v34  ;;  %v14844_v34 = vld [vmem:[#allocation57_spill] sm:$0xff] }
 0xde6   : > { %9146 = vmatprep.subr.mxu1 %v12998_v37 }
 0xde7   : > { %9162 = vmatpush3.msra.mxu1 %v12998_v37  ;;  %v13022_v47 = vpop.permute.xlu1 %6682  ;;  %v14841_v37 = vld [vmem:[#allocation56_spill] sm:$0xff] }
 0xde8   : > { %14801 = vst [vmem:[#allocation174_spill] sm:$0xff] %v13022_v47  ;;  %9147 = vmatprep.subr.mxu1 %v13022_v47 }
 0xde9   : > { %9163 = vmatpush3.msra.mxu1 %v13022_v47  ;;  %v14840_v47 = vld [vmem:[#allocation118_spill] sm:$0xff] }
 0xdea   : > { %9148 = vmatprep.subr.mxu1 %v13009_v58 }
 0xdeb   : > { %9164 = vmatpush3.msra.mxu1 %v13009_v58  ;;  %v13028_v53 = vpop.permute.xlu1 %6678  ;;  %v14834_v58 = vld [vmem:[#allocation54_spill] sm:$0xff] }
 0xdec   : > { %14802 = vst [vmem:[#allocation175_spill] sm:$0xff] %v13028_v53  ;;  %9149 = vmatprep.subr.mxu1 %v13028_v53 }
 0xded   : > { %9165 = vmatpush3.msra.mxu1 %v13028_v53  ;;  %v14832_v53 = vld [vmem:[#allocation105_spill] sm:$0xff] }
 0xdee   : > { %9150 = vmatprep.subr.mxu1 %v13019_v38 }
 0xdef   : > { %9166 = vmatpush3.msra.mxu1 %v13019_v38  ;;  %v13036_v21 = vpop.permute.xlu1 %6674 }
 0xdf0   : > { %14804 = vst [vmem:[#allocation177_spill] sm:$0xff] %v13036_v21  ;;  %9151 = vmatprep.subr.mxu1 %v13036_v21 }
 0xdf1   : > { %9167 = vmatpush3.msra.mxu1 %v13036_v21 }
 0xdf2   : > { %9152 = vmatprep.subr.mxu1 %v13031_v14 }
 0xdf3   : > { %9168 = vmatpush3.msra.mxu1 %v13031_v14  ;;  %v13044_v39 = vpop.permute.xlu1 %6670 }
 0xdf4   : > { %14806 = vst [vmem:[#allocation179_spill] sm:$0xff] %v13044_v39  ;;  %9153 = vmatprep.subr.mxu1 %v13044_v39 }
 0xdf5   : > { %9169 = vmatpush3.msra.mxu1 %v13044_v39 }
 0xdf6   : > { %9154 = vmatprep.subr.mxu1 %v13041_v31 }
 0xdf7   : > { %9170 = vmatpush3.msra.mxu1 %v13041_v31  ;;  %v13050_v35 = vpop.permute.xlu1 %6666  ;;  %v13066_v31 = vpop.f32.mrf.mxu1 }
 0xdf8   : > { %14807 = vst [vmem:[#allocation180_spill] sm:$0xff] %v13050_v35  ;;  %9155 = vmatprep.subr.mxu1 %v13050_v35  ;;  %14811 = vst [vmem:[#allocation184_spill] sm:$0xff] %v13066_v31 }
 0xdf9   : > { %9171 = vmatpush3.msra.mxu1 %v13050_v35  ;;  %v13068_v39 = vpop.f32.mrf.mxu1 }
 0xdfa   : > { %9156 = vmatprep.subr.mxu1 %v13053_v12  ;;  %14812 = vst [vmem:[#allocation185_spill] sm:$0xff] %v13068_v39 }
 0xdfb   : > { %9172 = vmatpush3.msra.mxu1 %v13053_v12  ;;  %v13070_v14 = vpop.f32.mrf.mxu1 }
 0xdfc   : > { %14813 = vst [vmem:[#allocation186_spill] sm:$0xff] %v13070_v14 }
 0xdfd   : > { %v13072_v49 = vpop.f32.mrf.mxu1 }
 0xdfe   : > { %14814 = vst [vmem:[#allocation187_spill] sm:$0xff] %v13072_v49  ;;  %v14828_v49 = vld [vmem:[#allocation41_spill] sm:$0xff] }
 0xdff   : > { %v13074_v35 = vpop.f32.mrf.mxu1 }
 0xe00   : > { %14815 = vst [vmem:[#allocation188_spill] sm:$0xff] %v13074_v35 }
 0xe01   : > { %v13076_v30 = vpop.f32.mrf.mxu1 }
 0xe02   : > { %14816 = vst [vmem:[#allocation189_spill] sm:$0xff] %v13076_v30  ;;  %v14827_v30 = vld [vmem:[#allocation42_spill] sm:$0xff] }
 0xe03   : > { %v13078_v12 = vpop.f32.mrf.mxu1 }
 0xe04   : > { %14817 = vst [vmem:[#allocation190_spill] sm:$0xff] %v13078_v12 }
 0xe05   : > { %v13080_v21 = vpop.f32.mrf.mxu1 }
 0xe06   : > { %14818 = vst [vmem:[#allocation191_spill] sm:$0xff] %v13080_v21  ;;  %v14826_v21 = vld [vmem:[#allocation52_spill] sm:$0xff] }
 0xe07   : > { %v13082_v38 = vpop.f32.mrf.mxu1 }
 0xe08   : > { %14819 = vst [vmem:[#allocation192_spill] sm:$0xff] %v13082_v38  ;;  %v14823_v38 = vld [vmem:[#allocation103_spill] sm:$0xff] }
 0xe09   : > { %v13084_v60 = vpop.f32.mrf.mxu1 }
 0xe0a   : > { %14820 = vst [vmem:[#allocation193_spill] sm:$0xff] %v13084_v60  ;;  %v14824_v60 = vld [vmem:[#allocation104_spill] sm:$0xff] }
 0xe53   : > { %v13086_v46 = vpop.f32.mrf.mxu1 }
 0xe54   : > { %14821 = vst [vmem:[#allocation194_spill] sm:$0xff] %v13086_v46  ;;  %v14825_v46 = vld [vmem:[#allocation53_spill] sm:$0xff] }
 0xe55   : > { %v13088_v31 = vpop.f32.mrf.mxu1 }
 0xe56   : > { %14822 = vst [vmem:[#allocation195_spill] sm:$0xff] %v13088_v31 }
 0xe57   : > { %v8919_v39 = vpop.f32.mrf.mxu1 }
 0xe58   : > { %v13092_v14 = vsel %vm768_vm3, %v8919_v39, -1e+30 }
 0xe59   : > { %5767 = vmax.xlane.f32.xlu1 %v13092_v14  ;;  %v5670_v35 = vpop.f32.mrf.mxu1 }
 0xe5a   : > { %v13097_v12 = vsel %vm768_vm3, %v5670_v35, -1e+30 }
 0xe5b   : > { %5765 = vmax.xlane.f32.xlu0 %v13097_v12  ;;  %v8922_v31 = vpop.f32.mrf.mxu1 }
 0xe5d   : > { %4277 = vadd.xlane.f32.xlu1 %v14823_v38  ;;  %v5680_v39 = vpop.f32.mrf.mxu1 }
 0xe5f   : > { %4275 = vadd.xlane.f32.xlu0 %v14824_v60  ;;  %v8925_v35 = vpop.f32.mrf.mxu1  ;;  %v14831_v60 = vld [vmem:[#allocation106_spill] sm:$0xff] }
 0xe61   : > { %1920 = vadd.xlane.f32.xlu1 %v14825_v46  ;;  %v5690_v38 = vpop.f32.mrf.mxu1 }
 0xe63   : > { %1918 = vadd.xlane.f32.xlu0 %v14826_v21  ;;  %v14833_v21 = vld [vmem:[#allocation55_spill] sm:$0xff] }
 0xe64   : > { %v8928_v46 = vpop.f32.mrf.mxu1 }
 0xe65   : > { %5064 = vadd.xlane.f32.xlu1 %v12610_v16 }
 0xe66   : > { %v5700_v16 = vpop.f32.mrf.mxu1 }
 0xe67   : > { %5062 = vadd.xlane.f32.xlu0 %v12616_v13  ;;  %v13116_v13 = vsel %vm768_vm3, %v5680_v39, -1e+30 }
 0xe69   : > { %2707 = vadd.xlane.f32.xlu1 %v14827_v30  ;;  %v8931_v30 = vpop.f32.mrf.mxu1 }
 0xe6a   : > { %v13158_v36 = vsel %vm768_vm3, %v8931_v30, -1e+30 }
 0xe6b   : > { %2705 = vadd.xlane.f32.xlu0 %v14828_v49  ;;  %v5710_v49 = vpop.f32.mrf.mxu1 }
 0xe6d   : > { %3494 = vadd.xlane.f32.xlu1 %v14829_v9  ;;  %v13127_v9 = vsel %vm768_vm3, %v8922_v31, -1e+30  ;;  %v13142_v31 = vsel %vm768_vm3, %v8928_v46, -1e+30  ;;  %v13154_v46 = vpop.xlane.xlu1 %1910 }
 0xe6f   : > { %3492 = vadd.xlane.f32.xlu0 %v14830_v7  ;;  %v13122_v7 = vsel %vm768_vm3, %v8925_v35, -1e+30  ;;  %v14835_v35 = vld [vmem:[#allocation43_spill] sm:$0xff] }
 0xe71   : > { %4281 = vadd.xlane.f32.xlu1 %v14831_v60 }
 0xe73   : > { %4279 = vadd.xlane.f32.xlu0 %v14832_v53  ;;  %v8934_v53 = vpop.f32.mrf.mxu1 }
 0xe75   : > { %1924 = vadd.xlane.f32.xlu1 %v14833_v21  ;;  %v5720_v39 = vpop.f32.mrf.mxu1  ;;  %v14836_v21 = vld [vmem:[#allocation44_spill] sm:$0xff] }
 0xe77   : > { %1922 = vadd.xlane.f32.xlu0 %v14834_v58  ;;  %v13132_v58 = vsel %vm768_vm3, %v5690_v38, -1e+30  ;;  %v13149_v38 = vsel %vm768_vm3, %v5720_v39, -1e+30  ;;  %v8937_v60 = vpop.f32.mrf.mxu1 }
 0xe79   : > { %5769 = vmax.xlane.f32.xlu1 %v13116_v13 }
 0xe7b   : > { %5066 = vadd.xlane.f32.xlu0 %v12635_v28  ;;  %v13137_v28 = vsel %vm768_vm3, %v5700_v16, -1e+30  ;;  %v5730_v16 = vpop.f32.mrf.mxu1 }
 0xe7d   : > { %5775 = vmax.xlane.f32.xlu1 %v13122_v7  ;;  %v8940_v39 = vpop.f32.mrf.mxu1 }
 0xe7e   : > { %v13175_v30 = vsel %vm768_vm3, %v8940_v39, -1e+30  ;;  %v13190_v39 = vsel %vm768_vm3, %v5730_v16, -1e+30  ;;  %v14846_v16 = vld [vmem:[#allocation109_spill] sm:$0xff] }
 0xe7f   : > { %5771 = vmax.xlane.f32.xlu0 %v13127_v9  ;;  %14838 = vst [vmem:[#allocation103_spill] sm:$0xff] %v13175_v30  ;;  %v5740_v25 = vpop.f32.mrf.mxu1 }
 0xe81   : > { %5773 = vmax.xlane.f32.xlu1 %v13132_v58 }
 0xe83   : > { %5777 = vmax.xlane.f32.xlu0 %v13137_v28 }
 0xe85   : > { %5779 = vmax.xlane.f32.xlu1 %v13142_v31 }
 0xe87   : > { %2709 = vadd.xlane.f32.xlu0 %v14835_v35  ;;  %v13168_v35 = vsel %vm768_vm3, %v5710_v49, -1e+30 }
 0xe89   : > { %5068 = vadd.xlane.f32.xlu1 %v12639_v48  ;;  %v13163_v48 = vsel %vm768_vm3, %v8937_v60, -1e+30  ;;  %v13180_v60 = vsel %vm768_vm3, %v8934_v53, -1e+30  ;;  %v14842_v53 = vld [vmem:[#allocation108_spill] sm:$0xff] }
 0xe8b   : > { %5785 = vmax.xlane.f32.xlu0 %v13149_v38 }
 0xe8d   : > { %2711 = vadd.xlane.f32.xlu1 %v14836_v21  ;;  %v14839_v21 = vld [vmem:[#allocation107_spill] sm:$0xff] }
 0xe8f   : > { %3496 = vadd.xlane.f32.xlu0 %v14837_v50  ;;  %v13171_v50 = vpop.xlane.xlu1 %1912 }
 0xe91   : > { %5783 = vmax.xlane.f32.xlu1 %v13158_v36 }
 0xe93   : > { %5791 = vmax.xlane.f32.xlu0 %v13163_v48  ;;  %v13184_v49 = vpop.xlane.xlu1 %2697 }
 0xe95   : > { %5781 = vmax.xlane.f32.xlu1 %v13168_v35 }
 0xe97   : > { %5795 = vmax.xlane.f32.xlu0 %v13175_v30  ;;  %v13193_v22 = vpop.xlane.xlu1 %2699  ;;  %v14869_v30 = vld [vmem:[#allocation125_spill] sm:$0xff] }
 0xe99   : > { %5787 = vmax.xlane.f32.xlu1 %v13180_v60 }
 0xe9b   : > { %4283 = vadd.xlane.f32.xlu0 %v14839_v21  ;;  %v13198_v21 = vpop.xlane.xlu1 %3486 }
 0xe9d   : > { %3498 = vadd.xlane.f32.xlu1 %v14840_v47  ;;  %v14845_v47 = vld [vmem:[#allocation119_spill] sm:$0xff] }
 0xe9f   : > { %1926 = vadd.xlane.f32.xlu0 %v14841_v37  ;;  %v13203_v37 = vpop.xlane.xlu1 %4271 }
 0xea1   : > { %5789 = vmax.xlane.f32.xlu1 %v13190_v39 }
 0xea3   : > { %5070 = vadd.xlane.f32.xlu0 %v12642_v18  ;;  %v13208_v18 = vpop.xlane.xlu1 %1914 }
 0xea5   : > { %4285 = vadd.xlane.f32.xlu1 %v14842_v53  ;;  %v14849_v53 = vld [vmem:[#allocation120_spill] sm:$0xff] }
 0xea7   : > { %2713 = vadd.xlane.f32.xlu0 %v14843_v59  ;;  %v14850_v59 = vld [vmem:[#allocation110_spill] sm:$0xff] }
 0xea9   : > { %1928 = vadd.xlane.f32.xlu1 %v14844_v34  ;;  %v13213_v34 = vpop.xlane.xlu1 %4273 }
 0xeab   : > { %3500 = vadd.xlane.f32.xlu0 %v14845_v47  ;;  %v14851_v47 = vld [vmem:[#allocation47_spill] sm:$0xff] }
 0xead   : > { %5072 = vadd.xlane.f32.xlu1 %v12645_v4  ;;  %v14852_v4 = vld [vmem:[#allocation59_spill] sm:$0xff] }
 0xeaf   : > { %4287 = vadd.xlane.f32.xlu0 %v14846_v16  ;;  %v13218_v16 = vpop.xlane.xlu1 %1916 }
 0xeb1   : > { %2715 = vadd.xlane.f32.xlu1 %v14847_v19  ;;  %v14855_v19 = vld [vmem:[#allocation80_spill] sm:$0xff] }
 0xeb3   : > { %1930 = vadd.xlane.f32.xlu0 %v14848_v61  ;;  %v14854_v61 = vld [vmem:[#allocation143_spill] sm:$0xff] }
 0xeb5   : > { %3502 = vadd.xlane.f32.xlu1 %v14849_v53  ;;  %v13223_v53 = vpop.xlane.xlu1 %2701 }
 0xeb7   : > { %5074 = vadd.xlane.f32.xlu0 %v12756_v45  ;;  %v14856_v45 = vld [vmem:[#allocation60_spill] sm:$0xff] }
 0xeb9   : > { %4289 = vadd.xlane.f32.xlu1 %v14850_v59  ;;  %v14857_v59 = vld [vmem:[#allocation122_spill] sm:$0xff] }
 0xebb   : > { %2717 = vadd.xlane.f32.xlu0 %v14851_v47  ;;  %v13228_v47 = vpop.xlane.xlu1 %2703 }
 0xebd   : > { %1932 = vadd.xlane.f32.xlu1 %v14852_v4  ;;  %v14858_v4 = vld [vmem:[#allocation144_spill] sm:$0xff] }
 0xebf   : > { %3504 = vadd.xlane.f32.xlu0 %v14853_v26  ;;  %v14859_v26 = vld [vmem:[#allocation81_spill] sm:$0xff] }
 0xec1   : > { %5076 = vadd.xlane.f32.xlu1 %v12758_v54  ;;  %v14860_v54 = vld [vmem:[#allocation61_spill] sm:$0xff] }
 0xec3   : > { %4291 = vadd.xlane.f32.xlu0 %v14854_v61  ;;  %v13233_v61 = vpop.xlane.xlu1 %3490 }
 0xec5   : > { %2719 = vadd.xlane.f32.xlu1 %v14855_v19  ;;  %v14861_v19 = vld [vmem:[#allocation123_spill] sm:$0xff] }
 0xec7   : > { %1934 = vadd.xlane.f32.xlu0 %v14856_v45  ;;  %v13238_v45 = vsel %vm768_vm3, %v5740_v25, -1e+30 }
 0xec8   : > { %14862 = vst [vmem:[#allocation104_spill] sm:$0xff] %v13238_v45 }
 0xec9   : > { %3506 = vadd.xlane.f32.xlu1 %v14857_v59  ;;  %v13242_v59 = vpop.xlane.xlu1 %5060 }
 0xecb   : > { %5078 = vadd.xlane.f32.xlu0 %v12763_v15  ;;  %v14863_v15 = vld [vmem:[#allocation145_spill] sm:$0xff] }
 0xecd   : > { %4293 = vadd.xlane.f32.xlu1 %v14858_v4  ;;  %v13245_v4 = vpop.xlane.xlu0 %3484  ;;  %v13249_v62 = vpop.xlane.xlu1 %5058 }
 0xecf   : > { %2721 = vadd.xlane.f32.xlu0 %v14859_v26  ;;  %v14864_v26 = vld [vmem:[#allocation62_spill] sm:$0xff] }
 0xed1   : > { %1936 = vadd.xlane.f32.xlu1 %v14860_v54  ;;  %v14865_v54 = vld [vmem:[#allocation82_spill] sm:$0xff]  ;;  %v13252_v25 = vpop.xlane.xlu0 %3488 }
 0xed3   : > { %3508 = vadd.xlane.f32.xlu0 %v14861_v19  ;;  %v14866_v19 = vld [vmem:[#allocation124_spill] sm:$0xff] }
 0xed5   : > { %5793 = vmax.xlane.f32.xlu1 %v13238_v45 }
 0xed7   : > { %4295 = vadd.xlane.f32.xlu0 %v14863_v15 }
 0xed9   : > { %5080 = vadd.xlane.f32.xlu1 %v12768_v3 }
 0xedb   : > { %1938 = vadd.xlane.f32.xlu0 %v14864_v26 }
 0xedd   : > { %2723 = vadd.xlane.f32.xlu1 %v14865_v54 }
 0xedf   : > { %5082 = vadd.xlane.f32.xlu0 %v12778_v56 }
 0xee1   : > { %3510 = vadd.xlane.f32.xlu1 %v14866_v19  ;;  %v14870_v19 = vld [vmem:[#allocation63_spill] sm:$0xff] }
 0xee2   : > { %v5768_v1 = vpop.xlane.xlu1 %5767 }
 0xee3   : > { %v5798_v15 = vsub.f32 %v13092_v14, %v5768_v1  ;;  %2725 = vadd.xlane.f32.xlu0 %v14867_v41  ;;  %v14871_v41 = vld [vmem:[#allocation147_spill] sm:$0xff] }
 0xee4   : > { %v5766_v3 = vpop.xlane.xlu0 %5765 }
 0xee5   : > { %v5797_v10 = vsub.f32 %v13097_v12, %v5766_v3  ;;  %4297 = vadd.xlane.f32.xlu1 %v14868_v51  ;;  %v5815_v26 = vmul.f32 1.442695, %v5798_v15  ;;  %v14872_v12 = vld [vmem:[#allocation148_spill] sm:$0xff]  ;;  %v14875_v3 = vld [vmem:[#allocation126_spill] sm:$0xff] }
 0xee6   : > { %v13259_v54 = vpop.xlane.xlu1 %4277 }
 0xee7   : > { %v5813_v45 = vmul.f32 1.442695, %v5797_v10  ;;  %3512 = vadd.xlane.f32.xlu0 %v14869_v30  ;;  %v14873_v30 = vld [vmem:[#allocation84_spill] sm:$0xff] }
 0xee8   : > { %v13262_v56 = vpop.xlane.xlu0 %4275 }
 0xee9   : > { %9451 = vpow2.f32 %v5813_v45  ;;  %1940 = vadd.xlane.f32.xlu1 %v14870_v19 }
 0xeea   : > { %9453 = vpow2.f32 %v5815_v26  ;;  %v13265_v1 = vpop.xlane.xlu1 %1920 }
 0xeeb   : > { %4299 = vadd.xlane.f32.xlu0 %v14871_v41  ;;  %v14877_v41 = vld [vmem:[#allocation6_spill] sm:$0xff] }
 0xeec   : > { %v13268_v14 = vpop.xlane.xlu0 %1918 }
 0xeed   : > { %5084 = vadd.xlane.f32.xlu1 %v12783_v5 }
 0xeee   : > { %v13271_v51 = vpop.xlane.xlu1 %5064 }
 0xeef   : > { %4301 = vadd.xlane.f32.xlu0 %v14872_v12 }
 0xef0   : > { %v13274_v10 = vpop.xlane.xlu0 %5062 }
 0xef1   : > { %2727 = vadd.xlane.f32.xlu1 %v14873_v30  ;;  %v14879_v30 = vld [vmem:[#allocation8_spill] sm:$0xff] }
 0xef2   : > { %v13277_v45 = vpop.xlane.xlu1 %2707 }
 0xef3   : > { %14874 = vst [vmem:[#allocation53_spill] sm:$0xff] %v13277_v45  ;;  %5088 = vadd.xlane.f32.xlu0 %v12884_v27 }
 0xef4   : > { %v13280_v15 = vpop.xlane.xlu0 %2705 }
 0xef5   : > { %3514 = vadd.xlane.f32.xlu1 %v14875_v3 }
 0xef6   : > { %v13283_v26 = vpop.eup %9451  ;;  %v13285_v19 = vpop.xlane.xlu1 %3494 }
 0xef7   : > { %14876 = vst [vmem:[#allocation52_spill] sm:$0xff] %v13285_v19  ;;  %v13287_v5 = vpop.eup %9453  ;;  %8973 = vmatprep.mubr.f32.mxu0 %v13283_v26  ;;  %1190 = vadd.xlane.f32.xlu0 %v14877_v41  ;;  %v14880_v41 = vld [vmem:[#allocation5_spill] sm:$0xff] }
 0xef8   : > { %v13291_v12 = vpop.xlane.xlu0 %3492  ;;  %8974 = vmatmul.mubr.f32.vlgmr.msra.gmra.mxu0 %v13287_v5 }
 0xef9   : > { %8998 = vmatpush3.xpose.msk.msra.mxu0 %vm866_vm2, %v12918_v23  ;;  %5086 = vadd.xlane.f32.xlu1 %v12882_v29  ;;  %v14882_v29 = vld [vmem:[#allocation10_spill] sm:$0xff] }
 0xefa   : > { %8999 = vmatprep.subr.msk.mxu0 %vm866_vm2, %v12848_v55  ;;  %v13299_v27 = vpop.xlane.xlu1 %4281 }
 0xefb   : > { %14878 = vst [vmem:[#allocation42_spill] sm:$0xff] %v13299_v27  ;;  %1194 = vadd.xlane.f32.xlu0 %v14879_v30  ;;  %v14884_v30 = vld [vmem:[#allocation7_spill] sm:$0xff]  ;;  %v14885_v27 = vld [vmem:[#allocation12_spill] sm:$0xff] }
 0xefc   : > { %v13302_v3 = vpop.xlane.xlu0 %4279 }
 0xefd   : > { %9000 = vmatpush3.xpose.msk.msra.mxu0 %vm866_vm2, %v12848_v55  ;;  %1188 = vadd.xlane.f32.xlu1 %v14880_v41 }
 0xefe   : > { %9001 = vmatprep.subr.msk.mxu0 %vm866_vm2, %v12854_v11  ;;  %v13309_v23 = vpop.xlane.xlu1 %1924 }
 0xeff   : > { %14881 = vst [vmem:[#allocation41_spill] sm:$0xff] %v13309_v23  ;;  %1198 = vadd.xlane.f32.xlu0 %v14882_v29  ;;  %v14887_v29 = vld [vmem:[#allocation9_spill] sm:$0xff] }
 0xf00   : > { %v13312_v19 = vpop.xlane.xlu0 %1922 }
 0xf01   : > { %14883 = vst [vmem:[#allocation116_spill] sm:$0xff] %v13312_v19  ;;  %9002 = vmatpush3.xpose.msk.msra.mxu0 %vm866_vm2, %v12854_v11  ;;  %1192 = vadd.xlane.f32.xlu1 %v14884_v30  ;;  %v14888_v30 = vld [vmem:[#allocation14_spill] sm:$0xff] }
 0xf02   : > { %9003 = vmatprep.subr.msk.mxu0 %vm866_vm2, %v12931_v33  ;;  %v5770_v55 = vpop.xlane.xlu1 %5769 }
 0xf03   : > { %v5799_v41 = vsub.f32 %v13116_v13, %v5770_v55  ;;  %1202 = vadd.xlane.f32.xlu0 %v14885_v27  ;;  %v14889_v55 = vld [vmem:[#allocation11_spill] sm:$0xff] }
 0xf04   : > { %v13321_v45 = vpop.xlane.xlu0 %5066 }
 0xf05   : > { %14886 = vst [vmem:[#allocation115_spill] sm:$0xff] %v13321_v45  ;;  %v5817_v23 = vmul.f32 1.442695, %v5799_v41  ;;  %9004 = vmatpush3.xpose.msk.msra.mxu0 %vm866_vm2, %v12931_v33  ;;  %1196 = vadd.xlane.f32.xlu1 %v14887_v29 }
 0xf06   : > { %9005 = vmatprep.subr.msk.mxu0 %vm866_vm2, %v12860_v8  ;;  %v5776_v11 = vpop.xlane.xlu1 %5775 }
 0xf07   : > { %9455 = vpow2.f32 %v5817_v23  ;;  %1206 = vadd.xlane.f32.xlu0 %v14888_v30  ;;  %v5802_v19 = vsub.f32 %v13122_v7, %v5776_v11  ;;  %v14890_v23 = vld [vmem:[#allocation16_spill] sm:$0xff] }
 0xf08   : > { %v5772_v13 = vpop.xlane.xlu0 %5771 }
 0xf09   : > { %v5800_v27 = vsub.f32 %v13127_v9, %v5772_v13  ;;  %9006 = vmatpush3.xpose.msk.msra.mxu0 %vm866_vm2, %v12860_v8  ;;  %1200 = vadd.xlane.f32.xlu1 %v14889_v55  ;;  %v5823_v30 = vmul.f32 1.442695, %v5802_v19  ;;  %v14891_v8 = vld [vmem:[#allocation13_spill] sm:$0xff]  ;;  %v14894_v55 = vld [vmem:[#allocation20_spill] sm:$0xff] }
 0xf0a   : > { %9007 = vmatprep.subr.msk.mxu0 %vm866_vm2, %v12940_v2  ;;  %v5774_v33 = vpop.xlane.xlu1 %5773 }
 0xf0b   : > { %v5819_v41 = vmul.f32 1.442695, %v5800_v27  ;;  %v5801_v29 = vsub.f32 %v13132_v58, %v5774_v33  ;;  %1210 = vadd.xlane.f32.xlu0 %v14890_v23  ;;  %v14892_v27 = vld [vmem:[#allocation18_spill] sm:$0xff]  ;;  %v14896_v23 = vld [vmem:[#allocation19_spill] sm:$0xff] }
 0xf0c   : > { %v5778_v45 = vpop.xlane.xlu0 %5777 }
 0xf0d   : > { %9457 = vpow2.f32 %v5819_v41  ;;  %v5821_v7 = vmul.f32 1.442695, %v5801_v29  ;;  %v5803_v9 = vsub.f32 %v13137_v28, %v5778_v45  ;;  %9008 = vmatpush3.xpose.msk.msra.mxu0 %vm866_vm2, %v12940_v2  ;;  %1204 = vadd.xlane.f32.xlu1 %v14891_v8  ;;  %v14893_v2 = vld [vmem:[#allocation15_spill] sm:$0xff]  ;;  %v14895_v41 = vld [vmem:[#allocation17_spill] sm:$0xff] }
 0xf0e   : > { %9009 = vmatprep.subr.msk.mxu0 %vm866_vm2, %v12863_v52  ;;  %v5780_v11 = vpop.xlane.xlu1 %5779 }
 0xf0f   : > { %9459 = vpow2.f32 %v5821_v7  ;;  %v5825_v13 = vmul.f32 1.442695, %v5803_v9  ;;  %v5804_v58 = vsub.f32 %v13142_v31, %v5780_v11  ;;  %1214 = vadd.xlane.f32.xlu0 %v14892_v27 }
 0xf10   : > { %9461 = vpow2.f32 %v5823_v30  ;;  %v13346_v19 = vpop.xlane.xlu0 %2709 }
 0xf11   : > { %9463 = vpow2.f32 %v5825_v13  ;;  %v5827_v28 = vmul.f32 1.442695, %v5804_v58  ;;  %9010 = vmatpush3.xpose.msk.msra.mxu0 %vm866_vm2, %v12863_v52  ;;  %1208 = vadd.xlane.f32.xlu1 %v14893_v2 }
 0xf12   : > { %9011 = vmatprep.subr.msk.mxu0 %vm866_vm2, %v12947_v42  ;;  %v13353_v45 = vpop.xlane.xlu1 %5068 }
 0xf13   : > { %1218 = vadd.xlane.f32.xlu0 %v14894_v55  ;;  %9465 = vpow2.f32 %v5827_v28  ;;  %v14898_v55 = vld [vmem:[#allocation65_spill] sm:$0xff] }
 0xf14   : > { %v13356_v31 = vpop.eup %9455  ;;  %v5786_v33 = vpop.xlane.xlu0 %5785  ;;  %9467 = vrcp.f32 %v13171_v50 }
 0xf15   : > { %9012 = vmatpush3.xpose.msk.msra.mxu0 %vm866_vm2, %v12947_v42  ;;  %1212 = vadd.xlane.f32.xlu1 %v14895_v41  ;;  %9469 = vrcp.f32 %v13154_v46 }
 0xf16   : > { %8976 = vmatprep.mubr.f32.mxu0 %v13356_v31  ;;  %9013 = vmatprep.subr.msk.mxu0 %vm866_vm2, %v12872_v44  ;;  %v13364_v52 = vpop.xlane.xlu1 %2711  ;;  %9471 = vrcp.f32 %v13245_v4  ;;  %v5807_v4 = vsub.f32 %v13149_v38, %v5786_v33 }
 0xf17   : > { %9473 = vrcp.f32 %v13184_v49 }
 0xf18   : > { %v13368_v29 = vpop.xlane.xlu0 %3496  ;;  %9475 = vrcp.f32 %v13203_v37 }
 0xf19   : > { %9014 = vmatpush3.xpose.msk.msra.mxu0 %vm866_vm2, %v12872_v44  ;;  %1216 = vadd.xlane.f32.xlu1 %v14896_v23  ;;  %9477 = vrcp.f32 %v13193_v22  ;;  %v14899_v23 = vld [vmem:[#allocation128_spill] sm:$0xff] }
 0xf1a   : > { %v13373_v42 = vpop.eup %9457  ;;  %9015 = vmatprep.subr.msk.mxu0 %vm866_vm2, %v12956_v20  ;;  %v5784_v30 = vpop.xlane.xlu1 %5783  ;;  %9479 = vrcp.f32 %v13198_v21 }
 0xf1b   : > { %8977 = vmatmul.mubr.f32.gmra.mxu0 %v13373_v42  ;;  %v5806_v44 = vsub.f32 %v13158_v36, %v5784_v30  ;;  %9481 = vrcp.f32 %v13213_v34 }
 0xf1c   : > { %v13379_v50 = vpop.eup %9459  ;;  %v5792_v46 = vpop.xlane.xlu0 %5791 }
 0xf1d   : > { %v13382_v7 = vpop.eup %9461  ;;  %9016 = vmatpush3.xpose.msk.msra.mxu0 %vm866_vm2, %v12956_v20  ;;  %8979 = vmatprep.mubr.f32.mxu0 %v13379_v50  ;;  %v5831_v20 = vmul.f32 1.442695, %v5806_v44 }
 0xf1e   : > { %v13388_v9 = vpop.eup %9463  ;;  %9017 = vmatprep.subr.msk.mxu0 %vm866_vm2, %v12876_v57  ;;  %v5782_v8 = vpop.xlane.xlu1 %5781 }
 0xf1f   : > { %v5805_v49 = vsub.f32 %v13168_v35, %v5782_v8  ;;  %8980 = vmatmul.mubr.f32.gmra.mxu0 %v13382_v7  ;;  %v5833_v35 = vmul.f32 1.442695, %v5807_v4 }
 0xf20   : > { %v13397_v36 = vpop.xlane.xlu0 %5795  ;;  %8982 = vmatprep.mubr.f32.mxu0 %v13388_v9  ;;  %v13403_v11 = vpop.eup %9465 }
 0xf21   : > { %v5829_v38 = vmul.f32 1.442695, %v5805_v49  ;;  %9018 = vmatpush3.xpose.msk.msra.mxu0 %vm866_vm2, %v12876_v57  ;;  %v9468_v21 = vpop.eup %9467 }
 0xf22   : > { %9019 = vmatprep.subr.msk.mxu0 %vm866_vm2, %v12878_v63  ;;  %v5788_v22 = vpop.xlane.xlu1 %5787  ;;  %v9470_v57 = vpop.eup %9469 }
 0xf23   : > { %9483 = vpow2.f32 %v5829_v38  ;;  %v5808_v37 = vsub.f32 %v13180_v60, %v5788_v22  ;;  %8983 = vmatmul.mubr.f32.gmra.mxu0 %v13403_v11  ;;  %v14897_v60 = vld [vmem:[#allocation64_spill] sm:$0xff]  ;;  %v9472_v28 = vpop.eup %9471  ;;  %v2151_v33 = vmul.f32 %v9470_v57, %v14898_v55 }
 0xf24   : > { %9485 = vrcp.f32 %v13218_v16  ;;  %v13411_v13 = vpop.xlane.xlu0 %4283  ;;  %v2152_v27 = vmul.f32 %v9468_v21, %v14897_v60  ;;  %v5810_v16 = vsub.f32 %v13163_v48, %v5792_v46  ;;  %v9474_v41 = vpop.eup %9473  ;;  %v3725_v30 = vmul.f32 %v9472_v28, %v14899_v23 }
 0xf25   : > { %9487 = vpow2.f32 %v5831_v20  ;;  %v5835_v58 = vmul.f32 1.442695, %v5808_v37  ;;  %9020 = vmatpush3.xpose.msk.msra.mxu0 %vm866_vm2, %v12878_v63  ;;  %v9476_v46 = vpop.eup %9475 }
 0xf26   : > { %9489 = vpow2.f32 %v5833_v35  ;;  %9021 = vmatprep.subr.msk.mxu0 %vm866_vm2, %v12880_v0  ;;  %v13417_v34 = vpop.xlane.xlu1 %3498  ;;  %v9478_v8 = vpop.eup %9477 }
 0xf27   : > { %9491 = vpow2.f32 %v5835_v58 }
 0xf28   : > { %v13421_v2 = vpop.xlane.xlu0 %1926  ;;  %9493 = vrcp.f32 %v13208_v18  ;;  %v5839_v18 = vmul.f32 1.442695, %v5810_v16 }
 0xf29   : > { %9022 = vmatpush3.xpose.msk.msra.mxu0 %vm866_vm2, %v12880_v0  ;;  %2185 = vrot.lane.b32.xlu0 %v2152_v27, %s9857_s27  ;;  %9495 = vrcp.f32 %v13242_v59  ;;  %v14900_v0 = vld [vmem:[#allocation86_spill] sm:$0xff]  ;;  %v9480_v59 = vpop.eup %9479 }
 0xf2a   : > { %9023 = vmatprep.subr.msk.mxu0 %vm866_vm2, %v12887_v32  ;;  %2183 = vrot.lane.b32.xlu1 %v2151_v33, %s9857_s27  ;;  %v5790_v63 = vpop.xlane.xlu1 %5789  ;;  %v2938_v4 = vmul.f32 %v9474_v41, %v14900_v0  ;;  %9497 = vrcp.f32 %v13249_v62  ;;  %v9482_v20 = vpop.eup %9481  ;;  %v14901_v62 = vld [vmem:[#allocation150_spill] sm:$0xff] }
 0xf2b   : > { %v5809_v48 = vsub.f32 %v13190_v39, %v5790_v63  ;;  %9499 = vrcp.f32 %v13228_v47  ;;  %v4512_v38 = vmul.f32 %v9476_v46, %v14901_v62  ;;  %v14902_v47 = vld [vmem:[#allocation85_spill] sm:$0xff]  ;;  %v14905_v33 = vld [vmem:[#allocation66_spill] sm:$0xff] }
 0xf2c   : > { %v13434_v44 = vpop.xlane.xlu0 %5070  ;;  %v2939_v37 = vmul.f32 %v9478_v8, %v14902_v47 }
 0xf2d   : > { %v5837_v49 = vmul.f32 1.442695, %v5809_v48  ;;  %9024 = vmatpush3.xpose.msk.msra.mxu0 %vm866_vm2, %v12887_v32  ;;  %3757 = vrot.lane.b32.xlu0 %v3725_v30, %s9858_s29 }
 0xf2e   : > { %9025 = vmatprep.subr.msk.mxu0 %vm866_vm2, %v12963_v40  ;;  %2970 = vrot.lane.b32.xlu1 %v2938_v4, %s9859_s30  ;;  %v13445_v39 = vpop.xlane.xlu1 %4285 }
 0xf2f   : > { %9501 = vpow2.f32 %v5837_v49 }
 0xf30   : > { %v13448_v35 = vpop.eup %9483  ;;  %9503 = vpow2.f32 %v5839_v18  ;;  %v13450_v32 = vpop.xlane.xlu0 %2713 }
 0xf31   : > { %v9486_v22 = vpop.eup %9485  ;;  %9505 = vrcp.f32 %v13223_v53  ;;  %9026 = vmatpush3.xpose.msk.msra.mxu0 %vm866_vm2, %v12963_v40  ;;  %4544 = vrot.lane.b32.xlu0 %v4512_v38, %s9860_s7  ;;  %v14903_v40 = vld [vmem:[#allocation149_spill] sm:$0xff] }
 0xf32   : > { %v13457_v21 = vpop.eup %9487  ;;  %8985 = vmatprep.mubr.f32.mxu0 %v13448_v35  ;;  %9027 = vmatprep.subr.msk.mxu0 %vm866_vm2, %v12899_v24  ;;  %v13462_v57 = vpop.xlane.xlu1 %1928  ;;  %9507 = vrcp.f32 %v13233_v61  ;;  %v4513_v53 = vmul.f32 %v9482_v20, %v14903_v40  ;;  %v14904_v61 = vld [vmem:[#allocation127_spill] sm:$0xff]  ;;  %v2154_v41 = vmul.f32 %v9486_v22, %v14905_v33 }
 0xf33   : > { %v13464_v58 = vpop.eup %9489  ;;  %2972 = vrot.lane.b32.xlu1 %v2939_v37, %s9859_s30  ;;  %8986 = vmatmul.mubr.f32.gmra.mxu0 %v13457_v21  ;;  %9509 = vrcp.f32 %v13252_v25  ;;  %v3726_v28 = vmul.f32 %v9480_v59, %v14904_v61  ;;  %v14910_v61 = vld [vmem:[#allocation130_spill] sm:$0xff] }
 0xf34   : > { %v13470_v60 = vpop.eup %9491  ;;  %8988 = vmatprep.mubr.f32.mxu0 %v13464_v58  ;;  %v13473_v27 = vpop.xlane.xlu0 %3500  ;;  %9511 = vrcp.f32 %v13262_v56 }
 0xf35   : > { %9028 = vmatpush3.xpose.msk.msra.mxu0 %vm866_vm2, %v12899_v24  ;;  %4546 = vrot.lane.b32.xlu0 %v4513_v53, %s9860_s7  ;;  %v9494_v16 = vpop.eup %9493  ;;  %v14906_v24 = vld [vmem:[#allocation67_spill] sm:$0xff]  ;;  %9513 = vrcp.f32 %v13268_v14  ;;  %v14908_v14 = vld [vmem:[#allocation88_spill] sm:$0xff] }
 0xf36   : > { %9053 = vmatprep.subr.mxu0 %v13000_v17  ;;  %v13481_v55 = vpop.xlane.xlu1 %5072  ;;  %v9496_v63 = vpop.eup %9495  ;;  %v2153_v48 = vmul.f32 %v9494_v16, %v14906_v24 }
 0xf37   : > { %3759 = vrot.lane.b32.xlu1 %v3726_v28, %s9858_s29  ;;  %8989 = vmatmul.mubr.f32.gmra.mxu0 %v13470_v60  ;;  %v9498_v23 = vpop.eup %9497  ;;  %v5300_v18 = vmul.f32 %v9496_v63, %v13058_v6  ;;  %v14907_v6 = vld [vmem:[#allocation87_spill] sm:$0xff]  ;;  %v14911_v63 = vld [vmem:[#allocation152_spill] sm:$0xff] }
 0xf38   : > { %v13486_v25 = vpop.xlane.xlu0 %4287  ;;  %v9500_v46 = vpop.eup %9499  ;;  %v5299_v56 = vmul.f32 %v9498_v23, %v13060_v43  ;;  %v14909_v43 = vld [vmem:[#allocation129_spill] sm:$0xff] }
 0xf39   : > { %2189 = vrot.lane.b32.xlu0 %v2154_v41, %s9857_s27  ;;  %v2941_v20 = vmul.f32 %v9500_v46, %v14907_v6 }
 0xf3a   : > { %v13491_v30 = vpop.xlane.xlu1 %2715 }
 0xf3b   : > { %2187 = vrot.lane.b32.xlu1 %v2153_v48, %s9857_s27 }
 0xf3c   : > { %v13495_v0 = vpop.eup %9501  ;;  %v13497_v4 = vpop.xlane.xlu0 %1930 }
 0xf3d   : > { %v13499_v8 = vpop.eup %9503  ;;  %5333 = vrot.lane.b32.xlu0 %v5300_v18, %s9861_s8  ;;  %8991 = vmatprep.mubr.f32.mxu0 %v13495_v0  ;;  %v14912_v18 = vld [vmem:[#allocation69_spill] sm:$0xff] }
 0xf3e   : > { %v9506_v49 = vpop.eup %9505  ;;  %8992 = vmatmul.mubr.f32.gmra.mxu0 %v13499_v8  ;;  %v13506_v59 = vpop.xlane.xlu1 %3502 }
 0xf3f   : > { %5331 = vrot.lane.b32.xlu1 %v5299_v56, %s9861_s8  ;;  %v9508_v62 = vpop.eup %9507  ;;  %v2940_v22 = vmul.f32 %v9506_v49, %v14908_v14 }
 0xf40   : > { %v13510_v38 = vpop.xlane.xlu0 %5074  ;;  %v9510_v47 = vpop.eup %9509  ;;  %v3728_v40 = vmul.f32 %v9508_v62, %v14909_v43  ;;  %v14915_v43 = vld [vmem:[#allocation103_spill] sm:$0xff] }
 0xf41   : > { %2976 = vrot.lane.b32.xlu0 %v2941_v20, %s9859_s30  ;;  %v3727_v28 = vmul.f32 %v9510_v47, %v14910_v61  ;;  %v9512_v16 = vpop.eup %9511 }
 0xf42   : > { %v13514_v37 = vpop.xlane.xlu1 %4289  ;;  %v4514_v24 = vmul.f32 %v9512_v16, %v14911_v63  ;;  %v9514_v48 = vpop.eup %9513  ;;  %v14916_v16 = vld [vmem:[#allocation104_spill] sm:$0xff] }
 0xf43   : > { %2974 = vrot.lane.b32.xlu1 %v2940_v22, %s9859_s30  ;;  %v2155_v56 = vmul.f32 %v9514_v48, %v14912_v18 }
 0xf44   : > { %v13518_v53 = vpop.xlane.xlu0 %2717 }
 0xf45   : > { %3763 = vrot.lane.b32.xlu0 %v3728_v40, %s9858_s29  ;;  %v5812_v40 = vsub.f32 %v14915_v43, %v13397_v36 }
 0xf46   : > { %v13522_v33 = vpop.xlane.xlu1 %1932 }
 0xf47   : > { %3761 = vrot.lane.b32.xlu1 %v3727_v28, %s9858_s29 }
 0xf48   : > { %v13525_v41 = vpop.xlane.xlu0 %3504 }
 0xf4a   : > { %v13528_v23 = vpop.xlane.xlu1 %5076 }
 0xf4b   : > { %4548 = vrot.lane.b32.xlu1 %v4514_v24, %s9860_s7  ;;  %v5843_v24 = vmul.f32 1.442695, %v5812_v40 }
 0xf4c   : > { %v13531_v46 = vpop.xlane.xlu0 %4291 }
 0xf4e   : > { %v13534_v49 = vpop.xlane.xlu1 %2719 }
 0xf4f   : > { %2191 = vrot.lane.b32.xlu1 %v2155_v56, %s9857_s27 }
 0xf50   : > { %v13537_v6 = vpop.xlane.xlu0 %1934 }
 0xf52   : > { %v13539_v20 = vpop.xlane.xlu1 %3506 }
 0xf54   : > { %v13541_v62 = vpop.xlane.xlu0 %5078 }
 0xf56   : > { %v13543_v14 = vpop.xlane.xlu1 %4293 }
 0xf57   : > { %14913 = vst [vmem:[#allocation106_spill] sm:$0xff] %v13543_v14 }
 0xf58   : > { %v13545_v22 = vpop.xlane.xlu0 %2721 }
 0xf5a   : > { %v13547_v47 = vpop.xlane.xlu1 %1936 }
 0xf5b   : > { %14914 = vst [vmem:[#allocation105_spill] sm:$0xff] %v13547_v47 }
 0xf5c   : > { %v13551_v61 = vpop.xlane.xlu0 %3508 }
 0xf5e   : > { %v5794_v28 = vpop.xlane.xlu1 %5793 }
 0xf5f   : > { %v5811_v63 = vsub.f32 %v14916_v16, %v5794_v28 }
 0xf60   : > { %v13554_v48 = vpop.xlane.xlu0 %4295 }
 0xf61   : > { %v5841_v18 = vmul.f32 1.442695, %v5811_v63 }
 0xf62   : > { %v13556_v56 = vpop.xlane.xlu1 %5080 }
 0xf63   : > { %9515 = vpow2.f32 %v5841_v18  ;;  %v14926_v18 = vld [vmem:[#allocation166_spill] sm:$0xff] }
 0xf64   : > { %9517 = vpow2.f32 %v5843_v24  ;;  %v13558_v14 = vpop.xlane.xlu0 %1938  ;;  %5845 = vadd.xlane.f32.xlu0 %v13283_v26 }
 0xf65   : > { %14917 = vst [vmem:[#allocation55_spill] sm:$0xff] %v13558_v14  ;;  %v15005_v14 = vld [vmem:[#allocation115_spill] sm:$0xff] }
 0xf66   : > { %v13561_v47 = vpop.xlane.xlu1 %2723 }
 0xf68   : > { %v13563_v36 = vpop.xlane.xlu0 %5082  ;;  %5849 = vadd.xlane.f32.xlu0 %v13356_v31  ;;  %v14924_v31 = vld [vmem:[#allocation171_spill] sm:$0xff] }
 0xf69   : > { %14918 = vst [vmem:[#allocation54_spill] sm:$0xff] %v13563_v36 }
 0xf6a   : > { %v13566_v43 = vpop.xlane.xlu1 %3510 }
 0xf6b   : > { %14919 = vst [vmem:[#allocation43_spill] sm:$0xff] %v13566_v43 }
 0xf6c   : > { %v13568_v40 = vpop.xlane.xlu0 %2725  ;;  %5853 = vadd.xlane.f32.xlu0 %v13379_v50 }
 0xf6d   : > { %14920 = vst [vmem:[#allocation44_spill] sm:$0xff] %v13568_v40 }
 0xf6e   : > { %v13571_v28 = vpop.xlane.xlu1 %4297 }
 0xf6f   : > { %14921 = vst [vmem:[#allocation117_spill] sm:$0xff] %v13571_v28 }
 0xf70   : > { %v13573_v16 = vpop.eup %9515  ;;  %v13575_v63 = vpop.xlane.xlu0 %3512  ;;  %5857 = vadd.xlane.f32.xlu0 %v13388_v9  ;;  %v14928_v9 = vld [vmem:[#allocation173_spill] sm:$0xff] }
 0xf71   : > { %14922 = vst [vmem:[#allocation107_spill] sm:$0xff] %v13575_v63  ;;  %v9518_v26 = vpop.eup %9517  ;;  %8994 = vmatprep.mubr.f32.mxu0 %v13573_v16 }
 0xf72   : > { %8995 = vmatmul.mubr.f32.gmra.mxu0 %v9518_v26  ;;  %v13579_v24 = vpop.xlane.xlu1 %1940 }
 0xf73   : > { %14923 = vst [vmem:[#allocation118_spill] sm:$0xff] %v13579_v24  ;;  %5847 = vadd.xlane.f32.xlu1 %v13287_v5  ;;  %9029 = vmatprep.mubr.msk.f32.mxu0 %vm866_vm2, %v14924_v31  ;;  %v14929_v5 = vld [vmem:[#allocation37_spill] sm:$0xff]  ;;  %v14932_v31 = vld [vmem:[#allocation167_spill] sm:$0xff] }
 0xf74   : > { %v13584_v50 = vpop.xlane.xlu0 %4299  ;;  %5861 = vadd.xlane.f32.xlu0 %v13448_v35  ;;  %v14931_v35 = vld [vmem:[#allocation50_spill] sm:$0xff] }
 0xf75   : > { %14925 = vst [vmem:[#allocation56_spill] sm:$0xff] %v13584_v50 }
 0xf76   : > { %9030 = vmatmul.mubr.msk.f32.vlgmr.msra.gmra.mxu0 %vm866_vm2, %v14926_v18  ;;  %v13589_v63 = vpop.xlane.xlu1 %5084 }
 0xf77   : > { %14927 = vst [vmem:[#allocation108_spill] sm:$0xff] %v13589_v63  ;;  %5851 = vadd.xlane.f32.xlu1 %v13373_v42  ;;  %9054 = vmatpush3.msra.mxu0 %v13000_v17  ;;  %v14934_v17 = vld [vmem:[#allocation165_spill] sm:$0xff] }
 0xf78   : > { %9032 = vmatprep.mubr.msk.f32.mxu0 %vm866_vm2, %v14928_v9  ;;  %9055 = vmatprep.subr.mxu0 %v14929_v5  ;;  %v13596_v24 = vpop.xlane.xlu0 %4301  ;;  %v14935_v42 = vld [vmem:[#allocation101_spill] sm:$0xff] }
 0xf79   : > { %14930 = vst [vmem:[#allocation45_spill] sm:$0xff] %v13596_v24  ;;  %5865 = vadd.xlane.f32.xlu0 %v13464_v58  ;;  %9056 = vmatpush3.msra.mxu0 %v14929_v5  ;;  %v14937_v58 = vld [vmem:[#allocation39_spill] sm:$0xff]  ;;  %v14938_v5 = vld [vmem:[#allocation168_spill] sm:$0xff] }
 0xf7a   : > { %9057 = vmatprep.subr.mxu0 %v14931_v35  ;;  %9033 = vmatmul.mubr.msk.f32.gmra.mxu0 %vm866_vm2, %v14932_v31  ;;  %v13603_v18 = vpop.xlane.xlu1 %2727 }
 0xf7b   : > { %14933 = vst [vmem:[#allocation57_spill] sm:$0xff] %v13603_v18  ;;  %5855 = vadd.xlane.f32.xlu1 %v13382_v7  ;;  %9058 = vmatpush3.msra.mxu0 %v14931_v35  ;;  %v14940_v7 = vld [vmem:[#allocation114_spill] sm:$0xff] }
 0xf7c   : > { %9035 = vmatprep.mubr.msk.f32.mxu0 %vm866_vm2, %v14934_v17  ;;  %9059 = vmatprep.subr.mxu0 %v14935_v42  ;;  %v13610_v9 = vpop.xlane.xlu0 %5088  ;;  %v14941_v35 = vld [vmem:[#allocation102_spill] sm:$0xff] }
 0xf7d   : > { %14936 = vst [vmem:[#allocation119_spill] sm:$0xff] %v13610_v9  ;;  %5869 = vadd.xlane.f32.xlu0 %v13495_v0  ;;  %9060 = vmatpush3.msra.mxu0 %v14935_v42  ;;  %v14942_v0 = vld [vmem:[#allocation174_spill] sm:$0xff]  ;;  %v14943_v42 = vld [vmem:[#allocation169_spill] sm:$0xff] }
 0xf7e   : > { %9061 = vmatprep.subr.mxu0 %v14937_v58  ;;  %9036 = vmatmul.mubr.msk.f32.gmra.mxu0 %vm866_vm2, %v14938_v5  ;;  %v13617_v31 = vpop.xlane.xlu1 %3514 }
 0xf7f   : > { %14939 = vst [vmem:[#allocation109_spill] sm:$0xff] %v13617_v31  ;;  %5859 = vadd.xlane.f32.xlu1 %v13403_v11  ;;  %9062 = vmatpush3.msra.mxu0 %v14937_v58  ;;  %v14945_v11 = vld [vmem:[#allocation49_spill] sm:$0xff]  ;;  %v14946_v58 = vld [vmem:[#allocation40_spill] sm:$0xff] }
 0xf80   : > { %9038 = vmatprep.mubr.msk.f32.mxu0 %vm866_vm2, %v14940_v7  ;;  %9063 = vmatprep.subr.mxu0 %v14941_v35  ;;  %v1191_v17 = vpop.xlane.xlu0 %1190 }
 0xf81   : > { %9519 = vrcp.f32 %v1191_v17  ;;  %5875 = vadd.xlane.f32.xlu0 %v9518_v26  ;;  %9064 = vmatpush3.msra.mxu0 %v14941_v35  ;;  %v14947_v26 = vld [vmem:[#allocation175_spill] sm:$0xff]  ;;  %v14948_v35 = vld [vmem:[#allocation170_spill] sm:$0xff] }
 0xf82   : > { %9065 = vmatprep.subr.mxu0 %v14942_v0  ;;  %9039 = vmatmul.mubr.msk.f32.gmra.mxu0 %vm866_vm2, %v14943_v42  ;;  %v13628_v5 = vpop.xlane.xlu1 %5086 }
 0xf83   : > { %14944 = vst [vmem:[#allocation46_spill] sm:$0xff] %v13628_v5  ;;  %5863 = vadd.xlane.f32.xlu1 %v13457_v21  ;;  %9066 = vmatpush3.msra.mxu0 %v14942_v0  ;;  %v14949_v21 = vld [vmem:[#allocation38_spill] sm:$0xff]  ;;  %v14950_v0 = vld [vmem:[#allocation113_spill] sm:$0xff] }
 0xf84   : > { %9041 = vmatprep.mubr.msk.f32.mxu0 %vm866_vm2, %v14945_v11  ;;  %9067 = vmatprep.subr.mxu0 %v14946_v58  ;;  %v1195_v7 = vpop.xlane.xlu0 %1194  ;;  %v14951_v11 = vld [vmem:[#allocation177_spill] sm:$0xff] }
 0xf85   : > { %9521 = vrcp.f32 %v1195_v7  ;;  %9068 = vmatpush3.msra.mxu0 %v14946_v58  ;;  %v14952_v58 = vld [vmem:[#allocation172_spill] sm:$0xff] }
 0xf86   : > { %9069 = vmatprep.subr.mxu0 %v14947_v26  ;;  %9042 = vmatmul.mubr.msk.f32.gmra.mxu0 %vm866_vm2, %v14948_v35  ;;  %v1189_v17 = vpop.xlane.xlu1 %1188 }
 0xf87   : > { %5867 = vadd.xlane.f32.xlu1 %v13470_v60  ;;  %9070 = vmatpush3.msra.mxu0 %v14947_v26  ;;  %9523 = vrcp.f32 %v1189_v17  ;;  %v14953_v60 = vld [vmem:[#allocation112_spill] sm:$0xff] }
 0xf88   : > { %9044 = vmatprep.mubr.msk.f32.mxu0 %vm866_vm2, %v14949_v21  ;;  %9071 = vmatprep.subr.mxu0 %v14950_v0  ;;  %v1199_v42 = vpop.xlane.xlu0 %1198  ;;  %v14954_v26 = vld [vmem:[#allocation176_spill] sm:$0xff]  ;;  %v14955_v21 = vld [vmem:[#allocation179_spill] sm:$0xff] }
 0xf89   : > { %9525 = vrcp.f32 %v1199_v42  ;;  %9072 = vmatpush3.msra.mxu0 %v14950_v0  ;;  %v14956_v0 = vld [vmem:[#allocation111_spill] sm:$0xff] }
 0xf8a   : > { %9073 = vmatprep.subr.mxu0 %v14951_v11  ;;  %9045 = vmatmul.mubr.msk.f32.gmra.mxu0 %vm866_vm2, %v14952_v58  ;;  %v1193_v7 = vpop.xlane.xlu1 %1192  ;;  %v14958_v58 = vld [vmem:[#allocation51_spill] sm:$0xff] }
 0xf8b   : > { %5871 = vadd.xlane.f32.xlu1 %v13499_v8  ;;  %9074 = vmatpush3.msra.mxu0 %v14951_v11  ;;  %9527 = vrcp.f32 %v1193_v7  ;;  %v14957_v8 = vld [vmem:[#allocation21_spill] sm:$0xff]  ;;  %v14959_v7 = vld [vmem:[#allocation178_spill] sm:$0xff] }
 0xf8c   : > { %9047 = vmatprep.mubr.msk.f32.mxu0 %vm866_vm2, %v14953_v60  ;;  %9075 = vmatprep.subr.mxu0 %v14954_v26  ;;  %v1203_v35 = vpop.xlane.xlu0 %1202 }
 0xf8d   : > { %9529 = vrcp.f32 %v1203_v35  ;;  %9076 = vmatpush3.msra.mxu0 %v14954_v26  ;;  %v14960_v35 = vld [vmem:[#allocation180_spill] sm:$0xff] }
 0xf8e   : > { %v9520_v17 = vpop.eup %9519  ;;  %9077 = vmatprep.subr.mxu0 %v14955_v21  ;;  %9048 = vmatmul.mubr.msk.f32.gmra.mxu0 %vm866_vm2, %v14956_v0  ;;  %v1197_v42 = vpop.xlane.xlu1 %1196 }
 0xf8f   : > { %5873 = vadd.xlane.f32.xlu1 %v13573_v16  ;;  %9078 = vmatpush3.msra.mxu0 %v14955_v21  ;;  %9531 = vrcp.f32 %v1197_v42  ;;  %v1430_v11 = vmul.f32 %v9520_v17, %v14957_v8  ;;  %v14961_v16 = vld [vmem:[#allocation48_spill] sm:$0xff]  ;;  %v14962_v17 = vld [vmem:[#allocation23_spill] sm:$0xff]  ;;  %v14963_v8 = vld [vmem:[#allocation181_spill] sm:$0xff] }
 0xf90   : > { %9050 = vmatprep.mubr.msk.f32.mxu0 %vm866_vm2, %v14958_v58  ;;  %9079 = vmatprep.subr.mxu0 %v14959_v7  ;;  %v1207_v60 = vpop.xlane.xlu0 %1206 }
 0xf91   : > { %9533 = vrcp.f32 %v1207_v60  ;;  %9080 = vmatpush3.msra.mxu0 %v14959_v7  ;;  %1446 = vst.msk [vmem:[#allocation3 + $0x8] sm:$0xff] %vm866_vm2, %v1430_v11  ;;  %v14964_v11 = vld [vmem:[#allocation22_spill] sm:$0xff] }
 0xf92   : > { %v9522_v26 = vpop.eup %9521  ;;  %9081 = vmatprep.subr.mxu0 %v14960_v35  ;;  %9051 = vmatmul.mubr.msk.f32.gmra.mxu0 %vm866_vm2, %v14961_v16  ;;  %v1201_v21 = vpop.xlane.xlu1 %1200 }
 0xf93   : > { %9082 = vmatpush3.msra.mxu0 %v14960_v35  ;;  %9535 = vrcp.f32 %v1201_v21  ;;  %v1432_v0 = vmul.f32 %v9522_v26, %v14962_v17  ;;  %v14965_v35 = vld [vmem:[#allocation25_spill] sm:$0xff]  ;;  %v14966_v17 = vld [vmem:[#allocation24_spill] sm:$0xff] }
 0xf94   : > { %v9524_v42 = vpop.eup %9523  ;;  %9083 = vmatprep.subr.mxu0 %v14963_v8  ;;  %v1211_v58 = vpop.xlane.xlu0 %1210 }
 0xf95   : > { %9537 = vrcp.f32 %v1211_v58  ;;  %9084 = vmatpush3.msra.mxu0 %v14963_v8  ;;  %v1429_v7 = vmul.f32 %v9524_v42, %v14964_v11  ;;  %1448 = vst.msk [vmem:[#allocation3 + $0x18] sm:$0xff] %vm866_vm2, %v1432_v0  ;;  %v14967_v0 = vld [vmem:[#allocation27_spill] sm:$0xff] }
 0xf96   : > { %v9526_v60 = vpop.eup %9525  ;;  %v1205_v9 = vpop.xlane.xlu1 %1204 }
 0xf97   : > { %9539 = vrcp.f32 %v1205_v9  ;;  %1445 = vst.msk [vmem:[#allocation3] sm:$0xff] %vm866_vm2, %v1429_v7  ;;  %v1434_v16 = vmul.f32 %v9526_v60, %v14965_v35  ;;  %v14968_v7 = vld [vmem:[#allocation26_spill] sm:$0xff] }
 0xf98   : > { %v9528_v21 = vpop.eup %9527  ;;  %v1215_v26 = vpop.xlane.xlu0 %1214 }
 0xf99   : > { %9541 = vrcp.f32 %v1215_v26  ;;  %v1431_v24 = vmul.f32 %v9528_v21, %v14966_v17  ;;  %1450 = vst.msk [vmem:[#allocation3 + $0x28] sm:$0xff] %vm866_vm2, %v1434_v16  ;;  %v14969_v16 = vld [vmem:[#allocation29_spill] sm:$0xff] }
 0xf9a   : > { %v9530_v58 = vpop.eup %9529  ;;  %v1209_v8 = vpop.xlane.xlu1 %1208 }
 0xf9b   : > { %9543 = vrcp.f32 %v1209_v8  ;;  %1447 = vst.msk [vmem:[#allocation3 + $0x10] sm:$0xff] %vm866_vm2, %v1431_v24  ;;  %v1436_v42 = vmul.f32 %v9530_v58, %v14967_v0  ;;  %v14970_v24 = vld [vmem:[#allocation28_spill] sm:$0xff] }
 0xf9c   : > { %v9532_v11 = vpop.eup %9531  ;;  %v1219_v9 = vpop.xlane.xlu0 %1218 }
 0xf9d   : > { %9545 = vrcp.f32 %v1219_v9  ;;  %v1433_v50 = vmul.f32 %v9532_v11, %v14968_v7  ;;  %1452 = vst.msk [vmem:[#allocation3 + $0x38] sm:$0xff] %vm866_vm2, %v1436_v42  ;;  %v14971_v42 = vld [vmem:[#allocation31_spill] sm:$0xff] }
 0xf9e   : > { %v9534_v60 = vpop.eup %9533  ;;  %v1213_v35 = vpop.xlane.xlu1 %1212 }
 0xf9f   : > { %9547 = vrcp.f32 %v1213_v35  ;;  %1449 = vst.msk [vmem:[#allocation3 + $0x20] sm:$0xff] %vm866_vm2, %v1433_v50  ;;  %v1438_v21 = vmul.f32 %v9534_v60, %v14969_v16  ;;  %v14972_v50 = vld [vmem:[#allocation30_spill] sm:$0xff] }
 0xfa0   : > { %v9536_v26 = vpop.eup %9535  ;;  %v2186_v17 = vpop.permute.xlu0 %2185 }
 0xfa1   : > { %2233 = vst.msk [vmem:[#allocation3 + $0x8] sm:$0xff] %vm2231_vm4, %v2186_v17  ;;  %v1435_v58 = vmul.f32 %v9536_v26, %v14970_v24 }
 0xfa2   : > { %1454 = vst.msk [vmem:[#allocation3 + $0x48] sm:$0xff] %vm866_vm2, %v1438_v21  ;;  %v9538_v8 = vpop.eup %9537  ;;  %v1217_v0 = vpop.xlane.xlu1 %1216  ;;  %v14973_v21 = vld [vmem:[#allocation33_spill] sm:$0xff] }
 0xfa3   : > { %9549 = vrcp.f32 %v1217_v0  ;;  %1451 = vst.msk [vmem:[#allocation3 + $0x30] sm:$0xff] %vm866_vm2, %v1435_v58  ;;  %v1440_v11 = vmul.f32 %v9538_v8, %v14971_v42  ;;  %v14974_v58 = vld [vmem:[#allocation32_spill] sm:$0xff] }
 0xfa4   : > { %v9540_v9 = vpop.eup %9539  ;;  %v3758_v7 = vpop.permute.xlu0 %3757 }
 0xfa5   : > { %v1437_v35 = vmul.f32 %v9540_v9, %v14972_v50  ;;  %1456 = vst.msk [vmem:[#allocation3 + $0x58] sm:$0xff] %vm866_vm2, %v1440_v11  ;;  %v14975_v11 = vld [vmem:[#allocation35_spill] sm:$0xff] }
 0xfa6   : > { %v9542_v60 = vpop.eup %9541  ;;  %v2184_v16 = vpop.permute.xlu1 %2183 }
 0xfa7   : > { %2232 = vst.msk [vmem:[#allocation3] sm:$0xff] %vm2231_vm4, %v2184_v16  ;;  %v1442_v26 = vmul.f32 %v9542_v60, %v14973_v21  ;;  %v14976_v60 = vld [vmem:[#allocation34_spill] sm:$0xff] }
 0xfa8   : > { %1453 = vst.msk [vmem:[#allocation3 + $0x40] sm:$0xff] %vm866_vm2, %v1437_v35  ;;  %v9544_v17 = vpop.eup %9543  ;;  %v4545_v24 = vpop.permute.xlu0 %4544 }
 0xfa9   : > { %v1439_v8 = vmul.f32 %v9544_v17, %v14974_v58  ;;  %1458 = vst.msk [vmem:[#allocation3 + $0x68] sm:$0xff] %vm866_vm2, %v1442_v26  ;;  %v14977_v58 = vld [vmem:[#allocation36_spill] sm:$0xff] }
 0xfaa   : > { %v9546_v0 = vpop.eup %9545  ;;  %v2971_v42 = vpop.permute.xlu1 %2970 }
 0xfab   : > { %3019 = vst.msk [vmem:[#allocation3] sm:$0xff] %vm3018_vm5, %v2971_v42  ;;  %v1444_v9 = vmul.f32 %v9546_v0, %v14975_v11 }
 0xfac   : > { %1455 = vst.msk [vmem:[#allocation3 + $0x50] sm:$0xff] %vm866_vm2, %v1439_v8  ;;  %v9548_v50 = vpop.eup %9547  ;;  %v4547_v35 = vpop.permute.xlu0 %4546 }
 0xfad   : > { %3806 = vst.msk [vmem:[#allocation3] sm:$0xff] %vm3805_vm6, %v3758_v7  ;;  %v1441_v16 = vmul.f32 %v9548_v50, %v14976_v60 }
 0xfae   : > { %4593 = vst.msk [vmem:[#allocation3] sm:$0xff] %vm4592_vm7, %v4545_v24  ;;  %v2973_v21 = vpop.permute.xlu1 %2972 }
 0xfaf   : > { %1460 = vst.msk [vmem:[#allocation3 + $0x78] sm:$0xff] %vm866_vm2, %v1444_v9  ;;  %1457 = vst.msk [vmem:[#allocation3 + $0x60] sm:$0xff] %vm866_vm2, %v1441_v16 }
 0xfb0   : > { %3020 = vst.msk [vmem:[#allocation3 + $0x8] sm:$0xff] %vm3018_vm5, %v2973_v21  ;;  %v9550_v26 = vpop.eup %9549  ;;  %v2190_v17 = vpop.permute.xlu0 %2189 }
 0xfb1   : > { %2235 = vst.msk [vmem:[#allocation3 + $0x18] sm:$0xff] %vm2231_vm4, %v2190_v17  ;;  %v1443_v8 = vmul.f32 %v9550_v26, %v14977_v58 }
 0xfb2   : > { %v3760_v0 = vpop.permute.xlu1 %3759 }
 0xfb3   : > { %3807 = vst.msk [vmem:[#allocation3 + $0x8] sm:$0xff] %vm3805_vm6, %v3760_v0 }
 0xfb4   : > { %1459 = vst.msk [vmem:[#allocation3 + $0x70] sm:$0xff] %vm866_vm2, %v1443_v8  ;;  %v5334_v7 = vpop.permute.xlu0 %5333 }
 0xfb5   : > { %4594 = vst.msk [vmem:[#allocation3 + $0x8] sm:$0xff] %vm4592_vm7, %v4547_v35 }
 0xfb6   : > { %5381 = vst.msk [vmem:[#allocation3 + $0x8] sm:$0xff] %vm5379_vm8, %v5334_v7  ;;  %v2188_v24 = vpop.permute.xlu1 %2187 }
 0xfb7   : > { %2234 = vst.msk [vmem:[#allocation3 + $0x10] sm:$0xff] %vm2231_vm4, %v2188_v24 }
 0xfb8   : > { %v2977_v42 = vpop.permute.xlu0 %2976  ;;  %v8975_v26 = vpop.f32.mrf.mxu0 }
 0xfb9   : > { %3022 = vst.msk [vmem:[#allocation3 + $0x18] sm:$0xff] %vm3018_vm5, %v2977_v42 }
 0xfba   : > { %v5332_v11 = vpop.permute.xlu1 %5331  ;;  %v5991_v58 = vpop.f32.mrf.mxu0 }
 0xfbb   : > { %5380 = vst.msk [vmem:[#allocation3] sm:$0xff] %vm5379_vm8, %v5332_v11 }
 0xfbc   : > { %v3764_v9 = vpop.permute.xlu0 %3763 }
 0xfbd   : > { %3809 = vst.msk [vmem:[#allocation3 + $0x18] sm:$0xff] %vm3805_vm6, %v3764_v9 }
 0xfbe   : > { %v2975_v50 = vpop.permute.xlu1 %2974 }
 0xfbf   : > { %3021 = vst.msk [vmem:[#allocation3 + $0x10] sm:$0xff] %vm3018_vm5, %v2975_v50 }
 0xfc2   : > { %v3762_v60 = vpop.permute.xlu1 %3761 }
 0xfc3   : > { %3808 = vst.msk [vmem:[#allocation3 + $0x10] sm:$0xff] %vm3805_vm6, %v3762_v60 }
 0xfc6   : > { %v4549_v35 = vpop.permute.xlu1 %4548 }
 0xfc7   : > { %4595 = vst.msk [vmem:[#allocation3 + $0x10] sm:$0xff] %vm4592_vm7, %v4549_v35 }
 0xfca   : > { %v2192_v16 = vpop.permute.xlu1 %2191 }
 0xfcb   : > { %2236 = vst.msk [vmem:[#allocation3 + $0x20] sm:$0xff] %vm2231_vm4, %v2192_v16 }
 0xfdb   : > { %v13720_v7 = vpop.f32.mrf.mxu0 }
 0xfdd   : > { %v13722_v11 = vpop.f32.mrf.mxu0 }
 0xfdf   : > { %v13725_v9 = vpop.f32.mrf.mxu0 }
 0xfe1   : > { %v13727_v50 = vpop.f32.mrf.mxu0 }
 0xfe3   : > { %v13729_v60 = vpop.f32.mrf.mxu0 }
 0xfe5   : > { %v13731_v35 = vpop.f32.mrf.mxu0 }
 0xfed   : > { %v5846_v21 = vpop.xlane.xlu0 %5845 }
 0xfee   : > { %9551 = vrcp.f32 %v5846_v21 }
 0xff3   : > { %v13733_v16 = vpop.f32.mrf.mxu0 }
 0xff5   : > { %v13735_v21 = vpop.f32.mrf.mxu0 }
 0xffb   : > { %v9552_v17 = vpop.eup %9551 }
 0xffc   : > { %v5848_v8 = vpop.xlane.xlu1 %5847  ;;  %v6086_v0 = vmul.f32 %v9552_v17, %v5991_v58  ;;  %v13737_v17 = vpop.f32.mrf.mxu0 }
 0xffd   : > { %9553 = vrcp.f32 %v5848_v8  ;;  %14978 = vst [vmem:[#allocation58_spill] sm:$0xff] %v13737_v17 }
 0xffe   : > { %6118 = vrot.lane.b32.xlu1 %v6086_v0, %s9862_s9  ;;  %v13739_v58 = vpop.f32.mrf.mxu0  ;;  %9555 = vrcp.f32 %v13274_v10 }
 0xfff   : > { %14979 = vst [vmem:[#allocation120_spill] sm:$0xff] %v13739_v58  ;;  %9557 = vrcp.f32 %v13280_v15  ;;  %v14999_v15 = vld [vmem:[#allocation183_spill] sm:$0xff] }
0x1000   : > { %v5852_v58 = vpop.xlane.xlu1 %5851  ;;  %9559 = vrcp.f32 %v13259_v54 }
0x100a   : > { %v9554_v24 = vpop.eup %9553 }
0x100b   : > { %v6087_v42 = vmul.f32 %v9554_v24, %v8975_v26  ;;  %v13741_v26 = vpop.f32.mrf.mxu0 }
0x100c   : > { %14980 = vst [vmem:[#allocation110_spill] sm:$0xff] %v13741_v26 }
0x100d   : > { %6120 = vrot.lane.b32.xlu0 %v6087_v42, %s9862_s9  ;;  %v13743_v8 = vpop.f32.mrf.mxu0 }
0x100e   : > { %14981 = vst [vmem:[#allocation47_spill] sm:$0xff] %v13743_v8 }
0x1032   : > { %v13745_v0 = vpop.f32.mrf.mxu0 }
0x1033   : > { %14982 = vst [vmem:[#allocation59_spill] sm:$0xff] %v13745_v0 }
0x1034   : > { %v13747_v24 = vpop.f32.mrf.mxu0 }
0x1035   : > { %14983 = vst [vmem:[#allocation121_spill] sm:$0xff] %v13747_v24 }
0x1036   : > { %v9031_v42 = vpop.f32.mrf.mxu0 }
0x1037   : > { %v13751_v31 = vsel %vm768_vm3, %v9031_v42, -1e+30 }
0x1038   : > { %6554 = vmax.xlane.f32.xlu1 %v13751_v31  ;;  %v6457_v18 = vpop.f32.mrf.mxu0 }
0x1039   : > { %v13756_v63 = vsel %vm768_vm3, %v6457_v18, -1e+30 }
0x103a   : > { %v9034_v40 = vpop.f32.mrf.mxu0  ;;  %6552 = vmax.xlane.f32.xlu0 %v13756_v63 }
0x103b   : > { %v13761_v0 = vsel %vm768_vm3, %v9034_v40, -1e+30 }
0x103c   : > { %6558 = vmax.xlane.f32.xlu1 %v13761_v0  ;;  %v6467_v8 = vpop.f32.mrf.mxu0 }
0x103d   : > { %v13766_v42 = vsel %vm768_vm3, %v6467_v8, -1e+30 }
0x103e   : > { %14985 = vst [vmem:[#allocation143_spill] sm:$0xff] %v13766_v42  ;;  %v9037_v24 = vpop.f32.mrf.mxu0  ;;  %6556 = vmax.xlane.f32.xlu0 %v13766_v42 }
0x103f   : > { %v13771_v18 = vsel %vm768_vm3, %v9037_v24, -1e+30 }
0x1040   : > { %14986 = vst [vmem:[#allocation80_spill] sm:$0xff] %v13771_v18  ;;  %6562 = vmax.xlane.f32.xlu1 %v13771_v18  ;;  %v6477_v26 = vpop.f32.mrf.mxu0  ;;  %v15003_v18 = vld [vmem:[#allocation90_spill] sm:$0xff] }
0x1041   : > { %v13776_v40 = vsel %vm768_vm3, %v6477_v26, -1e+30 }
0x1042   : > { %14987 = vst [vmem:[#allocation60_spill] sm:$0xff] %v13776_v40  ;;  %v9040_v17 = vpop.f32.mrf.mxu0  ;;  %6560 = vmax.xlane.f32.xlu0 %v13776_v40 }
0x1043   : > { %v13781_v8 = vsel %vm768_vm3, %v9040_v17, -1e+30 }
0x1044   : > { %14988 = vst [vmem:[#allocation122_spill] sm:$0xff] %v13781_v8  ;;  %6566 = vmax.xlane.f32.xlu1 %v13781_v8  ;;  %v6487_v28 = vpop.f32.mrf.mxu0 }
0x1045   : > { %v13786_v24 = vsel %vm768_vm3, %v6487_v28, -1e+30 }
0x1046   : > { %14989 = vst [vmem:[#allocation144_spill] sm:$0xff] %v13786_v24  ;;  %v9043_v43 = vpop.f32.mrf.mxu0  ;;  %6564 = vmax.xlane.f32.xlu0 %v13786_v24 }
0x1047   : > { %v13791_v26 = vsel %vm768_vm3, %v9043_v43, -1e+30 }
0x1048   : > { %14990 = vst [vmem:[#allocation81_spill] sm:$0xff] %v13791_v26  ;;  %6570 = vmax.xlane.f32.xlu1 %v13791_v26  ;;  %v6497_v40 = vpop.f32.mrf.mxu0  ;;  %v13808_v26 = vpop.xlane.xlu1 %5855 }
0x1049   : > { %v13796_v17 = vsel %vm768_vm3, %v6497_v40, -1e+30 }
0x104a   : > { %14991 = vst [vmem:[#allocation61_spill] sm:$0xff] %v13796_v17  ;;  %v9046_v8 = vpop.f32.mrf.mxu0  ;;  %6568 = vmax.xlane.f32.xlu0 %v13796_v17 }
0x104b   : > { %v13801_v28 = vsel %vm768_vm3, %v9046_v8, -1e+30 }
0x104c   : > { %14992 = vst [vmem:[#allocation123_spill] sm:$0xff] %v13801_v28  ;;  %6574 = vmax.xlane.f32.xlu1 %v13801_v28  ;;  %v6507_v24 = vpop.f32.mrf.mxu0 }
0x104d   : > { %v13806_v43 = vsel %vm768_vm3, %v6507_v24, -1e+30 }
0x104e   : > { %14993 = vst [vmem:[#allocation145_spill] sm:$0xff] %v13806_v43  ;;  %v9049_v36 = vpop.f32.mrf.mxu0  ;;  %6572 = vmax.xlane.f32.xlu0 %v13806_v43  ;;  %v13826_v43 = vpop.xlane.xlu1 %5859 }
0x104f   : > { %v13813_v40 = vsel %vm768_vm3, %v9049_v36, -1e+30 }
0x1050   : > { %14994 = vst [vmem:[#allocation62_spill] sm:$0xff] %v13813_v40  ;;  %6578 = vmax.xlane.f32.xlu1 %v13813_v40  ;;  %v6517_v8 = vpop.f32.mrf.mxu0 }
0x1051   : > { %v13818_v28 = vsel %vm768_vm3, %v6517_v8, -1e+30  ;;  %v5850_v8 = vpop.xlane.xlu0 %5849 }
0x1052   : > { %14995 = vst [vmem:[#allocation82_spill] sm:$0xff] %v13818_v28  ;;  %v9052_v17 = vpop.f32.mrf.mxu0  ;;  %6576 = vmax.xlane.f32.xlu0 %v13818_v28  ;;  %v13836_v10 = vpop.xlane.xlu1 %5863  ;;  %9561 = vrcp.f32 %v5850_v8  ;;  %v15000_v8 = vld [vmem:[#allocation53_spill] sm:$0xff] }
0x1053   : > { %v13824_v24 = vsel %vm768_vm3, %v9052_v17, -1e+30  ;;  %9563 = vrcp.f32 %v13265_v1 }
0x1054   : > { %14996 = vst [vmem:[#allocation124_spill] sm:$0xff] %v13824_v24  ;;  %6582 = vmax.xlane.f32.xlu1 %v13824_v24  ;;  %v6527_v36 = vpop.f32.mrf.mxu0  ;;  %9565 = vrcp.f32 %v13291_v12  ;;  %v9556_v24 = vpop.eup %9555  ;;  %v15002_v12 = vld [vmem:[#allocation116_spill] sm:$0xff] }
0x1055   : > { %v13831_v40 = vsel %vm768_vm3, %v6527_v36, -1e+30  ;;  %v5854_v17 = vpop.xlane.xlu0 %5853  ;;  %9567 = vrcp.f32 %v13271_v51  ;;  %v5301_v36 = vmul.f32 %v9556_v24, %v14999_v15  ;;  %v9558_v54 = vpop.eup %9557 }
0x1056   : > { %14997 = vst [vmem:[#allocation83_spill] sm:$0xff] %v13831_v40  ;;  %6580 = vmax.xlane.f32.xlu0 %v13831_v40  ;;  %v13840_v28 = vpop.xlane.xlu1 %5867  ;;  %9569 = vrcp.f32 %v13302_v3  ;;  %v9560_v1 = vpop.eup %9559  ;;  %v15004_v3 = vld [vmem:[#allocation151_spill] sm:$0xff] }
0x1057   : > { %14998 = vst [vmem:[#allocation146_spill] sm:$0xff] %v13840_v28  ;;  %9571 = vrcp.f32 %v15000_v8  ;;  %v2942_v28 = vmul.f32 %v9558_v54, %v15003_v18  ;;  %v4515_v24 = vmul.f32 %v9560_v1, %v15004_v3  ;;  %v15006_v18 = vld [vmem:[#allocation52_spill] sm:$0xff]  ;;  %v15009_v3 = vld [vmem:[#allocation42_spill] sm:$0xff] }
0x1058   : > { %9573 = vrcp.f32 %v15002_v12  ;;  %v15007_v54 = vld [vmem:[#allocation68_spill] sm:$0xff] }
0x1059   : > { %v13844_v5 = vpop.xlane.xlu0 %5857  ;;  %9575 = vrcp.f32 %v5852_v58 }
0x105a   : > { %v13849_v40 = vpop.xlane.xlu1 %5871  ;;  %9577 = vrcp.f32 %v15005_v14  ;;  %v15008_v14 = vld [vmem:[#allocation132_spill] sm:$0xff] }
0x105b   : > { %15001 = vst [vmem:[#allocation125_spill] sm:$0xff] %v13849_v40  ;;  %9579 = vrcp.f32 %v15006_v18  ;;  %v15011_v18 = vld [vmem:[#allocation154_spill] sm:$0xff] }
0x105c   : > { %9581 = vrcp.f32 %v13346_v19 }
0x105d   : > { %v13853_v51 = vpop.xlane.xlu0 %5861  ;;  %9583 = vrcp.f32 %v15009_v3  ;;  %v15014_v3 = vld [vmem:[#allocation71_spill] sm:$0xff] }
0x105e   : > { %v13859_v40 = vpop.xlane.xlu1 %5873  ;;  %9585 = vrcp.f32 %v5854_v17 }
0x105f   : > { %v9562_v42 = vpop.eup %9561 }
0x1060   : > { %v9564_v15 = vpop.eup %9563 }
0x1061   : > { %v9566_v8 = vpop.eup %9565  ;;  %v2156_v12 = vmul.f32 %v9564_v15, %v15007_v54 }
0x1062   : > { %v9568_v58 = vpop.eup %9567  ;;  %v3729_v1 = vmul.f32 %v9566_v8, %v15008_v14  ;;  %v15013_v14 = vld [vmem:[#allocation89_spill] sm:$0xff] }
0x1065   : > { %5335 = vrot.lane.b32.xlu1 %v5301_v36, %s9861_s8  ;;  %v6088_v36 = vmul.f32 %v9562_v42, %v13722_v11  ;;  %v9570_v11 = vpop.eup %9569 }
0x1066   : > { %v4516_v19 = vmul.f32 %v9570_v11, %v15011_v18 }
0x1069   : > { %2978 = vrot.lane.b32.xlu1 %v2942_v28, %s9859_s30  ;;  %v13866_v28 = vpop.xlane.xlu0 %5865 }
0x106c   : > { %4550 = vrot.lane.b32.xlu0 %v4515_v24, %s9860_s7  ;;  %v15010_v24 = vld [vmem:[#allocation182_spill] sm:$0xff] }
0x106d   : > { %6122 = vrot.lane.b32.xlu1 %v6088_v36, %s9862_s9  ;;  %v5302_v15 = vmul.f32 %v9568_v58, %v15010_v24  ;;  %v9572_v36 = vpop.eup %9571  ;;  %v13876_v8 = vpop.xlane.xlu0 %5869 }
0x106e   : > { %v9574_v54 = vpop.eup %9573 }
0x106f   : > { %v2157_v58 = vmul.f32 %v9574_v54, %v15014_v3 }
0x1070   : > { %2193 = vrot.lane.b32.xlu0 %v2156_v12, %s9857_s27  ;;  %v6119_v42 = vpop.permute.xlu1 %6118  ;;  %v15012_v12 = vld [vmem:[#allocation41_spill] sm:$0xff] }
0x1071   : > { %6167 = vst.msk [vmem:[#allocation3] sm:$0xff] %vm6166_vm9, %v6119_v42  ;;  %3765 = vrot.lane.b32.xlu1 %v3729_v1, %s9858_s29  ;;  %9587 = vrcp.f32 %v15012_v12  ;;  %v2943_v42 = vmul.f32 %v9572_v36, %v15013_v14  ;;  %v9576_v1 = vpop.eup %9575  ;;  %v15015_v36 = vld [vmem:[#allocation185_spill] sm:$0xff] }
0x1072   : > { %9589 = vrcp.f32 %v13368_v29  ;;  %v9578_v24 = vpop.eup %9577  ;;  %v6089_v17 = vmul.f32 %v9576_v1, %v13720_v7  ;;  %v15016_v29 = vld [vmem:[#allocation131_spill] sm:$0xff]  ;;  %v15017_v7 = vld [vmem:[#allocation92_spill] sm:$0xff] }
0x1073   : > { %9591 = vrcp.f32 %v13353_v45  ;;  %v9580_v11 = vpop.eup %9579  ;;  %v5303_v18 = vmul.f32 %v9578_v24, %v15015_v36 }
0x1074   : > { %5337 = vrot.lane.b32.xlu0 %v5302_v15, %s9861_s8  ;;  %9593 = vrcp.f32 %v13411_v13  ;;  %v13888_v15 = vpop.xlane.xlu0 %5875  ;;  %v3730_v54 = vmul.f32 %v9580_v11, %v15016_v29 }
0x1075   : > { %4552 = vrot.lane.b32.xlu1 %v4516_v19, %s9860_s7  ;;  %v9582_v19 = vpop.eup %9581  ;;  %9595 = vrcp.f32 %v13364_v52 }
0x1076   : > { %v9584_v12 = vpop.eup %9583  ;;  %9597 = vrcp.f32 %v13421_v2  ;;  %v2944_v14 = vmul.f32 %v9582_v19, %v15017_v7 }
0x1077   : > { %v9586_v13 = vpop.eup %9585  ;;  %9599 = vrcp.f32 %v13808_v26  ;;  %v15020_v26 = vld [vmem:[#allocation134_spill] sm:$0xff] }
0x1078   : > { %2980 = vrot.lane.b32.xlu0 %v2943_v42, %s9859_s30  ;;  %v15018_v42 = vld [vmem:[#allocation153_spill] sm:$0xff]  ;;  %9601 = vrcp.f32 %v13434_v44  ;;  %v6090_v3 = vmul.f32 %v9586_v13, %v13727_v50  ;;  %v15021_v44 = vld [vmem:[#allocation184_spill] sm:$0xff] }
0x1079   : > { %2195 = vrot.lane.b32.xlu1 %v2157_v58, %s9857_s27  ;;  %v4517_v1 = vmul.f32 %v9584_v12, %v15018_v42  ;;  %9603 = vrcp.f32 %v13417_v34  ;;  %v15019_v58 = vld [vmem:[#allocation70_spill] sm:$0xff]  ;;  %v15022_v34 = vld [vmem:[#allocation156_spill] sm:$0xff] }
0x107a   : > { %9605 = vrcp.f32 %v13450_v32  ;;  %v15023_v32 = vld [vmem:[#allocation91_spill] sm:$0xff] }
0x107b   : > { %9607 = vrcp.f32 %v13445_v39  ;;  %v15024_v39 = vld [vmem:[#allocation73_spill] sm:$0xff] }
0x107c   : > { %6124 = vrot.lane.b32.xlu0 %v6089_v17, %s9862_s9  ;;  %9609 = vrcp.f32 %v13844_v5 }
0x107d   : > { %5339 = vrot.lane.b32.xlu1 %v5303_v18, %s9861_s8  ;;  %9611 = vrcp.f32 %v13462_v57  ;;  %v15025_v57 = vld [vmem:[#allocation187_spill] sm:$0xff] }
0x107e   : > { %v9588_v52 = vpop.eup %9587  ;;  %9613 = vrcp.f32 %v13473_v27  ;;  %v15026_v27 = vld [vmem:[#allocation133_spill] sm:$0xff] }
0x107f   : > { %v6121_v45 = vpop.permute.xlu0 %6120  ;;  %v9590_v2 = vpop.eup %9589  ;;  %v2158_v24 = vmul.f32 %v9588_v52, %v15019_v58  ;;  %9615 = vrcp.f32 %v13481_v55  ;;  %v15027_v55 = vld [vmem:[#allocation94_spill] sm:$0xff] }
0x1080   : > { %6168 = vst.msk [vmem:[#allocation3 + $0x8] sm:$0xff] %vm6166_vm9, %v6121_v45  ;;  %3767 = vrot.lane.b32.xlu0 %v3730_v54, %s9858_s29  ;;  %v9592_v17 = vpop.eup %9591  ;;  %v3731_v11 = vmul.f32 %v9590_v2, %v15020_v26  ;;  %9617 = vrcp.f32 %v13486_v25  ;;  %v15028_v25 = vld [vmem:[#allocation155_spill] sm:$0xff] }
0x1081   : > { %2982 = vrot.lane.b32.xlu1 %v2944_v14, %s9859_s30  ;;  %v9594_v36 = vpop.eup %9593  ;;  %v5304_v50 = vmul.f32 %v9592_v17, %v15021_v44  ;;  %9619 = vrcp.f32 %v13491_v30 }
0x1082   : > { %v9596_v18 = vpop.eup %9595  ;;  %v4518_v19 = vmul.f32 %v9594_v36, %v15022_v34  ;;  %9621 = vrcp.f32 %v13497_v4  ;;  %v15029_v4 = vld [vmem:[#allocation72_spill] sm:$0xff] }
0x1083   : > { %v9598_v29 = vpop.eup %9597  ;;  %v2945_v54 = vmul.f32 %v9596_v18, %v15023_v32  ;;  %9623 = vrcp.f32 %v13826_v43  ;;  %v15030_v43 = vld [vmem:[#allocation136_spill] sm:$0xff] }
0x1084   : > { %4554 = vrot.lane.b32.xlu0 %v4517_v1, %s9860_s7  ;;  %v9600_v12 = vpop.eup %9599  ;;  %v2159_v45 = vmul.f32 %v9598_v29, %v15024_v39  ;;  %9625 = vrcp.f32 %v13510_v38  ;;  %v15031_v38 = vld [vmem:[#allocation186_spill] sm:$0xff] }
0x1085   : > { %6126 = vrot.lane.b32.xlu1 %v6090_v3, %s9862_s9  ;;  %v9602_v7 = vpop.eup %9601  ;;  %v6091_v5 = vmul.f32 %v9600_v12, %v13725_v9  ;;  %9627 = vrcp.f32 %v13506_v59  ;;  %v15032_v59 = vld [vmem:[#allocation158_spill] sm:$0xff] }
0x1086   : > { %v9604_v14 = vpop.eup %9603  ;;  %v5305_v13 = vmul.f32 %v9602_v7, %v15025_v57  ;;  %9629 = vrcp.f32 %v13518_v53  ;;  %v15033_v53 = vld [vmem:[#allocation93_spill] sm:$0xff] }
0x1087   : > { %v9606_v42 = vpop.eup %9605  ;;  %v3732_v1 = vmul.f32 %v9604_v14, %v15026_v27  ;;  %9631 = vrcp.f32 %v13514_v37  ;;  %v15034_v37 = vld [vmem:[#allocation75_spill] sm:$0xff] }
0x1088   : > { %2197 = vrot.lane.b32.xlu0 %v2158_v24, %s9857_s27  ;;  %v9608_v52 = vpop.eup %9607  ;;  %v2946_v3 = vmul.f32 %v9606_v42, %v15027_v55  ;;  %9633 = vrcp.f32 %v13853_v51 }
0x1089   : > { %3769 = vrot.lane.b32.xlu1 %v3731_v11, %s9858_s29  ;;  %v9610_v9 = vpop.eup %9609  ;;  %v4519_v2 = vmul.f32 %v9608_v52, %v15028_v25  ;;  %9635 = vrcp.f32 %v13522_v33  ;;  %v15035_v33 = vld [vmem:[#allocation189_spill] sm:$0xff] }
0x108a   : > { %v9612_v58 = vpop.eup %9611  ;;  %v6092_v30 = vmul.f32 %v9610_v9, %v13731_v35  ;;  %9637 = vrcp.f32 %v13525_v41  ;;  %v15036_v41 = vld [vmem:[#allocation135_spill] sm:$0xff] }
0x108b   : > { %v9614_v24 = vpop.eup %9613  ;;  %v2160_v17 = vmul.f32 %v9612_v58, %v15029_v4  ;;  %9639 = vrcp.f32 %v13528_v23  ;;  %v15037_v23 = vld [vmem:[#allocation96_spill] sm:$0xff] }
0x108c   : > { %5341 = vrot.lane.b32.xlu0 %v5304_v50, %s9861_s8  ;;  %v9616_v26 = vpop.eup %9615  ;;  %v3733_v11 = vmul.f32 %v9614_v24, %v15030_v43  ;;  %9641 = vrcp.f32 %v13531_v46  ;;  %v15038_v46 = vld [vmem:[#allocation157_spill] sm:$0xff] }
0x108d   : > { %4556 = vrot.lane.b32.xlu1 %v4518_v19, %s9860_s7  ;;  %v9618_v36 = vpop.eup %9617  ;;  %v5306_v35 = vmul.f32 %v9616_v26, %v15031_v38  ;;  %9643 = vrcp.f32 %v13534_v49  ;;  %v15046_v24 = vld [vmem:[#allocation77_spill] sm:$0xff]  ;;  %v15047_v38 = vld [vmem:[#allocation191_spill] sm:$0xff] }
0x108e   : > { %v9620_v44 = vpop.eup %9619  ;;  %v4520_v50 = vmul.f32 %v9618_v36, %v15032_v59  ;;  %9645 = vrcp.f32 %v13537_v6  ;;  %v15039_v6 = vld [vmem:[#allocation74_spill] sm:$0xff] }
0x108f   : > { %v9622_v18 = vpop.eup %9621  ;;  %v2947_v34 = vmul.f32 %v9620_v44, %v15033_v53  ;;  %9647 = vrcp.f32 %v13836_v10  ;;  %v15040_v10 = vld [vmem:[#allocation138_spill] sm:$0xff]  ;;  %v15049_v53 = vld [vmem:[#allocation55_spill] sm:$0xff] }
0x1090   : > { %2984 = vrot.lane.b32.xlu0 %v2945_v54, %s9859_s30  ;;  %v9624_v19 = vpop.eup %9623  ;;  %v2161_v29 = vmul.f32 %v9622_v18, %v15034_v37  ;;  %9649 = vrcp.f32 %v13541_v62  ;;  %v15041_v62 = vld [vmem:[#allocation106_spill] sm:$0xff] }
0x1091   : > { %2199 = vrot.lane.b32.xlu1 %v2159_v45, %s9857_s27  ;;  %v9626_v32 = vpop.eup %9625  ;;  %v6093_v51 = vmul.f32 %v9624_v19, %v13729_v60  ;;  %9651 = vrcp.f32 %v13539_v20  ;;  %v15043_v20 = vld [vmem:[#allocation160_spill] sm:$0xff]  ;;  %v15050_v19 = vld [vmem:[#allocation98_spill] sm:$0xff] }
0x1092   : > { %v9628_v54 = vpop.eup %9627  ;;  %v5307_v12 = vmul.f32 %v9626_v32, %v15035_v33  ;;  %9653 = vrcp.f32 %v13545_v22  ;;  %v15044_v22 = vld [vmem:[#allocation105_spill] sm:$0xff]  ;;  %v15053_v33 = vld [vmem:[#allocation80_spill] sm:$0xff] }
0x1093   : > { %v9630_v39 = vpop.eup %9629  ;;  %v3734_v45 = vmul.f32 %v9628_v54, %v15036_v41  ;;  %9655 = vrcp.f32 %v15041_v62 }
0x1094   : > { %6128 = vrot.lane.b32.xlu0 %v6091_v5, %s9862_s9  ;;  %v9632_v7 = vpop.eup %9631  ;;  %v2948_v5 = vmul.f32 %v9630_v39, %v15037_v23  ;;  %9657 = vrcp.f32 %v13866_v28  ;;  %v15054_v39 = vld [vmem:[#allocation159_spill] sm:$0xff] }
0x1095   : > { %5343 = vrot.lane.b32.xlu1 %v5305_v13, %s9861_s8  ;;  %v9634_v60 = vpop.eup %9633  ;;  %v4521_v14 = vmul.f32 %v9632_v7, %v15038_v46  ;;  %9659 = vrcp.f32 %v15044_v22  ;;  %v15055_v7 = vld [vmem:[#allocation54_spill] sm:$0xff] }
0x1096   : > { %v9636_v57 = vpop.eup %9635  ;;  %v6094_v49 = vmul.f32 %v9634_v60, %v13735_v21  ;;  %v15042_v21 = vld [vmem:[#allocation188_spill] sm:$0xff]  ;;  %9661 = vrcp.f32 %v13551_v61 }
0x1097   : > { %v9638_v13 = vpop.eup %9637  ;;  %v2162_v42 = vmul.f32 %v9636_v57, %v15039_v6  ;;  %9663 = vrcp.f32 %v13556_v56  ;;  %v15058_v6 = vld [vmem:[#allocation43_spill] sm:$0xff] }
0x1098   : > { %3771 = vrot.lane.b32.xlu0 %v3732_v1, %s9858_s29  ;;  %v9640_v27 = vpop.eup %9639  ;;  %v3735_v1 = vmul.f32 %v9638_v13, %v15040_v10  ;;  %9665 = vrcp.f32 %v13554_v48 }
0x1099   : > { %2986 = vrot.lane.b32.xlu1 %v2946_v3, %s9859_s30  ;;  %v9642_v52 = vpop.eup %9641  ;;  %v5308_v55 = vmul.f32 %v9640_v27, %v15042_v21  ;;  %9667 = vrcp.f32 %v13561_v47  ;;  %v15059_v27 = vld [vmem:[#allocation122_spill] sm:$0xff] }
0x109a   : > { %v9644_v3 = vpop.eup %9643  ;;  %v4522_v9 = vmul.f32 %v9642_v52, %v15043_v20  ;;  %9669 = vrcp.f32 %v15049_v53 }
0x109b   : > { %v9646_v25 = vpop.eup %9645 }
0x109c   : > { %4558 = vrot.lane.b32.xlu0 %v4519_v2, %s9860_s7  ;;  %v15045_v2 = vld [vmem:[#allocation95_spill] sm:$0xff]  ;;  %v2163_v4 = vmul.f32 %v9646_v25, %v15046_v24  ;;  %v15064_v24 = vld [vmem:[#allocation81_spill] sm:$0xff] }
0x109d   : > { %6130 = vrot.lane.b32.xlu1 %v6092_v30, %s9862_s9  ;;  %v2949_v58 = vmul.f32 %v9644_v3, %v15045_v2  ;;  %v9648_v30 = vpop.eup %9647 }
0x109e   : > { %v6095_v43 = vmul.f32 %v9648_v30, %v13733_v16  ;;  %v15048_v16 = vld [vmem:[#allocation137_spill] sm:$0xff] }
0x10a0   : > { %2201 = vrot.lane.b32.xlu0 %v2160_v17, %s9857_s27  ;;  %v9650_v17 = vpop.eup %9649 }
0x10a1   : > { %3773 = vrot.lane.b32.xlu1 %v3733_v11, %s9858_s29  ;;  %v9652_v11 = vpop.eup %9651  ;;  %v5309_v61 = vmul.f32 %v9650_v17, %v15047_v38  ;;  %v15065_v17 = vld [vmem:[#allocation190_spill] sm:$0xff] }
0x10a2   : > { %v3736_v18 = vmul.f32 %v9652_v11, %v15048_v16  ;;  %v15066_v11 = vld [vmem:[#allocation162_spill] sm:$0xff]  ;;  %v15068_v16 = vld [vmem:[#allocation123_spill] sm:$0xff] }
0x10a4   : > { %5345 = vrot.lane.b32.xlu0 %v5306_v35, %s9861_s8  ;;  %v9654_v35 = vpop.eup %9653 }
0x10a5   : > { %4560 = vrot.lane.b32.xlu1 %v4520_v50, %s9860_s7  ;;  %v9656_v48 = vpop.eup %9655  ;;  %v2950_v37 = vmul.f32 %v9654_v35, %v15050_v19 }
0x10a6   : > { %v4523_v41 = vmul.f32 %v9656_v48, %v15054_v39  ;;  %v15069_v48 = vld [vmem:[#allocation97_spill] sm:$0xff]  ;;  %v15072_v39 = vld [vmem:[#allocation62_spill] sm:$0xff] }
0x10a8   : > { %2988 = vrot.lane.b32.xlu0 %v2947_v34, %s9859_s30 }
0x10a9   : > { %2203 = vrot.lane.b32.xlu1 %v2161_v29, %s9857_s27  ;;  %v15051_v29 = vld [vmem:[#allocation143_spill] sm:$0xff] }
0x10ac   : > { %6132 = vrot.lane.b32.xlu0 %v6093_v51, %s9862_s9 }
0x10ad   : > { %5347 = vrot.lane.b32.xlu1 %v5307_v12, %s9861_s8 }
0x10b0   : > { %3775 = vrot.lane.b32.xlu0 %v3734_v45, %s9858_s29 }
0x10b1   : > { %2990 = vrot.lane.b32.xlu1 %v2948_v5, %s9859_s30  ;;  %v15056_v5 = vld [vmem:[#allocation120_spill] sm:$0xff] }
0x10b4   : > { %4562 = vrot.lane.b32.xlu0 %v4521_v14, %s9860_s7  ;;  %v15057_v14 = vld [vmem:[#allocation60_spill] sm:$0xff] }
0x10b5   : > { %6134 = vrot.lane.b32.xlu1 %v6094_v49, %s9862_s9 }
0x10b8   : > { %2205 = vrot.lane.b32.xlu0 %v2162_v42, %s9857_s27 }
0x10b9   : > { %3777 = vrot.lane.b32.xlu1 %v3735_v1, %s9858_s29  ;;  %v15060_v1 = vld [vmem:[#allocation76_spill] sm:$0xff] }
0x10bc   : > { %5349 = vrot.lane.b32.xlu0 %v5308_v55, %s9861_s8  ;;  %v15061_v55 = vld [vmem:[#allocation140_spill] sm:$0xff] }
0x10bd   : > { %4564 = vrot.lane.b32.xlu1 %v4522_v9, %s9860_s7  ;;  %v15062_v9 = vld [vmem:[#allocation144_spill] sm:$0xff] }
0x10c0   : > { %2992 = vrot.lane.b32.xlu0 %v2949_v58, %s9859_s30  ;;  %v15063_v58 = vld [vmem:[#allocation117_spill] sm:$0xff] }
0x10c1   : > { %2207 = vrot.lane.b32.xlu1 %v2163_v4, %s9857_s27  ;;  %v6555_v28 = vpop.xlane.xlu1 %6554 }
0x10c2   : > { %v6585_v26 = vsub.f32 %v13751_v31, %v6555_v28 }
0x10c3   : > { %v6553_v36 = vpop.xlane.xlu0 %6552 }
0x10c4   : > { %v6584_v44 = vsub.f32 %v13756_v63, %v6553_v36  ;;  %6136 = vrot.lane.b32.xlu0 %v6095_v43, %s9862_s9  ;;  %v6602_v59 = vmul.f32 1.442695, %v6585_v26  ;;  %v9658_v63 = vpop.eup %9657 }
0x10c5   : > { %5351 = vrot.lane.b32.xlu1 %v5309_v61, %s9861_s8  ;;  %v6559_v50 = vpop.xlane.xlu1 %6558  ;;  %v9660_v45 = vpop.eup %9659  ;;  %v6096_v60 = vmul.f32 %v9658_v63, %v15056_v5  ;;  %v15067_v61 = vld [vmem:[#allocation61_spill] sm:$0xff] }
0x10c6   : > { %v6600_v56 = vmul.f32 1.442695, %v6584_v44  ;;  %v6587_v31 = vsub.f32 %v13761_v0, %v6559_v50  ;;  %v15052_v0 = vld [vmem:[#allocation146_spill] sm:$0xff]  ;;  %v9662_v46 = vpop.eup %9661  ;;  %v2164_v52 = vmul.f32 %v9660_v45, %v15060_v1 }
0x10c7   : > { %v6557_v34 = vpop.xlane.xlu0 %6556  ;;  %v9664_v62 = vpop.eup %9663  ;;  %v3737_v3 = vmul.f32 %v9662_v46, %v15061_v55  ;;  %v15073_v45 = vld [vmem:[#allocation58_spill] sm:$0xff] }
0x10c8   : > { %9671 = vpow2.f32 %v6600_v56  ;;  %v6586_v32 = vsub.f32 %v15051_v29, %v6557_v34  ;;  %3779 = vrot.lane.b32.xlu0 %v3736_v18, %s9858_s29  ;;  %v6606_v51 = vmul.f32 1.442695, %v6587_v31  ;;  %v9666_v20 = vpop.eup %9665  ;;  %v5310_v28 = vmul.f32 %v9664_v62, %v15065_v17 }
0x10c9   : > { %9673 = vpow2.f32 %v6602_v59  ;;  %2994 = vrot.lane.b32.xlu1 %v2950_v37, %s9859_s30  ;;  %v6563_v47 = vpop.xlane.xlu1 %6562  ;;  %v9668_v26 = vpop.eup %9667  ;;  %v4524_v36 = vmul.f32 %v9666_v20, %v15066_v11  ;;  %v15070_v37 = vld [vmem:[#allocation79_spill] sm:$0xff] }
0x10ca   : > { %9675 = vrcp.f32 %v15052_v0  ;;  %v6604_v54 = vmul.f32 1.442695, %v6586_v32  ;;  %v6589_v12 = vsub.f32 %v15053_v33, %v6563_v47  ;;  %v9670_v38 = vpop.eup %9669  ;;  %v2951_v53 = vmul.f32 %v9668_v26, %v15069_v48  ;;  %v15071_v32 = vld [vmem:[#allocation145_spill] sm:$0xff] }
0x10cb   : > { %9677 = vrcp.f32 %v15055_v7  ;;  %v6561_v23 = vpop.xlane.xlu0 %6560  ;;  %v2165_v63 = vmul.f32 %v9670_v38, %v15070_v37 }
0x10cc   : > { %9679 = vpow2.f32 %v6604_v54  ;;  %v6588_v57 = vsub.f32 %v15057_v14, %v6561_v23  ;;  %4566 = vrot.lane.b32.xlu0 %v4523_v41, %s9860_s7  ;;  %v6610_v49 = vmul.f32 1.442695, %v6589_v12  ;;  %v15075_v14 = vld [vmem:[#allocation82_spill] sm:$0xff] }
0x10cd   : > { %9681 = vpow2.f32 %v6606_v51  ;;  %6138 = vrot.lane.b32.xlu1 %v6096_v60, %s9862_s9  ;;  %v6567_v13 = vpop.xlane.xlu1 %6566  ;;  %v15074_v60 = vld [vmem:[#allocation193_spill] sm:$0xff] }
0x10ce   : > { %9683 = vrcp.f32 %v15058_v6  ;;  %v6608_v42 = vmul.f32 1.442695, %v6588_v57  ;;  %v6591_v10 = vsub.f32 %v15059_v27, %v6567_v13 }
0x10cf   : > { %v6565_v21 = vpop.xlane.xlu0 %6564 }
0x10d0   : > { %9685 = vpow2.f32 %v6608_v42  ;;  %v6590_v25 = vsub.f32 %v15062_v9, %v6565_v21  ;;  %2209 = vrot.lane.b32.xlu0 %v2164_v52, %s9857_s27  ;;  %v6614_v22 = vmul.f32 1.442695, %v6591_v10  ;;  %v15076_v10 = vld [vmem:[#allocation124_spill] sm:$0xff]  ;;  %v15077_v52 = vld [vmem:[#allocation139_spill] sm:$0xff] }
0x10d1   : > { %9687 = vpow2.f32 %v6610_v49  ;;  %3781 = vrot.lane.b32.xlu1 %v3737_v3, %s9858_s29  ;;  %v6571_v2 = vpop.xlane.xlu1 %6570  ;;  %v15078_v3 = vld [vmem:[#allocation83_spill] sm:$0xff] }
0x10d2   : > { %9689 = vrcp.f32 %v15063_v58  ;;  %v6612_v30 = vmul.f32 1.442695, %v6590_v25  ;;  %v6593_v4 = vsub.f32 %v15064_v24, %v6571_v2 }
0x10d3   : > { %v6569_v43 = vpop.xlane.xlu0 %6568 }
0x10d4   : > { %9691 = vpow2.f32 %v6612_v30  ;;  %v6592_v35 = vsub.f32 %v15067_v61, %v6569_v43  ;;  %5353 = vrot.lane.b32.xlu0 %v5310_v28, %s9861_s8  ;;  %v6618_v59 = vmul.f32 1.442695, %v6593_v4  ;;  %v15079_v30 = vld [vmem:[#allocation161_spill] sm:$0xff] }
0x10d5   : > { %v14033_v44 = vpop.eup %9671  ;;  %9693 = vpow2.f32 %v6614_v22  ;;  %4568 = vrot.lane.b32.xlu1 %v4524_v36, %s9860_s7  ;;  %v6575_v50 = vpop.xlane.xlu1 %6574 }
0x10d6   : > { %v14036_v56 = vpop.eup %9673  ;;  %v6616_v31 = vmul.f32 1.442695, %v6592_v35  ;;  %v6595_v18 = vsub.f32 %v15068_v16, %v6575_v50  ;;  %9085 = vmatprep.mubr.f32.mxu0 %v14033_v44 }
0x10d7   : > { %v9676_v34 = vpop.eup %9675  ;;  %v6573_v19 = vpop.xlane.xlu0 %6572  ;;  %9086 = vmatmul.mubr.f32.vlgmr.msra.gmra.mxu0 %v14036_v56 }
0x10d8   : > { %v9678_v29 = vpop.eup %9677  ;;  %9695 = vpow2.f32 %v6616_v31  ;;  %v6594_v51 = vsub.f32 %v15071_v32, %v6573_v19  ;;  %2996 = vrot.lane.b32.xlu0 %v2951_v53, %s9859_s30  ;;  %v6622_v0 = vmul.f32 1.442695, %v6595_v18  ;;  %v6097_v7 = vmul.f32 %v9676_v34, %v15073_v45 }
0x10d9   : > { %v14045_v47 = vpop.eup %9679  ;;  %9697 = vpow2.f32 %v6618_v59  ;;  %2211 = vrot.lane.b32.xlu1 %v2165_v63, %s9857_s27  ;;  %v6579_v54 = vpop.xlane.xlu1 %6578  ;;  %v5311_v46 = vmul.f32 %v9678_v29, %v15074_v60 }
0x10da   : > { %v14048_v33 = vpop.eup %9681  ;;  %v6620_v12 = vmul.f32 1.442695, %v6594_v51  ;;  %v6597_v41 = vsub.f32 %v15072_v39, %v6579_v54  ;;  %9088 = vmatprep.mubr.f32.mxu0 %v14045_v47 }
0x10db   : > { %v9684_v23 = vpop.eup %9683  ;;  %v6577_v5 = vpop.xlane.xlu0 %6576  ;;  %9089 = vmatmul.mubr.f32.gmra.mxu0 %v14048_v33 }
0x10dc   : > { %9699 = vpow2.f32 %v6620_v12  ;;  %v6596_v57 = vsub.f32 %v15075_v14, %v6577_v5  ;;  %6140 = vrot.lane.b32.xlu0 %v6097_v7, %s9862_s9  ;;  %v6626_v13 = vmul.f32 1.442695, %v6597_v41  ;;  %v3738_v62 = vmul.f32 %v9684_v23, %v15077_v52  ;;  %v15080_v23 = vld [vmem:[#allocation44_spill] sm:$0xff] }
0x10dd   : > { %v14057_v49 = vpop.eup %9685  ;;  %9701 = vpow2.f32 %v6622_v0  ;;  %5355 = vrot.lane.b32.xlu1 %v5311_v46, %s9861_s8  ;;  %v6583_v6 = vpop.xlane.xlu1 %6582 }
0x10de   : > { %v14060_v42 = vpop.eup %9687  ;;  %v6624_v27 = vmul.f32 1.442695, %v6596_v57  ;;  %v6599_v1 = vsub.f32 %v15076_v10, %v6583_v6  ;;  %9091 = vmatprep.mubr.f32.mxu0 %v14057_v49 }
0x10df   : > { %v9690_v21 = vpop.eup %9689  ;;  %v6581_v55 = vpop.xlane.xlu0 %6580  ;;  %9092 = vmatmul.mubr.f32.gmra.mxu0 %v14060_v42 }
0x10e0   : > { %9703 = vpow2.f32 %v6624_v27  ;;  %v6598_v20 = vsub.f32 %v15078_v3, %v6581_v55  ;;  %3783 = vrot.lane.b32.xlu0 %v3738_v62, %s9858_s29  ;;  %v6630_v25 = vmul.f32 1.442695, %v6599_v1  ;;  %v4525_v24 = vmul.f32 %v9690_v21, %v15079_v30  ;;  %v15082_v27 = vld [vmem:[#allocation108_spill] sm:$0xff]  ;;  %v15084_v21 = vld [vmem:[#allocation57_spill] sm:$0xff]  ;;  %v15087_v30 = vld [vmem:[#allocation78_spill] sm:$0xff] }
0x10e1   : > { %v14068_v9 = vpop.eup %9691  ;;  %9705 = vpow2.f32 %v6626_v13  ;;  %v5336_v22 = vpop.permute.xlu1 %5335  ;;  %v15083_v1 = vld [vmem:[#allocation100_spill] sm:$0xff] }
0x10e2   : > { %v14070_v2 = vpop.eup %9693  ;;  %v6628_v58 = vmul.f32 1.442695, %v6598_v20  ;;  %5382 = vst.msk [vmem:[#allocation3 + $0x10] sm:$0xff] %vm5379_vm8, %v5336_v22  ;;  %9094 = vmatprep.mubr.f32.mxu1 %v14068_v9  ;;  %v15085_v20 = vld [vmem:[#allocation125_spill] sm:$0xff] }
0x10e3   : > { %v4551_v4 = vpop.permute.xlu0 %4550  ;;  %9095 = vmatmul.mubr.f32.vlgmr.msra.gmra.mxu1 %v14070_v2 }
0x10e4   : > { %9707 = vpow2.f32 %v6628_v58  ;;  %4596 = vst.msk [vmem:[#allocation3 + $0x18] sm:$0xff] %vm4592_vm7, %v4551_v4  ;;  %4570 = vrot.lane.b32.xlu0 %v4525_v24, %s9860_s7 }
0x10e5   : > { %v14078_v17 = vpop.eup %9695  ;;  %9709 = vpow2.f32 %v6630_v25  ;;  %v2979_v28 = vpop.permute.xlu1 %2978 }
0x10e6   : > { %v14080_v26 = vpop.eup %9697  ;;  %3023 = vst.msk [vmem:[#allocation3 + $0x20] sm:$0xff] %vm3018_vm5, %v2979_v28  ;;  %9097 = vmatprep.mubr.f32.mxu1 %v14078_v17  ;;  %9711 = vrcp.f32 %v15080_v23  ;;  %v15088_v28 = vld [vmem:[#allocation46_spill] sm:$0xff] }
0x10e7   : > { %v2194_v43 = vpop.permute.xlu0 %2193  ;;  %9098 = vmatmul.mubr.f32.gmra.mxu1 %v14080_v26 }
0x10e8   : > { %2237 = vst.msk [vmem:[#allocation3 + $0x28] sm:$0xff] %vm2231_vm4, %v2194_v43  ;;  %v15089_v43 = vld [vmem:[#allocation192_spill] sm:$0xff] }
0x10e9   : > { %v14086_v11 = vpop.eup %9699  ;;  %v6123_v36 = vpop.permute.xlu1 %6122 }
0x10ea   : > { %v14088_v38 = vpop.eup %9701  ;;  %6169 = vst.msk [vmem:[#allocation3 + $0x10] sm:$0xff] %vm6166_vm9, %v6123_v36  ;;  %9100 = vmatprep.mubr.f32.mxu1 %v14086_v11 }
0x10eb   : > { %v5338_v61 = vpop.permute.xlu0 %5337  ;;  %9101 = vmatmul.mubr.f32.gmra.mxu1 %v14088_v38 }
0x10ec   : > { %5383 = vst.msk [vmem:[#allocation3 + $0x18] sm:$0xff] %vm5379_vm8, %v5338_v61 }
0x10ed   : > { %v14094_v35 = vpop.eup %9703  ;;  %v3766_v59 = vpop.permute.xlu1 %3765 }
0x10ee   : > { %v14096_v50 = vpop.eup %9705  ;;  %3810 = vst.msk [vmem:[#allocation3 + $0x20] sm:$0xff] %vm3805_vm6, %v3766_v59  ;;  %9103 = vmatprep.mubr.f32.mxu1 %v14094_v35 }
0x10ef   : > { %v2981_v31 = vpop.permute.xlu0 %2980  ;;  %9104 = vmatmul.mubr.f32.gmra.mxu1 %v14096_v50 }
0x10f0   : > { %3024 = vst.msk [vmem:[#allocation3 + $0x28] sm:$0xff] %vm3018_vm5, %v2981_v31 }
0x10f1   : > { %v14102_v16 = vpop.eup %9707  ;;  %v4553_v18 = vpop.permute.xlu1 %4552 }
0x10f2   : > { %v14104_v48 = vpop.eup %9709  ;;  %4597 = vst.msk [vmem:[#allocation3 + $0x20] sm:$0xff] %vm4592_vm7, %v4553_v18  ;;  %9106 = vmatprep.mubr.f32.mxu1 %v14102_v16 }
0x10f3   : > { %v6125_v53 = vpop.permute.xlu0 %6124  ;;  %9107 = vmatmul.mubr.f32.gmra.mxu1 %v14104_v48  ;;  %v9712_v6 = vpop.eup %9711 }
0x10f4   : > { %6170 = vst.msk [vmem:[#allocation3 + $0x18] sm:$0xff] %vm6166_vm9, %v6125_v53  ;;  %v2952_v52 = vmul.f32 %v9712_v6, %v15083_v1 }
0x10f5   : > { %v2196_v34 = vpop.permute.xlu1 %2195 }
0x10f6   : > { %2238 = vst.msk [vmem:[#allocation3 + $0x30] sm:$0xff] %vm2231_vm4, %v2196_v34 }
0x10f7   : > { %v3768_v19 = vpop.permute.xlu0 %3767 }
0x10f8   : > { %3811 = vst.msk [vmem:[#allocation3 + $0x28] sm:$0xff] %vm3805_vm6, %v3768_v19 }
0x10f9   : > { %v5340_v37 = vpop.permute.xlu1 %5339 }
0x10fa   : > { %5384 = vst.msk [vmem:[#allocation3 + $0x20] sm:$0xff] %vm5379_vm8, %v5340_v37 }
0x10fb   : > { %v4555_v63 = vpop.permute.xlu0 %4554 }
0x10fc   : > { %4598 = vst.msk [vmem:[#allocation3 + $0x28] sm:$0xff] %vm4592_vm7, %v4555_v63  ;;  %v15092_v63 = vld [vmem:[#allocation141_spill] sm:$0xff] }
0x10fd   : > { %v2983_v29 = vpop.permute.xlu1 %2982 }
0x10fe   : > { %3025 = vst.msk [vmem:[#allocation3 + $0x30] sm:$0xff] %vm3018_vm5, %v2983_v29 }
0x10ff   : > { %v2198_v32 = vpop.permute.xlu0 %2197 }
0x1100   : > { %2239 = vst.msk [vmem:[#allocation3 + $0x38] sm:$0xff] %vm2231_vm4, %v2198_v32 }
0x1101   : > { %6634 = vadd.xlane.f32.xlu1 %v14036_v56  ;;  %v6127_v51 = vpop.permute.xlu1 %6126 }
0x1102   : > { %6171 = vst.msk [vmem:[#allocation3 + $0x20] sm:$0xff] %vm6166_vm9, %v6127_v51 }
0x1103   : > { %v5342_v0 = vpop.permute.xlu0 %5341  ;;  %6632 = vadd.xlane.f32.xlu0 %v14033_v44 }
0x1104   : > { %5385 = vst.msk [vmem:[#allocation3 + $0x28] sm:$0xff] %vm5379_vm8, %v5342_v0  ;;  %v15093_v0 = vld [vmem:[#allocation195_spill] sm:$0xff] }
0x1105   : > { %6638 = vadd.xlane.f32.xlu1 %v14048_v33  ;;  %v3770_v54 = vpop.permute.xlu1 %3769 }
0x1106   : > { %3812 = vst.msk [vmem:[#allocation3 + $0x30] sm:$0xff] %vm3805_vm6, %v3770_v54 }
0x1107   : > { %v2985_v12 = vpop.permute.xlu0 %2984  ;;  %6636 = vadd.xlane.f32.xlu0 %v14045_v47 }
0x1108   : > { %3026 = vst.msk [vmem:[#allocation3 + $0x38] sm:$0xff] %vm3018_vm5, %v2985_v12 }
0x1109   : > { %6642 = vadd.xlane.f32.xlu1 %v14060_v42  ;;  %v4557_v56 = vpop.permute.xlu1 %4556 }
0x110a   : > { %4599 = vst.msk [vmem:[#allocation3 + $0x30] sm:$0xff] %vm4592_vm7, %v4557_v56 }
0x110b   : > { %v6129_v39 = vpop.permute.xlu0 %6128  ;;  %6640 = vadd.xlane.f32.xlu0 %v14057_v49  ;;  %v15081_v49 = vld [vmem:[#allocation118_spill] sm:$0xff] }
0x110c   : > { %6172 = vst.msk [vmem:[#allocation3 + $0x28] sm:$0xff] %vm6166_vm9, %v6129_v39  ;;  %9713 = vrcp.f32 %v15081_v49  ;;  %v15094_v39 = vld [vmem:[#allocation121_spill] sm:$0xff]  ;;  %v15098_v49 = vld [vmem:[#allocation119_spill] sm:$0xff] }
0x110d   : > { %6646 = vadd.xlane.f32.xlu1 %v14070_v2  ;;  %v2200_v44 = vpop.permute.xlu1 %2199  ;;  %9715 = vrcp.f32 %v15082_v27  ;;  %v15086_v2 = vld [vmem:[#allocation109_spill] sm:$0xff]  ;;  %v15100_v27 = vld [vmem:[#allocation142_spill] sm:$0xff] }
0x110e   : > { %2240 = vst.msk [vmem:[#allocation3 + $0x40] sm:$0xff] %vm2231_vm4, %v2200_v44  ;;  %9717 = vrcp.f32 %v15084_v21 }
0x110f   : > { %v3772_v33 = vpop.permute.xlu0 %3771  ;;  %6644 = vadd.xlane.f32.xlu0 %v14068_v9  ;;  %9719 = vrcp.f32 %v15085_v20 }
0x1110   : > { %3813 = vst.msk [vmem:[#allocation3 + $0x38] sm:$0xff] %vm3805_vm6, %v3772_v33  ;;  %9721 = vrcp.f32 %v15086_v2 }
0x1111   : > { %6650 = vadd.xlane.f32.xlu1 %v14080_v26  ;;  %v5344_v47 = vpop.permute.xlu1 %5343  ;;  %9723 = vrcp.f32 %v15088_v28 }
0x1112   : > { %5386 = vst.msk [vmem:[#allocation3 + $0x30] sm:$0xff] %vm5379_vm8, %v5344_v47  ;;  %9725 = vrcp.f32 %v13859_v40 }
0x1113   : > { %v4559_v41 = vpop.permute.xlu0 %4558  ;;  %6648 = vadd.xlane.f32.xlu0 %v14078_v17  ;;  %9727 = vrcp.f32 %v13876_v8 }
0x1114   : > { %4600 = vst.msk [vmem:[#allocation3 + $0x38] sm:$0xff] %vm4592_vm7, %v4559_v41 }
0x1115   : > { %6654 = vadd.xlane.f32.xlu1 %v14088_v38  ;;  %v2987_v45 = vpop.permute.xlu1 %2986 }
0x1116   : > { %3027 = vst.msk [vmem:[#allocation3 + $0x40] sm:$0xff] %vm3018_vm5, %v2987_v45  ;;  %v15095_v45 = vld [vmem:[#allocation107_spill] sm:$0xff] }
0x1117   : > { %v2202_v7 = vpop.permute.xlu0 %2201  ;;  %6652 = vadd.xlane.f32.xlu0 %v14086_v11  ;;  %9729 = vrcp.f32 %v15095_v45 }
0x1118   : > { %2241 = vst.msk [vmem:[#allocation3 + $0x48] sm:$0xff] %vm2231_vm4, %v2202_v7 }
0x1119   : > { %6658 = vadd.xlane.f32.xlu1 %v14096_v50  ;;  %v6131_v5 = vpop.permute.xlu1 %6130  ;;  %v9714_v25 = vpop.eup %9713 }
0x111a   : > { %6173 = vst.msk [vmem:[#allocation3 + $0x30] sm:$0xff] %vm6166_vm9, %v6131_v5  ;;  %v2166_v24 = vmul.f32 %v9714_v25, %v15087_v30  ;;  %v9716_v4 = vpop.eup %9715  ;;  %v15096_v5 = vld [vmem:[#allocation56_spill] sm:$0xff] }
0x111b   : > { %v5346_v60 = vpop.permute.xlu0 %5345  ;;  %6656 = vadd.xlane.f32.xlu0 %v14094_v35  ;;  %v5312_v11 = vmul.f32 %v9716_v4, %v15089_v43  ;;  %v9718_v36 = vpop.eup %9717  ;;  %v15090_v35 = vld [vmem:[#allocation99_spill] sm:$0xff]  ;;  %9731 = vrcp.f32 %v15096_v5 }
0x111c   : > { %5387 = vst.msk [vmem:[#allocation3 + $0x38] sm:$0xff] %vm5379_vm8, %v5346_v60  ;;  %v2953_v59 = vmul.f32 %v9718_v36, %v15090_v35  ;;  %v9720_v50 = vpop.eup %9719 }
0x111d   : > { %v3774_v46 = vpop.permute.xlu1 %3773  ;;  %v9722_v34 = vpop.eup %9721 }
0x111e   : > { %3814 = vst.msk [vmem:[#allocation3 + $0x40] sm:$0xff] %vm3805_vm6, %v3774_v46  ;;  %v3740_v29 = vmul.f32 %v9722_v34, %v15092_v63  ;;  %v9724_v40 = vpop.eup %9723 }
0x111f   : > { %v2989_v14 = vpop.permute.xlu0 %2988  ;;  %6662 = vadd.xlane.f32.xlu0 %v14104_v48  ;;  %v15091_v48 = vld [vmem:[#allocation110_spill] sm:$0xff]  ;;  %v5313_v54 = vmul.f32 %v9724_v40, %v15093_v0  ;;  %v9726_v56 = vpop.eup %9725 }
0x1120   : > { %3028 = vst.msk [vmem:[#allocation3 + $0x48] sm:$0xff] %vm3018_vm5, %v2989_v14  ;;  %v6099_v53 = vmul.f32 %v9720_v50, %v15091_v48  ;;  %v6100_v44 = vmul.f32 %v9726_v56, %v15094_v39  ;;  %v9728_v14 = vpop.eup %9727 }
0x1121   : > { %v4561_v57 = vpop.permute.xlu1 %4560 }
0x1122   : > { %4601 = vst.msk [vmem:[#allocation3 + $0x40] sm:$0xff] %vm4592_vm7, %v4561_v57 }
0x1123   : > { %v6133_v13 = vpop.permute.xlu0 %6132 }
0x1124   : > { %6174 = vst.msk [vmem:[#allocation3 + $0x38] sm:$0xff] %vm6166_vm9, %v6133_v13  ;;  %v15099_v13 = vld [vmem:[#allocation47_spill] sm:$0xff] }
0x1125   : > { %v2204_v42 = vpop.permute.xlu1 %2203  ;;  %v6098_v6 = vmul.f32 %v9728_v14, %v15099_v13 }
0x1126   : > { %2242 = vst.msk [vmem:[#allocation3 + $0x50] sm:$0xff] %vm2231_vm4, %v2204_v42  ;;  %v9730_v42 = vpop.eup %9729 }
0x1127   : > { %v3776_v10 = vpop.permute.xlu0 %3775 }
0x1128   : > { %3815 = vst.msk [vmem:[#allocation3 + $0x48] sm:$0xff] %vm3805_vm6, %v3776_v10  ;;  %v3739_v10 = vmul.f32 %v9730_v42, %v15100_v27  ;;  %v9732_v1 = vpop.eup %9731 }
0x1129   : > { %v5348_v62 = vpop.permute.xlu1 %5347 }
0x112a   : > { %5388 = vst.msk [vmem:[#allocation3 + $0x40] sm:$0xff] %vm5379_vm8, %v5348_v62  ;;  %2998 = vrot.lane.b32.xlu1 %v2952_v52, %s9859_s30  ;;  %v15101_v52 = vld [vmem:[#allocation164_spill] sm:$0xff] }
0x112b   : > { %v4563_v55 = vpop.permute.xlu0 %4562  ;;  %v4526_v62 = vmul.f32 %v9732_v1, %v15101_v52 }
0x112c   : > { %4602 = vst.msk [vmem:[#allocation3 + $0x48] sm:$0xff] %vm4592_vm7, %v4563_v55  ;;  %v15102_v55 = vld [vmem:[#allocation163_spill] sm:$0xff] }
0x112d   : > { %v2991_v3 = vpop.permute.xlu1 %2990 }
0x112e   : > { %3029 = vst.msk [vmem:[#allocation3 + $0x50] sm:$0xff] %vm3018_vm5, %v2991_v3 }
0x112f   : > { %v2206_v9 = vpop.permute.xlu0 %2205 }
0x1130   : > { %2243 = vst.msk [vmem:[#allocation3 + $0x58] sm:$0xff] %vm2231_vm4, %v2206_v9  ;;  %v15103_v9 = vld [vmem:[#allocation194_spill] sm:$0xff] }
0x1131   : > { %v6135_v22 = vpop.permute.xlu1 %6134 }
0x1132   : > { %6175 = vst.msk [vmem:[#allocation3 + $0x40] sm:$0xff] %vm6166_vm9, %v6135_v22 }
0x1133   : > { %v5350_v58 = vpop.permute.xlu0 %5349 }
0x1134   : > { %5389 = vst.msk [vmem:[#allocation3 + $0x48] sm:$0xff] %vm5379_vm8, %v5350_v58 }
0x1135   : > { %2213 = vrot.lane.b32.xlu0 %v2166_v24, %s9857_s27  ;;  %v3778_v17 = vpop.permute.xlu1 %3777  ;;  %v6989_v24 = vld [vmem:[%s14383_s4 + $0x18] sm:$0xff] }
0x1136   : > { %3816 = vst.msk [vmem:[#allocation3 + $0x50] sm:$0xff] %vm3805_vm6, %v3778_v17  ;;  %9109 = vmatprep.subr.mxu1 %v6989_v24  ;;  %v6988_v17 = vld [vmem:[%s14383_s4 + $0x10] sm:$0xff] }
0x1137   : > { %v2993_v26 = vpop.permute.xlu0 %2992  ;;  %9110 = vmatpush3.msra.mxu1 %v6989_v24 }
0x1138   : > { %3030 = vst.msk [vmem:[#allocation3 + $0x58] sm:$0xff] %vm3018_vm5, %v2993_v26  ;;  %9111 = vmatprep.subr.mxu1 %v6988_v17  ;;  %v6987_v26 = vld [vmem:[%s14383_s4 + $0x8] sm:$0xff] }
0x1139   : > { %5357 = vrot.lane.b32.xlu0 %v5312_v11, %s9861_s8  ;;  %v4565_v38 = vpop.permute.xlu1 %4564  ;;  %9112 = vmatpush3.msra.mxu1 %v6988_v17  ;;  %v6986_v11 = vld [vmem:[%s14383_s4] sm:$0xff] }
0x113a   : > { %4603 = vst.msk [vmem:[#allocation3 + $0x50] sm:$0xff] %vm4592_vm7, %v4565_v38  ;;  %9113 = vmatprep.subr.mxu1 %v6987_v26 }
0x113b   : > { %v6137_v61 = vpop.permute.xlu0 %6136  ;;  %9114 = vmatpush3.msra.mxu1 %v6987_v26 }
0x113c   : > { %6176 = vst.msk [vmem:[#allocation3 + $0x48] sm:$0xff] %vm6166_vm9, %v6137_v61  ;;  %9115 = vmatprep.subr.mxu1 %v6986_v11 }
0x113d   : > { %3000 = vrot.lane.b32.xlu0 %v2953_v59, %s9859_s30  ;;  %v2208_v31 = vpop.permute.xlu1 %2207  ;;  %9116 = vmatpush3.msra.mxu1 %v6986_v11 }
0x113e   : > { %2244 = vst.msk [vmem:[#allocation3 + $0x60] sm:$0xff] %vm2231_vm4, %v2208_v31 }
0x113f   : > { %v3780_v18 = vpop.permute.xlu0 %3779 }
0x1140   : > { %3817 = vst.msk [vmem:[#allocation3 + $0x58] sm:$0xff] %vm3805_vm6, %v3780_v18 }
0x1141   : > { %6144 = vrot.lane.b32.xlu0 %v6099_v53, %s9862_s9  ;;  %v5352_v19 = vpop.permute.xlu1 %5351 }
0x1142   : > { %5390 = vst.msk [vmem:[#allocation3 + $0x50] sm:$0xff] %vm5379_vm8, %v5352_v19 }
0x1143   : > { %v4567_v37 = vpop.permute.xlu0 %4566 }
0x1144   : > { %4604 = vst.msk [vmem:[#allocation3 + $0x58] sm:$0xff] %vm4592_vm7, %v4567_v37 }
0x1145   : > { %3787 = vrot.lane.b32.xlu0 %v3740_v29, %s9858_s29  ;;  %v2995_v32 = vpop.permute.xlu1 %2994 }
0x1146   : > { %3031 = vst.msk [vmem:[#allocation3 + $0x60] sm:$0xff] %vm3018_vm5, %v2995_v32 }
0x1147   : > { %v2210_v51 = vpop.permute.xlu0 %2209 }
0x1148   : > { %2245 = vst.msk [vmem:[#allocation3 + $0x68] sm:$0xff] %vm2231_vm4, %v2210_v51 }
0x1149   : > { %5359 = vrot.lane.b32.xlu0 %v5313_v54, %s9861_s8  ;;  %v6139_v12 = vpop.permute.xlu1 %6138 }
0x114a   : > { %6177 = vst.msk [vmem:[#allocation3 + $0x50] sm:$0xff] %vm6166_vm9, %v6139_v12 }
0x114b   : > { %v5354_v33 = vpop.permute.xlu0 %5353 }
0x114c   : > { %5391 = vst.msk [vmem:[#allocation3 + $0x58] sm:$0xff] %vm5379_vm8, %v5354_v33 }
0x114d   : > { %6146 = vrot.lane.b32.xlu0 %v6100_v44, %s9862_s9  ;;  %v3782_v47 = vpop.permute.xlu1 %3781 }
0x114e   : > { %3818 = vst.msk [vmem:[#allocation3 + $0x60] sm:$0xff] %vm3805_vm6, %v3782_v47  ;;  %6660 = vadd.xlane.f32.xlu1 %v14102_v16  ;;  %v15097_v16 = vld [vmem:[#allocation45_spill] sm:$0xff] }
0x114f   : > { %v2997_v41 = vpop.permute.xlu0 %2996  ;;  %9733 = vrcp.f32 %v15097_v16 }
0x1150   : > { %3032 = vst.msk [vmem:[#allocation3 + $0x68] sm:$0xff] %vm3018_vm5, %v2997_v41  ;;  %9735 = vrcp.f32 %v15098_v49 }
0x1151   : > { %v4569_v7 = vpop.permute.xlu1 %4568 }
0x1152   : > { %4605 = vst.msk [vmem:[#allocation3 + $0x60] sm:$0xff] %vm4592_vm7, %v4569_v7 }
0x1153   : > { %v6141_v23 = vpop.permute.xlu0 %6140 }
0x1154   : > { %6178 = vst.msk [vmem:[#allocation3 + $0x58] sm:$0xff] %vm6166_vm9, %v6141_v23 }
0x1155   : > { %v2212_v8 = vpop.permute.xlu1 %2211 }
0x1156   : > { %2246 = vst.msk [vmem:[#allocation3 + $0x70] sm:$0xff] %vm2231_vm4, %v2212_v8 }
0x1157   : > { %v3784_v60 = vpop.permute.xlu0 %3783 }
0x1158   : > { %3819 = vst.msk [vmem:[#allocation3 + $0x68] sm:$0xff] %vm3805_vm6, %v3784_v60 }
0x1159   : > { %v5356_v46 = vpop.permute.xlu1 %5355 }
0x115a   : > { %5392 = vst.msk [vmem:[#allocation3 + $0x60] sm:$0xff] %vm5379_vm8, %v5356_v46 }
0x115b   : > { %v4571_v57 = vpop.permute.xlu0 %4570 }
0x115c   : > { %4606 = vst.msk [vmem:[#allocation3 + $0x68] sm:$0xff] %vm4592_vm7, %v4571_v57  ;;  %v9734_v21 = vpop.eup %9733 }
0x115d   : > { %v4527_v3 = vmul.f32 %v9734_v21, %v15102_v55  ;;  %v9736_v20 = vpop.eup %9735 }
0x115e   : > { %v5314_v25 = vmul.f32 %v9736_v20, %v15103_v9 }
0x115f   : > { %6142 = vrot.lane.b32.xlu1 %v6098_v6, %s9862_s9 }
0x1163   : > { %3785 = vrot.lane.b32.xlu1 %v3739_v10, %s9858_s29  ;;  %s14306_s29 = scalar_lea.vmem %s14385_s6, %s7627_s25 }
0x1167   : > { %4572 = vrot.lane.b32.xlu1 %v4526_v62, %s9860_s7 }
0x116b   : > { %4574 = vrot.lane.b32.xlu1 %v4527_v3, %s9860_s7 }
0x116f   : > { %5361 = vrot.lane.b32.xlu1 %v5314_v25, %s9861_s8 }
0x118a   : > { %v6635_v22 = vpop.xlane.xlu1 %6634 }
0x118b   : > { %9737 = vrcp.f32 %v6635_v22 }
0x118c   : > { %v6633_v2 = vpop.xlane.xlu0 %6632 }
0x118d   : > { %9739 = vrcp.f32 %v6633_v2 }
0x118e   : > { %v6639_v58 = vpop.xlane.xlu1 %6638 }
0x118f   : > { %9741 = vrcp.f32 %v6639_v58  ;;  %v15104_v58 = vld [vmem:[#allocation59_spill] sm:$0xff] }
0x1190   : > { %v6637_v30 = vpop.xlane.xlu0 %6636 }
0x1191   : > { %9743 = vrcp.f32 %v6637_v30 }
0x1192   : > { %v6643_v4 = vpop.xlane.xlu1 %6642 }
0x1193   : > { %9745 = vrcp.f32 %v6643_v4 }
0x1194   : > { %v6641_v28 = vpop.xlane.xlu0 %6640 }
0x1195   : > { %9747 = vrcp.f32 %v6641_v28 }
0x1196   : > { %v6647_v43 = vpop.xlane.xlu1 %6646 }
0x1197   : > { %9749 = vrcp.f32 %v6647_v43  ;;  %v9087_v36 = vpop.f32.mrf.mxu0 }
0x1198   : > { %v9738_v38 = vpop.eup %9737  ;;  %v6645_v61 = vpop.xlane.xlu0 %6644 }
0x1199   : > { %v6874_v35 = vmul.f32 %v9738_v38, %v9087_v36  ;;  %9751 = vrcp.f32 %v6645_v61  ;;  %v6778_v59 = vpop.f32.mrf.mxu0 }
0x119a   : > { %v9740_v50 = vpop.eup %9739  ;;  %v6651_v31 = vpop.xlane.xlu1 %6650 }
0x119b   : > { %v6873_v18 = vmul.f32 %v9740_v50, %v6778_v59  ;;  %9753 = vrcp.f32 %v6651_v31  ;;  %v9090_v48 = vpop.f32.mrf.mxu0  ;;  %6907 = vrot.lane.b32.xlu0 %v6874_v35, %s9863_s18 }
0x119c   : > { %v9742_v53 = vpop.eup %9741  ;;  %v6649_v34 = vpop.xlane.xlu0 %6648 }
0x119d   : > { %v6876_v19 = vmul.f32 %v9742_v53, %v9090_v48  ;;  %9755 = vrcp.f32 %v6649_v34  ;;  %v6788_v37 = vpop.f32.mrf.mxu0  ;;  %6905 = vrot.lane.b32.xlu1 %v6873_v18, %s9863_s18 }
0x119e   : > { %v9744_v63 = vpop.eup %9743  ;;  %v6655_v29 = vpop.xlane.xlu1 %6654 }
0x119f   : > { %v6875_v40 = vmul.f32 %v9744_v63, %v6788_v37  ;;  %9757 = vrcp.f32 %v6655_v29  ;;  %v9093_v32 = vpop.f32.mrf.mxu0  ;;  %6911 = vrot.lane.b32.xlu0 %v6876_v19, %s9863_s18 }
0x11a0   : > { %v9746_v51 = vpop.eup %9745  ;;  %v6653_v0 = vpop.xlane.xlu0 %6652 }
0x11a1   : > { %v6878_v54 = vmul.f32 %v9746_v51, %v9093_v32  ;;  %9759 = vrcp.f32 %v6653_v0  ;;  %v6798_v12 = vpop.f32.mrf.mxu0  ;;  %6909 = vrot.lane.b32.xlu1 %v6875_v40, %s9863_s18 }
0x11a2   : > { %v9748_v56 = vpop.eup %9747  ;;  %v6659_v39 = vpop.xlane.xlu1 %6658 }
0x11a3   : > { %v6877_v44 = vmul.f32 %v9748_v56, %v6798_v12  ;;  %9761 = vrcp.f32 %v6659_v39  ;;  %v9096_v33 = vpop.f32.mrf.mxu1  ;;  %6915 = vrot.lane.b32.xlu0 %v6878_v54, %s9863_s18 }
0x11a4   : > { %v9750_v47 = vpop.eup %9749  ;;  %v6657_v41 = vpop.xlane.xlu0 %6656 }
0x11a5   : > { %v6880_v45 = vmul.f32 %v9750_v47, %v9096_v33  ;;  %9763 = vrcp.f32 %v6657_v41  ;;  %v6808_v7 = vpop.f32.mrf.mxu1  ;;  %6913 = vrot.lane.b32.xlu1 %v6877_v44, %s9863_s18 }
0x11a6   : > { %v9752_v23 = vpop.eup %9751  ;;  %v2999_v5 = vpop.permute.xlu1 %2998  ;;  %9765 = vrcp.f32 %v13888_v15 }
0x11a7   : > { %v6879_v8 = vmul.f32 %v9752_v23, %v6808_v7  ;;  %3033 = vst.msk [vmem:[#allocation3 + $0x70] sm:$0xff] %vm3018_vm5, %v2999_v5  ;;  %v9099_v60 = vpop.f32.mrf.mxu1  ;;  %6919 = vrot.lane.b32.xlu0 %v6880_v45, %s9863_s18 }
0x11a8   : > { %v9754_v16 = vpop.eup %9753  ;;  %v6663_v46 = vpop.xlane.xlu0 %6662 }
0x11a9   : > { %v6882_v14 = vmul.f32 %v9754_v16, %v9099_v60  ;;  %v6818_v57 = vpop.f32.mrf.mxu1  ;;  %6917 = vrot.lane.b32.xlu1 %v6879_v8, %s9863_s18  ;;  %9767 = vrcp.f32 %v6663_v46 }
0x11aa   : > { %v9756_v49 = vpop.eup %9755 }
0x11ab   : > { %v6881_v13 = vmul.f32 %v9756_v49, %v6818_v57  ;;  %v9102_v6 = vpop.f32.mrf.mxu1  ;;  %6923 = vrot.lane.b32.xlu0 %v6882_v14, %s9863_s18 }
0x11ac   : > { %v9758_v42 = vpop.eup %9757  ;;  %v2214_v27 = vpop.permute.xlu0 %2213 }
0x11ad   : > { %v6884_v10 = vmul.f32 %v9758_v42, %v9102_v6  ;;  %2247 = vst.msk [vmem:[#allocation3 + $0x78] sm:$0xff] %vm2231_vm4, %v2214_v27  ;;  %v6828_v1 = vpop.f32.mrf.mxu1  ;;  %6921 = vrot.lane.b32.xlu1 %v6881_v13, %s9863_s18 }
0x11ae   : > { %v9760_v52 = vpop.eup %9759 }
0x11af   : > { %v6883_v15 = vmul.f32 %v9760_v52, %v6828_v1  ;;  %v9105_v62 = vpop.f32.mrf.mxu1  ;;  %6927 = vrot.lane.b32.xlu0 %v6884_v10, %s9863_s18  ;;  %v14297_v10 = vld [vmem:[%s14384_s5] ss:$0 sm:$0xff]  ;;  %v7193_v52 = vld [vmem:[%s9925_s28 + $0x8] sm:$0xff] }
0x11b0   : > { %v9762_v21 = vpop.eup %9761  ;;  %v5358_v55 = vpop.permute.xlu0 %5357 }
0x11b1   : > { %v6886_v3 = vmul.f32 %v9762_v21, %v9105_v62  ;;  %5393 = vst.msk [vmem:[#allocation3 + $0x68] sm:$0xff] %vm5379_vm8, %v5358_v55  ;;  %v6838_v20 = vpop.f32.mrf.mxu1  ;;  %6925 = vrot.lane.b32.xlu1 %v6883_v15, %s9863_s18  ;;  %v7192_v21 = vld [vmem:[%s9925_s28] sm:$0xff] }
0x11b2   : > { %v9764_v9 = vpop.eup %9763 }
0x11b3   : > { %v6885_v25 = vmul.f32 %v9764_v9, %v6838_v20  ;;  %6931 = vrot.lane.b32.xlu0 %v6886_v3, %s9863_s18  ;;  %v9766_v2 = vpop.eup %9765  ;;  %v9108_v17 = vpop.f32.mrf.mxu1  ;;  %v7195_v9 = vld [vmem:[%s9925_s28 + $0x18] sm:$0xff] }
0x11b4   : > { %v3001_v22 = vpop.permute.xlu0 %3000  ;;  %v6101_v30 = vmul.f32 %v9766_v2, %v15104_v58  ;;  %v7194_v58 = vld [vmem:[%s9925_s28 + $0x10] sm:$0xff] }
0x11b5   : > { %3034 = vst.msk [vmem:[#allocation3 + $0x78] sm:$0xff] %vm3018_vm5, %v3001_v22  ;;  %6929 = vrot.lane.b32.xlu1 %v6885_v25, %s9863_s18  ;;  %v6848_v59 = vpop.f32.mrf.mxu1 }
0x11b6   : > { %v9768_v24 = vpop.eup %9767 }
0x11b7   : > { %v6888_v28 = vmul.f32 %v9768_v24, %v9108_v17  ;;  %v7197_v17 = vld [vmem:[%s9925_s28 + $0x28] sm:$0xff] }
0x11b8   : > { %v6145_v4 = vpop.permute.xlu0 %6144 }
0x11b9   : > { %6180 = vst.msk [vmem:[#allocation3 + $0x68] sm:$0xff] %vm6166_vm9, %v6145_v4  ;;  %6148 = vrot.lane.b32.xlu1 %v6101_v30, %s9862_s9 }
0x11bc   : > { %v3788_v26 = vpop.permute.xlu0 %3787 }
0x11bd   : > { %3821 = vst.msk [vmem:[#allocation3 + $0x78] sm:$0xff] %vm3805_vm6, %v3788_v26  ;;  %6935 = vrot.lane.b32.xlu1 %v6888_v28, %s9863_s18 }
0x11c0   : > { %v5360_v36 = vpop.permute.xlu0 %5359 }
0x11c4   : > { %v6147_v50 = vpop.permute.xlu0 %6146 }
0x11d7   : > { %v6661_v43 = vpop.xlane.xlu1 %6660 }
0x11d8   : > { %9769 = vrcp.f32 %v6661_v43 }
0x11db   : > { %v6143_v11 = vpop.permute.xlu1 %6142 }
0x11dc   : > { %6179 = vst.msk [vmem:[#allocation3 + $0x60] sm:$0xff] %vm6166_vm9, %v6143_v11  ;;  %v7196_v11 = vld [vmem:[%s9925_s28 + $0x20] sm:$0xff] }
0x11df   : > { %v3786_v38 = vpop.permute.xlu1 %3785 }
0x11e0   : > { %3820 = vst.msk [vmem:[#allocation3 + $0x70] sm:$0xff] %vm3805_vm6, %v3786_v38 }
0x11e3   : > { %v4573_v61 = vpop.permute.xlu1 %4572 }
0x11e4   : > { %4607 = vst.msk [vmem:[#allocation3 + $0x70] sm:$0xff] %vm4592_vm7, %v4573_v61 }
0x11e5   : > { %v9770_v35 = vpop.eup %9769  ;;  %5394 = vst.msk [vmem:[#allocation3 + $0x70] sm:$0xff] %vm5379_vm8, %v5360_v36 }
0x11e6   : > { %6181 = vst.msk [vmem:[#allocation3 + $0x70] sm:$0xff] %vm6166_vm9, %v6147_v50  ;;  %v6887_v31 = vmul.f32 %v9770_v35, %v6848_v59  ;;  %v7199_v35 = vld [vmem:[%s9925_s28 + $0x38] sm:$0xff] }
0x11e7   : > { %v4575_v18 = vpop.permute.xlu1 %4574 }
0x11e8   : > { %4608 = vst.msk [vmem:[#allocation3 + $0x78] sm:$0xff] %vm4592_vm7, %v4575_v18  ;;  %6933 = vrot.lane.b32.xlu0 %v6887_v31, %s9863_s18  ;;  %v7198_v18 = vld [vmem:[%s9925_s28 + $0x30] sm:$0xff] }
0x11eb   : > { %v5362_v48 = vpop.permute.xlu1 %5361 }
0x11ec   : > { %5395 = vst.msk [vmem:[#allocation3 + $0x78] sm:$0xff] %vm5379_vm8, %v5362_v48 }
0x120d   : > { %v6908_v53 = vpop.permute.xlu0 %6907 }
0x120e   : > { %6955 = vst.msk [vmem:[#allocation3 + $0x8] sm:$0xff] %vm6953_vm10, %v6908_v53 }
0x120f   : > { %v6906_v34 = vpop.permute.xlu1 %6905 }
0x1210   : > { %6954 = vst.msk [vmem:[#allocation3] sm:$0xff] %vm6953_vm10, %v6906_v34 }
0x1211   : > { %v6912_v19 = vpop.permute.xlu0 %6911 }
0x1212   : > { %6957 = vst.msk [vmem:[#allocation3 + $0x18] sm:$0xff] %vm6953_vm10, %v6912_v19  ;;  %v7201_v19 = vld [vmem:[%s9925_s28 + $0x48] sm:$0xff] }
0x1213   : > { %v6910_v37 = vpop.permute.xlu1 %6909 }
0x1214   : > { %6956 = vst.msk [vmem:[#allocation3 + $0x10] sm:$0xff] %vm6953_vm10, %v6910_v37 }
0x1215   : > { %v6916_v63 = vpop.permute.xlu0 %6915  ;;  %v6971_v32 = vld [vmem:[#allocation3 + $0x8] sm:$0xff] }
0x1216   : > { %6959 = vst.msk [vmem:[#allocation3 + $0x28] sm:$0xff] %vm6953_vm10, %v6916_v63 }
0x1217   : > { %v6914_v29 = vpop.permute.xlu1 %6913  ;;  %v6970_v40 = vld [vmem:[#allocation3] sm:$0xff] }
0x1218   : > { %6958 = vst.msk [vmem:[#allocation3 + $0x20] sm:$0xff] %vm6953_vm10, %v6914_v29  ;;  %9117 = vmatprep.mubr.msk.f32.mxu1 %vm297_vm0, %v6970_v40  ;;  %v7200_v40 = vld [vmem:[%s9925_s28 + $0x40] sm:$0xff] }
0x1219   : > { %v6920_v51 = vpop.permute.xlu0 %6919  ;;  %9118 = vmatmul.mubr.msk.f32.vlgmr.msra.gmra.mxu1 %vm297_vm0, %v6971_v32  ;;  %v6973_v12 = vld [vmem:[#allocation3 + $0x18] sm:$0xff] }
0x121a   : > { %6961 = vst.msk [vmem:[#allocation3 + $0x38] sm:$0xff] %vm6953_vm10, %v6920_v51 }
0x121b   : > { %v6918_v0 = vpop.permute.xlu1 %6917  ;;  %v6972_v54 = vld [vmem:[#allocation3 + $0x10] sm:$0xff] }
0x121c   : > { %6960 = vst.msk [vmem:[#allocation3 + $0x30] sm:$0xff] %vm6953_vm10, %v6918_v0  ;;  %9120 = vmatprep.mubr.msk.f32.mxu1 %vm297_vm0, %v6972_v54  ;;  %v7203_v54 = vld [vmem:[%s9925_s28 + $0x58] sm:$0xff] }
0x121d   : > { %v6924_v56 = vpop.permute.xlu0 %6923  ;;  %9121 = vmatmul.mubr.msk.f32.gmra.mxu1 %vm297_vm0, %v6973_v12  ;;  %v6975_v33 = vld [vmem:[#allocation3 + $0x28] sm:$0xff] }
0x121e   : > { %6963 = vst.msk [vmem:[#allocation3 + $0x48] sm:$0xff] %vm6953_vm10, %v6924_v56 }
0x121f   : > { %v6922_v39 = vpop.permute.xlu1 %6921  ;;  %v6974_v44 = vld [vmem:[#allocation3 + $0x20] sm:$0xff] }
0x1220   : > { %6962 = vst.msk [vmem:[#allocation3 + $0x40] sm:$0xff] %vm6953_vm10, %v6922_v39  ;;  %9123 = vmatprep.mubr.msk.f32.mxu1 %vm297_vm0, %v6974_v44  ;;  %v7202_v44 = vld [vmem:[%s9925_s28 + $0x50] sm:$0xff] }
0x1221   : > { %v6928_v47 = vpop.permute.xlu0 %6927  ;;  %9124 = vmatmul.mubr.msk.f32.gmra.mxu1 %vm297_vm0, %v6975_v33  ;;  %v6977_v7 = vld [vmem:[#allocation3 + $0x38] sm:$0xff] }
0x1222   : > { %6965 = vst.msk [vmem:[#allocation3 + $0x58] sm:$0xff] %vm6953_vm10, %v6928_v47 }
0x1223   : > { %v6926_v41 = vpop.permute.xlu1 %6925  ;;  %v6976_v45 = vld [vmem:[#allocation3 + $0x30] sm:$0xff] }
0x1224   : > { %6964 = vst.msk [vmem:[#allocation3 + $0x50] sm:$0xff] %vm6953_vm10, %v6926_v41  ;;  %9126 = vmatprep.mubr.msk.f32.mxu1 %vm297_vm0, %v6976_v45  ;;  %v7205_v45 = vld [vmem:[%s9925_s28 + $0x68] sm:$0xff] }
0x1225   : > { %v6932_v23 = vpop.permute.xlu0 %6931  ;;  %9127 = vmatmul.mubr.msk.f32.gmra.mxu1 %vm297_vm0, %v6977_v7  ;;  %v6979_v60 = vld [vmem:[#allocation3 + $0x48] sm:$0xff] }
0x1226   : > { %6967 = vst.msk [vmem:[#allocation3 + $0x68] sm:$0xff] %vm6953_vm10, %v6932_v23 }
0x1227   : > { %v6930_v5 = vpop.permute.xlu1 %6929  ;;  %v6978_v8 = vld [vmem:[#allocation3 + $0x40] sm:$0xff] }
0x1228   : > { %6966 = vst.msk [vmem:[#allocation3 + $0x60] sm:$0xff] %vm6953_vm10, %v6930_v5  ;;  %9129 = vmatprep.mubr.msk.f32.mxu1 %vm297_vm0, %v6978_v8  ;;  %v7204_v8 = vld [vmem:[%s9925_s28 + $0x60] sm:$0xff] }
0x1229   : > { %9130 = vmatmul.mubr.msk.f32.gmra.mxu1 %vm297_vm0, %v6979_v60  ;;  %v6981_v14 = vld [vmem:[#allocation3 + $0x58] sm:$0xff] }
0x122b   : > { %v6149_v16 = vpop.permute.xlu1 %6148  ;;  %v6980_v46 = vld [vmem:[#allocation3 + $0x50] sm:$0xff] }
0x122c   : > { %6182 = vst.msk [vmem:[#allocation3 + $0x78] sm:$0xff] %vm6166_vm9, %v6149_v16  ;;  %9132 = vmatprep.mubr.msk.f32.mxu1 %vm297_vm0, %v6980_v46 }
0x122d   : > { %9133 = vmatmul.mubr.msk.f32.gmra.mxu1 %vm297_vm0, %v6981_v14  ;;  %v6983_v13 = vld [vmem:[#allocation3 + $0x68] sm:$0xff] }
0x122f   : > { %v6936_v57 = vpop.permute.xlu1 %6935  ;;  %v6982_v49 = vld [vmem:[#allocation3 + $0x60] sm:$0xff] }
0x1230   : > { %6969 = vst.msk [vmem:[#allocation3 + $0x78] sm:$0xff] %vm6953_vm10, %v6936_v57  ;;  %9135 = vmatprep.mubr.msk.f32.mxu1 %vm297_vm0, %v6982_v49  ;;  %v7207_v57 = vld [vmem:[%s9925_s28 + $0x78] sm:$0xff] }
0x1231   : > { %9136 = vmatmul.mubr.msk.f32.gmra.mxu1 %vm297_vm0, %v6983_v13 }
0x1237   : > { %v6985_v27 = vld [vmem:[#allocation3 + $0x78] sm:$0xff] }
0x125a   : > { %v6934_v6 = vpop.permute.xlu0 %6933 }
0x125b   : > { %6968 = vst.msk [vmem:[#allocation3 + $0x70] sm:$0xff] %vm6953_vm10, %v6934_v6  ;;  %v7206_v6 = vld [vmem:[%s9925_s28 + $0x70] sm:$0xff] }
0x1262   : > { %v6984_v42 = vld [vmem:[#allocation3 + $0x70] sm:$0xff] }
0x1263   : > { %9138 = vmatprep.mubr.msk.f32.mxu1 %vm297_vm0, %v6984_v42 }
0x1264   : > { %9139 = vmatmul.mubr.msk.f32.gmra.mxu1 %vm297_vm0, %v6985_v27 }
0x12d9   : > { %v9119_v1 = vpop.f32.mrf.mxu1 }
0x12da   : > { %v7118_v15 = vadd.f32 %v9119_v1, %v14297_v10 }
0x12db   : > { %v7112_v62 = vpop.f32.mrf.mxu1 }
0x12dc   : > { %v7209_v55 = vadd.f32 %v7193_v52, %v7118_v15  ;;  %v7113_v3 = vadd.f32 %v14297_v10, %v7112_v62 }
0x12dd   : > { %v9122_v20 = vpop.f32.mrf.mxu1 }
0x12de   : > { %7225 = vst.msk [vmem:[%s14306_s29 + $0x8] sm:$0xff] %vm297_vm0, %v7209_v55  ;;  %v7208_v25 = vadd.f32 %v7192_v21, %v7113_v3  ;;  %v7128_v22 = vadd.f32 %v9122_v20, %v14297_v10 }
0x12df   : > { %v7122_v2 = vpop.f32.mrf.mxu1 }
0x12e0   : > { %7224 = vst.msk [vmem:[%s14306_s29] sm:$0xff] %vm297_vm0, %v7208_v25  ;;  %v7211_v30 = vadd.f32 %v7195_v9, %v7128_v22  ;;  %v7123_v24 = vadd.f32 %v14297_v10, %v7122_v2 }
0x12e1   : > { %v9125_v4 = vpop.f32.mrf.mxu1 }
0x12e2   : > { %7227 = vst.msk [vmem:[%s14306_s29 + $0x18] sm:$0xff] %vm297_vm0, %v7211_v30  ;;  %v7210_v28 = vadd.f32 %v7194_v58, %v7123_v24  ;;  %v7138_v26 = vadd.f32 %v9125_v4, %v14297_v10 }
0x12e3   : > { %v7132_v43 = vpop.f32.mrf.mxu1 }
0x12e4   : > { %7226 = vst.msk [vmem:[%s14306_s29 + $0x10] sm:$0xff] %vm297_vm0, %v7210_v28  ;;  %v7213_v36 = vadd.f32 %v7197_v17, %v7138_v26  ;;  %v7133_v38 = vadd.f32 %v14297_v10, %v7132_v43 }
0x12e5   : > { %v9128_v61 = vpop.f32.mrf.mxu1 }
0x12e6   : > { %7229 = vst.msk [vmem:[%s14306_s29 + $0x28] sm:$0xff] %vm297_vm0, %v7213_v36  ;;  %v7212_v59 = vadd.f32 %v7196_v11, %v7133_v38  ;;  %v7148_v50 = vadd.f32 %v9128_v61, %v14297_v10 }
0x12e7   : > { %v7142_v31 = vpop.f32.mrf.mxu1 }
0x12e8   : > { %7228 = vst.msk [vmem:[%s14306_s29 + $0x20] sm:$0xff] %vm297_vm0, %v7212_v59  ;;  %v7215_v48 = vadd.f32 %v7199_v35, %v7148_v50  ;;  %v7143_v53 = vadd.f32 %v14297_v10, %v7142_v31 }
0x12e9   : > { %v9131_v34 = vpop.f32.mrf.mxu1 }
0x12ea   : > { %7231 = vst.msk [vmem:[%s14306_s29 + $0x38] sm:$0xff] %vm297_vm0, %v7215_v48  ;;  %v7214_v37 = vadd.f32 %v7198_v18, %v7143_v53  ;;  %v7158_v63 = vadd.f32 %v9131_v34, %v14297_v10 }
0x12eb   : > { %v7152_v29 = vpop.f32.mrf.mxu1 }
0x12ec   : > { %7230 = vst.msk [vmem:[%s14306_s29 + $0x30] sm:$0xff] %vm297_vm0, %v7214_v37  ;;  %v7217_v32 = vadd.f32 %v7201_v19, %v7158_v63  ;;  %v7153_v51 = vadd.f32 %v14297_v10, %v7152_v29 }
0x12ed   : > { %v9134_v0 = vpop.f32.mrf.mxu1 }
0x12ee   : > { %7233 = vst.msk [vmem:[%s14306_s29 + $0x48] sm:$0xff] %vm297_vm0, %v7217_v32  ;;  %v7216_v12 = vadd.f32 %v7200_v40, %v7153_v51  ;;  %v7168_v56 = vadd.f32 %v9134_v0, %v14297_v10 }
0x12ef   : > { %v7162_v39 = vpop.f32.mrf.mxu1 }
0x12f0   : > { %7232 = vst.msk [vmem:[%s14306_s29 + $0x40] sm:$0xff] %vm297_vm0, %v7216_v12  ;;  %v7219_v33 = vadd.f32 %v7203_v54, %v7168_v56  ;;  %v7163_v47 = vadd.f32 %v14297_v10, %v7162_v39 }
0x12f1   : > { %v9137_v41 = vpop.f32.mrf.mxu1 }
0x12f2   : > { %7235 = vst.msk [vmem:[%s14306_s29 + $0x58] sm:$0xff] %vm297_vm0, %v7219_v33  ;;  %v7218_v7 = vadd.f32 %v7202_v44, %v7163_v47  ;;  %v7178_v23 = vadd.f32 %v9137_v41, %v14297_v10 }
0x12f3   : > { %v7172_v5 = vpop.f32.mrf.mxu1 }
0x12f4   : > { %7234 = vst.msk [vmem:[%s14306_s29 + $0x50] sm:$0xff] %vm297_vm0, %v7218_v7  ;;  %v7221_v60 = vadd.f32 %v7205_v45, %v7178_v23  ;;  %v7173_v16 = vadd.f32 %v14297_v10, %v7172_v5 }
0x12f6   : > { %7237 = vst.msk [vmem:[%s14306_s29 + $0x68] sm:$0xff] %vm297_vm0, %v7221_v60  ;;  %v7220_v46 = vadd.f32 %v7204_v8, %v7173_v16 }
0x12f8   : > { %7236 = vst.msk [vmem:[%s14306_s29 + $0x60] sm:$0xff] %vm297_vm0, %v7220_v46 }
0x1324   : > { %v9140_v14 = vpop.f32.mrf.mxu1 }
0x1325   : > { %v7188_v49 = vadd.f32 %v9140_v14, %v14297_v10 }
0x1326   : > { %v7182_v13 = vpop.f32.mrf.mxu1 }
0x1327   : > { %v7223_v42 = vadd.f32 %v7207_v57, %v7188_v49  ;;  %v7183_v27 = vadd.f32 %v14297_v10, %v7182_v13 }
0x1329   : > { %7239 = vst.msk [vmem:[%s14306_s29 + $0x78] sm:$0xff] %vm297_vm0, %v7223_v42  ;;  %v7222_v1 = vadd.f32 %v7206_v6, %v7183_v27 }
0x132b   : > { %7238 = vst.msk [vmem:[%s14306_s29 + $0x70] sm:$0xff] %vm297_vm0, %v7222_v1 }
0x132c PF: > { %s16_s23 = sadd.s32 1, %s9832_s23   ;;  %s15105_s21 = smov %s9828_s22 }
0x132d   : > { %p13_p5 = scmp.ge.s32.totalorder %s16_s23, 4   ;;  %s15106_s22 = smov %s15108_s24 }
0x132f   :  { %15 = sbr.rel (!%p13_p5) target bundleno = 2 (0x2), region = 80 }

</bundles_post_ra>
